<compile_context>
chip_gen: v5e
topology: v5e:2x2
jax: 0.10.0
libtpu: 0.0.40
codegen_flags: <defaults>
</compile_context>

<pallas_src>
import functools

import jax
import jax.numpy as jnp
import numpy as np
from jax.experimental import pallas as pl
from jax.experimental.pallas import tpu as pltpu


# ----------------------------------------------------------------------------
# Stage 1: input projection for both directions (hoisted out of the recurrence)
# ----------------------------------------------------------------------------
def _in_proj_kernel(x_ref, wf_ref, wb_ref, bf_ref, bb_ref, gf_ref, gb_ref):
    x = x_ref[...]
    gf_ref[...] = (jnp.dot(x, wf_ref[...], preferred_element_type=jnp.float32)
                   + bf_ref[...]).astype(gf_ref.dtype)
    gb_ref[...] = (jnp.dot(x, wb_ref[...], preferred_element_type=jnp.float32)
                   + bb_ref[...]).astype(gb_ref.dtype)


def in_proj_pallas(x_flat, wih_f, wih_b, b_f, b_b):
    """x_flat: [N, D] -> (gates_f, gates_b), each [N, 4H]."""
    N, D = x_flat.shape
    four_h = wih_f.shape[1]
    tn = N if N <= 512 else 512
    return pl.pallas_call(
        _in_proj_kernel,
        grid=(pl.cdiv(N, tn),),
        in_specs=[pl.BlockSpec((tn, D), lambda i: (i, 0)),
                  pl.BlockSpec((D, four_h), lambda i: (0, 0)),
                  pl.BlockSpec((D, four_h), lambda i: (0, 0)),
                  pl.BlockSpec((1, four_h), lambda i: (0, 0)),
                  pl.BlockSpec((1, four_h), lambda i: (0, 0))],
        out_specs=[pl.BlockSpec((tn, four_h), lambda i: (i, 0)),
                   pl.BlockSpec((tn, four_h), lambda i: (i, 0))],
        out_shape=(jax.ShapeDtypeStruct((N, four_h), jnp.float32),
                   jax.ShapeDtypeStruct((N, four_h), jnp.float32)),
        compiler_params=pltpu.CompilerParams(
            dimension_semantics=("parallel",)),
    )(x_flat, wih_f, wih_b, b_f, b_b)


# ----------------------------------------------------------------------------
# Stage 2: bidirectional recurrence, time-chunked grid. Per grid step the kernel
# consumes Tc precomputed gate tiles per direction and only does h @ W_hh.
# Backward direction reads/writes chunk (n_chunks-1-t) with reversed local index.
# Hidden/cell state lives in VMEM scratch and persists across grid iterations.
# ----------------------------------------------------------------------------
def _bilstm_kernel(gf_ref, gb_ref, whh_f_ref, whh_b_ref,
                   hf_out_ref, hb_out_ref,
                   hf_s, cf_s, hb_s, cb_s, *, tc, hidden):
    @pl.when(pl.program_id(0) == 0)
    def _():
        hf_s[...] = jnp.zeros_like(hf_s)
        cf_s[...] = jnp.zeros_like(cf_s)
        hb_s[...] = jnp.zeros_like(hb_s)
        cb_s[...] = jnp.zeros_like(cb_s)

    def cell(g_pre, h, c, whh_ref):
        gates = g_pre + jnp.dot(h, whh_ref[...],
                                preferred_element_type=jnp.float32)
        i_g = jax.nn.sigmoid(gates[:, 0 * hidden:1 * hidden])
        f_g = jax.nn.sigmoid(gates[:, 1 * hidden:2 * hidden])
        g_g = jnp.tanh(gates[:, 2 * hidden:3 * hidden])
        o_g = jax.nn.sigmoid(gates[:, 3 * hidden:4 * hidden])
        c_new = f_g * c + i_g * g_g
        h_new = o_g * jnp.tanh(c_new)
        return h_new, c_new

    hf, cf = hf_s[...], cf_s[...]
    hb, cb = hb_s[...], cb_s[...]
    # Fully-unrolled inner loop over the Tc timesteps of this chunk (static indices
    # -> unmasked, lane-dense (B, H) stores into the output tile).
    for i in range(tc):
        hf, cf = cell(gf_ref[i], hf, cf, whh_f_ref)
        hf_out_ref[i] = hf.astype(hf_out_ref.dtype)
        j = tc - 1 - i  # backward stream walks its (reversed) chunk back-to-front
        hb, cb = cell(gb_ref[j], hb, cb, whh_b_ref)
        hb_out_ref[j] = hb.astype(hb_out_ref.dtype)

    hf_s[...] = hf
    cf_s[...] = cf
    hb_s[...] = hb
    cb_s[...] = cb


def bilstm_pallas(gates_f, gates_b, whh_f, whh_b, tc):
    """gates_*: [T, B, 4H] precomputed x@W_ih+b -> (h_fwd, h_bwd), each [T, B, H]."""
    T, B, four_h = gates_f.shape
    H = four_h // 4
    n_chunks = T // tc

    grid_spec = pltpu.PrefetchScalarGridSpec(
        num_scalar_prefetch=0,
        grid=(n_chunks,),
        in_specs=[
            pl.BlockSpec((tc, B, four_h), lambda t: (t, 0, 0)),
            pl.BlockSpec((tc, B, four_h), lambda t: (n_chunks - 1 - t, 0, 0)),
            pl.BlockSpec((H, four_h), lambda t: (0, 0)),
            pl.BlockSpec((H, four_h), lambda t: (0, 0)),
        ],
        out_specs=[
            pl.BlockSpec((tc, B, H), lambda t: (t, 0, 0)),
            pl.BlockSpec((tc, B, H), lambda t: (n_chunks - 1 - t, 0, 0)),
        ],
        scratch_shapes=[pltpu.VMEM((B, H), jnp.float32)] * 4,
    )
    return pl.pallas_call(
        functools.partial(_bilstm_kernel, tc=tc, hidden=H),
        grid_spec=grid_spec,
        out_shape=(jax.ShapeDtypeStruct((T, B, H), jnp.float32),
                   jax.ShapeDtypeStruct((T, B, H), jnp.float32)),
        compiler_params=pltpu.CompilerParams(
            dimension_semantics=("arbitrary",)),  # recurrence => sequential grid
    )(gates_f, gates_b, whh_f, whh_b)


# ----------------------------------------------------------------------------
# Stage 3: fused concat + output projection (no [T,B,2H] concatenate in HBM).
# ----------------------------------------------------------------------------
def _out_proj_kernel(hf_ref, hb_ref, wf_ref, wb_ref, b_ref, o_ref):
    o_ref[...] = (jnp.dot(hf_ref[...], wf_ref[...],
                          preferred_element_type=jnp.float32)
                  + jnp.dot(hb_ref[...], wb_ref[...],
                            preferred_element_type=jnp.float32)
                  + b_ref[...]).astype(o_ref.dtype)


def out_proj_pallas(hf, hb, w_f, w_b, b):
    """hf, hb: [N, H]; w_f, w_b: [H, O]; b: [1, O] -> [N, O]."""
    N, H = hf.shape
    O = w_f.shape[1]
    tn = N if N <= 512 else 512
    return pl.pallas_call(
        _out_proj_kernel,
        grid=(pl.cdiv(N, tn),),
        in_specs=[pl.BlockSpec((tn, H), lambda i: (i, 0)),
                  pl.BlockSpec((tn, H), lambda i: (i, 0)),
                  pl.BlockSpec((H, O), lambda i: (0, 0)),
                  pl.BlockSpec((H, O), lambda i: (0, 0)),
                  pl.BlockSpec((1, O), lambda i: (0, 0))],
        out_specs=pl.BlockSpec((tn, O), lambda i: (i, 0)),
        out_shape=jax.ShapeDtypeStruct((N, O), jnp.float32),
        compiler_params=pltpu.CompilerParams(
            dimension_semantics=("parallel",)),
    )(hf, hb, w_f, w_b, b)


# ----------------------------------------------------------------------------
# Wrapper
# ----------------------------------------------------------------------------
def _pick_time_chunk(T, max_chunk=16):
    best = 1
    for c in range(1, min(T, max_chunk) + 1):
        if T % c == 0:
            best = c
    return best


@jax.jit
def rnn_forward(x, params):
    """Pallas equivalent of RNN.forward: x [B, T, D] -> [B, T, output_dim]."""
    B, T, D = x.shape
    H = params["whh_f"].shape[0]
    B_pad = ((B + 7) // 8) * 8  # f32 sublane alignment

    xt = jnp.transpose(x, (1, 0, 2))  # [T, B, D] (time-major)
    if B_pad != B:
        xt = jnp.pad(xt, ((0, 0), (0, B_pad - B), (0, 0)))
    x_flat = xt.reshape(T * B_pad, D)

    # Stage 1: one big [T*B, D] @ [D, 4H] per direction (bias folded in).
    gf_flat, gb_flat = in_proj_pallas(x_flat, params["wih_f"], params["wih_b"],
                                      params["b_f"], params["b_b"])
    gf = gf_flat.reshape(T, B_pad, 4 * H)
    gb = gb_flat.reshape(T, B_pad, 4 * H)

    # Stage 2: sequential bidirectional recurrence over time chunks.
    tc = _pick_time_chunk(T)
    h_fwd, h_bwd = bilstm_pallas(gf, gb, params["whh_f"], params["whh_b"], tc)

    # Stage 3: fused concat + linear.
    w_out = params["w_out"]
    y_flat = out_proj_pallas(h_fwd.reshape(T * B_pad, H),
                             h_bwd.reshape(T * B_pad, H),
                             w_out[:H], w_out[H:], params["b_out"])
    y = jnp.transpose(y_flat.reshape(T, B_pad, -1), (1, 0, 2))  # [B_pad, T, O]
    return y[:B]


def init_params(key, input_dim, output_dim, rnn_units):
    """Same parameter shapes as the PyTorch module (stored transposed for x @ W).
    bias = bias_ih + bias_hh, gate order i, f, g, o."""
    H = rnn_units
    k = jax.random.split(key, 10)
    s = 1.0 / np.sqrt(H)
    u = lambda kk, shape: jax.random.uniform(kk, shape, jnp.float32, -s, s)
    wih_f = u(k[0], (input_dim, 4 * H))     # weight_ih_l0.T
    whh_f = u(k[1], (H, 4 * H))             # weight_hh_l0.T
    b_f = u(k[2], (1, 4 * H)) + u(k[3], (1, 4 * H))
    wih_b = u(k[4], (input_dim, 4 * H))     # weight_ih_l0_reverse.T
    whh_b = u(k[5], (H, 4 * H))             # weight_hh_l0_reverse.T
    b_b = u(k[6], (1, 4 * H)) + u(k[7], (1, 4 * H))
    so = 1.0 / np.sqrt(2 * H)
    w_out = jax.random.uniform(k[8], (2 * H, output_dim), jnp.float32, -so, so)
    b_out = jax.random.uniform(k[9], (1, output_dim), jnp.float32, -so, so)
    return dict(wih_f=wih_f, whh_f=whh_f, b_f=b_f,
                wih_b=wih_b, whh_b=whh_b, b_b=b_b,
                w_out=w_out, b_out=b_out)


def rnn_forward_ref(x, params):
    """Pure-JAX reference (PyTorch bidirectional-LSTM semantics) for validation."""
    B, T, D = x.shape
    H = params["whh_f"].shape[0]

    def run_dir(wih, whh, b, reverse):
        h = jnp.zeros((B, H), jnp.float32)
        c = jnp.zeros((B, H), jnp.float32)
        outs = [None] * T
        order = range(T - 1, -1, -1) if reverse else range(T)
        for t in order:
            gates = x[:, t, :] @ wih + h @ whh + b
            i_g = jax.nn.sigmoid(gates[:, :H])
            f_g = jax.nn.sigmoid(gates[:, H:2 * H])
            g_g = jnp.tanh(gates[:, 2 * H:3 * H])
            o_g = jax.nn.sigmoid(gates[:, 3 * H:])
            c = f_g * c + i_g * g_g
            h = o_g * jnp.tanh(c)
            outs[t] = h
        return jnp.stack(outs, axis=1)  # [B, T, H]

    hf = run_dir(params["wih_f"], params["whh_f"], params["b_f"], False)
    hb = run_dir(params["wih_b"], params["whh_b"], params["b_b"], True)
    h = jnp.concatenate([hf, hb], axis=-1)
    return h @ params["w_out"] + params["b_out"]


if __name__ == "__main__":
    # batch, seq, input_dim, rnn_units (module default, lane-aligned), output_dim
    B, T, D, H, O = 2, 8, 16, 128, 8
    key = jax.random.PRNGKey(0)
    pkey, xkey = jax.random.split(key)
    params = init_params(pkey, D, O, H)
    x = jax.random.normal(xkey, (B, T, D), jnp.float32)

    y = jax.block_until_ready(rnn_forward(x, params))
    y_ref = rnn_forward_ref(x, params)
    assert y.shape == (B, T, O), y.shape
    np.testing.assert_allclose(np.asarray(y), np.asarray(y_ref),
                               rtol=1e-4, atol=1e-4)
    print("KERNEL_OK")
</pallas_src>

<mosaic_0001>
module attributes {stable_mosaic.version = 11 : i64} {
  func.func @_in_proj_kernel(%arg0: i32, %arg1: memref<64x16xf32, #tpu.memory_space<vmem>>, %arg2: memref<16x512xf32, #tpu.memory_space<vmem>>, %arg3: memref<16x512xf32, #tpu.memory_space<vmem>>, %arg4: memref<1x512xf32, #tpu.memory_space<vmem>>, %arg5: memref<1x512xf32, #tpu.memory_space<vmem>>, %arg6: memref<64x512xf32, #tpu.memory_space<vmem>>, %arg7: memref<64x512xf32, #tpu.memory_space<vmem>>) attributes {dimension_semantics = [#tpu.dimension_semantics<parallel>], iteration_bounds = array<i64: 1>, scalar_prefetch = 0 : i64, scratch_operands = 0 : i64, tpu.core_type = #tpu.core_type<tc>, window_params = [{transform_indices = @transform_0, window_bounds = array<i64: 64, 16>}, {pipeline_mode = #tpu.pipeline_mode<synchronous>, transform_indices = @transform_1, window_bounds = array<i64: 16, 512>}, {pipeline_mode = #tpu.pipeline_mode<synchronous>, transform_indices = @transform_2, window_bounds = array<i64: 16, 512>}, {pipeline_mode = #tpu.pipeline_mode<synchronous>, transform_indices = @transform_3, window_bounds = array<i64: 1, 512>}, {pipeline_mode = #tpu.pipeline_mode<synchronous>, transform_indices = @transform_4, window_bounds = array<i64: 1, 512>}, {transform_indices = @transform_5, window_bounds = array<i64: 64, 512>}, {transform_indices = @transform_6, window_bounds = array<i64: 64, 512>}]} {
    %c0 = arith.constant 0 : index
    %c0_0 = arith.constant 0 : index
    %0 = vector.load %arg1[%c0, %c0_0] : memref<64x16xf32, #tpu.memory_space<vmem>>, vector<64x16xf32>
    %c0_1 = arith.constant 0 : index
    %c0_2 = arith.constant 0 : index
    %1 = vector.load %arg2[%c0_1, %c0_2] : memref<16x512xf32, #tpu.memory_space<vmem>>, vector<16x512xf32>
    %cst = arith.constant dense<0.000000e+00> : vector<64x512xf32>
    %2 = tpu.matmul %0, %1, %cst {dimension_numbers = #tpu.dot_dimension_numbers<[1], [0], [0], [1], [0, 0, 1, 1], [], []>} : vector<64x16xf32>, vector<16x512xf32>, vector<64x512xf32> -> vector<64x512xf32>
    %c0_3 = arith.constant 0 : index
    %c0_4 = arith.constant 0 : index
    %3 = vector.load %arg4[%c0_3, %c0_4] : memref<1x512xf32, #tpu.memory_space<vmem>>, vector<1x512xf32>
    %4 = vector.broadcast %3 : vector<1x512xf32> to vector<64x512xf32>
    %5 = arith.addf %2, %4 : vector<64x512xf32>
    %c0_5 = arith.constant 0 : index
    %c0_6 = arith.constant 0 : index
    %6 = vector.load %arg6[%c0_5, %c0_6] : memref<64x512xf32, #tpu.memory_space<vmem>>, vector<64x512xf32>
    tpu.vector_store %arg6[%c0_5, %c0_6], %5 {strides = array<i32>} : memref<64x512xf32, #tpu.memory_space<vmem>>, vector<64x512xf32>,
    %c0_7 = arith.constant 0 : index
    %c0_8 = arith.constant 0 : index
    %7 = vector.load %arg3[%c0_7, %c0_8] : memref<16x512xf32, #tpu.memory_space<vmem>>, vector<16x512xf32>
    %cst_9 = arith.constant dense<0.000000e+00> : vector<64x512xf32>
    %8 = tpu.matmul %0, %7, %cst_9 {dimension_numbers = #tpu.dot_dimension_numbers<[1], [0], [0], [1], [0, 0, 1, 1], [], []>} : vector<64x16xf32>, vector<16x512xf32>, vector<64x512xf32> -> vector<64x512xf32>
    %c0_10 = arith.constant 0 : index
    %c0_11 = arith.constant 0 : index
    %9 = vector.load %arg5[%c0_10, %c0_11] : memref<1x512xf32, #tpu.memory_space<vmem>>, vector<1x512xf32>
    %10 = vector.broadcast %9 : vector<1x512xf32> to vector<64x512xf32>
    %11 = arith.addf %8, %10 : vector<64x512xf32>
    %c0_12 = arith.constant 0 : index
    %c0_13 = arith.constant 0 : index
    %12 = vector.load %arg7[%c0_12, %c0_13] : memref<64x512xf32, #tpu.memory_space<vmem>>, vector<64x512xf32>
    tpu.vector_store %arg7[%c0_12, %c0_13], %11 {strides = array<i32>} : memref<64x512xf32, #tpu.memory_space<vmem>>, vector<64x512xf32>,
    return
  }
  func.func @transform_0(%arg0: i32) -> (i32, i32) {
    %c0_i32 = arith.constant 0 : i32
    %c0_i32_0 = arith.constant 0 : i32
    return %arg0, %c0_i32 : i32, i32
  }
  func.func @transform_1(%arg0: i32) -> (i32, i32) {
    %c0_i32 = arith.constant 0 : i32
    %c0_i32_0 = arith.constant 0 : i32
    %c0_i32_1 = arith.constant 0 : i32
    return %c0_i32, %c0_i32_0 : i32, i32
  }
  func.func @transform_2(%arg0: i32) -> (i32, i32) {
    %c0_i32 = arith.constant 0 : i32
    %c0_i32_0 = arith.constant 0 : i32
    %c0_i32_1 = arith.constant 0 : i32
    return %c0_i32, %c0_i32_0 : i32, i32
  }
  func.func @transform_3(%arg0: i32) -> (i32, i32) {
    %c0_i32 = arith.constant 0 : i32
    %c0_i32_0 = arith.constant 0 : i32
    %c0_i32_1 = arith.constant 0 : i32
    return %c0_i32, %c0_i32_0 : i32, i32
  }
  func.func @transform_4(%arg0: i32) -> (i32, i32) {
    %c0_i32 = arith.constant 0 : i32
    %c0_i32_0 = arith.constant 0 : i32
    %c0_i32_1 = arith.constant 0 : i32
    return %c0_i32, %c0_i32_0 : i32, i32
  }
  func.func @transform_5(%arg0: i32) -> (i32, i32) {
    %c0_i32 = arith.constant 0 : i32
    %c0_i32_0 = arith.constant 0 : i32
    return %arg0, %c0_i32 : i32, i32
  }
  func.func @transform_6(%arg0: i32) -> (i32, i32) {
    %c0_i32 = arith.constant 0 : i32
    %c0_i32_0 = arith.constant 0 : i32
    return %arg0, %c0_i32 : i32, i32
  }
}

module attributes {stable_mosaic.version = 11 : i64} {
  func.func @_bilstm_kernel(%arg0: i32, %arg1: memref<8x8x512xf32, #tpu.memory_space<vmem>>, %arg2: memref<8x8x512xf32, #tpu.memory_space<vmem>>, %arg3: memref<128x512xf32, #tpu.memory_space<vmem>>, %arg4: memref<128x512xf32, #tpu.memory_space<vmem>>, %arg5: memref<8x8x128xf32, #tpu.memory_space<vmem>>, %arg6: memref<8x8x128xf32, #tpu.memory_space<vmem>>, %arg7: memref<8x128xf32, #tpu.memory_space<vmem>>, %arg8: memref<8x128xf32, #tpu.memory_space<vmem>>, %arg9: memref<8x128xf32, #tpu.memory_space<vmem>>, %arg10: memref<8x128xf32, #tpu.memory_space<vmem>>) attributes {dimension_semantics = [#tpu.dimension_semantics<arbitrary>], iteration_bounds = array<i64: 1>, scalar_prefetch = 0 : i64, scratch_operands = 4 : i64, tpu.core_type = #tpu.core_type<tc>, window_params = [{transform_indices = @transform_0, window_bounds = array<i64: 8, 8, 512>}, {transform_indices = @transform_1, window_bounds = array<i64: 8, 8, 512>}, {pipeline_mode = #tpu.pipeline_mode<synchronous>, transform_indices = @transform_2, window_bounds = array<i64: 128, 512>}, {pipeline_mode = #tpu.pipeline_mode<synchronous>, transform_indices = @transform_3, window_bounds = array<i64: 128, 512>}, {transform_indices = @transform_4, window_bounds = array<i64: 8, 8, 128>}, {transform_indices = @transform_5, window_bounds = array<i64: 8, 8, 128>}]} {
    %c0_i32 = arith.constant 0 : i32
    %0 = arith.cmpi eq, %arg0, %c0_i32 : i32
    %1 = arith.extui %0 : i1 to i32
    %c0_i32_0 = arith.constant 0 : i32
    %2 = arith.cmpi ne, %1, %c0_i32_0 : i32
    scf.if %2 {
      %cst_200 = arith.constant 0.000000e+00 : f32
      %539 = vector.broadcast %cst_200 : f32 to vector<8x128xf32>
      %c0_201 = arith.constant 0 : index
      %c0_202 = arith.constant 0 : index
      %540 = vector.load %arg7[%c0_201, %c0_202] : memref<8x128xf32, #tpu.memory_space<vmem>>, vector<8x128xf32>
      tpu.vector_store %arg7[%c0_201, %c0_202], %539 {strides = array<i32>} : memref<8x128xf32, #tpu.memory_space<vmem>>, vector<8x128xf32>,
      %cst_203 = arith.constant 0.000000e+00 : f32
      %541 = vector.broadcast %cst_203 : f32 to vector<8x128xf32>
      %c0_204 = arith.constant 0 : index
      %c0_205 = arith.constant 0 : index
      %542 = vector.load %arg8[%c0_204, %c0_205] : memref<8x128xf32, #tpu.memory_space<vmem>>, vector<8x128xf32>
      tpu.vector_store %arg8[%c0_204, %c0_205], %541 {strides = array<i32>} : memref<8x128xf32, #tpu.memory_space<vmem>>, vector<8x128xf32>,
      %cst_206 = arith.constant 0.000000e+00 : f32
      %543 = vector.broadcast %cst_206 : f32 to vector<8x128xf32>
      %c0_207 = arith.constant 0 : index
      %c0_208 = arith.constant 0 : index
      %544 = vector.load %arg9[%c0_207, %c0_208] : memref<8x128xf32, #tpu.memory_space<vmem>>, vector<8x128xf32>
      tpu.vector_store %arg9[%c0_207, %c0_208], %543 {strides = array<i32>} : memref<8x128xf32, #tpu.memory_space<vmem>>, vector<8x128xf32>,
      %cst_209 = arith.constant 0.000000e+00 : f32
      %545 = vector.broadcast %cst_209 : f32 to vector<8x128xf32>
      %c0_210 = arith.constant 0 : index
      %c0_211 = arith.constant 0 : index
      %546 = vector.load %arg10[%c0_210, %c0_211] : memref<8x128xf32, #tpu.memory_space<vmem>>, vector<8x128xf32>
      tpu.vector_store %arg10[%c0_210, %c0_211], %545 {strides = array<i32>} : memref<8x128xf32, #tpu.memory_space<vmem>>, vector<8x128xf32>,
    } else {
    }
    %c0 = arith.constant 0 : index
    %c0_1 = arith.constant 0 : index
    %3 = vector.load %arg7[%c0, %c0_1] : memref<8x128xf32, #tpu.memory_space<vmem>>, vector<8x128xf32>
    %c0_2 = arith.constant 0 : index
    %c0_3 = arith.constant 0 : index
    %4 = vector.load %arg8[%c0_2, %c0_3] : memref<8x128xf32, #tpu.memory_space<vmem>>, vector<8x128xf32>
    %c0_4 = arith.constant 0 : index
    %c0_5 = arith.constant 0 : index
    %5 = vector.load %arg9[%c0_4, %c0_5] : memref<8x128xf32, #tpu.memory_space<vmem>>, vector<8x128xf32>
    %c0_6 = arith.constant 0 : index
    %c0_7 = arith.constant 0 : index
    %6 = vector.load %arg10[%c0_6, %c0_7] : memref<8x128xf32, #tpu.memory_space<vmem>>, vector<8x128xf32>
    %c0_8 = arith.constant 0 : index
    %c0_9 = arith.constant 0 : index
    %c0_10 = arith.constant 0 : index
    %7 = vector.load %arg1[%c0_8, %c0_9, %c0_10] : memref<8x8x512xf32, #tpu.memory_space<vmem>>, vector<1x8x512xf32>
    %8 = vector.shape_cast %7 : vector<1x8x512xf32> to vector<8x512xf32>
    %c0_11 = arith.constant 0 : index
    %c0_12 = arith.constant 0 : index
    %9 = vector.load %arg3[%c0_11, %c0_12] : memref<128x512xf32, #tpu.memory_space<vmem>>, vector<128x512xf32>
    %cst = arith.constant dense<0.000000e+00> : vector<8x512xf32>
    %10 = tpu.matmul %3, %9, %cst {dimension_numbers = #tpu.dot_dimension_numbers<[1], [0], [0], [1], [0, 0, 1, 1], [], []>} : vector<8x128xf32>, vector<128x512xf32>, vector<8x512xf32> -> vector<8x512xf32>
    %11 = arith.addf %8, %10 : vector<8x512xf32>
    %12 = vector.extract_strided_slice %11 {offsets = [0, 0], sizes = [8, 128], strides = [1, 1]} : vector<8x512xf32> to vector<8x128xf32>
    %13 = arith.negf %12 : vector<8x128xf32>
    %14 = math.exp %13 : vector<8x128xf32>
    %cst_13 = arith.constant 1.000000e+00 : f32
    %15 = vector.broadcast %cst_13 : f32 to vector<8x128xf32>
    %16 = arith.addf %15, %14 : vector<8x128xf32>
    %17 = arith.divf %15, %16 : vector<8x128xf32>
    %18 = vector.extract_strided_slice %11 {offsets = [0, 128], sizes = [8, 128], strides = [1, 1]} : vector<8x512xf32> to vector<8x128xf32>
    %19 = arith.negf %18 : vector<8x128xf32>
    %20 = math.exp %19 : vector<8x128xf32>
    %cst_14 = arith.constant 1.000000e+00 : f32
    %21 = vector.broadcast %cst_14 : f32 to vector<8x128xf32>
    %22 = arith.addf %21, %20 : vector<8x128xf32>
    %23 = arith.divf %21, %22 : vector<8x128xf32>
    %24 = vector.extract_strided_slice %11 {offsets = [0, 256], sizes = [8, 128], strides = [1, 1]} : vector<8x512xf32> to vector<8x128xf32>
    %25 = math.tanh %24 : vector<8x128xf32>
    %26 = vector.extract_strided_slice %11 {offsets = [0, 384], sizes = [8, 128], strides = [1, 1]} : vector<8x512xf32> to vector<8x128xf32>
    %27 = arith.negf %26 : vector<8x128xf32>
    %28 = math.exp %27 : vector<8x128xf32>
    %cst_15 = arith.constant 1.000000e+00 : f32
    %29 = vector.broadcast %cst_15 : f32 to vector<8x128xf32>
    %30 = arith.addf %29, %28 : vector<8x128xf32>
    %31 = arith.divf %29, %30 : vector<8x128xf32>
    %32 = arith.mulf %23, %4 : vector<8x128xf32>
    %33 = arith.mulf %17, %25 : vector<8x128xf32>
    %34 = arith.addf %32, %33 : vector<8x128xf32>
    %35 = math.tanh %34 : vector<8x128xf32>
    %36 = arith.mulf %31, %35 : vector<8x128xf32>
    %c0_16 = arith.constant 0 : index
    %c0_17 = arith.constant 0 : index
    %c0_18 = arith.constant 0 : index
    %37 = vector.load %arg5[%c0_16, %c0_17, %c0_18] : memref<8x8x128xf32, #tpu.memory_space<vmem>>, vector<1x8x128xf32>
    %38 = vector.shape_cast %37 : vector<1x8x128xf32> to vector<8x128xf32>
    %39 = vector.shape_cast %36 : vector<8x128xf32> to vector<1x8x128xf32>
    tpu.vector_store %arg5[%c0_16, %c0_17, %c0_18], %39 {strides = array<i32>} : memref<8x8x128xf32, #tpu.memory_space<vmem>>, vector<1x8x128xf32>,
    %c7 = arith.constant 7 : index
    %c0_19 = arith.constant 0 : index
    %c0_20 = arith.constant 0 : index
    %40 = vector.load %arg2[%c7, %c0_19, %c0_20] : memref<8x8x512xf32, #tpu.memory_space<vmem>>, vector<1x8x512xf32>
    %41 = vector.shape_cast %40 : vector<1x8x512xf32> to vector<8x512xf32>
    %c0_21 = arith.constant 0 : index
    %c0_22 = arith.constant 0 : index
    %42 = vector.load %arg4[%c0_21, %c0_22] : memref<128x512xf32, #tpu.memory_space<vmem>>, vector<128x512xf32>
    %cst_23 = arith.constant dense<0.000000e+00> : vector<8x512xf32>
    %43 = tpu.matmul %5, %42, %cst_23 {dimension_numbers = #tpu.dot_dimension_numbers<[1], [0], [0], [1], [0, 0, 1, 1], [], []>} : vector<8x128xf32>, vector<128x512xf32>, vector<8x512xf32> -> vector<8x512xf32>
    %44 = arith.addf %41, %43 : vector<8x512xf32>
    %45 = vector.extract_strided_slice %44 {offsets = [0, 0], sizes = [8, 128], strides = [1, 1]} : vector<8x512xf32> to vector<8x128xf32>
    %46 = arith.negf %45 : vector<8x128xf32>
    %47 = math.exp %46 : vector<8x128xf32>
    %cst_24 = arith.constant 1.000000e+00 : f32
    %48 = vector.broadcast %cst_24 : f32 to vector<8x128xf32>
    %49 = arith.addf %48, %47 : vector<8x128xf32>
    %50 = arith.divf %48, %49 : vector<8x128xf32>
    %51 = vector.extract_strided_slice %44 {offsets = [0, 128], sizes = [8, 128], strides = [1, 1]} : vector<8x512xf32> to vector<8x128xf32>
    %52 = arith.negf %51 : vector<8x128xf32>
    %53 = math.exp %52 : vector<8x128xf32>
    %cst_25 = arith.constant 1.000000e+00 : f32
    %54 = vector.broadcast %cst_25 : f32 to vector<8x128xf32>
    %55 = arith.addf %54, %53 : vector<8x128xf32>
    %56 = arith.divf %54, %55 : vector<8x128xf32>
    %57 = vector.extract_strided_slice %44 {offsets = [0, 256], sizes = [8, 128], strides = [1, 1]} : vector<8x512xf32> to vector<8x128xf32>
    %58 = math.tanh %57 : vector<8x128xf32>
    %59 = vector.extract_strided_slice %44 {offsets = [0, 384], sizes = [8, 128], strides = [1, 1]} : vector<8x512xf32> to vector<8x128xf32>
    %60 = arith.negf %59 : vector<8x128xf32>
    %61 = math.exp %60 : vector<8x128xf32>
    %cst_26 = arith.constant 1.000000e+00 : f32
    %62 = vector.broadcast %cst_26 : f32 to vector<8x128xf32>
    %63 = arith.addf %62, %61 : vector<8x128xf32>
    %64 = arith.divf %62, %63 : vector<8x128xf32>
    %65 = arith.mulf %56, %6 : vector<8x128xf32>
    %66 = arith.mulf %50, %58 : vector<8x128xf32>
    %67 = arith.addf %65, %66 : vector<8x128xf32>
    %68 = math.tanh %67 : vector<8x128xf32>
    %69 = arith.mulf %64, %68 : vector<8x128xf32>
    %c7_27 = arith.constant 7 : index
    %c0_28 = arith.constant 0 : index
    %c0_29 = arith.constant 0 : index
    %70 = vector.load %arg6[%c7_27, %c0_28, %c0_29] : memref<8x8x128xf32, #tpu.memory_space<vmem>>, vector<1x8x128xf32>
    %71 = vector.shape_cast %70 : vector<1x8x128xf32> to vector<8x128xf32>
    %72 = vector.shape_cast %69 : vector<8x128xf32> to vector<1x8x128xf32>
    tpu.vector_store %arg6[%c7_27, %c0_28, %c0_29], %72 {strides = array<i32>} : memref<8x8x128xf32, #tpu.memory_space<vmem>>, vector<1x8x128xf32>,
    %c1 = arith.constant 1 : index
    %c0_30 = arith.constant 0 : index
    %c0_31 = arith.constant 0 : index
    %73 = vector.load %arg1[%c1, %c0_30, %c0_31] : memref<8x8x512xf32, #tpu.memory_space<vmem>>, vector<1x8x512xf32>
    %74 = vector.shape_cast %73 : vector<1x8x512xf32> to vector<8x512xf32>
    %c0_32 = arith.constant 0 : index
    %c0_33 = arith.constant 0 : index
    %75 = vector.load %arg3[%c0_32, %c0_33] : memref<128x512xf32, #tpu.memory_space<vmem>>, vector<128x512xf32>
    %cst_34 = arith.constant dense<0.000000e+00> : vector<8x512xf32>
    %76 = tpu.matmul %36, %75, %cst_34 {dimension_numbers = #tpu.dot_dimension_numbers<[1], [0], [0], [1], [0, 0, 1, 1], [], []>} : vector<8x128xf32>, vector<128x512xf32>, vector<8x512xf32> -> vector<8x512xf32>
    %77 = arith.addf %74, %76 : vector<8x512xf32>
    %78 = vector.extract_strided_slice %77 {offsets = [0, 0], sizes = [8, 128], strides = [1, 1]} : vector<8x512xf32> to vector<8x128xf32>
    %79 = arith.negf %78 : vector<8x128xf32>
    %80 = math.exp %79 : vector<8x128xf32>
    %cst_35 = arith.constant 1.000000e+00 : f32
    %81 = vector.broadcast %cst_35 : f32 to vector<8x128xf32>
    %82 = arith.addf %81, %80 : vector<8x128xf32>
    %83 = arith.divf %81, %82 : vector<8x128xf32>
    %84 = vector.extract_strided_slice %77 {offsets = [0, 128], sizes = [8, 128], strides = [1, 1]} : vector<8x512xf32> to vector<8x128xf32>
    %85 = arith.negf %84 : vector<8x128xf32>
    %86 = math.exp %85 : vector<8x128xf32>
    %cst_36 = arith.constant 1.000000e+00 : f32
    %87 = vector.broadcast %cst_36 : f32 to vector<8x128xf32>
    %88 = arith.addf %87, %86 : vector<8x128xf32>
    %89 = arith.divf %87, %88 : vector<8x128xf32>
    %90 = vector.extract_strided_slice %77 {offsets = [0, 256], sizes = [8, 128], strides = [1, 1]} : vector<8x512xf32> to vector<8x128xf32>
    %91 = math.tanh %90 : vector<8x128xf32>
    %92 = vector.extract_strided_slice %77 {offsets = [0, 384], sizes = [8, 128], strides = [1, 1]} : vector<8x512xf32> to vector<8x128xf32>
    %93 = arith.negf %92 : vector<8x128xf32>
    %94 = math.exp %93 : vector<8x128xf32>
    %cst_37 = arith.constant 1.000000e+00 : f32
    %95 = vector.broadcast %cst_37 : f32 to vector<8x128xf32>
    %96 = arith.addf %95, %94 : vector<8x128xf32>
    %97 = arith.divf %95, %96 : vector<8x128xf32>
    %98 = arith.mulf %89, %34 : vector<8x128xf32>
    %99 = arith.mulf %83, %91 : vector<8x128xf32>
    %100 = arith.addf %98, %99 : vector<8x128xf32>
    %101 = math.tanh %100 : vector<8x128xf32>
    %102 = arith.mulf %97, %101 : vector<8x128xf32>
    %c1_38 = arith.constant 1 : index
    %c0_39 = arith.constant 0 : index
    %c0_40 = arith.constant 0 : index
    %103 = vector.load %arg5[%c1_38, %c0_39, %c0_40] : memref<8x8x128xf32, #tpu.memory_space<vmem>>, vector<1x8x128xf32>
    %104 = vector.shape_cast %103 : vector<1x8x128xf32> to vector<8x128xf32>
    %105 = vector.shape_cast %102 : vector<8x128xf32> to vector<1x8x128xf32>
    tpu.vector_store %arg5[%c1_38, %c0_39, %c0_40], %105 {strides = array<i32>} : memref<8x8x128xf32, #tpu.memory_space<vmem>>, vector<1x8x128xf32>,
    %c6 = arith.constant 6 : index
    %c0_41 = arith.constant 0 : index
    %c0_42 = arith.constant 0 : index
    %106 = vector.load %arg2[%c6, %c0_41, %c0_42] : memref<8x8x512xf32, #tpu.memory_space<vmem>>, vector<1x8x512xf32>
    %107 = vector.shape_cast %106 : vector<1x8x512xf32> to vector<8x512xf32>
    %c0_43 = arith.constant 0 : index
    %c0_44 = arith.constant 0 : index
    %108 = vector.load %arg4[%c0_43, %c0_44] : memref<128x512xf32, #tpu.memory_space<vmem>>, vector<128x512xf32>
    %cst_45 = arith.constant dense<0.000000e+00> : vector<8x512xf32>
    %109 = tpu.matmul %69, %108, %cst_45 {dimension_numbers = #tpu.dot_dimension_numbers<[1], [0], [0], [1], [0, 0, 1, 1], [], []>} : vector<8x128xf32>, vector<128x512xf32>, vector<8x512xf32> -> vector<8x512xf32>
    %110 = arith.addf %107, %109 : vector<8x512xf32>
    %111 = vector.extract_strided_slice %110 {offsets = [0, 0], sizes = [8, 128], strides = [1, 1]} : vector<8x512xf32> to vector<8x128xf32>
    %112 = arith.negf %111 : vector<8x128xf32>
    %113 = math.exp %112 : vector<8x128xf32>
    %cst_46 = arith.constant 1.000000e+00 : f32
    %114 = vector.broadcast %cst_46 : f32 to vector<8x128xf32>
    %115 = arith.addf %114, %113 : vector<8x128xf32>
    %116 = arith.divf %114, %115 : vector<8x128xf32>
    %117 = vector.extract_strided_slice %110 {offsets = [0, 128], sizes = [8, 128], strides = [1, 1]} : vector<8x512xf32> to vector<8x128xf32>
    %118 = arith.negf %117 : vector<8x128xf32>
    %119 = math.exp %118 : vector<8x128xf32>
    %cst_47 = arith.constant 1.000000e+00 : f32
    %120 = vector.broadcast %cst_47 : f32 to vector<8x128xf32>
    %121 = arith.addf %120, %119 : vector<8x128xf32>
    %122 = arith.divf %120, %121 : vector<8x128xf32>
    %123 = vector.extract_strided_slice %110 {offsets = [0, 256], sizes = [8, 128], strides = [1, 1]} : vector<8x512xf32> to vector<8x128xf32>
    %124 = math.tanh %123 : vector<8x128xf32>
    %125 = vector.extract_strided_slice %110 {offsets = [0, 384], sizes = [8, 128], strides = [1, 1]} : vector<8x512xf32> to vector<8x128xf32>
    %126 = arith.negf %125 : vector<8x128xf32>
    %127 = math.exp %126 : vector<8x128xf32>
    %cst_48 = arith.constant 1.000000e+00 : f32
    %128 = vector.broadcast %cst_48 : f32 to vector<8x128xf32>
    %129 = arith.addf %128, %127 : vector<8x128xf32>
    %130 = arith.divf %128, %129 : vector<8x128xf32>
    %131 = arith.mulf %122, %67 : vector<8x128xf32>
    %132 = arith.mulf %116, %124 : vector<8x128xf32>
    %133 = arith.addf %131, %132 : vector<8x128xf32>
    %134 = math.tanh %133 : vector<8x128xf32>
    %135 = arith.mulf %130, %134 : vector<8x128xf32>
    %c6_49 = arith.constant 6 : index
    %c0_50 = arith.constant 0 : index
    %c0_51 = arith.constant 0 : index
    %136 = vector.load %arg6[%c6_49, %c0_50, %c0_51] : memref<8x8x128xf32, #tpu.memory_space<vmem>>, vector<1x8x128xf32>
    %137 = vector.shape_cast %136 : vector<1x8x128xf32> to vector<8x128xf32>
    %138 = vector.shape_cast %135 : vector<8x128xf32> to vector<1x8x128xf32>
    tpu.vector_store %arg6[%c6_49, %c0_50, %c0_51], %138 {strides = array<i32>} : memref<8x8x128xf32, #tpu.memory_space<vmem>>, vector<1x8x128xf32>,
    %c2 = arith.constant 2 : index
    %c0_52 = arith.constant 0 : index
    %c0_53 = arith.constant 0 : index
    %139 = vector.load %arg1[%c2, %c0_52, %c0_53] : memref<8x8x512xf32, #tpu.memory_space<vmem>>, vector<1x8x512xf32>
    %140 = vector.shape_cast %139 : vector<1x8x512xf32> to vector<8x512xf32>
    %c0_54 = arith.constant 0 : index
    %c0_55 = arith.constant 0 : index
    %141 = vector.load %arg3[%c0_54, %c0_55] : memref<128x512xf32, #tpu.memory_space<vmem>>, vector<128x512xf32>
    %cst_56 = arith.constant dense<0.000000e+00> : vector<8x512xf32>
    %142 = tpu.matmul %102, %141, %cst_56 {dimension_numbers = #tpu.dot_dimension_numbers<[1], [0], [0], [1], [0, 0, 1, 1], [], []>} : vector<8x128xf32>, vector<128x512xf32>, vector<8x512xf32> -> vector<8x512xf32>
    %143 = arith.addf %140, %142 : vector<8x512xf32>
    %144 = vector.extract_strided_slice %143 {offsets = [0, 0], sizes = [8, 128], strides = [1, 1]} : vector<8x512xf32> to vector<8x128xf32>
    %145 = arith.negf %144 : vector<8x128xf32>
    %146 = math.exp %145 : vector<8x128xf32>
    %cst_57 = arith.constant 1.000000e+00 : f32
    %147 = vector.broadcast %cst_57 : f32 to vector<8x128xf32>
    %148 = arith.addf %147, %146 : vector<8x128xf32>
    %149 = arith.divf %147, %148 : vector<8x128xf32>
    %150 = vector.extract_strided_slice %143 {offsets = [0, 128], sizes = [8, 128], strides = [1, 1]} : vector<8x512xf32> to vector<8x128xf32>
    %151 = arith.negf %150 : vector<8x128xf32>
    %152 = math.exp %151 : vector<8x128xf32>
    %cst_58 = arith.constant 1.000000e+00 : f32
    %153 = vector.broadcast %cst_58 : f32 to vector<8x128xf32>
    %154 = arith.addf %153, %152 : vector<8x128xf32>
    %155 = arith.divf %153, %154 : vector<8x128xf32>
    %156 = vector.extract_strided_slice %143 {offsets = [0, 256], sizes = [8, 128], strides = [1, 1]} : vector<8x512xf32> to vector<8x128xf32>
    %157 = math.tanh %156 : vector<8x128xf32>
    %158 = vector.extract_strided_slice %143 {offsets = [0, 384], sizes = [8, 128], strides = [1, 1]} : vector<8x512xf32> to vector<8x128xf32>
    %159 = arith.negf %158 : vector<8x128xf32>
    %160 = math.exp %159 : vector<8x128xf32>
    %cst_59 = arith.constant 1.000000e+00 : f32
    %161 = vector.broadcast %cst_59 : f32 to vector<8x128xf32>
    %162 = arith.addf %161, %160 : vector<8x128xf32>
    %163 = arith.divf %161, %162 : vector<8x128xf32>
    %164 = arith.mulf %155, %100 : vector<8x128xf32>
    %165 = arith.mulf %149, %157 : vector<8x128xf32>
    %166 = arith.addf %164, %165 : vector<8x128xf32>
    %167 = math.tanh %166 : vector<8x128xf32>
    %168 = arith.mulf %163, %167 : vector<8x128xf32>
    %c2_60 = arith.constant 2 : index
    %c0_61 = arith.constant 0 : index
    %c0_62 = arith.constant 0 : index
    %169 = vector.load %arg5[%c2_60, %c0_61, %c0_62] : memref<8x8x128xf32, #tpu.memory_space<vmem>>, vector<1x8x128xf32>
    %170 = vector.shape_cast %169 : vector<1x8x128xf32> to vector<8x128xf32>
    %171 = vector.shape_cast %168 : vector<8x128xf32> to vector<1x8x128xf32>
    tpu.vector_store %arg5[%c2_60, %c0_61, %c0_62], %171 {strides = array<i32>} : memref<8x8x128xf32, #tpu.memory_space<vmem>>, vector<1x8x128xf32>,
    %c5 = arith.constant 5 : index
    %c0_63 = arith.constant 0 : index
    %c0_64 = arith.constant 0 : index
    %172 = vector.load %arg2[%c5, %c0_63, %c0_64] : memref<8x8x512xf32, #tpu.memory_space<vmem>>, vector<1x8x512xf32>
    %173 = vector.shape_cast %172 : vector<1x8x512xf32> to vector<8x512xf32>
    %c0_65 = arith.constant 0 : index
    %c0_66 = arith.constant 0 : index
    %174 = vector.load %arg4[%c0_65, %c0_66] : memref<128x512xf32, #tpu.memory_space<vmem>>, vector<128x512xf32>
    %cst_67 = arith.constant dense<0.000000e+00> : vector<8x512xf32>
    %175 = tpu.matmul %135, %174, %cst_67 {dimension_numbers = #tpu.dot_dimension_numbers<[1], [0], [0], [1], [0, 0, 1, 1], [], []>} : vector<8x128xf32>, vector<128x512xf32>, vector<8x512xf32> -> vector<8x512xf32>
    %176 = arith.addf %173, %175 : vector<8x512xf32>
    %177 = vector.extract_strided_slice %176 {offsets = [0, 0], sizes = [8, 128], strides = [1, 1]} : vector<8x512xf32> to vector<8x128xf32>
    %178 = arith.negf %177 : vector<8x128xf32>
    %179 = math.exp %178 : vector<8x128xf32>
    %cst_68 = arith.constant 1.000000e+00 : f32
    %180 = vector.broadcast %cst_68 : f32 to vector<8x128xf32>
    %181 = arith.addf %180, %179 : vector<8x128xf32>
    %182 = arith.divf %180, %181 : vector<8x128xf32>
    %183 = vector.extract_strided_slice %176 {offsets = [0, 128], sizes = [8, 128], strides = [1, 1]} : vector<8x512xf32> to vector<8x128xf32>
    %184 = arith.negf %183 : vector<8x128xf32>
    %185 = math.exp %184 : vector<8x128xf32>
    %cst_69 = arith.constant 1.000000e+00 : f32
    %186 = vector.broadcast %cst_69 : f32 to vector<8x128xf32>
    %187 = arith.addf %186, %185 : vector<8x128xf32>
    %188 = arith.divf %186, %187 : vector<8x128xf32>
    %189 = vector.extract_strided_slice %176 {offsets = [0, 256], sizes = [8, 128], strides = [1, 1]} : vector<8x512xf32> to vector<8x128xf32>
    %190 = math.tanh %189 : vector<8x128xf32>
    %191 = vector.extract_strided_slice %176 {offsets = [0, 384], sizes = [8, 128], strides = [1, 1]} : vector<8x512xf32> to vector<8x128xf32>
    %192 = arith.negf %191 : vector<8x128xf32>
    %193 = math.exp %192 : vector<8x128xf32>
    %cst_70 = arith.constant 1.000000e+00 : f32
    %194 = vector.broadcast %cst_70 : f32 to vector<8x128xf32>
    %195 = arith.addf %194, %193 : vector<8x128xf32>
    %196 = arith.divf %194, %195 : vector<8x128xf32>
    %197 = arith.mulf %188, %133 : vector<8x128xf32>
    %198 = arith.mulf %182, %190 : vector<8x128xf32>
    %199 = arith.addf %197, %198 : vector<8x128xf32>
    %200 = math.tanh %199 : vector<8x128xf32>
    %201 = arith.mulf %196, %200 : vector<8x128xf32>
    %c5_71 = arith.constant 5 : index
    %c0_72 = arith.constant 0 : index
    %c0_73 = arith.constant 0 : index
    %202 = vector.load %arg6[%c5_71, %c0_72, %c0_73] : memref<8x8x128xf32, #tpu.memory_space<vmem>>, vector<1x8x128xf32>
    %203 = vector.shape_cast %202 : vector<1x8x128xf32> to vector<8x128xf32>
    %204 = vector.shape_cast %201 : vector<8x128xf32> to vector<1x8x128xf32>
    tpu.vector_store %arg6[%c5_71, %c0_72, %c0_73], %204 {strides = array<i32>} : memref<8x8x128xf32, #tpu.memory_space<vmem>>, vector<1x8x128xf32>,
    %c3 = arith.constant 3 : index
    %c0_74 = arith.constant 0 : index
    %c0_75 = arith.constant 0 : index
    %205 = vector.load %arg1[%c3, %c0_74, %c0_75] : memref<8x8x512xf32, #tpu.memory_space<vmem>>, vector<1x8x512xf32>
    %206 = vector.shape_cast %205 : vector<1x8x512xf32> to vector<8x512xf32>
    %c0_76 = arith.constant 0 : index
    %c0_77 = arith.constant 0 : index
    %207 = vector.load %arg3[%c0_76, %c0_77] : memref<128x512xf32, #tpu.memory_space<vmem>>, vector<128x512xf32>
    %cst_78 = arith.constant dense<0.000000e+00> : vector<8x512xf32>
    %208 = tpu.matmul %168, %207, %cst_78 {dimension_numbers = #tpu.dot_dimension_numbers<[1], [0], [0], [1], [0, 0, 1, 1], [], []>} : vector<8x128xf32>, vector<128x512xf32>, vector<8x512xf32> -> vector<8x512xf32>
    %209 = arith.addf %206, %208 : vector<8x512xf32>
    %210 = vector.extract_strided_slice %209 {offsets = [0, 0], sizes = [8, 128], strides = [1, 1]} : vector<8x512xf32> to vector<8x128xf32>
    %211 = arith.negf %210 : vector<8x128xf32>
    %212 = math.exp %211 : vector<8x128xf32>
    %cst_79 = arith.constant 1.000000e+00 : f32
    %213 = vector.broadcast %cst_79 : f32 to vector<8x128xf32>
    %214 = arith.addf %213, %212 : vector<8x128xf32>
    %215 = arith.divf %213, %214 : vector<8x128xf32>
    %216 = vector.extract_strided_slice %209 {offsets = [0, 128], sizes = [8, 128], strides = [1, 1]} : vector<8x512xf32> to vector<8x128xf32>
    %217 = arith.negf %216 : vector<8x128xf32>
    %218 = math.exp %217 : vector<8x128xf32>
    %cst_80 = arith.constant 1.000000e+00 : f32
    %219 = vector.broadcast %cst_80 : f32 to vector<8x128xf32>
    %220 = arith.addf %219, %218 : vector<8x128xf32>
    %221 = arith.divf %219, %220 : vector<8x128xf32>
    %222 = vector.extract_strided_slice %209 {offsets = [0, 256], sizes = [8, 128], strides = [1, 1]} : vector<8x512xf32> to vector<8x128xf32>
    %223 = math.tanh %222 : vector<8x128xf32>
    %224 = vector.extract_strided_slice %209 {offsets = [0, 384], sizes = [8, 128], strides = [1, 1]} : vector<8x512xf32> to vector<8x128xf32>
    %225 = arith.negf %224 : vector<8x128xf32>
    %226 = math.exp %225 : vector<8x128xf32>
    %cst_81 = arith.constant 1.000000e+00 : f32
    %227 = vector.broadcast %cst_81 : f32 to vector<8x128xf32>
    %228 = arith.addf %227, %226 : vector<8x128xf32>
    %229 = arith.divf %227, %228 : vector<8x128xf32>
    %230 = arith.mulf %221, %166 : vector<8x128xf32>
    %231 = arith.mulf %215, %223 : vector<8x128xf32>
    %232 = arith.addf %230, %231 : vector<8x128xf32>
    %233 = math.tanh %232 : vector<8x128xf32>
    %234 = arith.mulf %229, %233 : vector<8x128xf32>
    %c3_82 = arith.constant 3 : index
    %c0_83 = arith.constant 0 : index
    %c0_84 = arith.constant 0 : index
    %235 = vector.load %arg5[%c3_82, %c0_83, %c0_84] : memref<8x8x128xf32, #tpu.memory_space<vmem>>, vector<1x8x128xf32>
    %236 = vector.shape_cast %235 : vector<1x8x128xf32> to vector<8x128xf32>
    %237 = vector.shape_cast %234 : vector<8x128xf32> to vector<1x8x128xf32>
    tpu.vector_store %arg5[%c3_82, %c0_83, %c0_84], %237 {strides = array<i32>} : memref<8x8x128xf32, #tpu.memory_space<vmem>>, vector<1x8x128xf32>,
    %c4 = arith.constant 4 : index
    %c0_85 = arith.constant 0 : index
    %c0_86 = arith.constant 0 : index
    %238 = vector.load %arg2[%c4, %c0_85, %c0_86] : memref<8x8x512xf32, #tpu.memory_space<vmem>>, vector<1x8x512xf32>
    %239 = vector.shape_cast %238 : vector<1x8x512xf32> to vector<8x512xf32>
    %c0_87 = arith.constant 0 : index
    %c0_88 = arith.constant 0 : index
    %240 = vector.load %arg4[%c0_87, %c0_88] : memref<128x512xf32, #tpu.memory_space<vmem>>, vector<128x512xf32>
    %cst_89 = arith.constant dense<0.000000e+00> : vector<8x512xf32>
    %241 = tpu.matmul %201, %240, %cst_89 {dimension_numbers = #tpu.dot_dimension_numbers<[1], [0], [0], [1], [0, 0, 1, 1], [], []>} : vector<8x128xf32>, vector<128x512xf32>, vector<8x512xf32> -> vector<8x512xf32>
    %242 = arith.addf %239, %241 : vector<8x512xf32>
    %243 = vector.extract_strided_slice %242 {offsets = [0, 0], sizes = [8, 128], strides = [1, 1]} : vector<8x512xf32> to vector<8x128xf32>
    %244 = arith.negf %243 : vector<8x128xf32>
    %245 = math.exp %244 : vector<8x128xf32>
    %cst_90 = arith.constant 1.000000e+00 : f32
    %246 = vector.broadcast %cst_90 : f32 to vector<8x128xf32>
    %247 = arith.addf %246, %245 : vector<8x128xf32>
    %248 = arith.divf %246, %247 : vector<8x128xf32>
    %249 = vector.extract_strided_slice %242 {offsets = [0, 128], sizes = [8, 128], strides = [1, 1]} : vector<8x512xf32> to vector<8x128xf32>
    %250 = arith.negf %249 : vector<8x128xf32>
    %251 = math.exp %250 : vector<8x128xf32>
    %cst_91 = arith.constant 1.000000e+00 : f32
    %252 = vector.broadcast %cst_91 : f32 to vector<8x128xf32>
    %253 = arith.addf %252, %251 : vector<8x128xf32>
    %254 = arith.divf %252, %253 : vector<8x128xf32>
    %255 = vector.extract_strided_slice %242 {offsets = [0, 256], sizes = [8, 128], strides = [1, 1]} : vector<8x512xf32> to vector<8x128xf32>
    %256 = math.tanh %255 : vector<8x128xf32>
    %257 = vector.extract_strided_slice %242 {offsets = [0, 384], sizes = [8, 128], strides = [1, 1]} : vector<8x512xf32> to vector<8x128xf32>
    %258 = arith.negf %257 : vector<8x128xf32>
    %259 = math.exp %258 : vector<8x128xf32>
    %cst_92 = arith.constant 1.000000e+00 : f32
    %260 = vector.broadcast %cst_92 : f32 to vector<8x128xf32>
    %261 = arith.addf %260, %259 : vector<8x128xf32>
    %262 = arith.divf %260, %261 : vector<8x128xf32>
    %263 = arith.mulf %254, %199 : vector<8x128xf32>
    %264 = arith.mulf %248, %256 : vector<8x128xf32>
    %265 = arith.addf %263, %264 : vector<8x128xf32>
    %266 = math.tanh %265 : vector<8x128xf32>
    %267 = arith.mulf %262, %266 : vector<8x128xf32>
    %c4_93 = arith.constant 4 : index
    %c0_94 = arith.constant 0 : index
    %c0_95 = arith.constant 0 : index
    %268 = vector.load %arg6[%c4_93, %c0_94, %c0_95] : memref<8x8x128xf32, #tpu.memory_space<vmem>>, vector<1x8x128xf32>
    %269 = vector.shape_cast %268 : vector<1x8x128xf32> to vector<8x128xf32>
    %270 = vector.shape_cast %267 : vector<8x128xf32> to vector<1x8x128xf32>
    tpu.vector_store %arg6[%c4_93, %c0_94, %c0_95], %270 {strides = array<i32>} : memref<8x8x128xf32, #tpu.memory_space<vmem>>, vector<1x8x128xf32>,
    %c4_96 = arith.constant 4 : index
    %c0_97 = arith.constant 0 : index
    %c0_98 = arith.constant 0 : index
    %271 = vector.load %arg1[%c4_96, %c0_97, %c0_98] : memref<8x8x512xf32, #tpu.memory_space<vmem>>, vector<1x8x512xf32>
    %272 = vector.shape_cast %271 : vector<1x8x512xf32> to vector<8x512xf32>
    %c0_99 = arith.constant 0 : index
    %c0_100 = arith.constant 0 : index
    %273 = vector.load %arg3[%c0_99, %c0_100] : memref<128x512xf32, #tpu.memory_space<vmem>>, vector<128x512xf32>
    %cst_101 = arith.constant dense<0.000000e+00> : vector<8x512xf32>
    %274 = tpu.matmul %234, %273, %cst_101 {dimension_numbers = #tpu.dot_dimension_numbers<[1], [0], [0], [1], [0, 0, 1, 1], [], []>} : vector<8x128xf32>, vector<128x512xf32>, vector<8x512xf32> -> vector<8x512xf32>
    %275 = arith.addf %272, %274 : vector<8x512xf32>
    %276 = vector.extract_strided_slice %275 {offsets = [0, 0], sizes = [8, 128], strides = [1, 1]} : vector<8x512xf32> to vector<8x128xf32>
    %277 = arith.negf %276 : vector<8x128xf32>
    %278 = math.exp %277 : vector<8x128xf32>
    %cst_102 = arith.constant 1.000000e+00 : f32
    %279 = vector.broadcast %cst_102 : f32 to vector<8x128xf32>
    %280 = arith.addf %279, %278 : vector<8x128xf32>
    %281 = arith.divf %279, %280 : vector<8x128xf32>
    %282 = vector.extract_strided_slice %275 {offsets = [0, 128], sizes = [8, 128], strides = [1, 1]} : vector<8x512xf32> to vector<8x128xf32>
    %283 = arith.negf %282 : vector<8x128xf32>
    %284 = math.exp %283 : vector<8x128xf32>
    %cst_103 = arith.constant 1.000000e+00 : f32
    %285 = vector.broadcast %cst_103 : f32 to vector<8x128xf32>
    %286 = arith.addf %285, %284 : vector<8x128xf32>
    %287 = arith.divf %285, %286 : vector<8x128xf32>
    %288 = vector.extract_strided_slice %275 {offsets = [0, 256], sizes = [8, 128], strides = [1, 1]} : vector<8x512xf32> to vector<8x128xf32>
    %289 = math.tanh %288 : vector<8x128xf32>
    %290 = vector.extract_strided_slice %275 {offsets = [0, 384], sizes = [8, 128], strides = [1, 1]} : vector<8x512xf32> to vector<8x128xf32>
    %291 = arith.negf %290 : vector<8x128xf32>
    %292 = math.exp %291 : vector<8x128xf32>
    %cst_104 = arith.constant 1.000000e+00 : f32
    %293 = vector.broadcast %cst_104 : f32 to vector<8x128xf32>
    %294 = arith.addf %293, %292 : vector<8x128xf32>
    %295 = arith.divf %293, %294 : vector<8x128xf32>
    %296 = arith.mulf %287, %232 : vector<8x128xf32>
    %297 = arith.mulf %281, %289 : vector<8x128xf32>
    %298 = arith.addf %296, %297 : vector<8x128xf32>
    %299 = math.tanh %298 : vector<8x128xf32>
    %300 = arith.mulf %295, %299 : vector<8x128xf32>
    %c4_105 = arith.constant 4 : index
    %c0_106 = arith.constant 0 : index
    %c0_107 = arith.constant 0 : index
    %301 = vector.load %arg5[%c4_105, %c0_106, %c0_107] : memref<8x8x128xf32, #tpu.memory_space<vmem>>, vector<1x8x128xf32>
    %302 = vector.shape_cast %301 : vector<1x8x128xf32> to vector<8x128xf32>
    %303 = vector.shape_cast %300 : vector<8x128xf32> to vector<1x8x128xf32>
    tpu.vector_store %arg5[%c4_105, %c0_106, %c0_107], %303 {strides = array<i32>} : memref<8x8x128xf32, #tpu.memory_space<vmem>>, vector<1x8x128xf32>,
    %c3_108 = arith.constant 3 : index
    %c0_109 = arith.constant 0 : index
    %c0_110 = arith.constant 0 : index
    %304 = vector.load %arg2[%c3_108, %c0_109, %c0_110] : memref<8x8x512xf32, #tpu.memory_space<vmem>>, vector<1x8x512xf32>
    %305 = vector.shape_cast %304 : vector<1x8x512xf32> to vector<8x512xf32>
    %c0_111 = arith.constant 0 : index
    %c0_112 = arith.constant 0 : index
    %306 = vector.load %arg4[%c0_111, %c0_112] : memref<128x512xf32, #tpu.memory_space<vmem>>, vector<128x512xf32>
    %cst_113 = arith.constant dense<0.000000e+00> : vector<8x512xf32>
    %307 = tpu.matmul %267, %306, %cst_113 {dimension_numbers = #tpu.dot_dimension_numbers<[1], [0], [0], [1], [0, 0, 1, 1], [], []>} : vector<8x128xf32>, vector<128x512xf32>, vector<8x512xf32> -> vector<8x512xf32>
    %308 = arith.addf %305, %307 : vector<8x512xf32>
    %309 = vector.extract_strided_slice %308 {offsets = [0, 0], sizes = [8, 128], strides = [1, 1]} : vector<8x512xf32> to vector<8x128xf32>
    %310 = arith.negf %309 : vector<8x128xf32>
    %311 = math.exp %310 : vector<8x128xf32>
    %cst_114 = arith.constant 1.000000e+00 : f32
    %312 = vector.broadcast %cst_114 : f32 to vector<8x128xf32>
    %313 = arith.addf %312, %311 : vector<8x128xf32>
    %314 = arith.divf %312, %313 : vector<8x128xf32>
    %315 = vector.extract_strided_slice %308 {offsets = [0, 128], sizes = [8, 128], strides = [1, 1]} : vector<8x512xf32> to vector<8x128xf32>
    %316 = arith.negf %315 : vector<8x128xf32>
    %317 = math.exp %316 : vector<8x128xf32>
    %cst_115 = arith.constant 1.000000e+00 : f32
    %318 = vector.broadcast %cst_115 : f32 to vector<8x128xf32>
    %319 = arith.addf %318, %317 : vector<8x128xf32>
    %320 = arith.divf %318, %319 : vector<8x128xf32>
    %321 = vector.extract_strided_slice %308 {offsets = [0, 256], sizes = [8, 128], strides = [1, 1]} : vector<8x512xf32> to vector<8x128xf32>
    %322 = math.tanh %321 : vector<8x128xf32>
    %323 = vector.extract_strided_slice %308 {offsets = [0, 384], sizes = [8, 128], strides = [1, 1]} : vector<8x512xf32> to vector<8x128xf32>
    %324 = arith.negf %323 : vector<8x128xf32>
    %325 = math.exp %324 : vector<8x128xf32>
    %cst_116 = arith.constant 1.000000e+00 : f32
    %326 = vector.broadcast %cst_116 : f32 to vector<8x128xf32>
    %327 = arith.addf %326, %325 : vector<8x128xf32>
    %328 = arith.divf %326, %327 : vector<8x128xf32>
    %329 = arith.mulf %320, %265 : vector<8x128xf32>
    %330 = arith.mulf %314, %322 : vector<8x128xf32>
    %331 = arith.addf %329, %330 : vector<8x128xf32>
    %332 = math.tanh %331 : vector<8x128xf32>
    %333 = arith.mulf %328, %332 : vector<8x128xf32>
    %c3_117 = arith.constant 3 : index
    %c0_118 = arith.constant 0 : index
    %c0_119 = arith.constant 0 : index
    %334 = vector.load %arg6[%c3_117, %c0_118, %c0_119] : memref<8x8x128xf32, #tpu.memory_space<vmem>>, vector<1x8x128xf32>
    %335 = vector.shape_cast %334 : vector<1x8x128xf32> to vector<8x128xf32>
    %336 = vector.shape_cast %333 : vector<8x128xf32> to vector<1x8x128xf32>
    tpu.vector_store %arg6[%c3_117, %c0_118, %c0_119], %336 {strides = array<i32>} : memref<8x8x128xf32, #tpu.memory_space<vmem>>, vector<1x8x128xf32>,
    %c5_120 = arith.constant 5 : index
    %c0_121 = arith.constant 0 : index
    %c0_122 = arith.constant 0 : index
    %337 = vector.load %arg1[%c5_120, %c0_121, %c0_122] : memref<8x8x512xf32, #tpu.memory_space<vmem>>, vector<1x8x512xf32>
    %338 = vector.shape_cast %337 : vector<1x8x512xf32> to vector<8x512xf32>
    %c0_123 = arith.constant 0 : index
    %c0_124 = arith.constant 0 : index
    %339 = vector.load %arg3[%c0_123, %c0_124] : memref<128x512xf32, #tpu.memory_space<vmem>>, vector<128x512xf32>
    %cst_125 = arith.constant dense<0.000000e+00> : vector<8x512xf32>
    %340 = tpu.matmul %300, %339, %cst_125 {dimension_numbers = #tpu.dot_dimension_numbers<[1], [0], [0], [1], [0, 0, 1, 1], [], []>} : vector<8x128xf32>, vector<128x512xf32>, vector<8x512xf32> -> vector<8x512xf32>
    %341 = arith.addf %338, %340 : vector<8x512xf32>
    %342 = vector.extract_strided_slice %341 {offsets = [0, 0], sizes = [8, 128], strides = [1, 1]} : vector<8x512xf32> to vector<8x128xf32>
    %343 = arith.negf %342 : vector<8x128xf32>
    %344 = math.exp %343 : vector<8x128xf32>
    %cst_126 = arith.constant 1.000000e+00 : f32
    %345 = vector.broadcast %cst_126 : f32 to vector<8x128xf32>
    %346 = arith.addf %345, %344 : vector<8x128xf32>
    %347 = arith.divf %345, %346 : vector<8x128xf32>
    %348 = vector.extract_strided_slice %341 {offsets = [0, 128], sizes = [8, 128], strides = [1, 1]} : vector<8x512xf32> to vector<8x128xf32>
    %349 = arith.negf %348 : vector<8x128xf32>
    %350 = math.exp %349 : vector<8x128xf32>
    %cst_127 = arith.constant 1.000000e+00 : f32
    %351 = vector.broadcast %cst_127 : f32 to vector<8x128xf32>
    %352 = arith.addf %351, %350 : vector<8x128xf32>
    %353 = arith.divf %351, %352 : vector<8x128xf32>
    %354 = vector.extract_strided_slice %341 {offsets = [0, 256], sizes = [8, 128], strides = [1, 1]} : vector<8x512xf32> to vector<8x128xf32>
    %355 = math.tanh %354 : vector<8x128xf32>
    %356 = vector.extract_strided_slice %341 {offsets = [0, 384], sizes = [8, 128], strides = [1, 1]} : vector<8x512xf32> to vector<8x128xf32>
    %357 = arith.negf %356 : vector<8x128xf32>
    %358 = math.exp %357 : vector<8x128xf32>
    %cst_128 = arith.constant 1.000000e+00 : f32
    %359 = vector.broadcast %cst_128 : f32 to vector<8x128xf32>
    %360 = arith.addf %359, %358 : vector<8x128xf32>
    %361 = arith.divf %359, %360 : vector<8x128xf32>
    %362 = arith.mulf %353, %298 : vector<8x128xf32>
    %363 = arith.mulf %347, %355 : vector<8x128xf32>
    %364 = arith.addf %362, %363 : vector<8x128xf32>
    %365 = math.tanh %364 : vector<8x128xf32>
    %366 = arith.mulf %361, %365 : vector<8x128xf32>
    %c5_129 = arith.constant 5 : index
    %c0_130 = arith.constant 0 : index
    %c0_131 = arith.constant 0 : index
    %367 = vector.load %arg5[%c5_129, %c0_130, %c0_131] : memref<8x8x128xf32, #tpu.memory_space<vmem>>, vector<1x8x128xf32>
    %368 = vector.shape_cast %367 : vector<1x8x128xf32> to vector<8x128xf32>
    %369 = vector.shape_cast %366 : vector<8x128xf32> to vector<1x8x128xf32>
    tpu.vector_store %arg5[%c5_129, %c0_130, %c0_131], %369 {strides = array<i32>} : memref<8x8x128xf32, #tpu.memory_space<vmem>>, vector<1x8x128xf32>,
    %c2_132 = arith.constant 2 : index
    %c0_133 = arith.constant 0 : index
    %c0_134 = arith.constant 0 : index
    %370 = vector.load %arg2[%c2_132, %c0_133, %c0_134] : memref<8x8x512xf32, #tpu.memory_space<vmem>>, vector<1x8x512xf32>
    %371 = vector.shape_cast %370 : vector<1x8x512xf32> to vector<8x512xf32>
    %c0_135 = arith.constant 0 : index
    %c0_136 = arith.constant 0 : index
    %372 = vector.load %arg4[%c0_135, %c0_136] : memref<128x512xf32, #tpu.memory_space<vmem>>, vector<128x512xf32>
    %cst_137 = arith.constant dense<0.000000e+00> : vector<8x512xf32>
    %373 = tpu.matmul %333, %372, %cst_137 {dimension_numbers = #tpu.dot_dimension_numbers<[1], [0], [0], [1], [0, 0, 1, 1], [], []>} : vector<8x128xf32>, vector<128x512xf32>, vector<8x512xf32> -> vector<8x512xf32>
    %374 = arith.addf %371, %373 : vector<8x512xf32>
    %375 = vector.extract_strided_slice %374 {offsets = [0, 0], sizes = [8, 128], strides = [1, 1]} : vector<8x512xf32> to vector<8x128xf32>
    %376 = arith.negf %375 : vector<8x128xf32>
    %377 = math.exp %376 : vector<8x128xf32>
    %cst_138 = arith.constant 1.000000e+00 : f32
    %378 = vector.broadcast %cst_138 : f32 to vector<8x128xf32>
    %379 = arith.addf %378, %377 : vector<8x128xf32>
    %380 = arith.divf %378, %379 : vector<8x128xf32>
    %381 = vector.extract_strided_slice %374 {offsets = [0, 128], sizes = [8, 128], strides = [1, 1]} : vector<8x512xf32> to vector<8x128xf32>
    %382 = arith.negf %381 : vector<8x128xf32>
    %383 = math.exp %382 : vector<8x128xf32>
    %cst_139 = arith.constant 1.000000e+00 : f32
    %384 = vector.broadcast %cst_139 : f32 to vector<8x128xf32>
    %385 = arith.addf %384, %383 : vector<8x128xf32>
    %386 = arith.divf %384, %385 : vector<8x128xf32>
    %387 = vector.extract_strided_slice %374 {offsets = [0, 256], sizes = [8, 128], strides = [1, 1]} : vector<8x512xf32> to vector<8x128xf32>
    %388 = math.tanh %387 : vector<8x128xf32>
    %389 = vector.extract_strided_slice %374 {offsets = [0, 384], sizes = [8, 128], strides = [1, 1]} : vector<8x512xf32> to vector<8x128xf32>
    %390 = arith.negf %389 : vector<8x128xf32>
    %391 = math.exp %390 : vector<8x128xf32>
    %cst_140 = arith.constant 1.000000e+00 : f32
    %392 = vector.broadcast %cst_140 : f32 to vector<8x128xf32>
    %393 = arith.addf %392, %391 : vector<8x128xf32>
    %394 = arith.divf %392, %393 : vector<8x128xf32>
    %395 = arith.mulf %386, %331 : vector<8x128xf32>
    %396 = arith.mulf %380, %388 : vector<8x128xf32>
    %397 = arith.addf %395, %396 : vector<8x128xf32>
    %398 = math.tanh %397 : vector<8x128xf32>
    %399 = arith.mulf %394, %398 : vector<8x128xf32>
    %c2_141 = arith.constant 2 : index
    %c0_142 = arith.constant 0 : index
    %c0_143 = arith.constant 0 : index
    %400 = vector.load %arg6[%c2_141, %c0_142, %c0_143] : memref<8x8x128xf32, #tpu.memory_space<vmem>>, vector<1x8x128xf32>
    %401 = vector.shape_cast %400 : vector<1x8x128xf32> to vector<8x128xf32>
    %402 = vector.shape_cast %399 : vector<8x128xf32> to vector<1x8x128xf32>
    tpu.vector_store %arg6[%c2_141, %c0_142, %c0_143], %402 {strides = array<i32>} : memref<8x8x128xf32, #tpu.memory_space<vmem>>, vector<1x8x128xf32>,
    %c6_144 = arith.constant 6 : index
    %c0_145 = arith.constant 0 : index
    %c0_146 = arith.constant 0 : index
    %403 = vector.load %arg1[%c6_144, %c0_145, %c0_146] : memref<8x8x512xf32, #tpu.memory_space<vmem>>, vector<1x8x512xf32>
    %404 = vector.shape_cast %403 : vector<1x8x512xf32> to vector<8x512xf32>
    %c0_147 = arith.constant 0 : index
    %c0_148 = arith.constant 0 : index
    %405 = vector.load %arg3[%c0_147, %c0_148] : memref<128x512xf32, #tpu.memory_space<vmem>>, vector<128x512xf32>
    %cst_149 = arith.constant dense<0.000000e+00> : vector<8x512xf32>
    %406 = tpu.matmul %366, %405, %cst_149 {dimension_numbers = #tpu.dot_dimension_numbers<[1], [0], [0], [1], [0, 0, 1, 1], [], []>} : vector<8x128xf32>, vector<128x512xf32>, vector<8x512xf32> -> vector<8x512xf32>
    %407 = arith.addf %404, %406 : vector<8x512xf32>
    %408 = vector.extract_strided_slice %407 {offsets = [0, 0], sizes = [8, 128], strides = [1, 1]} : vector<8x512xf32> to vector<8x128xf32>
    %409 = arith.negf %408 : vector<8x128xf32>
    %410 = math.exp %409 : vector<8x128xf32>
    %cst_150 = arith.constant 1.000000e+00 : f32
    %411 = vector.broadcast %cst_150 : f32 to vector<8x128xf32>
    %412 = arith.addf %411, %410 : vector<8x128xf32>
    %413 = arith.divf %411, %412 : vector<8x128xf32>
    %414 = vector.extract_strided_slice %407 {offsets = [0, 128], sizes = [8, 128], strides = [1, 1]} : vector<8x512xf32> to vector<8x128xf32>
    %415 = arith.negf %414 : vector<8x128xf32>
    %416 = math.exp %415 : vector<8x128xf32>
    %cst_151 = arith.constant 1.000000e+00 : f32
    %417 = vector.broadcast %cst_151 : f32 to vector<8x128xf32>
    %418 = arith.addf %417, %416 : vector<8x128xf32>
    %419 = arith.divf %417, %418 : vector<8x128xf32>
    %420 = vector.extract_strided_slice %407 {offsets = [0, 256], sizes = [8, 128], strides = [1, 1]} : vector<8x512xf32> to vector<8x128xf32>
    %421 = math.tanh %420 : vector<8x128xf32>
    %422 = vector.extract_strided_slice %407 {offsets = [0, 384], sizes = [8, 128], strides = [1, 1]} : vector<8x512xf32> to vector<8x128xf32>
    %423 = arith.negf %422 : vector<8x128xf32>
    %424 = math.exp %423 : vector<8x128xf32>
    %cst_152 = arith.constant 1.000000e+00 : f32
    %425 = vector.broadcast %cst_152 : f32 to vector<8x128xf32>
    %426 = arith.addf %425, %424 : vector<8x128xf32>
    %427 = arith.divf %425, %426 : vector<8x128xf32>
    %428 = arith.mulf %419, %364 : vector<8x128xf32>
    %429 = arith.mulf %413, %421 : vector<8x128xf32>
    %430 = arith.addf %428, %429 : vector<8x128xf32>
    %431 = math.tanh %430 : vector<8x128xf32>
    %432 = arith.mulf %427, %431 : vector<8x128xf32>
    %c6_153 = arith.constant 6 : index
    %c0_154 = arith.constant 0 : index
    %c0_155 = arith.constant 0 : index
    %433 = vector.load %arg5[%c6_153, %c0_154, %c0_155] : memref<8x8x128xf32, #tpu.memory_space<vmem>>, vector<1x8x128xf32>
    %434 = vector.shape_cast %433 : vector<1x8x128xf32> to vector<8x128xf32>
    %435 = vector.shape_cast %432 : vector<8x128xf32> to vector<1x8x128xf32>
    tpu.vector_store %arg5[%c6_153, %c0_154, %c0_155], %435 {strides = array<i32>} : memref<8x8x128xf32, #tpu.memory_space<vmem>>, vector<1x8x128xf32>,
    %c1_156 = arith.constant 1 : index
    %c0_157 = arith.constant 0 : index
    %c0_158 = arith.constant 0 : index
    %436 = vector.load %arg2[%c1_156, %c0_157, %c0_158] : memref<8x8x512xf32, #tpu.memory_space<vmem>>, vector<1x8x512xf32>
    %437 = vector.shape_cast %436 : vector<1x8x512xf32> to vector<8x512xf32>
    %c0_159 = arith.constant 0 : index
    %c0_160 = arith.constant 0 : index
    %438 = vector.load %arg4[%c0_159, %c0_160] : memref<128x512xf32, #tpu.memory_space<vmem>>, vector<128x512xf32>
    %cst_161 = arith.constant dense<0.000000e+00> : vector<8x512xf32>
    %439 = tpu.matmul %399, %438, %cst_161 {dimension_numbers = #tpu.dot_dimension_numbers<[1], [0], [0], [1], [0, 0, 1, 1], [], []>} : vector<8x128xf32>, vector<128x512xf32>, vector<8x512xf32> -> vector<8x512xf32>
    %440 = arith.addf %437, %439 : vector<8x512xf32>
    %441 = vector.extract_strided_slice %440 {offsets = [0, 0], sizes = [8, 128], strides = [1, 1]} : vector<8x512xf32> to vector<8x128xf32>
    %442 = arith.negf %441 : vector<8x128xf32>
    %443 = math.exp %442 : vector<8x128xf32>
    %cst_162 = arith.constant 1.000000e+00 : f32
    %444 = vector.broadcast %cst_162 : f32 to vector<8x128xf32>
    %445 = arith.addf %444, %443 : vector<8x128xf32>
    %446 = arith.divf %444, %445 : vector<8x128xf32>
    %447 = vector.extract_strided_slice %440 {offsets = [0, 128], sizes = [8, 128], strides = [1, 1]} : vector<8x512xf32> to vector<8x128xf32>
    %448 = arith.negf %447 : vector<8x128xf32>
    %449 = math.exp %448 : vector<8x128xf32>
    %cst_163 = arith.constant 1.000000e+00 : f32
    %450 = vector.broadcast %cst_163 : f32 to vector<8x128xf32>
    %451 = arith.addf %450, %449 : vector<8x128xf32>
    %452 = arith.divf %450, %451 : vector<8x128xf32>
    %453 = vector.extract_strided_slice %440 {offsets = [0, 256], sizes = [8, 128], strides = [1, 1]} : vector<8x512xf32> to vector<8x128xf32>
    %454 = math.tanh %453 : vector<8x128xf32>
    %455 = vector.extract_strided_slice %440 {offsets = [0, 384], sizes = [8, 128], strides = [1, 1]} : vector<8x512xf32> to vector<8x128xf32>
    %456 = arith.negf %455 : vector<8x128xf32>
    %457 = math.exp %456 : vector<8x128xf32>
    %cst_164 = arith.constant 1.000000e+00 : f32
    %458 = vector.broadcast %cst_164 : f32 to vector<8x128xf32>
    %459 = arith.addf %458, %457 : vector<8x128xf32>
    %460 = arith.divf %458, %459 : vector<8x128xf32>
    %461 = arith.mulf %452, %397 : vector<8x128xf32>
    %462 = arith.mulf %446, %454 : vector<8x128xf32>
    %463 = arith.addf %461, %462 : vector<8x128xf32>
    %464 = math.tanh %463 : vector<8x128xf32>
    %465 = arith.mulf %460, %464 : vector<8x128xf32>
    %c1_165 = arith.constant 1 : index
    %c0_166 = arith.constant 0 : index
    %c0_167 = arith.constant 0 : index
    %466 = vector.load %arg6[%c1_165, %c0_166, %c0_167] : memref<8x8x128xf32, #tpu.memory_space<vmem>>, vector<1x8x128xf32>
    %467 = vector.shape_cast %466 : vector<1x8x128xf32> to vector<8x128xf32>
    %468 = vector.shape_cast %465 : vector<8x128xf32> to vector<1x8x128xf32>
    tpu.vector_store %arg6[%c1_165, %c0_166, %c0_167], %468 {strides = array<i32>} : memref<8x8x128xf32, #tpu.memory_space<vmem>>, vector<1x8x128xf32>,
    %c7_168 = arith.constant 7 : index
    %c0_169 = arith.constant 0 : index
    %c0_170 = arith.constant 0 : index
    %469 = vector.load %arg1[%c7_168, %c0_169, %c0_170] : memref<8x8x512xf32, #tpu.memory_space<vmem>>, vector<1x8x512xf32>
    %470 = vector.shape_cast %469 : vector<1x8x512xf32> to vector<8x512xf32>
    %c0_171 = arith.constant 0 : index
    %c0_172 = arith.constant 0 : index
    %471 = vector.load %arg3[%c0_171, %c0_172] : memref<128x512xf32, #tpu.memory_space<vmem>>, vector<128x512xf32>
    %cst_173 = arith.constant dense<0.000000e+00> : vector<8x512xf32>
    %472 = tpu.matmul %432, %471, %cst_173 {dimension_numbers = #tpu.dot_dimension_numbers<[1], [0], [0], [1], [0, 0, 1, 1], [], []>} : vector<8x128xf32>, vector<128x512xf32>, vector<8x512xf32> -> vector<8x512xf32>
    %473 = arith.addf %470, %472 : vector<8x512xf32>
    %474 = vector.extract_strided_slice %473 {offsets = [0, 0], sizes = [8, 128], strides = [1, 1]} : vector<8x512xf32> to vector<8x128xf32>
    %475 = arith.negf %474 : vector<8x128xf32>
    %476 = math.exp %475 : vector<8x128xf32>
    %cst_174 = arith.constant 1.000000e+00 : f32
    %477 = vector.broadcast %cst_174 : f32 to vector<8x128xf32>
    %478 = arith.addf %477, %476 : vector<8x128xf32>
    %479 = arith.divf %477, %478 : vector<8x128xf32>
    %480 = vector.extract_strided_slice %473 {offsets = [0, 128], sizes = [8, 128], strides = [1, 1]} : vector<8x512xf32> to vector<8x128xf32>
    %481 = arith.negf %480 : vector<8x128xf32>
    %482 = math.exp %481 : vector<8x128xf32>
    %cst_175 = arith.constant 1.000000e+00 : f32
    %483 = vector.broadcast %cst_175 : f32 to vector<8x128xf32>
    %484 = arith.addf %483, %482 : vector<8x128xf32>
    %485 = arith.divf %483, %484 : vector<8x128xf32>
    %486 = vector.extract_strided_slice %473 {offsets = [0, 256], sizes = [8, 128], strides = [1, 1]} : vector<8x512xf32> to vector<8x128xf32>
    %487 = math.tanh %486 : vector<8x128xf32>
    %488 = vector.extract_strided_slice %473 {offsets = [0, 384], sizes = [8, 128], strides = [1, 1]} : vector<8x512xf32> to vector<8x128xf32>
    %489 = arith.negf %488 : vector<8x128xf32>
    %490 = math.exp %489 : vector<8x128xf32>
    %cst_176 = arith.constant 1.000000e+00 : f32
    %491 = vector.broadcast %cst_176 : f32 to vector<8x128xf32>
    %492 = arith.addf %491, %490 : vector<8x128xf32>
    %493 = arith.divf %491, %492 : vector<8x128xf32>
    %494 = arith.mulf %485, %430 : vector<8x128xf32>
    %495 = arith.mulf %479, %487 : vector<8x128xf32>
    %496 = arith.addf %494, %495 : vector<8x128xf32>
    %497 = math.tanh %496 : vector<8x128xf32>
    %498 = arith.mulf %493, %497 : vector<8x128xf32>
    %c7_177 = arith.constant 7 : index
    %c0_178 = arith.constant 0 : index
    %c0_179 = arith.constant 0 : index
    %499 = vector.load %arg5[%c7_177, %c0_178, %c0_179] : memref<8x8x128xf32, #tpu.memory_space<vmem>>, vector<1x8x128xf32>
    %500 = vector.shape_cast %499 : vector<1x8x128xf32> to vector<8x128xf32>
    %501 = vector.shape_cast %498 : vector<8x128xf32> to vector<1x8x128xf32>
    tpu.vector_store %arg5[%c7_177, %c0_178, %c0_179], %501 {strides = array<i32>} : memref<8x8x128xf32, #tpu.memory_space<vmem>>, vector<1x8x128xf32>,
    %c0_180 = arith.constant 0 : index
    %c0_181 = arith.constant 0 : index
    %c0_182 = arith.constant 0 : index
    %502 = vector.load %arg2[%c0_180, %c0_181, %c0_182] : memref<8x8x512xf32, #tpu.memory_space<vmem>>, vector<1x8x512xf32>
    %503 = vector.shape_cast %502 : vector<1x8x512xf32> to vector<8x512xf32>
    %c0_183 = arith.constant 0 : index
    %c0_184 = arith.constant 0 : index
    %504 = vector.load %arg4[%c0_183, %c0_184] : memref<128x512xf32, #tpu.memory_space<vmem>>, vector<128x512xf32>
    %cst_185 = arith.constant dense<0.000000e+00> : vector<8x512xf32>
    %505 = tpu.matmul %465, %504, %cst_185 {dimension_numbers = #tpu.dot_dimension_numbers<[1], [0], [0], [1], [0, 0, 1, 1], [], []>} : vector<8x128xf32>, vector<128x512xf32>, vector<8x512xf32> -> vector<8x512xf32>
    %506 = arith.addf %503, %505 : vector<8x512xf32>
    %507 = vector.extract_strided_slice %506 {offsets = [0, 0], sizes = [8, 128], strides = [1, 1]} : vector<8x512xf32> to vector<8x128xf32>
    %508 = arith.negf %507 : vector<8x128xf32>
    %509 = math.exp %508 : vector<8x128xf32>
    %cst_186 = arith.constant 1.000000e+00 : f32
    %510 = vector.broadcast %cst_186 : f32 to vector<8x128xf32>
    %511 = arith.addf %510, %509 : vector<8x128xf32>
    %512 = arith.divf %510, %511 : vector<8x128xf32>
    %513 = vector.extract_strided_slice %506 {offsets = [0, 128], sizes = [8, 128], strides = [1, 1]} : vector<8x512xf32> to vector<8x128xf32>
    %514 = arith.negf %513 : vector<8x128xf32>
    %515 = math.exp %514 : vector<8x128xf32>
    %cst_187 = arith.constant 1.000000e+00 : f32
    %516 = vector.broadcast %cst_187 : f32 to vector<8x128xf32>
    %517 = arith.addf %516, %515 : vector<8x128xf32>
    %518 = arith.divf %516, %517 : vector<8x128xf32>
    %519 = vector.extract_strided_slice %506 {offsets = [0, 256], sizes = [8, 128], strides = [1, 1]} : vector<8x512xf32> to vector<8x128xf32>
    %520 = math.tanh %519 : vector<8x128xf32>
    %521 = vector.extract_strided_slice %506 {offsets = [0, 384], sizes = [8, 128], strides = [1, 1]} : vector<8x512xf32> to vector<8x128xf32>
    %522 = arith.negf %521 : vector<8x128xf32>
    %523 = math.exp %522 : vector<8x128xf32>
    %cst_188 = arith.constant 1.000000e+00 : f32
    %524 = vector.broadcast %cst_188 : f32 to vector<8x128xf32>
    %525 = arith.addf %524, %523 : vector<8x128xf32>
    %526 = arith.divf %524, %525 : vector<8x128xf32>
    %527 = arith.mulf %518, %463 : vector<8x128xf32>
    %528 = arith.mulf %512, %520 : vector<8x128xf32>
    %529 = arith.addf %527, %528 : vector<8x128xf32>
    %530 = math.tanh %529 : vector<8x128xf32>
    %531 = arith.mulf %526, %530 : vector<8x128xf32>
    %c0_189 = arith.constant 0 : index
    %c0_190 = arith.constant 0 : index
    %c0_191 = arith.constant 0 : index
    %532 = vector.load %arg6[%c0_189, %c0_190, %c0_191] : memref<8x8x128xf32, #tpu.memory_space<vmem>>, vector<1x8x128xf32>
    %533 = vector.shape_cast %532 : vector<1x8x128xf32> to vector<8x128xf32>
    %534 = vector.shape_cast %531 : vector<8x128xf32> to vector<1x8x128xf32>
    tpu.vector_store %arg6[%c0_189, %c0_190, %c0_191], %534 {strides = array<i32>} : memref<8x8x128xf32, #tpu.memory_space<vmem>>, vector<1x8x128xf32>,
    %c0_192 = arith.constant 0 : index
    %c0_193 = arith.constant 0 : index
    %535 = vector.load %arg7[%c0_192, %c0_193] : memref<8x128xf32, #tpu.memory_space<vmem>>, vector<8x128xf32>
    tpu.vector_store %arg7[%c0_192, %c0_193], %498 {strides = array<i32>} : memref<8x128xf32, #tpu.memory_space<vmem>>, vector<8x128xf32>,
    %c0_194 = arith.constant 0 : index
    %c0_195 = arith.constant 0 : index
    %536 = vector.load %arg8[%c0_194, %c0_195] : memref<8x128xf32, #tpu.memory_space<vmem>>, vector<8x128xf32>
    tpu.vector_store %arg8[%c0_194, %c0_195], %496 {strides = array<i32>} : memref<8x128xf32, #tpu.memory_space<vmem>>, vector<8x128xf32>,
    %c0_196 = arith.constant 0 : index
    %c0_197 = arith.constant 0 : index
    %537 = vector.load %arg9[%c0_196, %c0_197] : memref<8x128xf32, #tpu.memory_space<vmem>>, vector<8x128xf32>
    tpu.vector_store %arg9[%c0_196, %c0_197], %531 {strides = array<i32>} : memref<8x128xf32, #tpu.memory_space<vmem>>, vector<8x128xf32>,
    %c0_198 = arith.constant 0 : index
    %c0_199 = arith.constant 0 : index
    %538 = vector.load %arg10[%c0_198, %c0_199] : memref<8x128xf32, #tpu.memory_space<vmem>>, vector<8x128xf32>
    tpu.vector_store %arg10[%c0_198, %c0_199], %529 {strides = array<i32>} : memref<8x128xf32, #tpu.memory_space<vmem>>, vector<8x128xf32>,
    return
  }
  func.func @transform_0(%arg0: i32) -> (i32, i32, i32) {
    %c0_i32 = arith.constant 0 : i32
    %c0_i32_0 = arith.constant 0 : i32
    %c0_i32_1 = arith.constant 0 : i32
    return %arg0, %c0_i32, %c0_i32_0 : i32, i32, i32
  }
  func.func @transform_1(%arg0: i32) -> (i32, i32, i32) {
    %c0_i32 = arith.constant 0 : i32
    %0 = arith.subi %c0_i32, %arg0 : i32
    %c0_i32_0 = arith.constant 0 : i32
    %c0_i32_1 = arith.constant 0 : i32
    %c0_i32_2 = arith.constant 0 : i32
    return %0, %c0_i32_0, %c0_i32_1 : i32, i32, i32
  }
  func.func @transform_2(%arg0: i32) -> (i32, i32) {
    %c0_i32 = arith.constant 0 : i32
    %c0_i32_0 = arith.constant 0 : i32
    %c0_i32_1 = arith.constant 0 : i32
    return %c0_i32, %c0_i32_0 : i32, i32
  }
  func.func @transform_3(%arg0: i32) -> (i32, i32) {
    %c0_i32 = arith.constant 0 : i32
    %c0_i32_0 = arith.constant 0 : i32
    %c0_i32_1 = arith.constant 0 : i32
    return %c0_i32, %c0_i32_0 : i32, i32
  }
  func.func @transform_4(%arg0: i32) -> (i32, i32, i32) {
    %c0_i32 = arith.constant 0 : i32
    %c0_i32_0 = arith.constant 0 : i32
    %c0_i32_1 = arith.constant 0 : i32
    return %arg0, %c0_i32, %c0_i32_0 : i32, i32, i32
  }
  func.func @transform_5(%arg0: i32) -> (i32, i32, i32) {
    %c0_i32 = arith.constant 0 : i32
    %0 = arith.subi %c0_i32, %arg0 : i32
    %c0_i32_0 = arith.constant 0 : i32
    %c0_i32_1 = arith.constant 0 : i32
    %c0_i32_2 = arith.constant 0 : i32
    return %0, %c0_i32_0, %c0_i32_1 : i32, i32, i32
  }
}

module attributes {stable_mosaic.version = 11 : i64} {
  func.func @_out_proj_kernel(%arg0: i32, %arg1: memref<64x128xf32, #tpu.memory_space<vmem>>, %arg2: memref<64x128xf32, #tpu.memory_space<vmem>>, %arg3: memref<128x8xf32, #tpu.memory_space<vmem>>, %arg4: memref<128x8xf32, #tpu.memory_space<vmem>>, %arg5: memref<1x8xf32, #tpu.memory_space<vmem>>, %arg6: memref<64x8xf32, #tpu.memory_space<vmem>>) attributes {dimension_semantics = [#tpu.dimension_semantics<parallel>], iteration_bounds = array<i64: 1>, scalar_prefetch = 0 : i64, scratch_operands = 0 : i64, tpu.core_type = #tpu.core_type<tc>, window_params = [{transform_indices = @transform_0, window_bounds = array<i64: 64, 128>}, {transform_indices = @transform_1, window_bounds = array<i64: 64, 128>}, {pipeline_mode = #tpu.pipeline_mode<synchronous>, transform_indices = @transform_2, window_bounds = array<i64: 128, 8>}, {pipeline_mode = #tpu.pipeline_mode<synchronous>, transform_indices = @transform_3, window_bounds = array<i64: 128, 8>}, {pipeline_mode = #tpu.pipeline_mode<synchronous>, transform_indices = @transform_4, window_bounds = array<i64: 1, 8>}, {transform_indices = @transform_5, window_bounds = array<i64: 64, 8>}]} {
    %c0 = arith.constant 0 : index
    %c0_0 = arith.constant 0 : index
    %0 = vector.load %arg1[%c0, %c0_0] : memref<64x128xf32, #tpu.memory_space<vmem>>, vector<64x128xf32>
    %c0_1 = arith.constant 0 : index
    %c0_2 = arith.constant 0 : index
    %1 = vector.load %arg3[%c0_1, %c0_2] : memref<128x8xf32, #tpu.memory_space<vmem>>, vector<128x8xf32>
    %cst = arith.constant dense<0.000000e+00> : vector<64x8xf32>
    %2 = tpu.matmul %0, %1, %cst {dimension_numbers = #tpu.dot_dimension_numbers<[1], [0], [0], [1], [0, 0, 1, 1], [], []>} : vector<64x128xf32>, vector<128x8xf32>, vector<64x8xf32> -> vector<64x8xf32>
    %c0_3 = arith.constant 0 : index
    %c0_4 = arith.constant 0 : index
    %3 = vector.load %arg2[%c0_3, %c0_4] : memref<64x128xf32, #tpu.memory_space<vmem>>, vector<64x128xf32>
    %c0_5 = arith.constant 0 : index
    %c0_6 = arith.constant 0 : index
    %4 = vector.load %arg4[%c0_5, %c0_6] : memref<128x8xf32, #tpu.memory_space<vmem>>, vector<128x8xf32>
    %cst_7 = arith.constant dense<0.000000e+00> : vector<64x8xf32>
    %5 = tpu.matmul %3, %4, %cst_7 {dimension_numbers = #tpu.dot_dimension_numbers<[1], [0], [0], [1], [0, 0, 1, 1], [], []>} : vector<64x128xf32>, vector<128x8xf32>, vector<64x8xf32> -> vector<64x8xf32>
    %6 = arith.addf %2, %5 : vector<64x8xf32>
    %c0_8 = arith.constant 0 : index
    %c0_9 = arith.constant 0 : index
    %7 = vector.load %arg5[%c0_8, %c0_9] : memref<1x8xf32, #tpu.memory_space<vmem>>, vector<1x8xf32>
    %8 = vector.broadcast %7 : vector<1x8xf32> to vector<64x8xf32>
    %9 = arith.addf %6, %8 : vector<64x8xf32>
    %c0_10 = arith.constant 0 : index
    %c0_11 = arith.constant 0 : index
    %10 = vector.load %arg6[%c0_10, %c0_11] : memref<64x8xf32, #tpu.memory_space<vmem>>, vector<64x8xf32>
    tpu.vector_store %arg6[%c0_10, %c0_11], %9 {strides = array<i32>} : memref<64x8xf32, #tpu.memory_space<vmem>>, vector<64x8xf32>,
    return
  }
  func.func @transform_0(%arg0: i32) -> (i32, i32) {
    %c0_i32 = arith.constant 0 : i32
    %c0_i32_0 = arith.constant 0 : i32
    return %arg0, %c0_i32 : i32, i32
  }
  func.func @transform_1(%arg0: i32) -> (i32, i32) {
    %c0_i32 = arith.constant 0 : i32
    %c0_i32_0 = arith.constant 0 : i32
    return %arg0, %c0_i32 : i32, i32
  }
  func.func @transform_2(%arg0: i32) -> (i32, i32) {
    %c0_i32 = arith.constant 0 : i32
    %c0_i32_0 = arith.constant 0 : i32
    %c0_i32_1 = arith.constant 0 : i32
    return %c0_i32, %c0_i32_0 : i32, i32
  }
  func.func @transform_3(%arg0: i32) -> (i32, i32) {
    %c0_i32 = arith.constant 0 : i32
    %c0_i32_0 = arith.constant 0 : i32
    %c0_i32_1 = arith.constant 0 : i32
    return %c0_i32, %c0_i32_0 : i32, i32
  }
  func.func @transform_4(%arg0: i32) -> (i32, i32) {
    %c0_i32 = arith.constant 0 : i32
    %c0_i32_0 = arith.constant 0 : i32
    %c0_i32_1 = arith.constant 0 : i32
    return %c0_i32, %c0_i32_0 : i32, i32
  }
  func.func @transform_5(%arg0: i32) -> (i32, i32) {
    %c0_i32 = arith.constant 0 : i32
    %c0_i32_0 = arith.constant 0 : i32
    return %arg0, %c0_i32 : i32, i32
  }
}

</mosaic_0001>

<bundles_post_ra>
// kernel: rnn_forward.5
= control target key start
LH: loop header
LB: loop body
LE: loop exit
PB: predicated region body
PF: predicated region fallthrough
CT: control target
= control target key end

     0   :  { %vm162_vm0 = vcmask 64512   ;;  %s417_s3 = inlined_call_operand.vmem [shape: f32[128,8], index: 3, kind: input, shape index: {}]   ;;  %s418_s2 = inlined_call_operand.vmem [shape: f32[128,8], index: 2, kind: input, shape index: {}]   ;;  %s419_s1 = inlined_call_operand.vmem [shape: f32[64,128], index: 1, kind: input, shape index: {}]   ;;  %s420_s0 = inlined_call_operand.vmem [shape: f32[64,128], index: 0, kind: input, shape index: {}]   ;;  %s421_s4 = inlined_call_operand.vmem [shape: f32[1,8], index: 4, kind: input, shape index: {}]   ;;  %s422_s5 = inlined_call_operand.vmem [shape: f32[64,8], index: 5, kind: output, shape index: {}]  }
   0x1   :  { %v67_v0 = vld [vmem:[%s417_s3 + $0x78] sm:$0xff]  ;;  %v66_v2 = vld [vmem:[%s417_s3 + $0x70] sm:$0xff]  ;;  %v65_v4 = vld [vmem:[%s417_s3 + $0x68] sm:$0xff] }
   0x2   :  { %v43_v1 = vld [vmem:[%s418_s2 + $0x78] sm:$0xff]  ;;  %175 = vmatpush.msra.mxu2 %v67_v0  ;;  %v42_v3 = vld [vmem:[%s418_s2 + $0x70] sm:$0xff]  ;;  %v41_v5 = vld [vmem:[%s418_s2 + $0x68] sm:$0xff]  ;;  %68 = vmatpush.msra.mxu0 %v67_v0 }
   0x3   :  { %191 = vmatpush.msra.mxu3 %v43_v1  ;;  %109 = vmatpush.msra.mxu1 %v43_v1  ;;  %v64_v6 = vld [vmem:[%s417_s3 + $0x60] sm:$0xff]  ;;  %v63_v8 = vld [vmem:[%s417_s3 + $0x58] sm:$0xff]  ;;  %v62_v10 = vld [vmem:[%s417_s3 + $0x50] sm:$0xff] }
   0x4   :  { %176 = vmatpush.msra.mxu2 %v66_v2  ;;  %v40_v7 = vld [vmem:[%s418_s2 + $0x60] sm:$0xff]  ;;  %69 = vmatpush.msra.mxu0 %v66_v2  ;;  %v39_v9 = vld [vmem:[%s418_s2 + $0x58] sm:$0xff]  ;;  %v38_v11 = vld [vmem:[%s418_s2 + $0x50] sm:$0xff] }
   0x5   :  { %192 = vmatpush.msra.mxu3 %v42_v3  ;;  %110 = vmatpush.msra.mxu1 %v42_v3  ;;  %v61_v12 = vld [vmem:[%s417_s3 + $0x48] sm:$0xff]  ;;  %v60_v14 = vld [vmem:[%s417_s3 + $0x40] sm:$0xff]  ;;  %v59_v16 = vld [vmem:[%s417_s3 + $0x38] sm:$0xff] }
   0x6   :  { %177 = vmatpush.msra.mxu2 %v65_v4  ;;  %70 = vmatpush.msra.mxu0 %v65_v4  ;;  %v37_v13 = vld [vmem:[%s418_s2 + $0x48] sm:$0xff]  ;;  %v36_v15 = vld [vmem:[%s418_s2 + $0x40] sm:$0xff]  ;;  %v35_v17 = vld [vmem:[%s418_s2 + $0x38] sm:$0xff] }
   0x7   :  { %193 = vmatpush.msra.mxu3 %v41_v5  ;;  %111 = vmatpush.msra.mxu1 %v41_v5  ;;  %v58_v18 = vld [vmem:[%s417_s3 + $0x30] sm:$0xff]  ;;  %v57_v20 = vld [vmem:[%s417_s3 + $0x28] sm:$0xff]  ;;  %v56_v22 = vld [vmem:[%s417_s3 + $0x20] sm:$0xff] }
   0x8   :  { %178 = vmatpush.msra.mxu2 %v64_v6  ;;  %71 = vmatpush.msra.mxu0 %v64_v6  ;;  %v34_v19 = vld [vmem:[%s418_s2 + $0x30] sm:$0xff]  ;;  %v33_v21 = vld [vmem:[%s418_s2 + $0x28] sm:$0xff]  ;;  %v32_v23 = vld [vmem:[%s418_s2 + $0x20] sm:$0xff] }
   0x9   :  { %194 = vmatpush.msra.mxu3 %v40_v7  ;;  %112 = vmatpush.msra.mxu1 %v40_v7  ;;  %v55_v24 = vld [vmem:[%s417_s3 + $0x18] sm:$0xff]  ;;  %v54_v26 = vld [vmem:[%s417_s3 + $0x10] sm:$0xff]  ;;  %v53_v28 = vld [vmem:[%s417_s3 + $0x8] sm:$0xff] }
   0xa   :  { %179 = vmatpush.msra.mxu2 %v63_v8  ;;  %72 = vmatpush.msra.mxu0 %v63_v8  ;;  %v31_v25 = vld [vmem:[%s418_s2 + $0x18] sm:$0xff]  ;;  %v30_v27 = vld [vmem:[%s418_s2 + $0x10] sm:$0xff]  ;;  %v29_v29 = vld [vmem:[%s418_s2 + $0x8] sm:$0xff] }
   0xb   :  { %195 = vmatpush.msra.mxu3 %v39_v9  ;;  %113 = vmatpush.msra.mxu1 %v39_v9  ;;  %v52_v30 = vld [vmem:[%s417_s3] sm:$0xff]  ;;  %v49_v36 = vld [vmem:[%s419_s1 + $0x28] sm:$0xff]  ;;  %v50_v40 = vld [vmem:[%s419_s1 + $0x30] sm:$0xff] }
   0xc   :  { %180 = vmatpush.msra.mxu2 %v62_v10  ;;  %73 = vmatpush.msra.mxu0 %v62_v10  ;;  %v28_v31 = vld [vmem:[%s418_s2] sm:$0xff]  ;;  %v25_v37 = vld [vmem:[%s420_s0 + $0x28] sm:$0xff]  ;;  %v26_v41 = vld [vmem:[%s420_s0 + $0x30] sm:$0xff] }
   0xd   :  { %196 = vmatpush.msra.mxu3 %v38_v11  ;;  %114 = vmatpush.msra.mxu1 %v38_v11  ;;  %v48_v32 = vld [vmem:[%s419_s1 + $0x20] sm:$0xff]  ;;  %v45_v38 = vld [vmem:[%s419_s1 + $0x8] sm:$0xff]  ;;  %v46_v42 = vld [vmem:[%s419_s1 + $0x10] sm:$0xff] }
   0xe   :  { %181 = vmatpush.msra.mxu2 %v61_v12  ;;  %74 = vmatpush.msra.mxu0 %v61_v12  ;;  %v24_v33 = vld [vmem:[%s420_s0 + $0x20] sm:$0xff]  ;;  %v21_v39 = vld [vmem:[%s420_s0 + $0x8] sm:$0xff]  ;;  %v22_v43 = vld [vmem:[%s420_s0 + $0x10] sm:$0xff] }
   0xf   :  { %197 = vmatpush.msra.mxu3 %v37_v13  ;;  %115 = vmatpush.msra.mxu1 %v37_v13  ;;  %v44_v34 = vld [vmem:[%s419_s1] sm:$0xff]  ;;  %v51_v44 = vld [vmem:[%s419_s1 + $0x38] sm:$0xff] }
  0x10   :  { %182 = vmatpush.msra.mxu2 %v60_v14  ;;  %75 = vmatpush.msra.mxu0 %v60_v14  ;;  %v20_v35 = vld [vmem:[%s420_s0] sm:$0xff]  ;;  %v27_v45 = vld [vmem:[%s420_s0 + $0x38] sm:$0xff] }
  0x11   :  { %198 = vmatpush.msra.mxu3 %v36_v15  ;;  %116 = vmatpush.msra.mxu1 %v36_v15  ;;  %v47_v46 = vld [vmem:[%s419_s1 + $0x18] sm:$0xff]  ;;  %v207_v48 = vld [vmem:[%s421_s4] ss:$0 sm:$0xff] }
  0x12   :  { %183 = vmatpush.msra.mxu2 %v59_v16  ;;  %76 = vmatpush.msra.mxu0 %v59_v16  ;;  %v23_v47 = vld [vmem:[%s420_s0 + $0x18] sm:$0xff] }
  0x13   :  { %199 = vmatpush.msra.mxu3 %v35_v17  ;;  %117 = vmatpush.msra.mxu1 %v35_v17 }
  0x14   :  { %184 = vmatpush.msra.mxu2 %v58_v18  ;;  %77 = vmatpush.msra.mxu0 %v58_v18 }
  0x15   :  { %200 = vmatpush.msra.mxu3 %v34_v19  ;;  %118 = vmatpush.msra.mxu1 %v34_v19 }
  0x16   :  { %185 = vmatpush.msra.mxu2 %v57_v20  ;;  %78 = vmatpush.msra.mxu0 %v57_v20 }
  0x17   :  { %201 = vmatpush.msra.mxu3 %v33_v21  ;;  %119 = vmatpush.msra.mxu1 %v33_v21 }
  0x18   :  { %186 = vmatpush.msra.mxu2 %v56_v22  ;;  %79 = vmatpush.msra.mxu0 %v56_v22 }
  0x19   :  { %202 = vmatpush.msra.mxu3 %v32_v23  ;;  %120 = vmatpush.msra.mxu1 %v32_v23 }
  0x1a   :  { %187 = vmatpush.msra.mxu2 %v55_v24  ;;  %80 = vmatpush.msra.mxu0 %v55_v24 }
  0x1b   :  { %203 = vmatpush.msra.mxu3 %v31_v25  ;;  %121 = vmatpush.msra.mxu1 %v31_v25 }
  0x1c   :  { %188 = vmatpush.msra.mxu2 %v54_v26  ;;  %81 = vmatpush.msra.mxu0 %v54_v26 }
  0x1d   :  { %204 = vmatpush.msra.mxu3 %v30_v27  ;;  %122 = vmatpush.msra.mxu1 %v30_v27 }
  0x1e   :  { %189 = vmatpush.msra.mxu2 %v53_v28  ;;  %82 = vmatpush.msra.mxu0 %v53_v28 }
  0x1f   :  { %205 = vmatpush.msra.mxu3 %v29_v29  ;;  %123 = vmatpush.msra.mxu1 %v29_v29 }
  0x20   :  { %190 = vmatpush.msra.mxu2 %v52_v30  ;;  %83 = vmatpush.msra.mxu0 %v52_v30 }
  0x21   :  { %206 = vmatpush.msra.mxu3 %v28_v31  ;;  %96 = vmatmul.f32.vlgmr.msra.gmra.mxu2 %v48_v32 }
  0x22   :  { %137 = vmatmul.f32.vlgmr.msra.gmra.mxu3 %v24_v33  ;;  %124 = vmatpush.msra.mxu1 %v28_v31 }
  0x23   :  { %84 = vmatmul.f32.vlgmr.msra.gmra.mxu0 %v44_v34  ;;  %125 = vmatmul.f32.vlgmr.msra.gmra.mxu1 %v20_v35 }
  0x29   :  { %99 = vmatmul.f32.gmra.mxu2 %v49_v36 }
  0x2a   :  { %140 = vmatmul.f32.gmra.mxu3 %v25_v37 }
  0x2b   :  { %87 = vmatmul.f32.gmra.mxu0 %v45_v38  ;;  %128 = vmatmul.f32.gmra.mxu1 %v21_v39 }
  0x31   :  { %102 = vmatmul.f32.gmra.mxu2 %v50_v40 }
  0x32   :  { %143 = vmatmul.f32.gmra.mxu3 %v26_v41 }
  0x33   :  { %90 = vmatmul.f32.gmra.mxu0 %v46_v42  ;;  %131 = vmatmul.f32.gmra.mxu1 %v22_v43 }
  0x39   :  { %105 = vmatmul.f32.gmra.mxu2 %v51_v44 }
  0x3a   :  { %146 = vmatmul.f32.gmra.mxu3 %v27_v45 }
  0x3b   :  { %93 = vmatmul.f32.gmra.mxu0 %v47_v46  ;;  %134 = vmatmul.f32.gmra.mxu1 %v23_v47 }
  0xa0   :  { %v85_v49 = vpop.f32.mrf.mxu0  ;;  %v126_v50 = vpop.f32.mrf.mxu1 }
  0xa1   :  { %v127_v51 = vadd.f32 %v126_v50, %v85_v49 }
  0xa3   :  { %v154_v52 = vadd.f32 %v207_v48, %v127_v51 }
  0xa4   :  { %v97_v53 = vpop.f32.mrf.mxu2 }
  0xa5   :  { %v138_v54 = vpop.f32.mrf.mxu3  ;;  %163 = vst.msk [vmem:[%s422_s5] sm:$0xff] %vm162_vm0, %v154_v52 }
  0xa6   :  { %v139_v55 = vadd.f32 %v138_v54, %v97_v53 }
  0xa8   :  { %v158_v56 = vadd.f32 %v207_v48, %v139_v55  ;;  %v88_v57 = vpop.f32.mrf.mxu0  ;;  %v129_v58 = vpop.f32.mrf.mxu1 }
  0xa9   :  { %v130_v59 = vadd.f32 %v129_v58, %v88_v57 }
  0xaa   :  { %167 = vst.msk [vmem:[%s422_s5 + $0x20] sm:$0xff] %vm162_vm0, %v158_v56 }
  0xab   :  { %v155_v60 = vadd.f32 %v207_v48, %v130_v59 }
  0xac   :  { %v100_v61 = vpop.f32.mrf.mxu2 }
  0xad   :  { %v141_v62 = vpop.f32.mrf.mxu3  ;;  %164 = vst.msk [vmem:[%s422_s5 + $0x8] sm:$0xff] %vm162_vm0, %v155_v60 }
  0xae   :  { %v142_v63 = vadd.f32 %v141_v62, %v100_v61 }
  0xb0   :  { %v159_v0 = vadd.f32 %v207_v48, %v142_v63  ;;  %v91_v1 = vpop.f32.mrf.mxu0  ;;  %v132_v2 = vpop.f32.mrf.mxu1 }
  0xb1   :  { %v133_v3 = vadd.f32 %v132_v2, %v91_v1 }
  0xb2   :  { %168 = vst.msk [vmem:[%s422_s5 + $0x28] sm:$0xff] %vm162_vm0, %v159_v0 }
  0xb3   :  { %v156_v4 = vadd.f32 %v207_v48, %v133_v3 }
  0xb4   :  { %v103_v5 = vpop.f32.mrf.mxu2 }
  0xb5   :  { %v144_v6 = vpop.f32.mrf.mxu3  ;;  %165 = vst.msk [vmem:[%s422_s5 + $0x10] sm:$0xff] %vm162_vm0, %v156_v4 }
  0xb6   :  { %v145_v7 = vadd.f32 %v144_v6, %v103_v5 }
  0xb8   :  { %v160_v8 = vadd.f32 %v207_v48, %v145_v7  ;;  %v94_v9 = vpop.f32.mrf.mxu0  ;;  %v135_v10 = vpop.f32.mrf.mxu1 }
  0xb9   :  { %v136_v11 = vadd.f32 %v135_v10, %v94_v9 }
  0xba   :  { %169 = vst.msk [vmem:[%s422_s5 + $0x30] sm:$0xff] %vm162_vm0, %v160_v8 }
  0xbb   :  { %v157_v12 = vadd.f32 %v207_v48, %v136_v11 }
  0xbc   :  { %v106_v13 = vpop.f32.mrf.mxu2 }
  0xbd   :  { %v147_v14 = vpop.f32.mrf.mxu3  ;;  %166 = vst.msk [vmem:[%s422_s5 + $0x18] sm:$0xff] %vm162_vm0, %v157_v12 }
  0xbe   :  { %v148_v15 = vadd.f32 %v147_v14, %v106_v13 }
  0xc0   :  { %v161_v16 = vadd.f32 %v207_v48, %v148_v15 }
  0xc2   :  { %170 = vst.msk [vmem:[%s422_s5 + $0x38] sm:$0xff] %vm162_vm0, %v161_v16 }

// kernel: rnn_forward.3
= control target key start
LH: loop header
LB: loop body
LE: loop exit
PB: predicated region body
PF: predicated region fallthrough
CT: control target
= control target key end

     0   :  { %12 = vsyncpa [#allocation3], 0  ;;  %s601_s24 = smov [#allocation2]   ;;  %s602_s26 = smov 512   ;;  %s1042_s0 = inlined_call_operand.vmem [shape: f32[64,16], index: 0, kind: input, shape index: {}]   ;;  %s1043_s1 = inlined_call_operand.vmem [shape: f32[16,512], index: 1, kind: input, shape index: {}]   ;;  %s1044_s2 = inlined_call_operand.hbm [shape: f32[16,512], index: 2, kind: input, shape index: {}]   ;;  %s1045_s3 = inlined_call_operand.vmem [shape: f32[1,512], index: 3, kind: input, shape index: {}]   ;;  %s1046_s4 = inlined_call_operand.vmem [shape: f32[1,512], index: 4, kind: input, shape index: {}]   ;;  %s1047_s5 = inlined_call_operand.vmem [shape: f32[64,512], index: 5, kind: output, shape index: {0}]   ;;  %s1048_s6 = inlined_call_operand.vmem [shape: f32[64,512], index: 6, kind: output, shape index: {1}]  }
   0x1   :  { %s21_s23 = sshll.u32 %s1044_s2, 4  ;;  %s23_s25 = sshll.u32 %s601_s24, 4  ;;  %s22_s23 = int_to_ptr.hbm [resolvable:$true] %s21_s23  ;;  %s24_s25 = int_to_ptr.vmem [resolvable:$true] %s23_s25 }
   0x2   :  { %s603_s27 = smov 32  }
   0x3   :  { %29 = dma.hbm_to_vmem [thread:$0]  %s22_s23, 1024, %s24_s25, [#allocation3], %s602_s26, %s602_s26, %s603_s27  }
   0x4   :  { %599 = dma.done.wait [#allocation3], 1024  }
   0x5   :  { %600 = vsyncadd [#allocation3], 4294966272  ;;  %v52_v0 = vld [vmem:[%s1043_s1 + $0x30] sm:$0xff]  ;;  %v53_v1 = vld [vmem:[%s1043_s1 + $0x38] sm:$0xff]  ;;  %vm64_vm0 = vcmask 130048  }
   0x6   :  { %v48_v2 = vld [vmem:[%s1043_s1 + $0x10] sm:$0xff]  ;;  %185 = vmatpush.msra.mxu2 %v52_v0  ;;  %226 = vmatpush.msra.mxu3 %v53_v1  ;;  %v49_v3 = vld [vmem:[%s1043_s1 + $0x18] sm:$0xff]  ;;  %v657_v4 = vld [vmem:[%s1042_s0] sm:$0xff] }
   0x7   :  { %v291_v5 = vld [vmem:[#allocation2 + $0x30] sm:$0xff]  ;;  %v292_v6 = vld [vmem:[#allocation2 + $0x38] sm:$0xff]  ;;  %v50_v7 = vld [vmem:[%s1043_s1 + $0x20] sm:$0xff] }
   0x8   :  { %186 = vmatpush.msra.mxu2 %v48_v2  ;;  %227 = vmatpush.msra.mxu3 %v49_v3  ;;  %v51_v8 = vld [vmem:[%s1043_s1 + $0x28] sm:$0xff]  ;;  %v46_v9 = vld [vmem:[%s1043_s1] sm:$0xff]  ;;  %v287_v11 = vld [vmem:[#allocation2 + $0x10] sm:$0xff] }
   0x9   :  { %524 = vmatmul.msk.f32.vlgmr.msra.gmra.mxu2 %vm64_vm0, %v657_v4  ;;  %532 = vmatmul.msk.f32.vlgmr.msra.gmra.mxu3 %vm64_vm0, %v657_v4  ;;  %v47_v10 = vld [vmem:[%s1043_s1 + $0x8] sm:$0xff]  ;;  %v288_v12 = vld [vmem:[#allocation2 + $0x18] sm:$0xff]  ;;  %v289_v13 = vld [vmem:[#allocation2 + $0x20] sm:$0xff] }
   0xa   :  { %399 = vmatpush.msrb.mxu2 %v291_v5  ;;  %440 = vmatpush.msrb.mxu3 %v292_v6  ;;  %v290_v14 = vld [vmem:[#allocation2 + $0x28] sm:$0xff]  ;;  %v285_v16 = vld [vmem:[#allocation2] sm:$0xff]  ;;  %v40_v18 = vld [vmem:[%s1042_s0 + $0x10] sm:$0xff] }
   0xb   :  { %103 = vmatpush.msra.mxu0 %v50_v7  ;;  %144 = vmatpush.msra.mxu1 %v51_v8  ;;  %v39_v15 = vld [vmem:[%s1042_s0 + $0x8] sm:$0xff]  ;;  %v41_v19 = vld [vmem:[%s1042_s0 + $0x18] sm:$0xff]  ;;  %v42_v20 = vld [vmem:[%s1042_s0 + $0x20] sm:$0xff] }
   0xc   :  { %400 = vmatpush.msrb.mxu2 %v287_v11  ;;  %441 = vmatpush.msrb.mxu3 %v288_v12  ;;  %v286_v17 = vld [vmem:[#allocation2 + $0x8] sm:$0xff]  ;;  %v44_v22 = vld [vmem:[%s1042_s0 + $0x30] sm:$0xff]  ;;  %v45_v23 = vld [vmem:[%s1042_s0 + $0x38] sm:$0xff] }
   0xd   :  { %104 = vmatpush.msra.mxu0 %v46_v9  ;;  %145 = vmatpush.msra.mxu1 %v47_v10  ;;  %v43_v21 = vld [vmem:[%s1042_s0 + $0x28] sm:$0xff]  ;;  %v54_v24 = vld [vmem:[%s1045_s3] sm:$0xf] }
   0xe   :  { %508 = vmatmul.msk.f32.vlgmr.msra.gmra.mxu0 %vm64_vm0, %v657_v4  ;;  %516 = vmatmul.msk.f32.vlgmr.msra.gmra.mxu1 %vm64_vm0, %v657_v4  ;;  %v767_v25 = vperm.slane %v54_v24, 0  ;;  %v769_v26 = vperm.slane %v54_v24, 1  ;;  %v771_v27 = vperm.slane %v54_v24, 2  ;;  %v773_v28 = vperm.slane %v54_v24, 3 }
   0xf   :  { %317 = vmatpush.msrb.mxu0 %v289_v13  ;;  %358 = vmatpush.msrb.mxu1 %v290_v14 }
  0x11   :  { %525 = vmatmul.msk.f32.gmra.mxu2 %vm64_vm0, %v39_v15  ;;  %533 = vmatmul.msk.f32.gmra.mxu3 %vm64_vm0, %v39_v15 }
  0x12   :  { %318 = vmatpush.msrb.mxu0 %v285_v16  ;;  %359 = vmatpush.msrb.mxu1 %v286_v17 }
  0x16   :  { %509 = vmatmul.msk.f32.gmra.mxu0 %vm64_vm0, %v39_v15  ;;  %517 = vmatmul.msk.f32.gmra.mxu1 %vm64_vm0, %v39_v15 }
  0x19   :  { %526 = vmatmul.msk.f32.gmra.mxu2 %vm64_vm0, %v40_v18  ;;  %534 = vmatmul.msk.f32.gmra.mxu3 %vm64_vm0, %v40_v18 }
  0x1e   :  { %510 = vmatmul.msk.f32.gmra.mxu0 %vm64_vm0, %v40_v18  ;;  %518 = vmatmul.msk.f32.gmra.mxu1 %vm64_vm0, %v40_v18 }
  0x21   :  { %527 = vmatmul.msk.f32.gmra.mxu2 %vm64_vm0, %v41_v19  ;;  %535 = vmatmul.msk.f32.gmra.mxu3 %vm64_vm0, %v41_v19 }
  0x26   :  { %511 = vmatmul.msk.f32.gmra.mxu0 %vm64_vm0, %v41_v19  ;;  %519 = vmatmul.msk.f32.gmra.mxu1 %vm64_vm0, %v41_v19 }
  0x29   :  { %528 = vmatmul.msk.f32.gmra.mxu2 %vm64_vm0, %v42_v20  ;;  %536 = vmatmul.msk.f32.gmra.mxu3 %vm64_vm0, %v42_v20 }
  0x2e   :  { %512 = vmatmul.msk.f32.gmra.mxu0 %vm64_vm0, %v42_v20  ;;  %520 = vmatmul.msk.f32.gmra.mxu1 %vm64_vm0, %v42_v20 }
  0x31   :  { %529 = vmatmul.msk.f32.gmra.mxu2 %vm64_vm0, %v43_v21  ;;  %537 = vmatmul.msk.f32.gmra.mxu3 %vm64_vm0, %v43_v21 }
  0x36   :  { %513 = vmatmul.msk.f32.gmra.mxu0 %vm64_vm0, %v43_v21  ;;  %521 = vmatmul.msk.f32.gmra.mxu1 %vm64_vm0, %v43_v21 }
  0x39   :  { %530 = vmatmul.msk.f32.gmra.mxu2 %vm64_vm0, %v44_v22  ;;  %538 = vmatmul.msk.f32.gmra.mxu3 %vm64_vm0, %v44_v22 }
  0x3e   :  { %514 = vmatmul.msk.f32.gmra.mxu0 %vm64_vm0, %v44_v22  ;;  %522 = vmatmul.msk.f32.gmra.mxu1 %vm64_vm0, %v44_v22 }
  0x41   :  { %531 = vmatmul.msk.f32.gmra.mxu2 %vm64_vm0, %v45_v23  ;;  %539 = vmatmul.msk.f32.gmra.mxu3 %vm64_vm0, %v45_v23 }
  0x46   :  { %515 = vmatmul.msk.f32.gmra.mxu0 %vm64_vm0, %v45_v23  ;;  %523 = vmatmul.msk.f32.gmra.mxu1 %vm64_vm0, %v45_v23 }
  0x49   :  { %556 = vmatmul.msk.f32.vlgmr.msrb.gmra.mxu2 %vm64_vm0, %v657_v4  ;;  %564 = vmatmul.msk.f32.vlgmr.msrb.gmra.mxu3 %vm64_vm0, %v657_v4 }
  0x4e   :  { %540 = vmatmul.msk.f32.vlgmr.msrb.gmra.mxu0 %vm64_vm0, %v657_v4  ;;  %548 = vmatmul.msk.f32.vlgmr.msrb.gmra.mxu1 %vm64_vm0, %v657_v4 }
  0x51   :  { %557 = vmatmul.msk.f32.gmra.mxu2 %vm64_vm0, %v39_v15  ;;  %565 = vmatmul.msk.f32.gmra.mxu3 %vm64_vm0, %v39_v15 }
  0x56   :  { %541 = vmatmul.msk.f32.gmra.mxu0 %vm64_vm0, %v39_v15  ;;  %549 = vmatmul.msk.f32.gmra.mxu1 %vm64_vm0, %v39_v15 }
  0x59   :  { %558 = vmatmul.msk.f32.gmra.mxu2 %vm64_vm0, %v40_v18  ;;  %566 = vmatmul.msk.f32.gmra.mxu3 %vm64_vm0, %v40_v18 }
  0x5e   :  { %542 = vmatmul.msk.f32.gmra.mxu0 %vm64_vm0, %v40_v18  ;;  %550 = vmatmul.msk.f32.gmra.mxu1 %vm64_vm0, %v40_v18 }
  0x61   :  { %559 = vmatmul.msk.f32.gmra.mxu2 %vm64_vm0, %v41_v19  ;;  %567 = vmatmul.msk.f32.gmra.mxu3 %vm64_vm0, %v41_v19 }
  0x66   :  { %543 = vmatmul.msk.f32.gmra.mxu0 %vm64_vm0, %v41_v19  ;;  %551 = vmatmul.msk.f32.gmra.mxu1 %vm64_vm0, %v41_v19 }
  0x69   :  { %560 = vmatmul.msk.f32.gmra.mxu2 %vm64_vm0, %v42_v20  ;;  %568 = vmatmul.msk.f32.gmra.mxu3 %vm64_vm0, %v42_v20 }
  0x6e   :  { %544 = vmatmul.msk.f32.gmra.mxu0 %vm64_vm0, %v42_v20  ;;  %552 = vmatmul.msk.f32.gmra.mxu1 %vm64_vm0, %v42_v20 }
  0x71   :  { %561 = vmatmul.msk.f32.gmra.mxu2 %vm64_vm0, %v43_v21  ;;  %569 = vmatmul.msk.f32.gmra.mxu3 %vm64_vm0, %v43_v21 }
  0x76   :  { %545 = vmatmul.msk.f32.gmra.mxu0 %vm64_vm0, %v43_v21  ;;  %553 = vmatmul.msk.f32.gmra.mxu1 %vm64_vm0, %v43_v21 }
  0x79   :  { %562 = vmatmul.msk.f32.gmra.mxu2 %vm64_vm0, %v44_v22  ;;  %570 = vmatmul.msk.f32.gmra.mxu3 %vm64_vm0, %v44_v22 }
  0x7e   :  { %546 = vmatmul.msk.f32.gmra.mxu0 %vm64_vm0, %v44_v22  ;;  %554 = vmatmul.msk.f32.gmra.mxu1 %vm64_vm0, %v44_v22 }
  0x81   :  { %563 = vmatmul.msk.f32.gmra.mxu2 %vm64_vm0, %v45_v23  ;;  %571 = vmatmul.msk.f32.gmra.mxu3 %vm64_vm0, %v45_v23 }
  0x86   :  { %547 = vmatmul.msk.f32.gmra.mxu0 %vm64_vm0, %v45_v23  ;;  %555 = vmatmul.msk.f32.gmra.mxu1 %vm64_vm0, %v45_v23 }
  0x8b   :  { %v106_v29 = vpop.f32.mrf.mxu0  ;;  %v147_v30 = vpop.f32.mrf.mxu1 }
  0x8c   :  { %v107_v31 = vadd.f32 %v106_v29, %v767_v25  ;;  %v148_v32 = vadd.f32 %v147_v30, %v769_v26  ;;  %v188_v33 = vpop.f32.mrf.mxu2  ;;  %v229_v34 = vpop.f32.mrf.mxu3 }
  0x8d   :  { %v189_v35 = vadd.f32 %v188_v33, %v771_v27  ;;  %v230_v36 = vadd.f32 %v229_v34, %v773_v28  ;;  %v293_v33 = vld [vmem:[%s1046_s4] sm:$0xf] }
  0x8e   :  { %253 = vst [vmem:[%s1047_s5] sm:$0xff] %v107_v31 }
  0x8f   :  { %254 = vst [vmem:[%s1047_s5 + $0x8] sm:$0xff] %v148_v32 }
  0x90   :  { %255 = vst [vmem:[%s1047_s5 + $0x10] sm:$0xff] %v189_v35 }
  0x91   :  { %256 = vst [vmem:[%s1047_s5 + $0x18] sm:$0xff] %v230_v36 }
  0x93   :  { %v109_v37 = vpop.f32.mrf.mxu0  ;;  %v150_v38 = vpop.f32.mrf.mxu1 }
  0x94   :  { %v110_v39 = vadd.f32 %v109_v37, %v767_v25  ;;  %v151_v40 = vadd.f32 %v150_v38, %v769_v26  ;;  %v191_v41 = vpop.f32.mrf.mxu2  ;;  %v232_v42 = vpop.f32.mrf.mxu3 }
  0x95   :  { %v192_v43 = vadd.f32 %v191_v41, %v771_v27  ;;  %v233_v44 = vadd.f32 %v232_v42, %v773_v28 }
  0x96   :  { %257 = vst [vmem:[%s1047_s5 + $0x20] sm:$0xff] %v110_v39 }
  0x97   :  { %258 = vst [vmem:[%s1047_s5 + $0x28] sm:$0xff] %v151_v40 }
  0x98   :  { %259 = vst [vmem:[%s1047_s5 + $0x30] sm:$0xff] %v192_v43 }
  0x99   :  { %260 = vst [vmem:[%s1047_s5 + $0x38] sm:$0xff] %v233_v44 }
  0x9b   :  { %v112_v45 = vpop.f32.mrf.mxu0  ;;  %v153_v46 = vpop.f32.mrf.mxu1 }
  0x9c   :  { %v113_v47 = vadd.f32 %v112_v45, %v767_v25  ;;  %v154_v48 = vadd.f32 %v153_v46, %v769_v26  ;;  %v194_v49 = vpop.f32.mrf.mxu2  ;;  %v235_v50 = vpop.f32.mrf.mxu3 }
  0x9d   :  { %v195_v51 = vadd.f32 %v194_v49, %v771_v27  ;;  %v236_v52 = vadd.f32 %v235_v50, %v773_v28 }
  0x9e   :  { %261 = vst [vmem:[%s1047_s5 + $0x40] sm:$0xff] %v113_v47 }
  0x9f   :  { %262 = vst [vmem:[%s1047_s5 + $0x48] sm:$0xff] %v154_v48 }
  0xa0   :  { %263 = vst [vmem:[%s1047_s5 + $0x50] sm:$0xff] %v195_v51 }
  0xa1   :  { %264 = vst [vmem:[%s1047_s5 + $0x58] sm:$0xff] %v236_v52 }
  0xa3   :  { %v115_v53 = vpop.f32.mrf.mxu0  ;;  %v156_v54 = vpop.f32.mrf.mxu1 }
  0xa4   :  { %v116_v55 = vadd.f32 %v115_v53, %v767_v25  ;;  %v157_v56 = vadd.f32 %v156_v54, %v769_v26  ;;  %v197_v57 = vpop.f32.mrf.mxu2  ;;  %v238_v58 = vpop.f32.mrf.mxu3 }
  0xa5   :  { %v198_v59 = vadd.f32 %v197_v57, %v771_v27  ;;  %v239_v60 = vadd.f32 %v238_v58, %v773_v28 }
  0xa6   :  { %265 = vst [vmem:[%s1047_s5 + $0x60] sm:$0xff] %v116_v55 }
  0xa7   :  { %266 = vst [vmem:[%s1047_s5 + $0x68] sm:$0xff] %v157_v56 }
  0xa8   :  { %267 = vst [vmem:[%s1047_s5 + $0x70] sm:$0xff] %v198_v59 }
  0xa9   :  { %268 = vst [vmem:[%s1047_s5 + $0x78] sm:$0xff] %v239_v60 }
  0xab   :  { %v118_v61 = vpop.f32.mrf.mxu0  ;;  %v159_v62 = vpop.f32.mrf.mxu1 }
  0xac   :  { %v119_v63 = vadd.f32 %v118_v61, %v767_v25  ;;  %v160_v0 = vadd.f32 %v159_v62, %v769_v26  ;;  %v200_v1 = vpop.f32.mrf.mxu2  ;;  %v241_v2 = vpop.f32.mrf.mxu3 }
  0xad   :  { %v201_v3 = vadd.f32 %v200_v1, %v771_v27  ;;  %v242_v4 = vadd.f32 %v241_v2, %v773_v28 }
  0xae   :  { %269 = vst [vmem:[%s1047_s5 + $0x80] sm:$0xff] %v119_v63 }
  0xaf   :  { %270 = vst [vmem:[%s1047_s5 + $0x88] sm:$0xff] %v160_v0 }
  0xb0   :  { %271 = vst [vmem:[%s1047_s5 + $0x90] sm:$0xff] %v201_v3 }
  0xb1   :  { %272 = vst [vmem:[%s1047_s5 + $0x98] sm:$0xff] %v242_v4 }
  0xb3   :  { %v121_v5 = vpop.f32.mrf.mxu0  ;;  %v162_v6 = vpop.f32.mrf.mxu1 }
  0xb4   :  { %v122_v7 = vadd.f32 %v121_v5, %v767_v25  ;;  %v163_v8 = vadd.f32 %v162_v6, %v769_v26  ;;  %v203_v9 = vpop.f32.mrf.mxu2  ;;  %v244_v10 = vpop.f32.mrf.mxu3 }
  0xb5   :  { %v204_v11 = vadd.f32 %v203_v9, %v771_v27  ;;  %v245_v12 = vadd.f32 %v244_v10, %v773_v28 }
  0xb6   :  { %273 = vst [vmem:[%s1047_s5 + $0xa0] sm:$0xff] %v122_v7 }
  0xb7   :  { %274 = vst [vmem:[%s1047_s5 + $0xa8] sm:$0xff] %v163_v8 }
  0xb8   :  { %275 = vst [vmem:[%s1047_s5 + $0xb0] sm:$0xff] %v204_v11 }
  0xb9   :  { %276 = vst [vmem:[%s1047_s5 + $0xb8] sm:$0xff] %v245_v12 }
  0xbb   :  { %v124_v13 = vpop.f32.mrf.mxu0  ;;  %v165_v14 = vpop.f32.mrf.mxu1 }
  0xbc   :  { %v125_v15 = vadd.f32 %v124_v13, %v767_v25  ;;  %v166_v16 = vadd.f32 %v165_v14, %v769_v26  ;;  %v206_v17 = vpop.f32.mrf.mxu2  ;;  %v247_v18 = vpop.f32.mrf.mxu3 }
  0xbd   :  { %v207_v19 = vadd.f32 %v206_v17, %v771_v27  ;;  %v248_v20 = vadd.f32 %v247_v18, %v773_v28 }
  0xbe   :  { %277 = vst [vmem:[%s1047_s5 + $0xc0] sm:$0xff] %v125_v15 }
  0xbf   :  { %278 = vst [vmem:[%s1047_s5 + $0xc8] sm:$0xff] %v166_v16 }
  0xc0   :  { %279 = vst [vmem:[%s1047_s5 + $0xd0] sm:$0xff] %v207_v19 }
  0xc1   :  { %280 = vst [vmem:[%s1047_s5 + $0xd8] sm:$0xff] %v248_v20 }
  0xc3   :  { %v127_v21 = vpop.f32.mrf.mxu0  ;;  %v168_v22 = vpop.f32.mrf.mxu1 }
  0xc4   :  { %v128_v23 = vadd.f32 %v127_v21, %v767_v25  ;;  %v169_v24 = vadd.f32 %v168_v22, %v769_v26  ;;  %v209_v29 = vpop.f32.mrf.mxu2  ;;  %v250_v30 = vpop.f32.mrf.mxu3  ;;  %v903_v25 = vperm.slane %v293_v33, 0  ;;  %v905_v26 = vperm.slane %v293_v33, 1 }
  0xc5   :  { %v210_v31 = vadd.f32 %v209_v29, %v771_v27  ;;  %v251_v32 = vadd.f32 %v250_v30, %v773_v28  ;;  %v910_v27 = vperm.slane %v293_v33, 2  ;;  %v912_v28 = vperm.slane %v293_v33, 3 }
  0xc6   :  { %281 = vst [vmem:[%s1047_s5 + $0xe0] sm:$0xff] %v128_v23 }
  0xc7   :  { %282 = vst [vmem:[%s1047_s5 + $0xe8] sm:$0xff] %v169_v24 }
  0xc8   :  { %283 = vst [vmem:[%s1047_s5 + $0xf0] sm:$0xff] %v210_v31 }
  0xc9   :  { %284 = vst [vmem:[%s1047_s5 + $0xf8] sm:$0xff] %v251_v32 }
  0xcb   :  { %v320_v34 = vpop.f32.mrf.mxu0  ;;  %v361_v35 = vpop.f32.mrf.mxu1 }
  0xcc   :  { %v321_v36 = vadd.f32 %v320_v34, %v903_v25  ;;  %v362_v37 = vadd.f32 %v361_v35, %v905_v26  ;;  %v402_v38 = vpop.f32.mrf.mxu2  ;;  %v443_v39 = vpop.f32.mrf.mxu3 }
  0xcd   :  { %v403_v40 = vadd.f32 %v402_v38, %v910_v27  ;;  %v444_v41 = vadd.f32 %v443_v39, %v912_v28 }
  0xce   :  { %467 = vst [vmem:[%s1048_s6] sm:$0xff] %v321_v36 }
  0xcf   :  { %468 = vst [vmem:[%s1048_s6 + $0x8] sm:$0xff] %v362_v37 }
  0xd0   :  { %469 = vst [vmem:[%s1048_s6 + $0x10] sm:$0xff] %v403_v40 }
  0xd1   :  { %470 = vst [vmem:[%s1048_s6 + $0x18] sm:$0xff] %v444_v41 }
  0xd3   :  { %v323_v42 = vpop.f32.mrf.mxu0  ;;  %v364_v43 = vpop.f32.mrf.mxu1 }
  0xd4   :  { %v324_v44 = vadd.f32 %v323_v42, %v903_v25  ;;  %v365_v45 = vadd.f32 %v364_v43, %v905_v26  ;;  %v405_v46 = vpop.f32.mrf.mxu2  ;;  %v446_v47 = vpop.f32.mrf.mxu3 }
  0xd5   :  { %v406_v48 = vadd.f32 %v405_v46, %v910_v27  ;;  %v447_v49 = vadd.f32 %v446_v47, %v912_v28 }
  0xd6   :  { %471 = vst [vmem:[%s1048_s6 + $0x20] sm:$0xff] %v324_v44 }
  0xd7   :  { %472 = vst [vmem:[%s1048_s6 + $0x28] sm:$0xff] %v365_v45 }
  0xd8   :  { %473 = vst [vmem:[%s1048_s6 + $0x30] sm:$0xff] %v406_v48 }
  0xd9   :  { %474 = vst [vmem:[%s1048_s6 + $0x38] sm:$0xff] %v447_v49 }
  0xdb   :  { %v326_v50 = vpop.f32.mrf.mxu0  ;;  %v367_v51 = vpop.f32.mrf.mxu1 }
  0xdc   :  { %v327_v52 = vadd.f32 %v326_v50, %v903_v25  ;;  %v368_v53 = vadd.f32 %v367_v51, %v905_v26  ;;  %v408_v54 = vpop.f32.mrf.mxu2  ;;  %v449_v55 = vpop.f32.mrf.mxu3 }
  0xdd   :  { %v409_v56 = vadd.f32 %v408_v54, %v910_v27  ;;  %v450_v57 = vadd.f32 %v449_v55, %v912_v28 }
  0xde   :  { %475 = vst [vmem:[%s1048_s6 + $0x40] sm:$0xff] %v327_v52 }
  0xdf   :  { %476 = vst [vmem:[%s1048_s6 + $0x48] sm:$0xff] %v368_v53 }
  0xe0   :  { %477 = vst [vmem:[%s1048_s6 + $0x50] sm:$0xff] %v409_v56 }
  0xe1   :  { %478 = vst [vmem:[%s1048_s6 + $0x58] sm:$0xff] %v450_v57 }
  0xe3   :  { %v329_v58 = vpop.f32.mrf.mxu0  ;;  %v370_v59 = vpop.f32.mrf.mxu1 }
  0xe4   :  { %v330_v60 = vadd.f32 %v329_v58, %v903_v25  ;;  %v371_v61 = vadd.f32 %v370_v59, %v905_v26  ;;  %v411_v62 = vpop.f32.mrf.mxu2  ;;  %v452_v63 = vpop.f32.mrf.mxu3 }
  0xe5   :  { %v412_v0 = vadd.f32 %v411_v62, %v910_v27  ;;  %v453_v1 = vadd.f32 %v452_v63, %v912_v28 }
  0xe6   :  { %479 = vst [vmem:[%s1048_s6 + $0x60] sm:$0xff] %v330_v60 }
  0xe7   :  { %480 = vst [vmem:[%s1048_s6 + $0x68] sm:$0xff] %v371_v61 }
  0xe8   :  { %481 = vst [vmem:[%s1048_s6 + $0x70] sm:$0xff] %v412_v0 }
  0xe9   :  { %482 = vst [vmem:[%s1048_s6 + $0x78] sm:$0xff] %v453_v1 }
  0xeb   :  { %v332_v2 = vpop.f32.mrf.mxu0  ;;  %v373_v3 = vpop.f32.mrf.mxu1 }
  0xec   :  { %v333_v4 = vadd.f32 %v332_v2, %v903_v25  ;;  %v374_v5 = vadd.f32 %v373_v3, %v905_v26  ;;  %v414_v6 = vpop.f32.mrf.mxu2  ;;  %v455_v7 = vpop.f32.mrf.mxu3 }
  0xed   :  { %v415_v8 = vadd.f32 %v414_v6, %v910_v27  ;;  %v456_v9 = vadd.f32 %v455_v7, %v912_v28 }
  0xee   :  { %483 = vst [vmem:[%s1048_s6 + $0x80] sm:$0xff] %v333_v4 }
  0xef   :  { %484 = vst [vmem:[%s1048_s6 + $0x88] sm:$0xff] %v374_v5 }
  0xf0   :  { %485 = vst [vmem:[%s1048_s6 + $0x90] sm:$0xff] %v415_v8 }
  0xf1   :  { %486 = vst [vmem:[%s1048_s6 + $0x98] sm:$0xff] %v456_v9 }
  0xf3   :  { %v335_v10 = vpop.f32.mrf.mxu0  ;;  %v376_v11 = vpop.f32.mrf.mxu1 }
  0xf4   :  { %v336_v12 = vadd.f32 %v335_v10, %v903_v25  ;;  %v377_v13 = vadd.f32 %v376_v11, %v905_v26  ;;  %v417_v14 = vpop.f32.mrf.mxu2  ;;  %v458_v15 = vpop.f32.mrf.mxu3 }
  0xf5   :  { %v418_v16 = vadd.f32 %v417_v14, %v910_v27  ;;  %v459_v17 = vadd.f32 %v458_v15, %v912_v28 }
  0xf6   :  { %487 = vst [vmem:[%s1048_s6 + $0xa0] sm:$0xff] %v336_v12 }
  0xf7   :  { %488 = vst [vmem:[%s1048_s6 + $0xa8] sm:$0xff] %v377_v13 }
  0xf8   :  { %489 = vst [vmem:[%s1048_s6 + $0xb0] sm:$0xff] %v418_v16 }
  0xf9   :  { %490 = vst [vmem:[%s1048_s6 + $0xb8] sm:$0xff] %v459_v17 }
  0xfb   :  { %v338_v18 = vpop.f32.mrf.mxu0  ;;  %v379_v19 = vpop.f32.mrf.mxu1 }
  0xfc   :  { %v339_v20 = vadd.f32 %v338_v18, %v903_v25  ;;  %v380_v21 = vadd.f32 %v379_v19, %v905_v26  ;;  %v420_v22 = vpop.f32.mrf.mxu2  ;;  %v461_v23 = vpop.f32.mrf.mxu3 }
  0xfd   :  { %v421_v24 = vadd.f32 %v420_v22, %v910_v27  ;;  %v462_v29 = vadd.f32 %v461_v23, %v912_v28 }
  0xfe   :  { %491 = vst [vmem:[%s1048_s6 + $0xc0] sm:$0xff] %v339_v20 }
  0xff   :  { %492 = vst [vmem:[%s1048_s6 + $0xc8] sm:$0xff] %v380_v21 }
 0x100   :  { %493 = vst [vmem:[%s1048_s6 + $0xd0] sm:$0xff] %v421_v24 }
 0x101   :  { %494 = vst [vmem:[%s1048_s6 + $0xd8] sm:$0xff] %v462_v29 }
 0x103   :  { %v341_v30 = vpop.f32.mrf.mxu0  ;;  %v382_v31 = vpop.f32.mrf.mxu1 }
 0x104   :  { %v342_v32 = vadd.f32 %v341_v30, %v903_v25  ;;  %v383_v33 = vadd.f32 %v382_v31, %v905_v26  ;;  %v423_v34 = vpop.f32.mrf.mxu2  ;;  %v464_v35 = vpop.f32.mrf.mxu3 }
 0x105   :  { %v424_v36 = vadd.f32 %v423_v34, %v910_v27  ;;  %v465_v37 = vadd.f32 %v464_v35, %v912_v28 }
 0x106   :  { %495 = vst [vmem:[%s1048_s6 + $0xe0] sm:$0xff] %v342_v32 }
 0x107   :  { %496 = vst [vmem:[%s1048_s6 + $0xe8] sm:$0xff] %v383_v33 }
 0x108   :  { %497 = vst [vmem:[%s1048_s6 + $0xf0] sm:$0xff] %v424_v36 }
 0x109   :  { %498 = vst [vmem:[%s1048_s6 + $0xf8] sm:$0xff] %v465_v37 }
 0x10a   :  { %507 = vsyncpa [#allocation3], 1 }

// kernel: rnn_forward.4
= control target key start
LH: loop header
LB: loop body
LE: loop exit
PB: predicated region body
PF: predicated region fallthrough
CT: control target
= control target key end

     0   :  { %11 = vsyncpa [#allocation7], 0  ;;  %s6748_s0 = inlined_call_operand.vmem [shape: f32[8,8,512], index: 0, kind: input, shape index: {}]   ;;  %s6749_s1 = inlined_call_operand.vmem [shape: f32[8,8,512], index: 1, kind: input, shape index: {}]   ;;  %s6750_s2 = inlined_call_operand.hbm [shape: f32[128,512], index: 2, kind: input, shape index: {}]   ;;  %s6751_s3 = inlined_call_operand.hbm [shape: f32[128,512], index: 3, kind: input, shape index: {}]   ;;  %s6752_s4 = inlined_call_operand.vmem [shape: f32[8,8,128], index: 4, kind: output, shape index: {0}]   ;;  %s6753_s5 = inlined_call_operand.vmem [shape: f32[8,8,128], index: 5, kind: output, shape index: {1}]  }
   0x1   :  { %s30_s20 = sshll.u32 %s6750_s2, 4  ;;  %s31_s20 = int_to_ptr.hbm [resolvable:$true] %s30_s20 }
   0x2   :  { %12 = vsyncpa [#allocation9], 0  ;;  %s4059_s21 = smov [#allocation6]   ;;  %s43_s25 = sshll.u32 %s6751_s3, 4  ;;  %s44_s25 = int_to_ptr.hbm [resolvable:$true] %s43_s25 }
   0x3   :  { %s32_s22 = sshll.u32 %s4059_s21, 4  ;;  %s4060_s26 = smov 512   ;;  %s33_s22 = int_to_ptr.vmem [resolvable:$true] %s32_s22 }
   0x4   :  { %s4061_s27 = smov 32   ;;  %s4062_s28 = smov [#allocation8]  }
   0x5   :  { %38 = dma.hbm_to_vmem [thread:$0]  %s31_s20, 8192, %s33_s22, [#allocation7], %s4060_s26, %s4060_s26, %s4061_s27  }
   0x6   :  { %s45_s29 = sshll.u32 %s4062_s28, 4  ;;  %s46_s29 = int_to_ptr.vmem [resolvable:$true] %s45_s29 }
   0x7   :  { %51 = dma.hbm_to_vmem [thread:$0]  %s44_s25, 8192, %s46_s29, [#allocation9], %s4060_s26, %s4060_s26, %s4061_s27  }
   0x8   :  { %4055 = dma.done.wait [#allocation7], 8192  }
   0x9   :  { %4056 = vsyncadd [#allocation7], 4294959104 }
   0xa   :  { %4057 = dma.done.wait [#allocation9], 8192  }
   0xb   :  { %4058 = vsyncadd [#allocation9], 4294959104  ;;  %v4100_v0 = vld [vmem:[#allocation6 + $0x1e0] sm:$0xff]  ;;  %v4102_v1 = vld [vmem:[#allocation6 + $0x1e8] sm:$0xff]  ;;  %v6764_v62 = vmov 0.0  }
   0xc   :  { %v4104_v2 = vld [vmem:[#allocation6 + $0x1f8] sm:$0xff]  ;;  %170 = vmatpush.msra.mxu0 %v4100_v0  ;;  %190 = vmatpush.msra.mxu1 %v4102_v1  ;;  %v4108_v3 = vld [vmem:[#allocation6 + $0x1c0] sm:$0xff]  ;;  %v4110_v4 = vld [vmem:[#allocation6 + $0x1c8] sm:$0xff] }
   0xd   :  { %v4112_v5 = vld [vmem:[#allocation6 + $0x1d8] sm:$0xff]  ;;  %230 = vmatpush.msra.mxu3 %v4104_v2  ;;  %v4115_v6 = vld [vmem:[#allocation6 + $0x1a0] sm:$0xff]  ;;  %v4117_v7 = vld [vmem:[#allocation6 + $0x1a8] sm:$0xff] }
   0xe   :  { %171 = vmatpush.msra.mxu0 %v4108_v3  ;;  %191 = vmatpush.msra.mxu1 %v4110_v4  ;;  %v4121_v8 = vld [vmem:[#allocation6 + $0x1b8] sm:$0xff]  ;;  %v4124_v9 = vld [vmem:[#allocation6 + $0x180] sm:$0xff]  ;;  %v4126_v10 = vld [vmem:[#allocation6 + $0x188] sm:$0xff] }
   0xf   :  { %231 = vmatpush.msra.mxu3 %v4112_v5  ;;  %v4130_v11 = vld [vmem:[#allocation6 + $0x198] sm:$0xff]  ;;  %v4133_v12 = vld [vmem:[#allocation6 + $0x160] sm:$0xff]  ;;  %v4135_v13 = vld [vmem:[#allocation6 + $0x168] sm:$0xff] }
  0x10   :  { %172 = vmatpush.msra.mxu0 %v4115_v6  ;;  %192 = vmatpush.msra.mxu1 %v4117_v7  ;;  %v4139_v14 = vld [vmem:[#allocation6 + $0x178] sm:$0xff]  ;;  %v4142_v15 = vld [vmem:[#allocation6 + $0x140] sm:$0xff]  ;;  %v4144_v16 = vld [vmem:[#allocation6 + $0x148] sm:$0xff] }
  0x11   :  { %232 = vmatpush.msra.mxu3 %v4121_v8  ;;  %v4146_v17 = vld [vmem:[#allocation6 + $0x1f0] sm:$0xff]  ;;  %v4150_v18 = vld [vmem:[#allocation6 + $0x158] sm:$0xff]  ;;  %v4155_v20 = vld [vmem:[#allocation6 + $0x120] sm:$0xff] }
  0x12   :  { %173 = vmatpush.msra.mxu0 %v4124_v9  ;;  %193 = vmatpush.msra.mxu1 %v4126_v10  ;;  %v4152_v19 = vld [vmem:[#allocation6 + $0x1d0] sm:$0xff]  ;;  %v4157_v21 = vld [vmem:[#allocation6 + $0x128] sm:$0xff]  ;;  %v4162_v22 = vld [vmem:[#allocation6 + $0x138] sm:$0xff] }
  0x13   :  { %233 = vmatpush.msra.mxu3 %v4130_v11  ;;  %210 = vmatpush.msra.mxu2 %v4146_v17  ;;  %v4164_v23 = vld [vmem:[#allocation6 + $0x1b0] sm:$0xff]  ;;  %v4167_v24 = vld [vmem:[#allocation6 + $0x100] sm:$0xff]  ;;  %v4169_v25 = vld [vmem:[#allocation6 + $0x108] sm:$0xff] }
  0x14   :  { %174 = vmatpush.msra.mxu0 %v4133_v12  ;;  %194 = vmatpush.msra.mxu1 %v4135_v13  ;;  %v4174_v26 = vld [vmem:[#allocation6 + $0x118] sm:$0xff]  ;;  %v4176_v27 = vld [vmem:[#allocation6 + $0x190] sm:$0xff]  ;;  %v4179_v28 = vld [vmem:[#allocation6 + $0xe0] sm:$0xff] }
  0x15   :  { %234 = vmatpush.msra.mxu3 %v4139_v14  ;;  %211 = vmatpush.msra.mxu2 %v4152_v19  ;;  %v4181_v29 = vld [vmem:[#allocation6 + $0xe8] sm:$0xff]  ;;  %v4186_v30 = vld [vmem:[#allocation6 + $0xf8] sm:$0xff]  ;;  %v4188_v31 = vld [vmem:[#allocation6 + $0x170] sm:$0xff] }
  0x16   :  { %175 = vmatpush.msra.mxu0 %v4142_v15  ;;  %195 = vmatpush.msra.mxu1 %v4144_v16  ;;  %v4191_v32 = vld [vmem:[#allocation6 + $0xc0] sm:$0xff]  ;;  %v4193_v33 = vld [vmem:[#allocation6 + $0xc8] sm:$0xff]  ;;  %v4198_v34 = vld [vmem:[#allocation6 + $0xd8] sm:$0xff] }
  0x17   :  { %235 = vmatpush.msra.mxu3 %v4150_v18  ;;  %212 = vmatpush.msra.mxu2 %v4164_v23  ;;  %v4200_v35 = vld [vmem:[#allocation6 + $0x150] sm:$0xff]  ;;  %v4203_v36 = vld [vmem:[#allocation6 + $0xa0] sm:$0xff]  ;;  %v4205_v37 = vld [vmem:[#allocation6 + $0xa8] sm:$0xff] }
  0x18   :  { %176 = vmatpush.msra.mxu0 %v4155_v20  ;;  %196 = vmatpush.msra.mxu1 %v4157_v21  ;;  %v4210_v38 = vld [vmem:[#allocation6 + $0xb8] sm:$0xff]  ;;  %v4212_v39 = vld [vmem:[#allocation6 + $0x130] sm:$0xff]  ;;  %v4215_v40 = vld [vmem:[#allocation6 + $0x80] sm:$0xff] }
  0x19   :  { %236 = vmatpush.msra.mxu3 %v4162_v22  ;;  %213 = vmatpush.msra.mxu2 %v4176_v27  ;;  %v4217_v41 = vld [vmem:[#allocation6 + $0x88] sm:$0xff]  ;;  %v4222_v42 = vld [vmem:[#allocation6 + $0x98] sm:$0xff]  ;;  %v4224_v43 = vld [vmem:[#allocation6 + $0x110] sm:$0xff] }
  0x1a   :  { %177 = vmatpush.msra.mxu0 %v4167_v24  ;;  %197 = vmatpush.msra.mxu1 %v4169_v25  ;;  %v4227_v44 = vld [vmem:[#allocation6 + $0x60] sm:$0xff]  ;;  %v4229_v45 = vld [vmem:[#allocation6 + $0x68] sm:$0xff]  ;;  %v4234_v46 = vld [vmem:[#allocation6 + $0x78] sm:$0xff] }
  0x1b   :  { %237 = vmatpush.msra.mxu3 %v4174_v26  ;;  %214 = vmatpush.msra.mxu2 %v4188_v31  ;;  %v4236_v47 = vld [vmem:[#allocation6 + $0xf0] sm:$0xff]  ;;  %v4239_v48 = vld [vmem:[#allocation6 + $0x40] sm:$0xff]  ;;  %v4241_v49 = vld [vmem:[#allocation6 + $0x48] sm:$0xff] }
  0x1c   :  { %178 = vmatpush.msra.mxu0 %v4179_v28  ;;  %198 = vmatpush.msra.mxu1 %v4181_v29  ;;  %7046 = vst [vmem:[#allocation12_spill] sm:$0xff] %v4236_v47  ;;  %v4246_v50 = vld [vmem:[#allocation6 + $0x58] sm:$0xff]  ;;  %v4248_v51 = vld [vmem:[#allocation6 + $0xd0] sm:$0xff]  ;;  %v4251_v52 = vld [vmem:[#allocation6 + $0x20] sm:$0xff] }
  0x1d   :  { %238 = vmatpush.msra.mxu3 %v4186_v30  ;;  %215 = vmatpush.msra.mxu2 %v4200_v35  ;;  %7047 = vst [vmem:[#allocation13_spill] sm:$0xff] %v4248_v51  ;;  %v4253_v53 = vld [vmem:[#allocation6 + $0x28] sm:$0xff]  ;;  %v4258_v54 = vld [vmem:[#allocation6 + $0x38] sm:$0xff]  ;;  %v4260_v55 = vld [vmem:[#allocation6 + $0xb0] sm:$0xff] }
  0x1e   :  { %179 = vmatpush.msra.mxu0 %v4191_v32  ;;  %199 = vmatpush.msra.mxu1 %v4193_v33  ;;  %7048 = vst [vmem:[#allocation14_spill] sm:$0xff] %v4258_v54  ;;  %v4263_v56 = vld [vmem:[#allocation6] sm:$0xff]  ;;  %v4265_v57 = vld [vmem:[#allocation6 + $0x8] sm:$0xff]  ;;  %v4270_v58 = vld [vmem:[#allocation6 + $0x18] sm:$0xff] }
  0x1f   :  { %239 = vmatpush.msra.mxu3 %v4198_v34  ;;  %216 = vmatpush.msra.mxu2 %v4212_v39  ;;  %7049 = vst [vmem:[#allocation15_spill] sm:$0xff] %v4260_v55  ;;  %v4273_v59 = vld [vmem:[#allocation8 + $0x1e0] sm:$0xff]  ;;  %v4278_v60 = vld [vmem:[#allocation8 + $0x1e8] sm:$0xff]  ;;  %v4280_v61 = vld [vmem:[#allocation8 + $0x1f8] sm:$0xff] }
  0x20   :  { %180 = vmatpush.msra.mxu0 %v4203_v36  ;;  %200 = vmatpush.msra.mxu1 %v4205_v37  ;;  %7050 = vst [vmem:[#allocation16_spill] sm:$0xff] %v4263_v56  ;;  %v4284_v63 = vld [vmem:[#allocation8 + $0x1c0] sm:$0xff] }
  0x21   :  { %240 = vmatpush.msra.mxu3 %v4210_v38  ;;  %217 = vmatpush.msra.mxu2 %v4224_v43  ;;  %7051 = vst [vmem:[#allocation17_spill] sm:$0xff] %v4265_v57 }
  0x22   :  { %181 = vmatpush.msra.mxu0 %v4215_v40  ;;  %201 = vmatpush.msra.mxu1 %v4217_v41  ;;  %7052 = vst [vmem:[#allocation18_spill] sm:$0xff] %v4270_v58 }
  0x23   :  { %241 = vmatpush.msra.mxu3 %v4222_v42  ;;  %218 = vmatpush.msra.mxu2 %v4236_v47  ;;  %7053 = vst [vmem:[#allocation19_spill] sm:$0xff] %v4273_v59  ;;  %v4299_v47 = vld [vmem:[#allocation8 + $0x1a8] sm:$0xff] }
  0x24   :  { %182 = vmatpush.msra.mxu0 %v4227_v44  ;;  %202 = vmatpush.msra.mxu1 %v4229_v45  ;;  %7054 = vst [vmem:[#allocation20_spill] sm:$0xff] %v4278_v60 }
  0x25   :  { %242 = vmatpush.msra.mxu3 %v4234_v46  ;;  %219 = vmatpush.msra.mxu2 %v4248_v51  ;;  %7055 = vst [vmem:[#allocation21_spill] sm:$0xff] %v4280_v61  ;;  %v4290_v51 = vld [vmem:[#allocation8 + $0x1d8] sm:$0xff] }
  0x26   :  { %183 = vmatpush.msra.mxu0 %v4239_v48  ;;  %203 = vmatpush.msra.mxu1 %v4241_v49  ;;  %7056 = vst [vmem:[#allocation22_spill] sm:$0xff] %v4284_v63 }
  0x27   :  { %243 = vmatpush.msra.mxu3 %v4246_v50  ;;  %220 = vmatpush.msra.mxu2 %v4260_v55  ;;  %v4288_v55 = vld [vmem:[#allocation8 + $0x1c8] sm:$0xff]  ;;  %7058 = vst [vmem:[#allocation24_spill] sm:$0xff] %v4290_v51 }
  0x28   :  { %184 = vmatpush.msra.mxu0 %v4251_v52  ;;  %204 = vmatpush.msra.mxu1 %v4253_v53  ;;  %7057 = vst [vmem:[#allocation23_spill] sm:$0xff] %v4288_v55 }
  0x29   :  { %244 = vmatpush.msra.mxu3 %v4258_v54  ;;  %7061 = vst [vmem:[#allocation27_spill] sm:$0xff] %v4299_v47  ;;  %v4388_v54 = vld [vmem:[#allocation8 + $0x1b0] sm:$0xff] }
  0x2a   :  { %185 = vmatpush.msra.mxu0 %v4263_v56  ;;  %205 = vmatpush.msra.mxu1 %v4265_v57  ;;  %v4294_v57 = vld [vmem:[#allocation8 + $0x1a0] sm:$0xff]  ;;  %v4301_v56 = vld [vmem:[#allocation8 + $0x1b8] sm:$0xff]  ;;  %7091 = vst [vmem:[#allocation56_spill] sm:$0xff] %v4388_v54 }
  0x2b   :  { %245 = vmatpush.msra.mxu3 %v4270_v58  ;;  %186 = vmatmul.f32.vlgmr.msra.gmra.mxu0 %v6764_v62  ;;  %7059 = vst [vmem:[#allocation25_spill] sm:$0xff] %v4294_v57  ;;  %v4296_v58 = vld [vmem:[#allocation6 + $0x90] sm:$0xff] }
  0x2c   :  { %206 = vmatmul.f32.vlgmr.msra.gmra.mxu1 %v6764_v62  ;;  %387 = vmatpush.msrb.mxu0 %v4273_v59  ;;  %7060 = vst [vmem:[#allocation26_spill] sm:$0xff] %v4296_v58  ;;  %v4306_v59 = vld [vmem:[#allocation8 + $0x180] sm:$0xff] }
  0x2d   :  { %407 = vmatpush.msrb.mxu1 %v4278_v60  ;;  %447 = vmatpush.msrb.mxu3 %v4280_v61  ;;  %7062 = vst [vmem:[#allocation28_spill] sm:$0xff] %v4301_v56  ;;  %v4308_v60 = vld [vmem:[#allocation6 + $0x70] sm:$0xff]  ;;  %v4312_v61 = vld [vmem:[#allocation8 + $0x188] sm:$0xff] }
  0x2e   :  { %388 = vmatpush.msrb.mxu0 %v4284_v63  ;;  %246 = vmatmul.f32.vlgmr.msra.gmra.mxu3 %v6764_v62  ;;  %7063 = vst [vmem:[#allocation29_spill] sm:$0xff] %v4306_v59  ;;  %v4314_v63 = vld [vmem:[#allocation8 + $0x198] sm:$0xff]  ;;  %v4318_v62 = vld [vmem:[#allocation8 + $0x160] sm:$0xff] }
  0x2f   :  { %408 = vmatpush.msrb.mxu1 %v4288_v55  ;;  %448 = vmatpush.msrb.mxu3 %v4290_v51  ;;  %7064 = vst [vmem:[#allocation30_spill] sm:$0xff] %v4308_v60  ;;  %v4320_v55 = vld [vmem:[#allocation6 + $0x50] sm:$0xff]  ;;  %v4324_v51 = vld [vmem:[#allocation8 + $0x168] sm:$0xff] }
  0x30   :  { %389 = vmatpush.msrb.mxu0 %v4294_v57  ;;  %221 = vmatpush.msra.mxu2 %v4296_v58  ;;  %7065 = vst [vmem:[#allocation31_spill] sm:$0xff] %v4312_v61  ;;  %v4326_v57 = vld [vmem:[#allocation8 + $0x178] sm:$0xff]  ;;  %v4330_v58 = vld [vmem:[#allocation8 + $0x140] sm:$0xff] }
  0x31   :  { %7066 = vst [vmem:[#allocation32_spill] sm:$0xff] %v4314_v63  ;;  %409 = vmatpush.msrb.mxu1 %v4299_v47  ;;  %449 = vmatpush.msrb.mxu3 %v4301_v56  ;;  %v4332_v47 = vld [vmem:[#allocation6 + $0x30] sm:$0xff]  ;;  %v4336_v56 = vld [vmem:[#allocation8 + $0x148] sm:$0xff] }
  0x32   :  { %7067 = vst [vmem:[#allocation33_spill] sm:$0xff] %v4318_v62  ;;  %390 = vmatpush.msrb.mxu0 %v4306_v59  ;;  %222 = vmatpush.msra.mxu2 %v4308_v60  ;;  %v4338_v59 = vld [vmem:[#allocation8 + $0x158] sm:$0xff]  ;;  %v4342_v60 = vld [vmem:[#allocation8 + $0x120] sm:$0xff] }
  0x33   :  { %7068 = vst [vmem:[#allocation34_spill] sm:$0xff] %v4320_v55  ;;  %410 = vmatpush.msrb.mxu1 %v4312_v61  ;;  %450 = vmatpush.msrb.mxu3 %v4314_v63  ;;  %v4344_v61 = vld [vmem:[#allocation6 + $0x10] sm:$0xff]  ;;  %v4348_v63 = vld [vmem:[#allocation8 + $0x128] sm:$0xff] }
  0x34   :  { %7069 = vst [vmem:[#allocation35_spill] sm:$0xff] %v4324_v51  ;;  %391 = vmatpush.msrb.mxu0 %v4318_v62  ;;  %223 = vmatpush.msra.mxu2 %v4320_v55  ;;  %v4350_v62 = vld [vmem:[#allocation8 + $0x138] sm:$0xff]  ;;  %v4354_v55 = vld [vmem:[#allocation8 + $0x100] sm:$0xff] }
  0x35   :  { %7070 = vst [vmem:[#allocation36_spill] sm:$0xff] %v4326_v57  ;;  %411 = vmatpush.msrb.mxu1 %v4324_v51  ;;  %451 = vmatpush.msrb.mxu3 %v4326_v57  ;;  %v4358_v57 = vld [vmem:[#allocation8 + $0x108] sm:$0xff]  ;;  %v4360_v51 = vld [vmem:[#allocation8 + $0x118] sm:$0xff] }
  0x36   :  { %7071 = vst [vmem:[#allocation37_spill] sm:$0xff] %v4330_v58  ;;  %392 = vmatpush.msrb.mxu0 %v4330_v58  ;;  %224 = vmatpush.msra.mxu2 %v4332_v47  ;;  %v4366_v58 = vld [vmem:[#allocation8 + $0xe0] sm:$0xff] }
  0x37   :  { %7072 = vst [vmem:[#allocation38_spill] sm:$0xff] %v4332_v47  ;;  %412 = vmatpush.msrb.mxu1 %v4336_v56  ;;  %452 = vmatpush.msrb.mxu3 %v4338_v59  ;;  %v4364_v47 = vld [vmem:[#allocation8 + $0x1f0] sm:$0xff] }
  0x38   :  { %7073 = vst [vmem:[#allocation39_spill] sm:$0xff] %v4336_v56  ;;  %393 = vmatpush.msrb.mxu0 %v4342_v60  ;;  %225 = vmatpush.msra.mxu2 %v4344_v61  ;;  %v4370_v56 = vld [vmem:[#allocation8 + $0xe8] sm:$0xff] }
  0x39   :  { %7074 = vst [vmem:[#allocation40_spill] sm:$0xff] %v4338_v59  ;;  %413 = vmatpush.msrb.mxu1 %v4348_v63  ;;  %453 = vmatpush.msrb.mxu3 %v4350_v62  ;;  %v7084_v59 = vmov 0.0  }
  0x3a   :  { %7075 = vst [vmem:[#allocation41_spill] sm:$0xff] %v4342_v60  ;;  %394 = vmatpush.msrb.mxu0 %v4354_v55  ;;  %226 = vmatmul.f32.vlgmr.msra.gmra.mxu2 %v7084_v59  ;;  %v4372_v60 = vld [vmem:[#allocation8 + $0xf8] sm:$0xff] }
  0x3b   :  { %7076 = vst [vmem:[#allocation42_spill] sm:$0xff] %v4344_v61  ;;  %414 = vmatpush.msrb.mxu1 %v4358_v57  ;;  %454 = vmatpush.msrb.mxu3 %v4360_v51  ;;  %v4376_v61 = vld [vmem:[#allocation8 + $0x1d0] sm:$0xff] }
  0x3c   :  { %7077 = vst [vmem:[#allocation43_spill] sm:$0xff] %v4348_v63  ;;  %v4378_v63 = vld [vmem:[#allocation8 + $0xc0] sm:$0xff]  ;;  %427 = vmatpush.msrb.mxu2 %v4364_v47  ;;  %395 = vmatpush.msrb.mxu0 %v4366_v58 }
  0x3d   :  { %7078 = vst [vmem:[#allocation44_spill] sm:$0xff] %v4350_v62  ;;  %v4382_v62 = vld [vmem:[#allocation8 + $0xc8] sm:$0xff]  ;;  %415 = vmatpush.msrb.mxu1 %v4370_v56  ;;  %455 = vmatpush.msrb.mxu3 %v4372_v60 }
  0x3e   :  { %7079 = vst [vmem:[#allocation45_spill] sm:$0xff] %v4354_v55  ;;  %v4384_v55 = vld [vmem:[#allocation8 + $0xd8] sm:$0xff]  ;;  %428 = vmatpush.msrb.mxu2 %v4376_v61  ;;  %396 = vmatpush.msrb.mxu0 %v4378_v63 }
  0x3f   :  { %7080 = vst [vmem:[#allocation46_spill] sm:$0xff] %v4358_v57  ;;  %v4390_v57 = vld [vmem:[#allocation8 + $0xa0] sm:$0xff]  ;;  %416 = vmatpush.msrb.mxu1 %v4382_v62  ;;  %456 = vmatpush.msrb.mxu3 %v4384_v55 }
  0x40   :  { %7081 = vst [vmem:[#allocation47_spill] sm:$0xff] %v4360_v51  ;;  %v4394_v51 = vld [vmem:[#allocation8 + $0xa8] sm:$0xff]  ;;  %429 = vmatpush.msrb.mxu2 %v4388_v54  ;;  %397 = vmatpush.msrb.mxu0 %v4390_v57  ;;  %v4420_v54 = vld [vmem:[#allocation8 + $0x78] sm:$0xff] }
  0x41   :  { %7082 = vst [vmem:[#allocation48_spill] sm:$0xff] %v4364_v47  ;;  %v4396_v47 = vld [vmem:[#allocation8 + $0xb8] sm:$0xff]  ;;  %417 = vmatpush.msrb.mxu1 %v4394_v51 }
  0x42   :  { %7083 = vst [vmem:[#allocation49_spill] sm:$0xff] %v4366_v58  ;;  %v4400_v58 = vld [vmem:[#allocation8 + $0x190] sm:$0xff]  ;;  %457 = vmatpush.msrb.mxu3 %v4396_v47 }
  0x43   :  { %7085 = vst [vmem:[#allocation50_spill] sm:$0xff] %v4370_v56  ;;  %v4402_v56 = vld [vmem:[#allocation8 + $0x80] sm:$0xff]  ;;  %430 = vmatpush.msrb.mxu2 %v4400_v58 }
  0x44   :  { %7086 = vst [vmem:[#allocation51_spill] sm:$0xff] %v4372_v60  ;;  %v4406_v60 = vld [vmem:[#allocation8 + $0x88] sm:$0xff]  ;;  %398 = vmatpush.msrb.mxu0 %v4402_v56 }
  0x45   :  { %7087 = vst [vmem:[#allocation52_spill] sm:$0xff] %v4376_v61  ;;  %v4408_v61 = vld [vmem:[#allocation8 + $0x98] sm:$0xff]  ;;  %418 = vmatpush.msrb.mxu1 %v4406_v60 }
  0x46   :  { %7088 = vst [vmem:[#allocation53_spill] sm:$0xff] %v4378_v63  ;;  %v4412_v63 = vld [vmem:[#allocation8 + $0x170] sm:$0xff]  ;;  %458 = vmatpush.msrb.mxu3 %v4408_v61 }
  0x47   :  { %7089 = vst [vmem:[#allocation54_spill] sm:$0xff] %v4382_v62  ;;  %v4414_v62 = vld [vmem:[#allocation8 + $0x60] sm:$0xff]  ;;  %431 = vmatpush.msrb.mxu2 %v4412_v63 }
  0x48   :  { %7090 = vst [vmem:[#allocation55_spill] sm:$0xff] %v4384_v55  ;;  %v4418_v55 = vld [vmem:[#allocation8 + $0x68] sm:$0xff]  ;;  %399 = vmatpush.msrb.mxu0 %v4414_v62  ;;  %459 = vmatpush.msrb.mxu3 %v4420_v54 }
  0x49   :  { %7092 = vst [vmem:[#allocation57_spill] sm:$0xff] %v4390_v57  ;;  %v4424_v57 = vld [vmem:[#allocation8 + $0x150] sm:$0xff]  ;;  %419 = vmatpush.msrb.mxu1 %v4418_v55 }
  0x4a   :  { %7093 = vst [vmem:[#allocation58_spill] sm:$0xff] %v4394_v51  ;;  %v4426_v51 = vld [vmem:[#allocation8 + $0x40] sm:$0xff]  ;;  %432 = vmatpush.msrb.mxu2 %v4424_v57 }
  0x4b   :  { %7094 = vst [vmem:[#allocation59_spill] sm:$0xff] %v4396_v47  ;;  %v4430_v47 = vld [vmem:[#allocation8 + $0x48] sm:$0xff]  ;;  %400 = vmatpush.msrb.mxu0 %v4426_v51 }
  0x4c   :  { %7095 = vst [vmem:[#allocation60_spill] sm:$0xff] %v4400_v58  ;;  %v4432_v58 = vld [vmem:[#allocation8 + $0x58] sm:$0xff]  ;;  %420 = vmatpush.msrb.mxu1 %v4430_v47 }
  0x4d   :  { %7096 = vst [vmem:[#allocation61_spill] sm:$0xff] %v4402_v56  ;;  %v4436_v56 = vld [vmem:[#allocation8 + $0x130] sm:$0xff]  ;;  %460 = vmatpush.msrb.mxu3 %v4432_v58 }
  0x4e   :  { %7097 = vst [vmem:[#allocation62_spill] sm:$0xff] %v4406_v60  ;;  %v4438_v60 = vld [vmem:[#allocation8 + $0x20] sm:$0xff]  ;;  %433 = vmatpush.msrb.mxu2 %v4436_v56 }
  0x4f   :  { %7098 = vst [vmem:[#allocation63_spill] sm:$0xff] %v4408_v61  ;;  %v4442_v61 = vld [vmem:[#allocation8 + $0x28] sm:$0xff]  ;;  %401 = vmatpush.msrb.mxu0 %v4438_v60 }
  0x50   :  { %7099 = vst [vmem:[#allocation64_spill] sm:$0xff] %v4412_v63  ;;  %v4444_v63 = vld [vmem:[#allocation8 + $0x38] sm:$0xff]  ;;  %421 = vmatpush.msrb.mxu1 %v4442_v61 }
  0x51   :  { %7100 = vst [vmem:[#allocation65_spill] sm:$0xff] %v4414_v62  ;;  %v4448_v62 = vld [vmem:[#allocation8 + $0x110] sm:$0xff]  ;;  %461 = vmatpush.msrb.mxu3 %v4444_v63 }
  0x52   :  { %7101 = vst [vmem:[#allocation66_spill] sm:$0xff] %v4418_v55  ;;  %v4450_v55 = vld [vmem:[#allocation8] sm:$0xff]  ;;  %434 = vmatpush.msrb.mxu2 %v4448_v62 }
  0x53   :  { %7102 = vst [vmem:[#allocation67_spill] sm:$0xff] %v4420_v54  ;;  %v4454_v54 = vld [vmem:[#allocation8 + $0x8] sm:$0xff]  ;;  %402 = vmatpush.msrb.mxu0 %v4450_v55 }
  0x54   :  { %7103 = vst [vmem:[#allocation68_spill] sm:$0xff] %v4424_v57  ;;  %v4456_v57 = vld [vmem:[#allocation8 + $0x18] sm:$0xff]  ;;  %422 = vmatpush.msrb.mxu1 %v4454_v54  ;;  %403 = vmatmul.f32.vlgmr.msrb.gmra.mxu0 %v7084_v59 }
  0x55   :  { %7104 = vst [vmem:[#allocation69_spill] sm:$0xff] %v4432_v58  ;;  %v4462_v58 = vld [vmem:[#allocation8 + $0xf0] sm:$0xff]  ;;  %462 = vmatpush.msrb.mxu3 %v4456_v57  ;;  %423 = vmatmul.f32.vlgmr.msrb.gmra.mxu1 %v7084_v59 }
  0x56   :  { %7105 = vst [vmem:[#allocation70_spill] sm:$0xff] %v4438_v60  ;;  %v4468_v60 = vld [vmem:[#allocation8 + $0xd0] sm:$0xff]  ;;  %435 = vmatpush.msrb.mxu2 %v4462_v58  ;;  %463 = vmatmul.f32.vlgmr.msrb.gmra.mxu3 %v7084_v59 }
  0x57   :  { %7106 = vst [vmem:[#allocation71_spill] sm:$0xff] %v4444_v63  ;;  %v4472_v63 = vld [vmem:[#allocation8 + $0xb0] sm:$0xff]  ;;  %605 = vmatpush.msra.mxu0 %v4100_v0  ;;  %625 = vmatpush.msra.mxu1 %v4102_v1 }
  0x58   :  { %7107 = vst [vmem:[#allocation72_spill] sm:$0xff] %v4454_v54  ;;  %436 = vmatpush.msrb.mxu2 %v4468_v60  ;;  %665 = vmatpush.msra.mxu3 %v4104_v2  ;;  %v4484_v54 = vld [vmem:[#allocation8 + $0x70] sm:$0xff] }
  0x59   :  { %7108 = vst [vmem:[#allocation73_spill] sm:$0xff] %v4456_v57  ;;  %v4478_v57 = vld [vmem:[#allocation8 + $0x90] sm:$0xff]  ;;  %606 = vmatpush.msra.mxu0 %v4108_v3  ;;  %626 = vmatpush.msra.mxu1 %v4110_v4  ;;  %v7110_v4 = vld [vmem:[#allocation16_spill] sm:$0xff] }
  0x5a   :  { %437 = vmatpush.msrb.mxu2 %v4472_v63  ;;  %666 = vmatpush.msra.mxu3 %v4112_v5  ;;  %v4490_v0 = vld [vmem:[#allocation8 + $0x50] sm:$0xff]  ;;  %v7111_v5 = vld [vmem:[#allocation12_spill] sm:$0xff] }
  0x5b   :  { %607 = vmatpush.msra.mxu0 %v4115_v6  ;;  %627 = vmatpush.msra.mxu1 %v4117_v7  ;;  %v4496_v1 = vld [vmem:[#allocation8 + $0x30] sm:$0xff]  ;;  %v7112_v6 = vld [vmem:[#allocation17_spill] sm:$0xff] }
  0x5c   :  { %438 = vmatpush.msrb.mxu2 %v4478_v57  ;;  %667 = vmatpush.msra.mxu3 %v4121_v8  ;;  %v4502_v2 = vld [vmem:[#allocation8 + $0x10] sm:$0xff]  ;;  %v7114_v8 = vld [vmem:[#allocation19_spill] sm:$0xff] }
  0x5d   :  { %608 = vmatpush.msra.mxu0 %v4124_v9  ;;  %628 = vmatpush.msra.mxu1 %v4126_v10  ;;  %v7109_v3 = vld [vmem:[#allocation14_spill] sm:$0xff]  ;;  %v7115_v9 = vld [vmem:[#allocation13_spill] sm:$0xff]  ;;  %v7116_v10 = vld [vmem:[#allocation20_spill] sm:$0xff] }
  0x5e   :  { %439 = vmatpush.msrb.mxu2 %v4484_v54  ;;  %668 = vmatpush.msra.mxu3 %v4130_v11  ;;  %v7113_v7 = vld [vmem:[#allocation18_spill] sm:$0xff]  ;;  %v7117_v11 = vld [vmem:[#allocation21_spill] sm:$0xff] }
  0x5f   :  { %609 = vmatpush.msra.mxu0 %v4133_v12  ;;  %629 = vmatpush.msra.mxu1 %v4135_v13  ;;  %v7118_v12 = vld [vmem:[#allocation22_spill] sm:$0xff]  ;;  %v7119_v13 = vld [vmem:[#allocation15_spill] sm:$0xff] }
  0x60   :  { %440 = vmatpush.msrb.mxu2 %v4490_v0  ;;  %669 = vmatpush.msra.mxu3 %v4139_v14  ;;  %v7120_v14 = vld [vmem:[#allocation23_spill] sm:$0xff] }
  0x61   :  { %610 = vmatpush.msra.mxu0 %v4142_v15  ;;  %630 = vmatpush.msra.mxu1 %v4144_v16  ;;  %v7121_v15 = vld [vmem:[#allocation24_spill] sm:$0xff]  ;;  %v7122_v16 = vld [vmem:[#allocation25_spill] sm:$0xff] }
  0x62   :  { %441 = vmatpush.msrb.mxu2 %v4496_v1  ;;  %670 = vmatpush.msra.mxu3 %v4150_v18  ;;  %v7124_v18 = vld [vmem:[#allocation27_spill] sm:$0xff] }
  0x63   :  { %611 = vmatpush.msra.mxu0 %v4155_v20  ;;  %631 = vmatpush.msra.mxu1 %v4157_v21  ;;  %v7126_v20 = vld [vmem:[#allocation29_spill] sm:$0xff]  ;;  %v7127_v21 = vld [vmem:[#allocation30_spill] sm:$0xff] }
  0x64   :  { %442 = vmatpush.msrb.mxu2 %v4502_v2  ;;  %671 = vmatpush.msra.mxu3 %v4162_v22  ;;  %v7128_v22 = vld [vmem:[#allocation31_spill] sm:$0xff] }
  0x65   :  { %443 = vmatmul.f32.vlgmr.msrb.gmra.mxu2 %v7084_v59  ;;  %612 = vmatpush.msra.mxu0 %v4167_v24  ;;  %v7130_v24 = vld [vmem:[#allocation33_spill] sm:$0xff]  ;;  %v7158_v59 = vld [vmem:[#allocation59_spill] sm:$0xff] }
  0x66   :  { %645 = vmatpush.msra.mxu2 %v4146_v17  ;;  %632 = vmatpush.msra.mxu1 %v4169_v25  ;;  %v7123_v17 = vld [vmem:[#allocation26_spill] sm:$0xff] }
  0x67   :  { %672 = vmatpush.msra.mxu3 %v4174_v26  ;;  %613 = vmatpush.msra.mxu0 %v4179_v28  ;;  %v7131_v25 = vld [vmem:[#allocation34_spill] sm:$0xff]  ;;  %v7132_v26 = vld [vmem:[#allocation35_spill] sm:$0xff]  ;;  %v7134_v28 = vld [vmem:[#allocation37_spill] sm:$0xff] }
  0x68   :  { %646 = vmatpush.msra.mxu2 %v4152_v19  ;;  %633 = vmatpush.msra.mxu1 %v4181_v29  ;;  %v7125_v19 = vld [vmem:[#allocation28_spill] sm:$0xff]  ;;  %v7135_v29 = vld [vmem:[#allocation38_spill] sm:$0xff] }
  0x69   :  { %673 = vmatpush.msra.mxu3 %v4186_v30  ;;  %614 = vmatpush.msra.mxu0 %v4191_v32  ;;  %v7136_v30 = vld [vmem:[#allocation39_spill] sm:$0xff]  ;;  %v7138_v32 = vld [vmem:[#allocation41_spill] sm:$0xff] }
  0x6a   :  { %647 = vmatpush.msra.mxu2 %v4164_v23  ;;  %634 = vmatpush.msra.mxu1 %v4193_v33  ;;  %v7129_v23 = vld [vmem:[#allocation32_spill] sm:$0xff]  ;;  %v7139_v33 = vld [vmem:[#allocation42_spill] sm:$0xff] }
  0x6b   :  { %674 = vmatpush.msra.mxu3 %v4198_v34  ;;  %615 = vmatpush.msra.mxu0 %v4203_v36  ;;  %v7140_v34 = vld [vmem:[#allocation43_spill] sm:$0xff]  ;;  %v7142_v36 = vld [vmem:[#allocation44_spill] sm:$0xff] }
  0x6c   :  { %648 = vmatpush.msra.mxu2 %v4176_v27  ;;  %635 = vmatpush.msra.mxu1 %v4205_v37  ;;  %v7133_v27 = vld [vmem:[#allocation36_spill] sm:$0xff]  ;;  %v7143_v37 = vld [vmem:[#allocation45_spill] sm:$0xff] }
  0x6d   :  { %675 = vmatpush.msra.mxu3 %v4210_v38  ;;  %616 = vmatpush.msra.mxu0 %v4215_v40  ;;  %v7144_v38 = vld [vmem:[#allocation46_spill] sm:$0xff]  ;;  %v7146_v40 = vld [vmem:[#allocation47_spill] sm:$0xff] }
  0x6e   :  { %649 = vmatpush.msra.mxu2 %v4188_v31  ;;  %636 = vmatpush.msra.mxu1 %v4217_v41  ;;  %v7137_v31 = vld [vmem:[#allocation40_spill] sm:$0xff]  ;;  %v7147_v41 = vld [vmem:[#allocation49_spill] sm:$0xff] }
  0x6f   :  { %676 = vmatpush.msra.mxu3 %v4222_v42  ;;  %617 = vmatpush.msra.mxu0 %v4227_v44  ;;  %v7148_v42 = vld [vmem:[#allocation50_spill] sm:$0xff]  ;;  %v7150_v44 = vld [vmem:[#allocation51_spill] sm:$0xff] }
  0x70   :  { %650 = vmatpush.msra.mxu2 %v4200_v35  ;;  %637 = vmatpush.msra.mxu1 %v4229_v45  ;;  %v7141_v35 = vld [vmem:[#allocation48_spill] sm:$0xff]  ;;  %v7151_v45 = vld [vmem:[#allocation53_spill] sm:$0xff] }
  0x71   :  { %677 = vmatpush.msra.mxu3 %v4234_v46  ;;  %618 = vmatpush.msra.mxu0 %v4239_v48  ;;  %v7152_v46 = vld [vmem:[#allocation54_spill] sm:$0xff]  ;;  %v7153_v48 = vld [vmem:[#allocation60_spill] sm:$0xff] }
  0x72   :  { %651 = vmatpush.msra.mxu2 %v4212_v39  ;;  %638 = vmatpush.msra.mxu1 %v4241_v49  ;;  %v7145_v39 = vld [vmem:[#allocation52_spill] sm:$0xff]  ;;  %v7154_v49 = vld [vmem:[#allocation55_spill] sm:$0xff] }
  0x73   :  { %678 = vmatpush.msra.mxu3 %v4246_v50  ;;  %619 = vmatpush.msra.mxu0 %v4251_v52  ;;  %v7155_v50 = vld [vmem:[#allocation57_spill] sm:$0xff]  ;;  %v7156_v52 = vld [vmem:[#allocation58_spill] sm:$0xff] }
  0x74   :  { %652 = vmatpush.msra.mxu2 %v4224_v43  ;;  %639 = vmatpush.msra.mxu1 %v4253_v53  ;;  %v7149_v43 = vld [vmem:[#allocation56_spill] sm:$0xff] }
  0x75   :  { %679 = vmatpush.msra.mxu3 %v7109_v3  ;;  %620 = vmatpush.msra.mxu0 %v7110_v4  ;;  %v7157_v53 = vld [vmem:[#allocation64_spill] sm:$0xff]  ;;  %v7159_v3 = vld [vmem:[#allocation61_spill] sm:$0xff]  ;;  %v7160_v4 = vld [vmem:[#allocation62_spill] sm:$0xff] }
  0x76   :  { %653 = vmatpush.msra.mxu2 %v7111_v5  ;;  %640 = vmatpush.msra.mxu1 %v7112_v6  ;;  %v7161_v5 = vld [vmem:[#allocation68_spill] sm:$0xff]  ;;  %v7162_v6 = vld [vmem:[#allocation63_spill] sm:$0xff] }
  0x77   :  { %680 = vmatpush.msra.mxu3 %v7113_v7  ;;  %823 = vmatpush.msrb.mxu0 %v7114_v8  ;;  %v7163_v7 = vld [vmem:[#allocation65_spill] sm:$0xff]  ;;  %v7164_v8 = vld [vmem:[#allocation66_spill] sm:$0xff] }
  0x78   :  { %654 = vmatpush.msra.mxu2 %v7115_v9  ;;  %843 = vmatpush.msrb.mxu1 %v7116_v10  ;;  %v7165_v9 = vld [vmem:[#allocation67_spill] sm:$0xff]  ;;  %v7166_v10 = vld [vmem:[#allocation69_spill] sm:$0xff] }
  0x79   :  { %883 = vmatpush.msrb.mxu3 %v7117_v11  ;;  %824 = vmatpush.msrb.mxu0 %v7118_v12  ;;  %v7167_v11 = vld [vmem:[#allocation70_spill] sm:$0xff]  ;;  %v7168_v12 = vld [vmem:[#allocation71_spill] sm:$0xff] }
  0x7a   :  { %655 = vmatpush.msra.mxu2 %v7119_v13  ;;  %844 = vmatpush.msrb.mxu1 %v7120_v14 }
  0x7b   :  { %884 = vmatpush.msrb.mxu3 %v7121_v15  ;;  %825 = vmatpush.msrb.mxu0 %v7122_v16 }
  0x7c   :  { %656 = vmatpush.msra.mxu2 %v7123_v17  ;;  %845 = vmatpush.msrb.mxu1 %v7124_v18  ;;  %v104_v17 = vld [vmem:[%s6748_s0 + $0x10] sm:$0xff] }
  0x7d   :  { %885 = vmatpush.msrb.mxu3 %v7125_v19  ;;  %826 = vmatpush.msrb.mxu0 %v7126_v20 }
  0x7e   :  { %657 = vmatpush.msra.mxu2 %v7127_v21  ;;  %846 = vmatpush.msrb.mxu1 %v7128_v22 }
  0x7f   :  { %886 = vmatpush.msrb.mxu3 %v7129_v23  ;;  %827 = vmatpush.msrb.mxu0 %v7130_v24 }
  0x80   :  { %658 = vmatpush.msra.mxu2 %v7131_v25  ;;  %847 = vmatpush.msrb.mxu1 %v7132_v26 }
  0x81   :  { %887 = vmatpush.msrb.mxu3 %v7133_v27  ;;  %828 = vmatpush.msrb.mxu0 %v7134_v28 }
  0x82   :  { %659 = vmatpush.msra.mxu2 %v7135_v29  ;;  %848 = vmatpush.msrb.mxu1 %v7136_v30 }
  0x83   :  { %888 = vmatpush.msrb.mxu3 %v7137_v31  ;;  %829 = vmatpush.msrb.mxu0 %v7138_v32 }
  0x84   :  { %660 = vmatpush.msra.mxu2 %v7139_v33  ;;  %849 = vmatpush.msrb.mxu1 %v7140_v34 }
  0x85   :  { %889 = vmatpush.msrb.mxu3 %v7142_v36  ;;  %830 = vmatpush.msrb.mxu0 %v7143_v37 }
  0x86   :  { %863 = vmatpush.msrb.mxu2 %v7141_v35  ;;  %850 = vmatpush.msrb.mxu1 %v7144_v38 }
  0x87   :  { %890 = vmatpush.msrb.mxu3 %v7146_v40  ;;  %831 = vmatpush.msrb.mxu0 %v7147_v41 }
  0x88   :  { %864 = vmatpush.msrb.mxu2 %v7145_v39  ;;  %851 = vmatpush.msrb.mxu1 %v7148_v42 }
  0x89   :  { %891 = vmatpush.msrb.mxu3 %v7150_v44  ;;  %832 = vmatpush.msrb.mxu0 %v7151_v45  ;;  %v3631_v45 = vld [vmem:[%s6749_s1 + $0xe0] sm:$0xff] }
  0x8a   :  { %865 = vmatpush.msrb.mxu2 %v7149_v43  ;;  %852 = vmatpush.msrb.mxu1 %v7152_v46  ;;  %v3632_v46 = vld [vmem:[%s6749_s1 + $0xe8] sm:$0xff] }
  0x8b   :  { %892 = vmatpush.msrb.mxu3 %v7154_v49  ;;  %833 = vmatpush.msrb.mxu0 %v7155_v50 }
  0x8c   :  { %866 = vmatpush.msrb.mxu2 %v7153_v48  ;;  %853 = vmatpush.msrb.mxu1 %v7156_v52 }
  0x8d   :  { %893 = vmatpush.msrb.mxu3 %v7158_v59  ;;  %834 = vmatpush.msrb.mxu0 %v7159_v3 }
  0x8e   :  { %867 = vmatpush.msrb.mxu2 %v7157_v53  ;;  %854 = vmatpush.msrb.mxu1 %v7160_v4 }
  0x8f   :  { %894 = vmatpush.msrb.mxu3 %v7162_v6  ;;  %835 = vmatpush.msrb.mxu0 %v7163_v7 }
  0x90   :  { %868 = vmatpush.msrb.mxu2 %v7161_v5  ;;  %855 = vmatpush.msrb.mxu1 %v7164_v8 }
  0x91   :  { %895 = vmatpush.msrb.mxu3 %v7165_v9  ;;  %836 = vmatpush.msrb.mxu0 %v4426_v51  ;;  %v7170_v51 = vld [vmem:[#allocation73_spill] sm:$0xff] }
  0x92   :  { %869 = vmatpush.msrb.mxu2 %v4436_v56  ;;  %856 = vmatpush.msrb.mxu1 %v4430_v47  ;;  %v7169_v56 = vld [vmem:[#allocation72_spill] sm:$0xff] }
  0x93   :  { %896 = vmatpush.msrb.mxu3 %v7166_v10  ;;  %837 = vmatpush.msrb.mxu0 %v7167_v11  ;;  %v102_v47 = vld [vmem:[%s6748_s0] sm:$0xff]  ;;  %v3634_v11 = vld [vmem:[%s6749_s1 + $0xf8] sm:$0xff] }
  0x94   :  { %870 = vmatpush.msrb.mxu2 %v4448_v62  ;;  %857 = vmatpush.msrb.mxu1 %v4442_v61 }
  0x95   :  { %897 = vmatpush.msrb.mxu3 %v7168_v12  ;;  %838 = vmatpush.msrb.mxu0 %v4450_v55  ;;  %v103_v55 = vld [vmem:[%s6748_s0 + $0x8] sm:$0xff] }
  0x96   :  { %871 = vmatpush.msrb.mxu2 %v4462_v58  ;;  %858 = vmatpush.msrb.mxu1 %v7169_v56 }
  0x97   :  { %898 = vmatpush.msrb.mxu3 %v7170_v51 }
  0x98   :  { %872 = vmatpush.msrb.mxu2 %v4468_v60 }
  0x9a   :  { %873 = vmatpush.msrb.mxu2 %v4472_v63  ;;  %v105_v63 = vld [vmem:[%s6748_s0 + $0x18] sm:$0xff] }
  0x9c   :  { %874 = vmatpush.msrb.mxu2 %v4478_v57 }
  0x9e   :  { %875 = vmatpush.msrb.mxu2 %v4484_v54 }
  0xa0   :  { %876 = vmatpush.msrb.mxu2 %v4490_v0 }
  0xa2   :  { %877 = vmatpush.msrb.mxu2 %v4496_v1 }
  0xa4   :  { %878 = vmatpush.msrb.mxu2 %v4502_v2 }
  0xa8   :  { %v187_v58 = vpop.f32.mrf.mxu0 }
  0xa9   :  { %v250_v60 = vadd.f32 %v187_v58, %v102_v47  ;;  %v207_v61 = vpop.f32.mrf.mxu1 }
  0xaa   :  { %v251_v57 = vadd.f32 %v207_v61, %v103_v55 }
  0xab   :  { %v3628_v62 = vmul.f32 -1.442695, %v250_v60 }
  0xac   :  { %v3629_v54 = vmul.f32 -1.442695, %v251_v57 }
  0xad   :  { %3751 = vpow2.f32 %v3628_v62 }
  0xae   :  { %3753 = vpow2.f32 %v3629_v54 }
  0xb1   :  { %v247_v0 = vpop.f32.mrf.mxu3 }
  0xb2   :  { %v253_v1 = vadd.f32 %v247_v0, %v105_v63 }
  0xb3   :  { %v3752_v2 = vpop.eup %3751 }
  0xb4   :  { %v3754_v13 = vpop.eup %3753  ;;  %v257_v14 = vadd.f32 1.0, %v3752_v2  ;;  %v3630_v15 = vmul.f32 -1.442695, %v253_v1 }
  0xb5   :  { %v276_v16 = vadd.f32 1.0, %v3754_v13  ;;  %v3633_v13 = vld [vmem:[%s6749_s1 + $0xf0] sm:$0xff] }
  0xb6   :  { %3755 = vrcp.f32 %v257_v14  ;;  %vm263_vm0 = vweird.f32 %v257_v14  ;;  %v267_v22 = vand.u32 2147483647, %v257_v14  ;;  %v269_v26 = vand.u32 2147483648, %v257_v14 }
  0xb7   :  { %3757 = vrcp.f32 %v276_v16  ;;  %vm282_vm1 = vweird.f32 %v276_v16  ;;  %v288_v28 = vand.u32 2147483648, %v276_v16  ;;  %v286_v31 = vand.u32 2147483647, %v276_v16 }
  0xb8   :  { %3759 = vpow2.f32 %v3630_v15  ;;  %v270_v34 = vor.u32 1.1754944e-38, %v269_v26  ;;  %vm268_vm5 = vcmp.eq.f32.partialorder %v267_v22, 8.507059e+37 }
  0xb9   :  { %v289_v35 = vor.u32 1.1754944e-38, %v288_v28  ;;  %vm287_vm7 = vcmp.eq.f32.partialorder %v286_v31, 8.507059e+37 }
  0xbc   :  { %v3756_v18 = vpop.eup %3755 }
  0xbd   :  { %v3758_v19 = vpop.eup %3757  ;;  %v259_v20 = vmul.f32 %v3756_v18, %v257_v14  ;;  %v227_v21 = vpop.f32.mrf.mxu2  ;;  %vm264_vm2 = vweird.f32 %v3756_v18 }
  0xbe   :  { %v3760_v23 = vpop.eup %3759  ;;  %v278_v24 = vmul.f32 %v3758_v19, %v276_v16  ;;  %v252_v25 = vadd.f32 %v227_v21, %v104_v17  ;;  %vm283_vm3 = vweird.f32 %v3758_v19  ;;  %vm265_vm4 = vmor %vm263_vm0, %vm264_vm2 }
  0xbf   :  { %v260_v27 = vsub.f32 1.0, %v259_v20  ;;  %v296_v29 = vadd.f32 1.0, %v3760_v23  ;;  %vm284_vm6 = vmor %vm282_vm1, %vm283_vm3 }
  0xc0   :  { %v279_v30 = vsub.f32 1.0, %v278_v24  ;;  %3761 = vtanh.f32 %v252_v25 }
  0xc1   :  { %3763 = vrcp.f32 %v296_v29  ;;  %v261_v32 = vmul.f32 %v3756_v18, %v260_v27  ;;  %vm302_vm8 = vweird.f32 %v296_v29  ;;  %v308_v50 = vand.u32 2147483648, %v296_v29 }
  0xc2   :  { %v280_v33 = vmul.f32 %v3758_v19, %v279_v30  ;;  %v306_v59 = vand.u32 2147483647, %v296_v29 }
  0xc3   :  { %v262_v36 = vadd.f32 %v3756_v18, %v261_v32  ;;  %v309_v10 = vor.u32 1.1754944e-38, %v308_v50 }
  0xc4   :  { %v281_v37 = vadd.f32 %v3758_v19, %v280_v33  ;;  %vm307_vm11 = vcmp.eq.f32.partialorder %v306_v59, 8.507059e+37  ;;  %v4660_v59 = vld [vmem:[#allocation6 + $0x1e8] sm:$0xff] }
  0xc5   :  { %v266_v38 = vsel %vm265_vm4, %v3756_v18, %v262_v36 }
  0xc6   :  { %v3762_v39 = vpop.eup %3761  ;;  %v271_v40 = vsel %vm268_vm5, %v270_v34, %v266_v38  ;;  %v285_v41 = vsel %vm284_vm6, %v3758_v19, %v281_v37 }
  0xc7   :  { %v3764_v42 = vpop.eup %3763  ;;  %v290_v43 = vsel %vm287_vm7, %v289_v35, %v285_v41  ;;  %v313_v44 = vmul.f32 %v3762_v39, %v271_v40 }
  0xc8   :  { %v298_v48 = vmul.f32 %v3764_v42, %v296_v29  ;;  %v312_v49 = vmul.f32 0.0, %v290_v43  ;;  %vm303_vm9 = vweird.f32 %v3764_v42 }
  0xc9   :  { %vm304_vm10 = vmor %vm302_vm8, %vm303_vm9 }
  0xca   :  { %v299_v3 = vsub.f32 1.0, %v298_v48  ;;  %v4640_v4 = vadd.f32 %v313_v44, %v312_v49 }
  0xcc   :  { %v300_v7 = vmul.f32 %v3764_v42, %v299_v3  ;;  %3765 = vtanh.f32 %v4640_v4  ;;  %v4662_v3 = vld [vmem:[#allocation6 + $0x1f0] sm:$0xff] }
  0xce   :  { %v301_v12 = vadd.f32 %v3764_v42, %v300_v7  ;;  %v4672_v7 = vld [vmem:[#allocation6 + $0x1c8] sm:$0xff] }
  0xd0   :  { %v305_v51 = vsel %vm304_vm10, %v3764_v42, %v301_v12  ;;  %v4688_v12 = vld [vmem:[#allocation6 + $0x1b0] sm:$0xff] }
  0xd1   :  { %v404_v52 = vpop.f32.mrf.mxu0  ;;  %v310_v55 = vsel %vm307_vm11, %v309_v10, %v305_v51  ;;  %v4682_v10 = vld [vmem:[#allocation6 + $0x1a0] sm:$0xff] }
  0xd2   :  { %v424_v53 = vpop.f32.mrf.mxu1  ;;  %v467_v5 = vadd.f32 %v3631_v45, %v404_v52  ;;  %v3766_v58 = vpop.eup %3765  ;;  %v4694_v51 = vld [vmem:[#allocation6 + $0x180] sm:$0xff] }
  0xd3   :  { %v468_v6 = vadd.f32 %v3632_v46, %v424_v53  ;;  %v316_v61 = vmul.f32 %v3766_v58, %v310_v55  ;;  %v4658_v53 = vld [vmem:[#allocation6 + $0x1e0] sm:$0xff]  ;;  %v4698_v55 = vld [vmem:[#allocation6 + $0x190] sm:$0xff]  ;;  %v4702_v58 = vld [vmem:[#allocation6 + $0x198] sm:$0xff] }
  0xd4   :  { %v3635_v8 = vmul.f32 -1.442695, %v467_v5  ;;  %v4666_v5 = vld [vmem:[#allocation6 + $0x1f8] sm:$0xff] }
  0xd5   :  { %v3636_v9 = vmul.f32 -1.442695, %v468_v6  ;;  %317 = vst [vmem:[%s6752_s4] sm:$0xff] %v316_v61  ;;  %621 = vmatmul.f32.vlgmr.msra.gmra.mxu0 %v316_v61  ;;  %641 = vmatmul.f32.vlgmr.msra.gmra.mxu1 %v316_v61  ;;  %v4670_v6 = vld [vmem:[#allocation6 + $0x1c0] sm:$0xff] }
  0xd6   :  { %3767 = vpow2.f32 %v3635_v8  ;;  %681 = vmatmul.f32.vlgmr.msra.gmra.mxu3 %v316_v61  ;;  %661 = vmatmul.f32.vlgmr.msra.gmra.mxu2 %v316_v61  ;;  %v4674_v8 = vld [vmem:[#allocation6 + $0x1d0] sm:$0xff]  ;;  %v4708_v61 = vld [vmem:[#allocation6 + $0x168] sm:$0xff] }
  0xd7   :  { %3769 = vpow2.f32 %v3636_v9  ;;  %1041 = vmatpush.msra.mxu0 %v4658_v53  ;;  %1061 = vmatpush.msra.mxu1 %v4660_v59  ;;  %v4678_v9 = vld [vmem:[#allocation6 + $0x1d8] sm:$0xff] }
  0xd8   :  { %1081 = vmatpush.msra.mxu2 %v4662_v3  ;;  %1101 = vmatpush.msra.mxu3 %v4666_v5 }
  0xd9   :  { %v464_v56 = vpop.f32.mrf.mxu3  ;;  %1042 = vmatpush.msra.mxu0 %v4670_v6  ;;  %1062 = vmatpush.msra.mxu1 %v4672_v7 }
  0xda   :  { %v470_v47 = vadd.f32 %v3634_v11, %v464_v56  ;;  %1082 = vmatpush.msra.mxu2 %v4674_v8  ;;  %1102 = vmatpush.msra.mxu3 %v4678_v9  ;;  %v4684_v11 = vld [vmem:[#allocation6 + $0x1a8] sm:$0xff]  ;;  %v4690_v56 = vld [vmem:[#allocation6 + $0x1b8] sm:$0xff] }
  0xdb   :  { %1043 = vmatpush.msra.mxu0 %v4682_v10  ;;  %1063 = vmatpush.msra.mxu1 %v4684_v11 }
  0xdc   :  { %v3637_v60 = vmul.f32 -1.442695, %v470_v47  ;;  %v3768_v57 = vpop.eup %3767  ;;  %1083 = vmatpush.msra.mxu2 %v4688_v12  ;;  %1103 = vmatpush.msra.mxu3 %v4690_v56  ;;  %v4696_v47 = vld [vmem:[#allocation6 + $0x188] sm:$0xff] }
  0xdd   :  { %v3770_v62 = vpop.eup %3769  ;;  %v474_v54 = vadd.f32 1.0, %v3768_v57  ;;  %1044 = vmatpush.msra.mxu0 %v4694_v51  ;;  %1064 = vmatpush.msra.mxu1 %v4696_v47  ;;  %v4710_v57 = vld [vmem:[#allocation6 + $0x170] sm:$0xff] }
  0xde   :  { %3771 = vpow2.f32 %v3637_v60  ;;  %v493_v63 = vadd.f32 1.0, %v3770_v62  ;;  %1084 = vmatpush.msra.mxu2 %v4698_v55  ;;  %1104 = vmatpush.msra.mxu3 %v4702_v58  ;;  %v4706_v60 = vld [vmem:[#allocation6 + $0x160] sm:$0xff]  ;;  %v4714_v62 = vld [vmem:[#allocation6 + $0x178] sm:$0xff] }
  0xdf   :  { %3773 = vrcp.f32 %v474_v54  ;;  %v484_v21 = vand.u32 2147483647, %v474_v54  ;;  %v486_v22 = vand.u32 2147483648, %v474_v54  ;;  %vm480_vm14 = vweird.f32 %v474_v54  ;;  %1045 = vmatpush.msra.mxu0 %v4706_v60  ;;  %1065 = vmatpush.msra.mxu1 %v4708_v61 }
  0xe0   :  { %3775 = vrcp.f32 %v493_v63  ;;  %v505_v23 = vand.u32 2147483648, %v493_v63  ;;  %v503_v26 = vand.u32 2147483647, %v493_v63  ;;  %vm499_vm15 = vweird.f32 %v493_v63  ;;  %1085 = vmatpush.msra.mxu2 %v4710_v57  ;;  %1105 = vmatpush.msra.mxu3 %v4714_v62 }
  0xe1   :  { %v487_v30 = vor.u32 1.1754944e-38, %v486_v22  ;;  %vm485_vm1 = vcmp.eq.f32.partialorder %v484_v21, 8.507059e+37  ;;  %v4756_v21 = vld [vmem:[#allocation6 + $0x118] sm:$0xff]  ;;  %v4760_v22 = vld [vmem:[#allocation6 + $0xe0] sm:$0xff] }
  0xe2   :  { %v506_v32 = vor.u32 1.1754944e-38, %v505_v23  ;;  %vm504_vm3 = vcmp.eq.f32.partialorder %v503_v26, 8.507059e+37  ;;  %v4762_v23 = vld [vmem:[#allocation6 + $0xe8] sm:$0xff] }
  0xe4   :  { %v3772_v0 = vpop.eup %3771 }
  0xe5   :  { %v513_v1 = vadd.f32 1.0, %v3772_v0  ;;  %v3774_v2 = vpop.eup %3773  ;;  %v4722_v0 = vld [vmem:[#allocation6 + $0x150] sm:$0xff] }
  0xe6   :  { %v3776_v14 = vpop.eup %3775  ;;  %v476_v15 = vmul.f32 %v3774_v2, %v474_v54  ;;  %vm481_vm12 = vweird.f32 %v3774_v2  ;;  %v4718_v54 = vld [vmem:[#allocation6 + $0x140] sm:$0xff]  ;;  %1086 = vmatpush.msra.mxu2 %v4722_v0 }
  0xe7   :  { %3777 = vrcp.f32 %v513_v1  ;;  %v495_v16 = vmul.f32 %v3776_v14, %v493_v63  ;;  %vm500_vm13 = vweird.f32 %v3776_v14  ;;  %vm482_vm0 = vmor %vm480_vm14, %vm481_vm12  ;;  %v525_v44 = vand.u32 2147483648, %v513_v1  ;;  %v4720_v63 = vld [vmem:[#allocation6 + $0x148] sm:$0xff]  ;;  %1046 = vmatpush.msra.mxu0 %v4718_v54 }
  0xe8   :  { %v444_v17 = vpop.f32.mrf.mxu2  ;;  %v477_v18 = vsub.f32 1.0, %v476_v15  ;;  %vm501_vm2 = vmor %vm499_vm15, %vm500_vm13  ;;  %vm519_vm5 = vweird.f32 %v513_v1  ;;  %v523_v45 = vand.u32 2147483647, %v513_v1  ;;  %1066 = vmatpush.msra.mxu1 %v4720_v63  ;;  %v4738_v15 = vld [vmem:[#allocation6 + $0x138] sm:$0xff] }
  0xe9   :  { %v469_v19 = vadd.f32 %v3633_v13, %v444_v17  ;;  %v496_v20 = vsub.f32 1.0, %v495_v16  ;;  %v526_v48 = vor.u32 1.1754944e-38, %v525_v44  ;;  %v4732_v13 = vld [vmem:[#allocation6 + $0x128] sm:$0xff]  ;;  %v4742_v16 = vld [vmem:[#allocation6 + $0x100] sm:$0xff]  ;;  %v4803_v44 = vld [vmem:[#allocation6 + $0x90] sm:$0xff] }
  0xea   :  { %v478_v24 = vmul.f32 %v3774_v2, %v477_v18  ;;  %vm524_vm7 = vcmp.eq.f32.partialorder %v523_v45, 8.507059e+37  ;;  %1067 = vmatpush.msra.mxu1 %v4732_v13  ;;  %v4744_v17 = vld [vmem:[#allocation6 + $0x108] sm:$0xff]  ;;  %v4746_v18 = vld [vmem:[#allocation6 + $0x110] sm:$0xff]  ;;  %7180 = vst [vmem:[#allocation22_spill] sm:$0xff] %v4803_v44  ;;  %v4807_v45 = vld [vmem:[#allocation6 + $0x98] sm:$0xff] }
  0xeb   :  { %3779 = vtanh.f32 %v469_v19  ;;  %v497_v25 = vmul.f32 %v3776_v14, %v496_v20  ;;  %v3639_v19 = vld [vmem:[%s6748_s0 + $0x20] sm:$0xff]  ;;  %v3640_v20 = vld [vmem:[%s6748_s0 + $0x28] sm:$0xff]  ;;  %7181 = vst [vmem:[#allocation15_spill] sm:$0xff] %v4807_v45 }
  0xec   :  { %v479_v28 = vadd.f32 %v3774_v2, %v478_v24  ;;  %1068 = vmatpush.msra.mxu1 %v4744_v17  ;;  %v4764_v24 = vld [vmem:[#allocation6 + $0xf0] sm:$0xff] }
  0xed   :  { %v3778_v27 = vpop.eup %3777  ;;  %v498_v31 = vadd.f32 %v3776_v14, %v497_v25 }
  0xee   :  { %v515_v29 = vmul.f32 %v3778_v27, %v513_v1  ;;  %v483_v33 = vsel %vm482_vm0, %v3774_v2, %v479_v28  ;;  %vm520_vm4 = vweird.f32 %v3778_v27  ;;  %v4726_v1 = vld [vmem:[#allocation6 + $0x158] sm:$0xff]  ;;  %v4730_v2 = vld [vmem:[#allocation6 + $0x120] sm:$0xff]  ;;  %1069 = vmatpush.msra.mxu1 %v4762_v23 }
  0xef   :  { %v488_v35 = vsel %vm485_vm1, %v487_v30, %v483_v33  ;;  %v502_v36 = vsel %vm501_vm2, %v3776_v14, %v498_v31  ;;  %vm521_vm6 = vmor %vm519_vm5, %vm520_vm4  ;;  %1106 = vmatpush.msra.mxu3 %v4726_v1  ;;  %v4734_v14 = vld [vmem:[#allocation6 + $0x130] sm:$0xff]  ;;  %1047 = vmatpush.msra.mxu0 %v4730_v2  ;;  %v4772_v30 = vld [vmem:[#allocation6 + $0xc0] sm:$0xff] }
  0xf0   :  { %v516_v34 = vsub.f32 1.0, %v515_v29  ;;  %v507_v38 = vsel %vm504_vm3, %v506_v32, %v502_v36  ;;  %1087 = vmatpush.msra.mxu2 %v4734_v14  ;;  %v4774_v31 = vld [vmem:[#allocation6 + $0xc8] sm:$0xff]  ;;  %v4776_v32 = vld [vmem:[#allocation6 + $0xd0] sm:$0xff]  ;;  %v4780_v33 = vld [vmem:[#allocation6 + $0xd8] sm:$0xff] }
  0xf1   :  { %v3780_v37 = vpop.eup %3779  ;;  %v529_v40 = vmul.f32 0.0, %v507_v38  ;;  %1107 = vmatpush.msra.mxu3 %v4738_v15  ;;  %1048 = vmatpush.msra.mxu0 %v4742_v16  ;;  %7171 = vst [vmem:[#allocation14_spill] sm:$0xff] %v4774_v31  ;;  %v4784_v36 = vld [vmem:[#allocation6 + $0xa0] sm:$0xff]  ;;  %v3642_v38 = vld [vmem:[%s6748_s0 + $0x38] sm:$0xff] }
  0xf2   :  { %v517_v39 = vmul.f32 %v3778_v27, %v516_v34  ;;  %v530_v41 = vmul.f32 %v3780_v37, %v488_v35  ;;  %1088 = vmatpush.msra.mxu2 %v4746_v18  ;;  %7172 = vst [vmem:[#allocation16_spill] sm:$0xff] %v4776_v32  ;;  %1070 = vmatpush.msra.mxu1 %v4774_v31  ;;  %v4786_v37 = vld [vmem:[#allocation6 + $0xa8] sm:$0xff] }
  0xf3   :  { %1108 = vmatpush.msra.mxu3 %v4756_v21  ;;  %1049 = vmatpush.msra.mxu0 %v4760_v22  ;;  %7173 = vst [vmem:[#allocation12_spill] sm:$0xff] %v4780_v33 }
  0xf4   :  { %v4652_v42 = vadd.f32 %v530_v41, %v529_v40  ;;  %v518_v43 = vadd.f32 %v3778_v27, %v517_v39  ;;  %1089 = vmatpush.msra.mxu2 %v4764_v24  ;;  %7174 = vst [vmem:[#allocation17_spill] sm:$0xff] %v4784_v36  ;;  %1071 = vmatpush.msra.mxu1 %v4786_v37  ;;  %v4793_v39 = vld [vmem:[#allocation6 + $0xb0] sm:$0xff]  ;;  %v4795_v40 = vld [vmem:[#allocation6 + $0xb8] sm:$0xff]  ;;  %v4799_v41 = vld [vmem:[#allocation6 + $0x80] sm:$0xff] }
  0xf5   :  { %1050 = vmatpush.msra.mxu0 %v4772_v30  ;;  %7175 = vst [vmem:[#allocation18_spill] sm:$0xff] %v4786_v37 }
  0xf6   :  { %3781 = vtanh.f32 %v4652_v42  ;;  %v522_v46 = vsel %vm521_vm6, %v3778_v27, %v518_v43  ;;  %v4768_v27 = vld [vmem:[#allocation6 + $0xf8] sm:$0xff]  ;;  %1090 = vmatpush.msra.mxu2 %v4776_v32  ;;  %7176 = vst [vmem:[#allocation19_spill] sm:$0xff] %v4793_v39  ;;  %v4801_v43 = vld [vmem:[#allocation6 + $0x88] sm:$0xff] }
  0xf7   :  { %v527_v50 = vsel %vm524_vm7, %v526_v48, %v522_v46  ;;  %1109 = vmatpush.msra.mxu3 %v4768_v27  ;;  %1051 = vmatpush.msra.mxu0 %v4784_v36  ;;  %7177 = vst [vmem:[#allocation13_spill] sm:$0xff] %v4795_v40  ;;  %v4963_v36 = vld [vmem:[#allocation8 + $0x128] sm:$0xff] }
  0xf8   :  { %1091 = vmatpush.msra.mxu2 %v4793_v39  ;;  %7178 = vst [vmem:[#allocation20_spill] sm:$0xff] %v4799_v41  ;;  %1072 = vmatpush.msra.mxu1 %v4801_v43  ;;  %v3648_v32 = vld [vmem:[%s6749_s1 + $0xc8] sm:$0xff] }
  0xf9   :  { %1110 = vmatpush.msra.mxu3 %v4780_v33  ;;  %7179 = vst [vmem:[#allocation21_spill] sm:$0xff] %v4801_v43  ;;  %1052 = vmatpush.msra.mxu0 %v4799_v41  ;;  %v4965_v33 = vld [vmem:[#allocation8 + $0x130] sm:$0xff] }
  0xfa   :  { %1092 = vmatpush.msra.mxu2 %v4803_v44  ;;  %v4895_v44 = vld [vmem:[#allocation8 + $0x1b0] sm:$0xff] }
  0xfb   :  { %1111 = vmatpush.msra.mxu3 %v4795_v40  ;;  %7208 = vst [vmem:[#allocation47_spill] sm:$0xff] %v4895_v44 }
  0xfc   :  { %v3782_v49 = vpop.eup %3781 }
  0xfd   :  { %v533_v52 = vmul.f32 %v3782_v49, %v527_v50  ;;  %1112 = vmatpush.msra.mxu3 %v4807_v45  ;;  %v4811_v49 = vld [vmem:[#allocation6 + $0x60] sm:$0xff]  ;;  %v4814_v50 = vld [vmem:[#allocation6 + $0x68] sm:$0xff] }
  0xfe   :  { %7182 = vst [vmem:[#allocation23_spill] sm:$0xff] %v4811_v49  ;;  %1053 = vmatpush.msra.mxu0 %v4811_v49  ;;  %1073 = vmatpush.msra.mxu1 %v4814_v50  ;;  %v4881_v49 = vld [vmem:[#allocation8 + $0x1d0] sm:$0xff] }
  0xff   :  { %3638 = vst [vmem:[%s6753_s5 + $0x38] sm:$0xff] %v533_v52  ;;  %839 = vmatmul.f32.vlgmr.msrb.gmra.mxu0 %v533_v52  ;;  %859 = vmatmul.f32.vlgmr.msrb.gmra.mxu1 %v533_v52 }
 0x100   :  { %879 = vmatmul.f32.vlgmr.msrb.gmra.mxu2 %v533_v52  ;;  %899 = vmatmul.f32.vlgmr.msrb.gmra.mxu3 %v533_v52  ;;  %7183 = vst [vmem:[#allocation24_spill] sm:$0xff] %v4814_v50  ;;  %v4816_v52 = vld [vmem:[#allocation6 + $0x70] sm:$0xff] }
 0x101   :  { %7184 = vst [vmem:[#allocation25_spill] sm:$0xff] %v4816_v52  ;;  %1093 = vmatpush.msra.mxu2 %v4816_v52  ;;  %v4840_v52 = vld [vmem:[#allocation6 + $0x30] sm:$0xff] }
 0x102   :  { %7192 = vst [vmem:[#allocation33_spill] sm:$0xff] %v4840_v52 }
 0x103   :  { %7204 = vst [vmem:[#allocation44_spill] sm:$0xff] %v4881_v49 }
 0x152   :  { %v622_v25 = vpop.f32.mrf.mxu0  ;;  %v642_v26 = vpop.f32.mrf.mxu1 }
 0x153   :  { %v685_v28 = vadd.f32 %v3639_v19, %v622_v25  ;;  %v686_v29 = vadd.f32 %v3640_v20, %v642_v26  ;;  %v4818_v19 = vld [vmem:[#allocation6 + $0x78] sm:$0xff]  ;;  %v4822_v25 = vld [vmem:[#allocation6 + $0x40] sm:$0xff]  ;;  %v4824_v26 = vld [vmem:[#allocation6 + $0x48] sm:$0xff] }
 0x154   :  { %7185 = vst [vmem:[#allocation26_spill] sm:$0xff] %v4818_v19  ;;  %1113 = vmatpush.msra.mxu3 %v4818_v19  ;;  %1054 = vmatpush.msra.mxu0 %v4822_v25  ;;  %v4879_v19 = vld [vmem:[#allocation8 + $0x1c8] sm:$0xff] }
 0x155   :  { %v3643_v34 = vmul.f32 -1.442695, %v685_v28  ;;  %v3644_v35 = vmul.f32 -1.442695, %v686_v29  ;;  %7186 = vst [vmem:[#allocation27_spill] sm:$0xff] %v4822_v25  ;;  %v4826_v28 = vld [vmem:[#allocation6 + $0x50] sm:$0xff]  ;;  %1074 = vmatpush.msra.mxu1 %v4824_v26 }
 0x156   :  { %7187 = vst [vmem:[#allocation28_spill] sm:$0xff] %v4824_v26  ;;  %1094 = vmatpush.msra.mxu2 %v4826_v28  ;;  %v4846_v25 = vld [vmem:[#allocation6 + $0x38] sm:$0xff] }
 0x157   :  { %3783 = vpow2.f32 %v3643_v34  ;;  %7188 = vst [vmem:[#allocation29_spill] sm:$0xff] %v4826_v28  ;;  %v4830_v34 = vld [vmem:[#allocation6 + $0x58] sm:$0xff]  ;;  %v4855_v28 = vld [vmem:[#allocation6 + $0x10] sm:$0xff] }
 0x158   :  { %3785 = vpow2.f32 %v3644_v35  ;;  %7189 = vst [vmem:[#allocation30_spill] sm:$0xff] %v4830_v34  ;;  %1114 = vmatpush.msra.mxu3 %v4830_v34  ;;  %1095 = vmatpush.msra.mxu2 %v4840_v52  ;;  %v4864_v34 = vld [vmem:[#allocation8 + $0x1e8] sm:$0xff]  ;;  %v3641_v52 = vld [vmem:[%s6748_s0 + $0x30] sm:$0xff]  ;;  %v4873_v26 = vld [vmem:[#allocation8 + $0x1f8] sm:$0xff] }
 0x159   :  { %v682_v46 = vpop.f32.mrf.mxu3  ;;  %7193 = vst [vmem:[#allocation34_spill] sm:$0xff] %v4846_v25 }
 0x15a   :  { %v688_v48 = vadd.f32 %v3642_v38, %v682_v46  ;;  %v4836_v46 = vld [vmem:[#allocation6 + $0x20] sm:$0xff]  ;;  %7196 = vst [vmem:[#allocation37_spill] sm:$0xff] %v4855_v28  ;;  %1115 = vmatpush.msra.mxu3 %v4846_v25  ;;  %1096 = vmatpush.msra.mxu2 %v4855_v28  ;;  %v662_v25 = vpop.f32.mrf.mxu2  ;;  %v4885_v28 = vld [vmem:[#allocation8 + $0x1d8] sm:$0xff] }
 0x15b   :  { %7190 = vst [vmem:[#allocation31_spill] sm:$0xff] %v4836_v46  ;;  %1055 = vmatpush.msra.mxu0 %v4836_v46  ;;  %v4862_v46 = vld [vmem:[#allocation8 + $0x1e0] sm:$0xff]  ;;  %v687_v41 = vadd.f32 %v3641_v52, %v662_v25  ;;  %v4912_v52 = vld [vmem:[#allocation8 + $0x188] sm:$0xff]  ;;  %v4914_v25 = vld [vmem:[#allocation8 + $0x190] sm:$0xff] }
 0x15c   :  { %v3645_v20 = vmul.f32 -1.442695, %v688_v48  ;;  %v4838_v48 = vld [vmem:[#allocation6 + $0x28] sm:$0xff]  ;;  %7198 = vst [vmem:[#allocation39_spill] sm:$0xff] %v4862_v46 }
 0x15d   :  { %v3784_v29 = vpop.eup %3783  ;;  %7191 = vst [vmem:[#allocation32_spill] sm:$0xff] %v4838_v48  ;;  %1075 = vmatpush.msra.mxu1 %v4838_v48  ;;  %v4871_v48 = vld [vmem:[#allocation8 + $0x1f0] sm:$0xff] }
 0x15e   :  { %v3786_v35 = vpop.eup %3785  ;;  %v4832_v38 = vadd.f32 1.0, %v3784_v29  ;;  %3787 = vpow2.f32 %v3645_v20  ;;  %v4851_v20 = vld [vmem:[#allocation6] sm:$0xff]  ;;  %v4853_v29 = vld [vmem:[#allocation6 + $0x8] sm:$0xff]  ;;  %7199 = vst [vmem:[#allocation40_spill] sm:$0xff] %v4864_v34  ;;  %1299 = vmatpush.msrb.mxu2 %v4871_v48 }
 0x15f   :  { %v4842_v50 = vadd.f32 1.0, %v3786_v35  ;;  %7194 = vst [vmem:[#allocation35_spill] sm:$0xff] %v4851_v20  ;;  %1056 = vmatpush.msra.mxu0 %v4851_v20  ;;  %v4860_v35 = vld [vmem:[#allocation6 + $0x18] sm:$0xff]  ;;  %1076 = vmatpush.msra.mxu1 %v4853_v29  ;;  %v4877_v20 = vld [vmem:[#allocation8 + $0x1c0] sm:$0xff] }
 0x160   :  { %3789 = vrcp.f32 %v4832_v38  ;;  %7195 = vst [vmem:[#allocation36_spill] sm:$0xff] %v4853_v29  ;;  %1116 = vmatpush.msra.mxu3 %v4860_v35  ;;  %1300 = vmatpush.msrb.mxu2 %v4881_v49  ;;  %vm698_vm8 = vweird.f32 %v4832_v38  ;;  %v704_v39 = vand.u32 2147483648, %v4832_v38 }
 0x161   :  { %3791 = vrcp.f32 %v4842_v50  ;;  %7197 = vst [vmem:[#allocation38_spill] sm:$0xff] %v4860_v35  ;;  %1259 = vmatpush.msrb.mxu0 %v4862_v46  ;;  %1279 = vmatpush.msrb.mxu1 %v4864_v34  ;;  %v4891_v46 = vld [vmem:[#allocation8 + $0x1a0] sm:$0xff]  ;;  %v4893_v35 = vld [vmem:[#allocation8 + $0x1a8] sm:$0xff]  ;;  %vm717_vm10 = vweird.f32 %v4842_v50 }
 0x162   :  { %7200 = vst [vmem:[#allocation41_spill] sm:$0xff] %v4871_v48  ;;  %1319 = vmatpush.msrb.mxu3 %v4873_v26  ;;  %v4901_v48 = vld [vmem:[#allocation8 + $0x1b8] sm:$0xff]  ;;  %1301 = vmatpush.msrb.mxu2 %v4895_v44  ;;  %v4932_v44 = vld [vmem:[#allocation8 + $0x170] sm:$0xff] }
 0x163   :  { %7201 = vst [vmem:[#allocation42_spill] sm:$0xff] %v4873_v26  ;;  %1260 = vmatpush.msrb.mxu0 %v4877_v20  ;;  %1280 = vmatpush.msrb.mxu1 %v4879_v19  ;;  %v4910_v26 = vld [vmem:[#allocation8 + $0x180] sm:$0xff] }
 0x164   :  { %7202 = vst [vmem:[#allocation43_spill] sm:$0xff] %v4877_v20  ;;  %v3788_v45 = vpop.eup %3787  ;;  %1320 = vmatpush.msrb.mxu3 %v4885_v28  ;;  %1302 = vmatpush.msrb.mxu2 %v4914_v25 }
 0x165   :  { %7203 = vst [vmem:[#allocation48_spill] sm:$0xff] %v4879_v19  ;;  %v4887_v29 = vadd.f32 1.0, %v3788_v45  ;;  %1261 = vmatpush.msrb.mxu0 %v4891_v46  ;;  %1281 = vmatpush.msrb.mxu1 %v4893_v35  ;;  %v4920_v19 = vld [vmem:[#allocation8 + $0x198] sm:$0xff] }
 0x166   :  { %7205 = vst [vmem:[#allocation45_spill] sm:$0xff] %v4885_v28  ;;  %v4897_v43 = vpop.eup %3789  ;;  %1321 = vmatpush.msrb.mxu3 %v4901_v48  ;;  %v4926_v28 = vld [vmem:[#allocation8 + $0x168] sm:$0xff]  ;;  %1303 = vmatpush.msrb.mxu2 %v4932_v44 }
 0x167   :  { %7206 = vst [vmem:[#allocation46_spill] sm:$0xff] %v4891_v46  ;;  %v4903_v45 = vpop.eup %3791  ;;  %v694_v20 = vmul.f32 %v4897_v43, %v4832_v38  ;;  %3793 = vrcp.f32 %v4887_v29  ;;  %1262 = vmatpush.msrb.mxu0 %v4910_v26  ;;  %v4924_v46 = vld [vmem:[#allocation8 + $0x160] sm:$0xff]  ;;  %1282 = vmatpush.msrb.mxu1 %v4912_v52  ;;  %vm699_vm9 = vweird.f32 %v4897_v43  ;;  %vm737_vm0 = vweird.f32 %v4887_v29 }
 0x168   :  { %7207 = vst [vmem:[#allocation52_spill] sm:$0xff] %v4893_v35  ;;  %v713_v49 = vmul.f32 %v4903_v45, %v4842_v50  ;;  %3795 = vtanh.f32 %v687_v41  ;;  %1322 = vmatpush.msrb.mxu3 %v4920_v19  ;;  %v4942_v41 = vld [vmem:[#allocation8 + $0x140] sm:$0xff]  ;;  %vm718_vm11 = vweird.f32 %v4903_v45  ;;  %vm4973_vm12 = vmor %vm698_vm8, %vm699_vm9 }
 0x169   :  { %7209 = vst [vmem:[#allocation49_spill] sm:$0xff] %v4901_v48  ;;  %v695_v34 = vsub.f32 1.0, %v694_v20  ;;  %v4934_v20 = vld [vmem:[#allocation8 + $0x178] sm:$0xff]  ;;  %1263 = vmatpush.msrb.mxu0 %v4924_v46  ;;  %1283 = vmatpush.msrb.mxu1 %v4926_v28  ;;  %vm4986_vm13 = vmor %vm717_vm10, %vm718_vm11 }
 0x16a   :  { %7210 = vst [vmem:[#allocation50_spill] sm:$0xff] %v4910_v26  ;;  %v714_v40 = vsub.f32 1.0, %v713_v49  ;;  %v723_v26 = vand.u32 2147483648, %v4842_v50  ;;  %v702_v49 = vand.u32 2147483647, %v4832_v38  ;;  %1323 = vmatpush.msrb.mxu3 %v4934_v20 }
 0x16b   :  { %7211 = vst [vmem:[#allocation56_spill] sm:$0xff] %v4912_v52  ;;  %v696_v48 = vmul.f32 %v4897_v43, %v695_v34  ;;  %v4944_v52 = vld [vmem:[#allocation8 + $0x148] sm:$0xff]  ;;  %v721_v34 = vand.u32 2147483647, %v4842_v50  ;;  %1264 = vmatpush.msrb.mxu0 %v4942_v41 }
 0x16c   :  { %7212 = vst [vmem:[#allocation51_spill] sm:$0xff] %v4914_v25  ;;  %v4946_v25 = vld [vmem:[#allocation8 + $0x150] sm:$0xff]  ;;  %v715_v35 = vmul.f32 %v4903_v45, %v714_v40  ;;  %v4961_v40 = vld [vmem:[#allocation8 + $0x120] sm:$0xff]  ;;  %1284 = vmatpush.msrb.mxu1 %v4944_v52  ;;  %v724_v38 = vor.u32 1.1754944e-38, %v723_v26  ;;  %vm703_vm14 = vcmp.eq.f32.partialorder %v702_v49, 8.507059e+37 }
 0x16d   :  { %7213 = vst [vmem:[#allocation53_spill] sm:$0xff] %v4920_v19  ;;  %v4954_v19 = vld [vmem:[#allocation8 + $0x158] sm:$0xff]  ;;  %v697_v37 = vadd.f32 %v4897_v43, %v696_v48  ;;  %v705_v48 = vor.u32 1.1754944e-38, %v704_v39  ;;  %1304 = vmatpush.msrb.mxu2 %v4946_v25  ;;  %1265 = vmatpush.msrb.mxu0 %v4961_v40  ;;  %vm722_vm15 = vcmp.eq.f32.partialorder %v721_v34, 8.507059e+37 }
 0x16e   :  { %7214 = vst [vmem:[#allocation54_spill] sm:$0xff] %v4924_v46  ;;  %v4956_v46 = vpop.eup %3793  ;;  %1324 = vmatpush.msrb.mxu3 %v4954_v19  ;;  %1285 = vmatpush.msrb.mxu1 %v4963_v36 }
 0x16f   :  { %7215 = vst [vmem:[#allocation60_spill] sm:$0xff] %v4926_v28  ;;  %v733_v28 = vmul.f32 %v4956_v46, %v4887_v29  ;;  %v701_v39 = vsel %vm4973_vm12, %v4897_v43, %v697_v37  ;;  %v3647_v37 = vld [vmem:[%s6749_s1 + $0xc0] sm:$0xff]  ;;  %1305 = vmatpush.msrb.mxu2 %v4965_v33  ;;  %v5007_v43 = vld [vmem:[#allocation8 + $0x110] sm:$0xff]  ;;  %vm738_vm1 = vweird.f32 %v4956_v46 }
 0x170   :  { %7216 = vst [vmem:[#allocation55_spill] sm:$0xff] %v4932_v44  ;;  %v706_v31 = vsel %vm703_vm14, %v705_v48, %v701_v39  ;;  %v5009_v44 = vld [vmem:[#allocation8 + $0x118] sm:$0xff]  ;;  %vm5072_vm2 = vmor %vm737_vm0, %vm738_vm1 }
 0x171   :  { %7217 = vst [vmem:[#allocation57_spill] sm:$0xff] %v4934_v20  ;;  %v4980_v20 = vld [vmem:[#allocation8 + $0x138] sm:$0xff]  ;;  %v734_v50 = vsub.f32 1.0, %v733_v28  ;;  %1306 = vmatpush.msrb.mxu2 %v5007_v43 }
 0x172   :  { %7218 = vst [vmem:[#allocation58_spill] sm:$0xff] %v4942_v41  ;;  %v716_v41 = vadd.f32 %v4903_v45, %v715_v35  ;;  %v4995_v35 = vld [vmem:[#allocation8 + $0x100] sm:$0xff]  ;;  %1325 = vmatpush.msrb.mxu3 %v4980_v20 }
 0x173   :  { %7219 = vst [vmem:[#allocation64_spill] sm:$0xff] %v4944_v52  ;;  %v3796_v52 = vpop.eup %3795  ;;  %1266 = vmatpush.msrb.mxu0 %v4995_v35  ;;  %v735_v34 = vmul.f32 %v4956_v46, %v734_v50 }
 0x174   :  { %7220 = vst [vmem:[#allocation59_spill] sm:$0xff] %v4946_v25  ;;  %v4997_v25 = vld [vmem:[#allocation8 + $0x108] sm:$0xff]  ;;  %v720_v26 = vsel %vm4986_vm13, %v4903_v45, %v716_v41  ;;  %v748_v28 = vmul.f32 %v3796_v52, %v706_v31  ;;  %v5016_v45 = vld [vmem:[#allocation8 + $0xe0] sm:$0xff]  ;;  %v5024_v31 = vld [vmem:[#allocation8 + $0xf0] sm:$0xff]  ;;  %1326 = vmatpush.msrb.mxu3 %v5009_v44 }
 0x175   :  { %7225 = vst [vmem:[#allocation61_spill] sm:$0xff] %v4995_v35  ;;  %v725_v49 = vsel %vm722_vm15, %v724_v38, %v720_v26  ;;  %v5018_v41 = vld [vmem:[#allocation8 + $0xe8] sm:$0xff]  ;;  %1286 = vmatpush.msrb.mxu1 %v4997_v25  ;;  %v5026_v52 = vld [vmem:[#allocation8 + $0xf8] sm:$0xff]  ;;  %1267 = vmatpush.msrb.mxu0 %v5016_v45  ;;  %v5030_v26 = vld [vmem:[#allocation8 + $0xc0] sm:$0xff] }
 0x176   :  { %7226 = vst [vmem:[#allocation62_spill] sm:$0xff] %v4997_v25  ;;  %v747_v48 = vmul.f32 %v725_v49, %v4640_v4  ;;  %v5032_v35 = vld [vmem:[#allocation8 + $0xc8] sm:$0xff]  ;;  %v5039_v25 = vld [vmem:[#allocation8 + $0xd8] sm:$0xff]  ;;  %1307 = vmatpush.msrb.mxu2 %v5024_v31  ;;  %1327 = vmatpush.msrb.mxu3 %v5026_v52 }
 0x177   :  { %7227 = vst [vmem:[#allocation68_spill] sm:$0xff] %v5007_v43  ;;  %1287 = vmatpush.msrb.mxu1 %v5018_v41  ;;  %v5037_v43 = vld [vmem:[#allocation8 + $0xd0] sm:$0xff]  ;;  %1268 = vmatpush.msrb.mxu0 %v5030_v26 }
 0x178   :  { %7228 = vst [vmem:[#allocation63_spill] sm:$0xff] %v5009_v44  ;;  %v5034_v50 = vadd.f32 %v748_v28, %v747_v48  ;;  %v736_v44 = vadd.f32 %v4956_v46, %v735_v34  ;;  %v5049_v28 = vld [vmem:[#allocation8 + $0xa8] sm:$0xff]  ;;  %v3650_v34 = vld [vmem:[%s6749_s1 + $0xd8] sm:$0xff]  ;;  %1308 = vmatpush.msrb.mxu2 %v5037_v43  ;;  %1328 = vmatpush.msrb.mxu3 %v5039_v25 }
 0x179   :  { %7229 = vst [vmem:[#allocation65_spill] sm:$0xff] %v5016_v45  ;;  %v743_v45 = vand.u32 2147483648, %v4887_v29  ;;  %1288 = vmatpush.msrb.mxu1 %v5032_v35 }
 0x17a   :  { %7230 = vst [vmem:[#allocation66_spill] sm:$0xff] %v5026_v52  ;;  %3797 = vtanh.f32 %v5034_v50  ;;  %v741_v52 = vand.u32 2147483647, %v4887_v29  ;;  %v5087_v29 = vld [vmem:[#allocation8 + $0x60] sm:$0xff] }
 0x17b   :  { %7231 = vst [vmem:[#allocation67_spill] sm:$0xff] %v5030_v26  ;;  %1289 = vmatpush.msrb.mxu1 %v5049_v28 }
 0x17c   :  { %v840_v38 = vpop.f32.mrf.mxu0  ;;  %v860_v39 = vpop.f32.mrf.mxu1  ;;  %7232 = vst [vmem:[#allocation69_spill] sm:$0xff] %v5032_v35  ;;  %v740_v35 = vsel %vm5072_vm2, %v4956_v46, %v736_v44  ;;  %vm742_vm3 = vcmp.eq.f32.partialorder %v741_v52, 8.507059e+37  ;;  %v5099_v46 = vld [vmem:[#allocation8 + $0x40] sm:$0xff]  ;;  %v5101_v44 = vld [vmem:[#allocation8 + $0x48] sm:$0xff] }
 0x17d   :  { %7233 = vst [vmem:[#allocation70_spill] sm:$0xff] %v5034_v50  ;;  %v903_v4 = vadd.f32 %v3647_v37, %v840_v38  ;;  %v904_v49 = vadd.f32 %v3648_v32, %v860_v39  ;;  %v5047_v37 = vld [vmem:[#allocation8 + $0xa0] sm:$0xff]  ;;  %v5054_v38 = vld [vmem:[#allocation8 + $0xb0] sm:$0xff]  ;;  %v5056_v39 = vld [vmem:[#allocation8 + $0xb8] sm:$0xff] }
 0x17e   :  { %7234 = vst [vmem:[#allocation71_spill] sm:$0xff] %v5037_v43  ;;  %1269 = vmatpush.msrb.mxu0 %v5047_v37  ;;  %v5078_v43 = vld [vmem:[#allocation8 + $0x90] sm:$0xff]  ;;  %1309 = vmatpush.msrb.mxu2 %v5054_v38 }
 0x17f   :  { %7235 = vst [vmem:[#allocation72_spill] sm:$0xff] %v5039_v25  ;;  %v3651_v32 = vmul.f32 -1.442695, %v903_v4  ;;  %v3652_v48 = vmul.f32 -1.442695, %v904_v49  ;;  %v5064_v4 = vld [vmem:[#allocation8 + $0x80] sm:$0xff]  ;;  %1329 = vmatpush.msrb.mxu3 %v5056_v39 }
 0x180   :  { %7236 = vst [vmem:[#allocation73_spill] sm:$0xff] %v5047_v37  ;;  %v5066_v49 = vld [vmem:[#allocation8 + $0x88] sm:$0xff]  ;;  %v5080_v25 = vld [vmem:[#allocation8 + $0x98] sm:$0xff]  ;;  %v744_v37 = vor.u32 1.1754944e-38, %v743_v45  ;;  %1270 = vmatpush.msrb.mxu0 %v5064_v4  ;;  %1310 = vmatpush.msrb.mxu2 %v5078_v43  ;;  %v3798_v45 = vpop.eup %3797 }
 0x181   :  { %7237 = vst [vmem:[#allocation74_spill] sm:$0xff] %v5049_v28  ;;  %3799 = vpow2.f32 %v3651_v32  ;;  %v5089_v32 = vld [vmem:[#allocation8 + $0x68] sm:$0xff]  ;;  %1290 = vmatpush.msrb.mxu1 %v5066_v49  ;;  %v5093_v28 = vld [vmem:[#allocation8 + $0x70] sm:$0xff]  ;;  %1330 = vmatpush.msrb.mxu3 %v5080_v25 }
 0x182   :  { %7238 = vst [vmem:[#allocation75_spill] sm:$0xff] %v5056_v39  ;;  %3801 = vpow2.f32 %v3652_v48  ;;  %v5095_v48 = vld [vmem:[#allocation8 + $0x78] sm:$0xff]  ;;  %v745_v39 = vsel %vm742_vm3, %v744_v37, %v740_v35  ;;  %1271 = vmatpush.msrb.mxu0 %v5087_v29  ;;  %1311 = vmatpush.msrb.mxu2 %v5093_v28 }
 0x183   :  { %7239 = vst [vmem:[#allocation76_spill] sm:$0xff] %v5064_v4  ;;  %v900_v26 = vpop.f32.mrf.mxu3  ;;  %1291 = vmatpush.msrb.mxu1 %v5089_v32  ;;  %v751_v4 = vmul.f32 %v3798_v45, %v745_v39  ;;  %1331 = vmatpush.msrb.mxu3 %v5095_v48  ;;  %v5118_v39 = vld [vmem:[#allocation8 + $0x20] sm:$0xff] }
 0x184   :  { %7240 = vst [vmem:[#allocation77_spill] sm:$0xff] %v5066_v49  ;;  %v906_v50 = vadd.f32 %v3650_v34, %v900_v26  ;;  %1272 = vmatpush.msrb.mxu0 %v5099_v46  ;;  %v5109_v26 = vld [vmem:[#allocation8 + $0x50] sm:$0xff]  ;;  %v5111_v34 = vld [vmem:[#allocation8 + $0x58] sm:$0xff] }
 0x185   :  { %7243 = vst [vmem:[#allocation78_spill] sm:$0xff] %v5099_v46  ;;  %1292 = vmatpush.msrb.mxu1 %v5101_v44  ;;  %1057 = vmatmul.f32.vlgmr.msra.gmra.mxu0 %v751_v4  ;;  %v5126_v46 = vld [vmem:[#allocation8 + $0x38] sm:$0xff] }
 0x186   :  { %7244 = vst [vmem:[#allocation79_spill] sm:$0xff] %v5101_v44  ;;  %v3653_v49 = vmul.f32 -1.442695, %v906_v50  ;;  %1077 = vmatmul.f32.vlgmr.msra.gmra.mxu1 %v751_v4  ;;  %v5120_v50 = vld [vmem:[#allocation8 + $0x28] sm:$0xff]  ;;  %1097 = vmatmul.f32.vlgmr.msra.gmra.mxu2 %v751_v4  ;;  %v5124_v44 = vld [vmem:[#allocation8 + $0x30] sm:$0xff] }
 0x187   :  { %v3800_v52 = vpop.eup %3799  ;;  %7245 = vst [vmem:[#allocation80_spill] sm:$0xff] %v5109_v26  ;;  %1117 = vmatmul.f32.vlgmr.msra.gmra.mxu3 %v751_v4  ;;  %1312 = vmatpush.msrb.mxu2 %v5109_v26  ;;  %v880_v26 = vpop.f32.mrf.mxu2 }
 0x188   :  { %7246 = vst [vmem:[#allocation81_spill] sm:$0xff] %v5111_v34  ;;  %v3802_v35 = vpop.eup %3801  ;;  %v5113_v37 = vadd.f32 1.0, %v3800_v52  ;;  %3803 = vpow2.f32 %v3653_v49  ;;  %1332 = vmatpush.msrb.mxu3 %v5111_v34  ;;  %v5131_v49 = vld [vmem:[#allocation8] sm:$0xff]  ;;  %v5133_v52 = vld [vmem:[#allocation8 + $0x8] sm:$0xff]  ;;  %1273 = vmatpush.msrb.mxu0 %v5118_v39  ;;  %v3649_v34 = vld [vmem:[%s6749_s1 + $0xd0] sm:$0xff] }
 0x189   :  { %3646 = vst [vmem:[%s6752_s4 + $0x8] sm:$0xff] %v751_v4  ;;  %v5122_v45 = vadd.f32 1.0, %v3802_v35  ;;  %1293 = vmatpush.msrb.mxu1 %v5120_v50  ;;  %v5138_v4 = vld [vmem:[#allocation8 + $0x10] sm:$0xff]  ;;  %v5140_v35 = vld [vmem:[#allocation8 + $0x18] sm:$0xff]  ;;  %1313 = vmatpush.msrb.mxu2 %v5124_v44 }
 0x18a   :  { %7247 = vst [vmem:[#allocation82_spill] sm:$0xff] %v5118_v39  ;;  %3805 = vrcp.f32 %v5113_v37  ;;  %1333 = vmatpush.msrb.mxu3 %v5126_v46  ;;  %1274 = vmatpush.msrb.mxu0 %v5131_v49  ;;  %vm916_vm6 = vweird.f32 %v5113_v37 }
 0x18b   :  { %7248 = vst [vmem:[#allocation83_spill] sm:$0xff] %v5120_v50  ;;  %3807 = vrcp.f32 %v5122_v45  ;;  %1294 = vmatpush.msrb.mxu1 %v5133_v52  ;;  %1314 = vmatpush.msrb.mxu2 %v5138_v4  ;;  %vm935_vm7 = vweird.f32 %v5122_v45 }
 0x18c   :  { %7249 = vst [vmem:[#allocation84_spill] sm:$0xff] %v5124_v44  ;;  %1334 = vmatpush.msrb.mxu3 %v5140_v35  ;;  %1477 = vmatpush.msra.mxu0 %v4658_v53  ;;  %v905_v44 = vadd.f32 %v3649_v34, %v880_v26  ;;  %v7262_v26 = vld [vmem:[#allocation22_spill] sm:$0xff]  ;;  %v7263_v34 = vld [vmem:[#allocation15_spill] sm:$0xff] }
 0x18d   :  { %7250 = vst [vmem:[#allocation85_spill] sm:$0xff] %v5126_v46  ;;  %1497 = vmatpush.msra.mxu1 %v4660_v59  ;;  %1517 = vmatpush.msra.mxu2 %v4662_v3  ;;  %v922_v3 = vand.u32 2147483648, %v5113_v37 }
 0x18e   :  { %7251 = vst [vmem:[#allocation86_spill] sm:$0xff] %v5131_v49  ;;  %v3804_v39 = vpop.eup %3803  ;;  %1537 = vmatpush.msra.mxu3 %v4666_v5  ;;  %1478 = vmatpush.msra.mxu0 %v4670_v6  ;;  %v941_v5 = vand.u32 2147483648, %v5122_v45 }
 0x18f   :  { %7252 = vst [vmem:[#allocation87_spill] sm:$0xff] %v5133_v52  ;;  %v5151_v50 = vadd.f32 1.0, %v3804_v39  ;;  %1498 = vmatpush.msra.mxu1 %v4672_v7  ;;  %1518 = vmatpush.msra.mxu2 %v4674_v8  ;;  %v920_v7 = vand.u32 2147483647, %v5113_v37 }
 0x190   :  { %v3806_v46 = vpop.eup %3805  ;;  %1538 = vmatpush.msra.mxu3 %v4678_v9  ;;  %1479 = vmatpush.msra.mxu0 %v4682_v10  ;;  %v939_v9 = vand.u32 2147483647, %v5122_v45 }
 0x191   :  { %v3808_v49 = vpop.eup %3807  ;;  %v912_v52 = vmul.f32 %v3806_v46, %v5113_v37  ;;  %3809 = vrcp.f32 %v5151_v50  ;;  %1499 = vmatpush.msra.mxu1 %v4684_v11  ;;  %1519 = vmatpush.msra.mxu2 %v4688_v12  ;;  %vm917_vm4 = vweird.f32 %v3806_v46  ;;  %v923_v12 = vor.u32 1.1754944e-38, %v922_v3  ;;  %v7271_v3 = vld [vmem:[#allocation30_spill] sm:$0xff] }
 0x192   :  { %v931_v39 = vmul.f32 %v3808_v49, %v5122_v45  ;;  %3811 = vtanh.f32 %v905_v44  ;;  %1539 = vmatpush.msra.mxu3 %v4690_v56  ;;  %1480 = vmatpush.msra.mxu0 %v4694_v51  ;;  %vm936_vm5 = vweird.f32 %v3808_v49  ;;  %vm918_vm8 = vmor %vm916_vm6, %vm917_vm4  ;;  %vm921_vm10 = vcmp.eq.f32.partialorder %v920_v7, 8.507059e+37  ;;  %v7265_v45 = vld [vmem:[#allocation24_spill] sm:$0xff]  ;;  %v7274_v7 = vld [vmem:[#allocation33_spill] sm:$0xff] }
 0x193   :  { %v913_v53 = vsub.f32 1.0, %v912_v52  ;;  %1500 = vmatpush.msra.mxu1 %v4696_v47  ;;  %1520 = vmatpush.msra.mxu2 %v4698_v55  ;;  %vm937_vm9 = vmor %vm935_vm7, %vm936_vm5  ;;  %v942_v47 = vor.u32 1.1754944e-38, %v941_v5  ;;  %vm940_vm11 = vcmp.eq.f32.partialorder %v939_v9, 8.507059e+37  ;;  %vm955_vm13 = vweird.f32 %v5151_v50  ;;  %v7267_v52 = vld [vmem:[#allocation26_spill] sm:$0xff]  ;;  %v7272_v5 = vld [vmem:[#allocation31_spill] sm:$0xff] }
 0x194   :  { %v932_v59 = vsub.f32 1.0, %v931_v39  ;;  %1540 = vmatpush.msra.mxu3 %v4702_v58  ;;  %1481 = vmatpush.msra.mxu0 %v4706_v60  ;;  %v7268_v39 = vld [vmem:[#allocation27_spill] sm:$0xff] }
 0x195   :  { %v914_v6 = vmul.f32 %v3806_v46, %v913_v53  ;;  %1501 = vmatpush.msra.mxu1 %v4708_v61  ;;  %1521 = vmatpush.msra.mxu2 %v4710_v57  ;;  %v7269_v53 = vld [vmem:[#allocation28_spill] sm:$0xff]  ;;  %v7276_v9 = vld [vmem:[#allocation35_spill] sm:$0xff] }
 0x196   :  { %v933_v8 = vmul.f32 %v3808_v49, %v932_v59  ;;  %1541 = vmatpush.msra.mxu3 %v4714_v62  ;;  %1482 = vmatpush.msra.mxu0 %v4718_v54  ;;  %v7270_v59 = vld [vmem:[#allocation29_spill] sm:$0xff] }
 0x197   :  { %v5176_v10 = vpop.eup %3809  ;;  %v915_v11 = vadd.f32 %v3806_v46, %v914_v6  ;;  %1502 = vmatpush.msra.mxu1 %v4720_v63  ;;  %1522 = vmatpush.msra.mxu2 %v4722_v0  ;;  %v961_v0 = vand.u32 2147483648, %v5151_v50  ;;  %v7273_v6 = vld [vmem:[#allocation32_spill] sm:$0xff] }
 0x198   :  { %v934_v56 = vadd.f32 %v3808_v49, %v933_v8  ;;  %v951_v51 = vmul.f32 %v5176_v10, %v5151_v50  ;;  %v3812_v58 = vpop.eup %3811  ;;  %1542 = vmatpush.msra.mxu3 %v4726_v1  ;;  %1483 = vmatpush.msra.mxu0 %v4730_v2  ;;  %vm956_vm12 = vweird.f32 %v5176_v10  ;;  %v959_v1 = vand.u32 2147483647, %v5151_v50  ;;  %v7253_v2 = vld [vmem:[#allocation14_spill] sm:$0xff]  ;;  %v7264_v50 = vld [vmem:[#allocation23_spill] sm:$0xff] }
 0x199   :  { %v919_v55 = vsel %vm918_vm8, %v3806_v46, %v915_v11  ;;  %1503 = vmatpush.msra.mxu1 %v4732_v13  ;;  %1523 = vmatpush.msra.mxu2 %v4734_v14  ;;  %vm957_vm14 = vmor %vm955_vm13, %vm956_vm12  ;;  %v7254_v13 = vld [vmem:[#allocation16_spill] sm:$0xff]  ;;  %v7275_v8 = vld [vmem:[#allocation34_spill] sm:$0xff] }
 0x19a   :  { %v924_v60 = vsel %vm921_vm10, %v923_v12, %v919_v55  ;;  %v938_v61 = vsel %vm937_vm9, %v3808_v49, %v934_v56  ;;  %v952_v44 = vsub.f32 1.0, %v951_v51  ;;  %1543 = vmatpush.msra.mxu3 %v4738_v15  ;;  %1484 = vmatpush.msra.mxu0 %v4742_v16  ;;  %v7255_v14 = vld [vmem:[#allocation12_spill] sm:$0xff]  ;;  %v7256_v16 = vld [vmem:[#allocation17_spill] sm:$0xff]  ;;  %vm960_vm15 = vcmp.eq.f32.partialorder %v959_v1, 8.507059e+37  ;;  %v7279_v12 = vld [vmem:[#allocation38_spill] sm:$0xff] }
 0x19b   :  { %v943_v57 = vsel %vm940_vm11, %v942_v47, %v938_v61  ;;  %v966_v62 = vmul.f32 %v3812_v58, %v924_v60  ;;  %1504 = vmatpush.msra.mxu1 %v4744_v17  ;;  %1524 = vmatpush.msra.mxu2 %v4746_v18  ;;  %v7257_v17 = vld [vmem:[#allocation18_spill] sm:$0xff]  ;;  %v962_v18 = vor.u32 1.1754944e-38, %v961_v0  ;;  %v7266_v49 = vld [vmem:[#allocation25_spill] sm:$0xff]  ;;  %v7280_v56 = vld [vmem:[#allocation39_spill] sm:$0xff] }
 0x19c   :  { %v965_v46 = vmul.f32 %v943_v57, %v4652_v42  ;;  %v953_v54 = vmul.f32 %v5176_v10, %v952_v44  ;;  %1544 = vmatpush.msra.mxu3 %v4756_v21  ;;  %1485 = vmatpush.msra.mxu0 %v4760_v22  ;;  %v7258_v21 = vld [vmem:[#allocation19_spill] sm:$0xff]  ;;  %v7259_v22 = vld [vmem:[#allocation13_spill] sm:$0xff]  ;;  %v7281_v51 = vld [vmem:[#allocation40_spill] sm:$0xff] }
 0x19d   :  { %1505 = vmatpush.msra.mxu1 %v4762_v23  ;;  %1525 = vmatpush.msra.mxu2 %v4764_v24  ;;  %v7260_v23 = vld [vmem:[#allocation20_spill] sm:$0xff]  ;;  %v7261_v24 = vld [vmem:[#allocation21_spill] sm:$0xff]  ;;  %v7283_v55 = vld [vmem:[#allocation42_spill] sm:$0xff] }
 0x19e   :  { %v5200_v63 = vadd.f32 %v966_v62, %v965_v46  ;;  %v954_v42 = vadd.f32 %v5176_v10, %v953_v54  ;;  %1545 = vmatpush.msra.mxu3 %v4768_v27  ;;  %1486 = vmatpush.msra.mxu0 %v4772_v30  ;;  %v7278_v11 = vld [vmem:[#allocation37_spill] sm:$0xff]  ;;  %v7284_v58 = vld [vmem:[#allocation43_spill] sm:$0xff]  ;;  %v7285_v60 = vld [vmem:[#allocation48_spill] sm:$0xff] }
 0x19f   :  { %1506 = vmatpush.msra.mxu1 %v7253_v2  ;;  %1526 = vmatpush.msra.mxu2 %v7254_v13  ;;  %v7282_v47 = vld [vmem:[#allocation41_spill] sm:$0xff]  ;;  %v7286_v61 = vld [vmem:[#allocation44_spill] sm:$0xff]  ;;  %v7288_v57 = vld [vmem:[#allocation46_spill] sm:$0xff] }
 0x1a0   :  { %3813 = vtanh.f32 %v5200_v63  ;;  %1546 = vmatpush.msra.mxu3 %v7255_v14  ;;  %v958_v15 = vsel %vm957_vm14, %v5176_v10, %v954_v42  ;;  %1487 = vmatpush.msra.mxu0 %v7256_v16  ;;  %v7277_v10 = vld [vmem:[#allocation36_spill] sm:$0xff]  ;;  %v7287_v44 = vld [vmem:[#allocation45_spill] sm:$0xff]  ;;  %v7290_v46 = vld [vmem:[#allocation47_spill] sm:$0xff] }
 0x1a1   :  { %1507 = vmatpush.msra.mxu1 %v7257_v17  ;;  %1527 = vmatpush.msra.mxu2 %v7258_v21  ;;  %v963_v30 = vsel %vm960_vm15, %v962_v18, %v958_v15  ;;  %v7289_v62 = vld [vmem:[#allocation52_spill] sm:$0xff]  ;;  %v7291_v54 = vld [vmem:[#allocation49_spill] sm:$0xff]  ;;  %v7292_v42 = vld [vmem:[#allocation50_spill] sm:$0xff] }
 0x1a2   :  { %1547 = vmatpush.msra.mxu3 %v7259_v22  ;;  %1488 = vmatpush.msra.mxu0 %v7260_v23  ;;  %v7293_v0 = vld [vmem:[#allocation56_spill] sm:$0xff]  ;;  %v7294_v1 = vld [vmem:[#allocation51_spill] sm:$0xff]  ;;  %v7295_v2 = vld [vmem:[#allocation53_spill] sm:$0xff] }
 0x1a3   :  { %1508 = vmatpush.msra.mxu1 %v7261_v24  ;;  %1528 = vmatpush.msra.mxu2 %v7262_v26  ;;  %v7296_v13 = vld [vmem:[#allocation54_spill] sm:$0xff]  ;;  %v7297_v14 = vld [vmem:[#allocation60_spill] sm:$0xff]  ;;  %v7298_v15 = vld [vmem:[#allocation55_spill] sm:$0xff] }
 0x1a4   :  { %1548 = vmatpush.msra.mxu3 %v7263_v34  ;;  %1489 = vmatpush.msra.mxu0 %v7264_v50  ;;  %v7299_v16 = vld [vmem:[#allocation57_spill] sm:$0xff]  ;;  %v7300_v17 = vld [vmem:[#allocation58_spill] sm:$0xff]  ;;  %v7301_v18 = vld [vmem:[#allocation64_spill] sm:$0xff] }
 0x1a5   :  { %1509 = vmatpush.msra.mxu1 %v7265_v45  ;;  %1529 = vmatpush.msra.mxu2 %v7266_v49  ;;  %v7302_v21 = vld [vmem:[#allocation59_spill] sm:$0xff]  ;;  %v7303_v22 = vld [vmem:[#allocation61_spill] sm:$0xff]  ;;  %v7304_v23 = vld [vmem:[#allocation62_spill] sm:$0xff] }
 0x1a6   :  { %v3814_v27 = vpop.eup %3813  ;;  %1549 = vmatpush.msra.mxu3 %v7267_v52  ;;  %1490 = vmatpush.msra.mxu0 %v7268_v39  ;;  %v7305_v24 = vld [vmem:[#allocation68_spill] sm:$0xff]  ;;  %v7313_v26 = vld [vmem:[#allocation73_spill] sm:$0xff]  ;;  %v7314_v34 = vld [vmem:[#allocation74_spill] sm:$0xff] }
 0x1a7   :  { %v969_v37 = vmul.f32 %v3814_v27, %v963_v30  ;;  %1510 = vmatpush.msra.mxu1 %v7269_v53  ;;  %1530 = vmatpush.msra.mxu2 %v7270_v59  ;;  %v7306_v27 = vld [vmem:[#allocation63_spill] sm:$0xff]  ;;  %v7307_v30 = vld [vmem:[#allocation65_spill] sm:$0xff]  ;;  %v7318_v50 = vld [vmem:[#allocation78_spill] sm:$0xff] }
 0x1a8   :  { %1550 = vmatpush.msra.mxu3 %v7271_v3  ;;  %1491 = vmatpush.msra.mxu0 %v7272_v5  ;;  %v7320_v45 = vld [vmem:[#allocation80_spill] sm:$0xff]  ;;  %v7321_v49 = vld [vmem:[#allocation81_spill] sm:$0xff]  ;;  %v7322_v52 = vld [vmem:[#allocation82_spill] sm:$0xff] }
 0x1a9   :  { %3654 = vst [vmem:[%s6753_s5 + $0x30] sm:$0xff] %v969_v37  ;;  %1275 = vmatmul.f32.vlgmr.msrb.gmra.mxu0 %v969_v37  ;;  %1295 = vmatmul.f32.vlgmr.msrb.gmra.mxu1 %v969_v37  ;;  %v3656_v39 = vld [vmem:[%s6748_s0 + $0x48] sm:$0xff] }
 0x1aa   :  { %1315 = vmatmul.f32.vlgmr.msrb.gmra.mxu2 %v969_v37  ;;  %1335 = vmatmul.f32.vlgmr.msrb.gmra.mxu3 %v969_v37  ;;  %v7315_v37 = vld [vmem:[#allocation75_spill] sm:$0xff] }
 0x1ab   :  { %1511 = vmatpush.msra.mxu1 %v7273_v6  ;;  %1531 = vmatpush.msra.mxu2 %v7274_v7 }
 0x1ac   :  { %1551 = vmatpush.msra.mxu3 %v7275_v8  ;;  %1492 = vmatpush.msra.mxu0 %v7276_v9 }
 0x1ad   :  { %1512 = vmatpush.msra.mxu1 %v7277_v10  ;;  %1532 = vmatpush.msra.mxu2 %v7278_v11 }
 0x1ae   :  { %1552 = vmatpush.msra.mxu3 %v7279_v12  ;;  %1695 = vmatpush.msrb.mxu0 %v7280_v56 }
 0x1af   :  { %1715 = vmatpush.msrb.mxu1 %v7281_v51  ;;  %1735 = vmatpush.msrb.mxu2 %v7282_v47  ;;  %v3657_v51 = vld [vmem:[%s6748_s0 + $0x50] sm:$0xff] }
 0x1b0   :  { %1755 = vmatpush.msrb.mxu3 %v7283_v55  ;;  %1696 = vmatpush.msrb.mxu0 %v7284_v58 }
 0x1b1   :  { %1716 = vmatpush.msrb.mxu1 %v7285_v60  ;;  %1736 = vmatpush.msrb.mxu2 %v7286_v61 }
 0x1b2   :  { %1756 = vmatpush.msrb.mxu3 %v7287_v44  ;;  %1697 = vmatpush.msrb.mxu0 %v7288_v57 }
 0x1b3   :  { %1717 = vmatpush.msrb.mxu1 %v7289_v62  ;;  %1737 = vmatpush.msrb.mxu2 %v7290_v46 }
 0x1b4   :  { %1757 = vmatpush.msrb.mxu3 %v7291_v54  ;;  %1698 = vmatpush.msrb.mxu0 %v7292_v42 }
 0x1b5   :  { %1718 = vmatpush.msrb.mxu1 %v7293_v0  ;;  %1738 = vmatpush.msrb.mxu2 %v7294_v1 }
 0x1b6   :  { %1758 = vmatpush.msrb.mxu3 %v7295_v2  ;;  %1699 = vmatpush.msrb.mxu0 %v7296_v13 }
 0x1b7   :  { %1719 = vmatpush.msrb.mxu1 %v7297_v14  ;;  %1739 = vmatpush.msrb.mxu2 %v7298_v15 }
 0x1b8   :  { %1759 = vmatpush.msrb.mxu3 %v7299_v16  ;;  %1700 = vmatpush.msrb.mxu0 %v7300_v17 }
 0x1b9   :  { %1720 = vmatpush.msrb.mxu1 %v7301_v18  ;;  %1740 = vmatpush.msrb.mxu2 %v7302_v21 }
 0x1ba   :  { %1760 = vmatpush.msrb.mxu3 %v4954_v19  ;;  %1701 = vmatpush.msrb.mxu0 %v4961_v40  ;;  %v7308_v19 = vld [vmem:[#allocation66_spill] sm:$0xff]  ;;  %v7312_v40 = vld [vmem:[#allocation72_spill] sm:$0xff] }
 0x1bb   :  { %1721 = vmatpush.msrb.mxu1 %v4963_v36  ;;  %1741 = vmatpush.msrb.mxu2 %v4965_v33  ;;  %v7309_v36 = vld [vmem:[#allocation67_spill] sm:$0xff]  ;;  %v7310_v33 = vld [vmem:[#allocation69_spill] sm:$0xff] }
 0x1bc   :  { %1761 = vmatpush.msrb.mxu3 %v4980_v20  ;;  %1702 = vmatpush.msrb.mxu0 %v7303_v22  ;;  %v7311_v20 = vld [vmem:[#allocation71_spill] sm:$0xff] }
 0x1bd   :  { %1722 = vmatpush.msrb.mxu1 %v7304_v23  ;;  %1742 = vmatpush.msrb.mxu2 %v7305_v24 }
 0x1be   :  { %1762 = vmatpush.msrb.mxu3 %v7306_v27  ;;  %1703 = vmatpush.msrb.mxu0 %v7307_v30 }
 0x1bf   :  { %1723 = vmatpush.msrb.mxu1 %v5018_v41  ;;  %1743 = vmatpush.msrb.mxu2 %v5024_v31  ;;  %v7316_v41 = vld [vmem:[#allocation76_spill] sm:$0xff]  ;;  %v7317_v31 = vld [vmem:[#allocation77_spill] sm:$0xff] }
 0x1c0   :  { %1763 = vmatpush.msrb.mxu3 %v7308_v19  ;;  %1704 = vmatpush.msrb.mxu0 %v7309_v36 }
 0x1c1   :  { %1724 = vmatpush.msrb.mxu1 %v7310_v33  ;;  %1744 = vmatpush.msrb.mxu2 %v7311_v20  ;;  %v3663_v20 = vld [vmem:[%s6749_s1 + $0xa0] sm:$0xff] }
 0x1c2   :  { %1764 = vmatpush.msrb.mxu3 %v7312_v40  ;;  %1705 = vmatpush.msrb.mxu0 %v7313_v26  ;;  %v3664_v40 = vld [vmem:[%s6749_s1 + $0xa8] sm:$0xff]  ;;  %v7328_v26 = vld [vmem:[#allocation70_spill] sm:$0xff] }
 0x1c3   :  { %1725 = vmatpush.msrb.mxu1 %v7314_v34  ;;  %1745 = vmatpush.msrb.mxu2 %v5054_v38  ;;  %v7319_v38 = vld [vmem:[#allocation79_spill] sm:$0xff] }
 0x1c4   :  { %1765 = vmatpush.msrb.mxu3 %v7315_v37  ;;  %1706 = vmatpush.msrb.mxu0 %v7316_v41 }
 0x1c5   :  { %1726 = vmatpush.msrb.mxu1 %v7317_v31  ;;  %1746 = vmatpush.msrb.mxu2 %v5078_v43  ;;  %v7323_v43 = vld [vmem:[#allocation83_spill] sm:$0xff] }
 0x1c6   :  { %1766 = vmatpush.msrb.mxu3 %v5080_v25  ;;  %1707 = vmatpush.msrb.mxu0 %v5087_v29  ;;  %v7324_v25 = vld [vmem:[#allocation84_spill] sm:$0xff]  ;;  %v7325_v29 = vld [vmem:[#allocation85_spill] sm:$0xff] }
 0x1c7   :  { %1727 = vmatpush.msrb.mxu1 %v5089_v32  ;;  %1747 = vmatpush.msrb.mxu2 %v5093_v28  ;;  %v7326_v32 = vld [vmem:[#allocation86_spill] sm:$0xff]  ;;  %v7327_v28 = vld [vmem:[#allocation87_spill] sm:$0xff] }
 0x1c8   :  { %1767 = vmatpush.msrb.mxu3 %v5095_v48  ;;  %1708 = vmatpush.msrb.mxu0 %v7318_v50  ;;  %v3655_v48 = vld [vmem:[%s6748_s0 + $0x40] sm:$0xff] }
 0x1c9   :  { %1728 = vmatpush.msrb.mxu1 %v7319_v38  ;;  %1748 = vmatpush.msrb.mxu2 %v7320_v45 }
 0x1ca   :  { %1768 = vmatpush.msrb.mxu3 %v7321_v49  ;;  %1709 = vmatpush.msrb.mxu0 %v7322_v52 }
 0x1cb   :  { %1729 = vmatpush.msrb.mxu1 %v7323_v43  ;;  %1749 = vmatpush.msrb.mxu2 %v7324_v25 }
 0x1cc   :  { %1769 = vmatpush.msrb.mxu3 %v7325_v29  ;;  %1710 = vmatpush.msrb.mxu0 %v7326_v32  ;;  %v3666_v32 = vld [vmem:[%s6749_s1 + $0xb8] sm:$0xff] }
 0x1cd   :  { %1730 = vmatpush.msrb.mxu1 %v7327_v28  ;;  %1750 = vmatpush.msrb.mxu2 %v5138_v4  ;;  %v3658_v4 = vld [vmem:[%s6748_s0 + $0x58] sm:$0xff] }
 0x1ce   :  { %1770 = vmatpush.msrb.mxu3 %v5140_v35 }
 0x202   :  { %v1058_v53 = vpop.f32.mrf.mxu0 }
 0x203   :  { %v1078_v59 = vpop.f32.mrf.mxu1  ;;  %v1121_v3 = vadd.f32 %v3655_v48, %v1058_v53 }
 0x204   :  { %v1122_v5 = vadd.f32 %v3656_v39, %v1078_v59 }
 0x205   :  { %v3659_v6 = vmul.f32 -1.442695, %v1121_v3 }
 0x206   :  { %v3660_v7 = vmul.f32 -1.442695, %v1122_v5 }
 0x207   :  { %3815 = vpow2.f32 %v3659_v6 }
 0x208   :  { %3817 = vpow2.f32 %v3660_v7 }
 0x209   :  { %v1098_v47 = vpop.f32.mrf.mxu2 }
 0x20a   :  { %v1118_v35 = vpop.f32.mrf.mxu3  ;;  %v1123_v61 = vadd.f32 %v3657_v51, %v1098_v47 }
 0x20b   :  { %v1124_v8 = vadd.f32 %v3658_v4, %v1118_v35 }
 0x20d   :  { %v3661_v9 = vmul.f32 -1.442695, %v1124_v8  ;;  %v3816_v10 = vpop.eup %3815 }
 0x20e   :  { %v3818_v11 = vpop.eup %3817  ;;  %v1128_v12 = vadd.f32 1.0, %v3816_v10 }
 0x20f   :  { %3819 = vpow2.f32 %v3661_v9  ;;  %v1147_v56 = vadd.f32 1.0, %v3818_v11  ;;  %v3665_v9 = vld [vmem:[%s6749_s1 + $0xb0] sm:$0xff] }
 0x210   :  { %3821 = vrcp.f32 %v1128_v12  ;;  %v1140_v42 = vand.u32 2147483648, %v1128_v12  ;;  %v1138_v2 = vand.u32 2147483647, %v1128_v12  ;;  %vm1134_vm2 = vweird.f32 %v1128_v12 }
 0x211   :  { %3823 = vrcp.f32 %v1147_v56  ;;  %v1159_v0 = vand.u32 2147483648, %v1147_v56  ;;  %v1157_v14 = vand.u32 2147483647, %v1147_v56  ;;  %vm1153_vm3 = vweird.f32 %v1147_v56 }
 0x212   :  { %v1141_v17 = vor.u32 1.1754944e-38, %v1140_v42  ;;  %vm1139_vm6 = vcmp.eq.f32.partialorder %v1138_v2, 8.507059e+37 }
 0x213   :  { %v1160_v22 = vor.u32 1.1754944e-38, %v1159_v0  ;;  %vm1158_vm7 = vcmp.eq.f32.partialorder %v1157_v14, 8.507059e+37 }
 0x215   :  { %v3820_v55 = vpop.eup %3819 }
 0x216   :  { %v1167_v58 = vadd.f32 1.0, %v3820_v55  ;;  %v3822_v60 = vpop.eup %3821 }
 0x217   :  { %v3824_v44 = vpop.eup %3823  ;;  %v1130_v57 = vmul.f32 %v3822_v60, %v1128_v12  ;;  %vm1135_vm0 = vweird.f32 %v3822_v60 }
 0x218   :  { %3825 = vrcp.f32 %v1167_v58  ;;  %v1149_v62 = vmul.f32 %v3824_v44, %v1147_v56  ;;  %vm1154_vm1 = vweird.f32 %v3824_v44  ;;  %vm1136_vm4 = vmor %vm1134_vm2, %vm1135_vm0  ;;  %v1179_v52 = vand.u32 2147483648, %v1167_v58 }
 0x219   :  { %v1131_v46 = vsub.f32 1.0, %v1130_v57  ;;  %3827 = vtanh.f32 %v1123_v61  ;;  %vm1155_vm5 = vmor %vm1153_vm3, %vm1154_vm1  ;;  %vm1173_vm9 = vweird.f32 %v1167_v58  ;;  %v1177_v29 = vand.u32 2147483647, %v1167_v58 }
 0x21a   :  { %v1150_v54 = vsub.f32 1.0, %v1149_v62  ;;  %v1180_v48 = vor.u32 1.1754944e-38, %v1179_v52  ;;  %v5362_v52 = vld [vmem:[#allocation6 + $0x1c8] sm:$0xff] }
 0x21b   :  { %v1132_v1 = vmul.f32 %v3822_v60, %v1131_v46  ;;  %vm1178_vm11 = vcmp.eq.f32.partialorder %v1177_v29, 8.507059e+37  ;;  %v5372_v29 = vld [vmem:[#allocation6 + $0x1a0] sm:$0xff] }
 0x21c   :  { %v1151_v13 = vmul.f32 %v3824_v44, %v1150_v54 }
 0x21d   :  { %v1133_v16 = vadd.f32 %v3822_v60, %v1132_v1 }
 0x21e   :  { %v3826_v15 = vpop.eup %3825  ;;  %v1152_v18 = vadd.f32 %v3824_v44, %v1151_v13 }
 0x21f   :  { %v1169_v21 = vmul.f32 %v3826_v15, %v1167_v58  ;;  %v1137_v23 = vsel %vm1136_vm4, %v3822_v60, %v1133_v16  ;;  %v3828_v24 = vpop.eup %3827  ;;  %vm1174_vm8 = vweird.f32 %v3826_v15 }
 0x220   :  { %v1142_v27 = vsel %vm1139_vm6, %v1141_v17, %v1137_v23  ;;  %v1156_v30 = vsel %vm1155_vm5, %v3824_v44, %v1152_v18  ;;  %vm1175_vm10 = vmor %vm1173_vm9, %vm1174_vm8 }
 0x221   :  { %v1170_v19 = vsub.f32 1.0, %v1169_v21  ;;  %v1161_v36 = vsel %vm1158_vm7, %v1160_v22, %v1156_v30  ;;  %v1184_v33 = vmul.f32 %v3828_v24, %v1142_v27 }
 0x222   :  { %v1183_v34 = vmul.f32 %v1161_v36, %v7328_v26 }
 0x223   :  { %v1171_v37 = vmul.f32 %v3826_v15, %v1170_v19 }
 0x224   :  { %v5329_v50 = vadd.f32 %v1184_v33, %v1183_v34 }
 0x225   :  { %v1172_v49 = vadd.f32 %v3826_v15, %v1171_v37 }
 0x226   :  { %v1276_v41 = vpop.f32.mrf.mxu0  ;;  %v1296_v31 = vpop.f32.mrf.mxu1  ;;  %3829 = vtanh.f32 %v5329_v50 }
 0x227   :  { %v1339_v38 = vadd.f32 %v3663_v20, %v1276_v41  ;;  %v1340_v45 = vadd.f32 %v3664_v40, %v1296_v31  ;;  %v1176_v28 = vsel %vm1175_vm10, %v3826_v15, %v1172_v49  ;;  %v5350_v31 = vld [vmem:[#allocation6 + $0x1e8] sm:$0xff]  ;;  %v5360_v49 = vld [vmem:[#allocation6 + $0x1c0] sm:$0xff] }
 0x228   :  { %v1181_v3 = vsel %vm1178_vm11, %v1180_v48, %v1176_v28  ;;  %v5376_v28 = vld [vmem:[#allocation6 + $0x1b0] sm:$0xff]  ;;  %v5380_v48 = vld [vmem:[#allocation6 + $0x1b8] sm:$0xff] }
 0x229   :  { %v3667_v43 = vmul.f32 -1.442695, %v1339_v38  ;;  %v3668_v25 = vmul.f32 -1.442695, %v1340_v45  ;;  %v5352_v38 = vld [vmem:[#allocation6 + $0x1f0] sm:$0xff]  ;;  %v5356_v45 = vld [vmem:[#allocation6 + $0x1f8] sm:$0xff] }
 0x22b   :  { %3831 = vpow2.f32 %v3667_v43  ;;  %v5364_v43 = vld [vmem:[#allocation6 + $0x1d0] sm:$0xff] }
 0x22c   :  { %3833 = vpow2.f32 %v3668_v25  ;;  %v3830_v59 = vpop.eup %3829  ;;  %v5368_v25 = vld [vmem:[#allocation6 + $0x1d8] sm:$0xff] }
 0x22d   :  { %v1336_v39 = vpop.f32.mrf.mxu3  ;;  %v1187_v6 = vmul.f32 %v3830_v59, %v1181_v3  ;;  %v1316_v10 = vpop.f32.mrf.mxu2  ;;  %v5388_v59 = vld [vmem:[#allocation6 + $0x190] sm:$0xff]  ;;  %v5392_v3 = vld [vmem:[#allocation6 + $0x198] sm:$0xff] }
 0x22e   :  { %v1342_v53 = vadd.f32 %v3666_v32, %v1336_v39  ;;  %v1341_v51 = vadd.f32 %v3665_v9, %v1316_v10  ;;  %v5374_v32 = vld [vmem:[#allocation6 + $0x1a8] sm:$0xff]  ;;  %v5384_v39 = vld [vmem:[#allocation6 + $0x180] sm:$0xff]  ;;  %v5412_v9 = vld [vmem:[#allocation6 + $0x150] sm:$0xff] }
 0x22f   :  { %3662 = vst [vmem:[%s6752_s4 + $0x10] sm:$0xff] %v1187_v6  ;;  %1493 = vmatmul.f32.vlgmr.msra.gmra.mxu0 %v1187_v6  ;;  %1513 = vmatmul.f32.vlgmr.msra.gmra.mxu1 %v1187_v6  ;;  %v5416_v10 = vld [vmem:[#allocation6 + $0x158] sm:$0xff] }
 0x230   :  { %v3669_v5 = vmul.f32 -1.442695, %v1342_v53  ;;  %1533 = vmatmul.f32.vlgmr.msra.gmra.mxu2 %v1187_v6  ;;  %1553 = vmatmul.f32.vlgmr.msra.gmra.mxu3 %v1187_v6  ;;  %v5386_v53 = vld [vmem:[#allocation6 + $0x188] sm:$0xff] }
 0x231   :  { %v3832_v7 = vpop.eup %3831  ;;  %1933 = vmatpush.msra.mxu1 %v5350_v31  ;;  %1953 = vmatpush.msra.mxu2 %v5352_v38  ;;  %v5398_v6 = vld [vmem:[#allocation6 + $0x168] sm:$0xff] }
 0x232   :  { %v3834_v4 = vpop.eup %3833  ;;  %v1346_v35 = vadd.f32 1.0, %v3832_v7  ;;  %3835 = vpow2.f32 %v3669_v5  ;;  %1973 = vmatpush.msra.mxu3 %v5356_v45  ;;  %v5396_v5 = vld [vmem:[#allocation6 + $0x160] sm:$0xff]  ;;  %v5400_v7 = vld [vmem:[#allocation6 + $0x170] sm:$0xff] }
 0x233   :  { %v1365_v8 = vadd.f32 1.0, %v3834_v4  ;;  %1934 = vmatpush.msra.mxu1 %v5362_v52  ;;  %1954 = vmatpush.msra.mxu2 %v5364_v43  ;;  %v5404_v4 = vld [vmem:[#allocation6 + $0x178] sm:$0xff] }
 0x234   :  { %3837 = vrcp.f32 %v1346_v35  ;;  %v1358_v44 = vand.u32 2147483648, %v1346_v35  ;;  %v1356_v46 = vand.u32 2147483647, %v1346_v35  ;;  %vm1352_vm14 = vweird.f32 %v1346_v35  ;;  %1974 = vmatpush.msra.mxu3 %v5368_v25 }
 0x235   :  { %3839 = vrcp.f32 %v1365_v8  ;;  %v1377_v57 = vand.u32 2147483648, %v1365_v8  ;;  %v1375_v42 = vand.u32 2147483647, %v1365_v8  ;;  %vm1371_vm15 = vweird.f32 %v1365_v8  ;;  %1935 = vmatpush.msra.mxu1 %v5374_v32  ;;  %1955 = vmatpush.msra.mxu2 %v5376_v28 }
 0x236   :  { %v1359_v2 = vor.u32 1.1754944e-38, %v1358_v44  ;;  %vm1357_vm2 = vcmp.eq.f32.partialorder %v1356_v46, 8.507059e+37  ;;  %1975 = vmatpush.msra.mxu3 %v5380_v48  ;;  %v5446_v44 = vld [vmem:[#allocation6 + $0x118] sm:$0xff]  ;;  %v5454_v46 = vld [vmem:[#allocation6 + $0xf0] sm:$0xff] }
 0x237   :  { %v1378_v15 = vor.u32 1.1754944e-38, %v1377_v57  ;;  %vm1376_vm3 = vcmp.eq.f32.partialorder %v1375_v42, 8.507059e+37  ;;  %1936 = vmatpush.msra.mxu1 %v5386_v53  ;;  %1956 = vmatpush.msra.mxu2 %v5388_v59  ;;  %v5450_v57 = vld [vmem:[#allocation6 + $0xe0] sm:$0xff] }
 0x238   :  { %v3836_v11 = vpop.eup %3835  ;;  %1976 = vmatpush.msra.mxu3 %v5392_v3 }
 0x239   :  { %v1385_v12 = vadd.f32 1.0, %v3836_v11  ;;  %1937 = vmatpush.msra.mxu1 %v5398_v6  ;;  %1957 = vmatpush.msra.mxu2 %v5400_v7  ;;  %v5420_v11 = vld [vmem:[#allocation6 + $0x120] sm:$0xff] }
 0x23a   :  { %v3838_v56 = vpop.eup %3837  ;;  %1977 = vmatpush.msra.mxu3 %v5404_v4 }
 0x23b   :  { %v3840_v47 = vpop.eup %3839  ;;  %v1348_v55 = vmul.f32 %v3838_v56, %v1346_v35  ;;  %3841 = vrcp.f32 %v1385_v12  ;;  %vm1353_vm12 = vweird.f32 %v3838_v56  ;;  %v1397_v33 = vand.u32 2147483648, %v1385_v12  ;;  %v5408_v35 = vld [vmem:[#allocation6 + $0x140] sm:$0xff]  ;;  %1958 = vmatpush.msra.mxu2 %v5412_v9 }
 0x23c   :  { %v1367_v58 = vmul.f32 %v3840_v47, %v1365_v8  ;;  %3843 = vtanh.f32 %v1341_v51  ;;  %vm1372_vm13 = vweird.f32 %v3840_v47  ;;  %vm1354_vm0 = vmor %vm1352_vm14, %vm1353_vm12  ;;  %vm1391_vm5 = vweird.f32 %v1385_v12  ;;  %v5410_v8 = vld [vmem:[#allocation6 + $0x148] sm:$0xff]  ;;  %1978 = vmatpush.msra.mxu3 %v5416_v10  ;;  %v5428_v51 = vld [vmem:[#allocation6 + $0x138] sm:$0xff] }
 0x23d   :  { %v1349_v60 = vsub.f32 1.0, %v1348_v55  ;;  %vm1373_vm1 = vmor %vm1371_vm15, %vm1372_vm13  ;;  %v1395_v20 = vand.u32 2147483647, %v1385_v12  ;;  %v1398_v26 = vor.u32 1.1754944e-38, %v1397_v33  ;;  %1938 = vmatpush.msra.mxu1 %v5410_v8  ;;  %v5434_v55 = vld [vmem:[#allocation6 + $0x108] sm:$0xff]  ;;  %v5493_v33 = vld [vmem:[#allocation6 + $0x90] sm:$0xff] }
 0x23e   :  { %v1368_v61 = vsub.f32 1.0, %v1367_v58  ;;  %1979 = vmatpush.msra.mxu3 %v5428_v51  ;;  %v5436_v58 = vld [vmem:[#allocation6 + $0x110] sm:$0xff]  ;;  %7338 = vst [vmem:[#allocation22_spill] sm:$0xff] %v5493_v33 }
 0x23f   :  { %v1350_v62 = vmul.f32 %v3838_v56, %v1349_v60  ;;  %vm1396_vm7 = vcmp.eq.f32.partialorder %v1395_v20, 8.507059e+37  ;;  %v3671_v60 = vld [vmem:[%s6748_s0 + $0x60] sm:$0xff]  ;;  %v5497_v20 = vld [vmem:[#allocation6 + $0x98] sm:$0xff] }
 0x240   :  { %v1369_v54 = vmul.f32 %v3840_v47, %v1368_v61  ;;  %v3672_v61 = vld [vmem:[%s6748_s0 + $0x68] sm:$0xff]  ;;  %1980 = vmatpush.msra.mxu3 %v5446_v44  ;;  %7339 = vst [vmem:[#allocation15_spill] sm:$0xff] %v5497_v20 }
 0x241   :  { %v3842_v0 = vpop.eup %3841  ;;  %v1351_v1 = vadd.f32 %v3838_v56, %v1350_v62  ;;  %v5452_v62 = vld [vmem:[#allocation6 + $0xe8] sm:$0xff] }
 0x242   :  { %v1370_v13 = vadd.f32 %v3840_v47, %v1369_v54  ;;  %v1387_v14 = vmul.f32 %v3842_v0, %v1385_v12  ;;  %v3844_v17 = vpop.eup %3843  ;;  %vm1392_vm4 = vweird.f32 %v3842_v0  ;;  %v5422_v12 = vld [vmem:[#allocation6 + $0x128] sm:$0xff] }
 0x243   :  { %v1355_v16 = vsel %vm1354_vm0, %v3838_v56, %v1351_v1  ;;  %vm1393_vm6 = vmor %vm1391_vm5, %vm1392_vm4  ;;  %v5424_v56 = vld [vmem:[#allocation6 + $0x130] sm:$0xff]  ;;  %1939 = vmatpush.msra.mxu1 %v5422_v12 }
 0x244   :  { %v1360_v18 = vsel %vm1357_vm2, %v1359_v2, %v1355_v16  ;;  %v1374_v21 = vsel %vm1373_vm1, %v3840_v47, %v1370_v13  ;;  %v1388_v22 = vsub.f32 1.0, %v1387_v14  ;;  %1959 = vmatpush.msra.mxu2 %v5424_v56  ;;  %v5432_v47 = vld [vmem:[#allocation6 + $0x100] sm:$0xff]  ;;  %v5464_v14 = vld [vmem:[#allocation6 + $0xc8] sm:$0xff]  ;;  %v5470_v16 = vld [vmem:[#allocation6 + $0xd8] sm:$0xff] }
 0x245   :  { %v1379_v23 = vsel %vm1376_vm3, %v1378_v15, %v1374_v21  ;;  %v1402_v24 = vmul.f32 %v3844_v17, %v1360_v18  ;;  %1940 = vmatpush.msra.mxu1 %v5434_v55  ;;  %v5462_v13 = vld [vmem:[#allocation6 + $0xc0] sm:$0xff]  ;;  %7329 = vst [vmem:[#allocation14_spill] sm:$0xff] %v5464_v14  ;;  %v5466_v15 = vld [vmem:[#allocation6 + $0xd0] sm:$0xff] }
 0x246   :  { %v1401_v27 = vmul.f32 %v1379_v23, %v5200_v63  ;;  %v1389_v30 = vmul.f32 %v3842_v0, %v1388_v22  ;;  %v5348_v63 = vld [vmem:[#allocation6 + $0x1e0] sm:$0xff]  ;;  %1960 = vmatpush.msra.mxu2 %v5436_v58  ;;  %7330 = vst [vmem:[#allocation16_spill] sm:$0xff] %v5466_v15  ;;  %v5476_v22 = vld [vmem:[#allocation6 + $0xa8] sm:$0xff]  ;;  %v3674_v23 = vld [vmem:[%s6748_s0 + $0x78] sm:$0xff] }
 0x247   :  { %1913 = vmatpush.msra.mxu0 %v5348_v63  ;;  %1941 = vmatpush.msra.mxu1 %v5452_v62  ;;  %7331 = vst [vmem:[#allocation12_spill] sm:$0xff] %v5470_v16  ;;  %v5474_v21 = vld [vmem:[#allocation6 + $0xa0] sm:$0xff] }
 0x248   :  { %v5342_v19 = vadd.f32 %v1402_v24, %v1401_v27  ;;  %v1390_v36 = vadd.f32 %v3842_v0, %v1389_v30  ;;  %1961 = vmatpush.msra.mxu2 %v5454_v46  ;;  %7332 = vst [vmem:[#allocation17_spill] sm:$0xff] %v5474_v21  ;;  %v5483_v24 = vld [vmem:[#allocation6 + $0xb0] sm:$0xff]  ;;  %v5485_v27 = vld [vmem:[#allocation6 + $0xb8] sm:$0xff]  ;;  %v5489_v30 = vld [vmem:[#allocation6 + $0x80] sm:$0xff] }
 0x249   :  { %1914 = vmatpush.msra.mxu0 %v5360_v49  ;;  %1942 = vmatpush.msra.mxu1 %v5464_v14  ;;  %7333 = vst [vmem:[#allocation18_spill] sm:$0xff] %v5476_v22 }
 0x24a   :  { %3845 = vtanh.f32 %v5342_v19  ;;  %v1394_v40 = vsel %vm1393_vm6, %v3842_v0, %v1390_v36  ;;  %v5458_v0 = vld [vmem:[#allocation6 + $0xf8] sm:$0xff]  ;;  %1962 = vmatpush.msra.mxu2 %v5466_v15  ;;  %7334 = vst [vmem:[#allocation19_spill] sm:$0xff] %v5483_v24  ;;  %v5491_v36 = vld [vmem:[#allocation6 + $0x88] sm:$0xff] }
 0x24b   :  { %v1399_v37 = vsel %vm1396_vm7, %v1398_v26, %v1394_v40  ;;  %1915 = vmatpush.msra.mxu0 %v5372_v29  ;;  %1981 = vmatpush.msra.mxu3 %v5458_v0  ;;  %7335 = vst [vmem:[#allocation13_spill] sm:$0xff] %v5485_v27 }
 0x24c   :  { %1943 = vmatpush.msra.mxu1 %v5476_v22  ;;  %1963 = vmatpush.msra.mxu2 %v5483_v24  ;;  %7336 = vst [vmem:[#allocation20_spill] sm:$0xff] %v5489_v30  ;;  %v5642_v22 = vld [vmem:[#allocation8 + $0x158] sm:$0xff] }
 0x24d   :  { %1916 = vmatpush.msra.mxu0 %v5384_v39  ;;  %1982 = vmatpush.msra.mxu3 %v5470_v16  ;;  %7337 = vst [vmem:[#allocation21_spill] sm:$0xff] %v5491_v36  ;;  %v5654_v16 = vld [vmem:[#allocation8 + $0x130] sm:$0xff] }
 0x24e   :  { %1944 = vmatpush.msra.mxu1 %v5491_v36  ;;  %1964 = vmatpush.msra.mxu2 %v5493_v33  ;;  %v5585_v33 = vld [vmem:[#allocation8 + $0x1b0] sm:$0xff] }
 0x24f   :  { %1917 = vmatpush.msra.mxu0 %v5396_v5  ;;  %1983 = vmatpush.msra.mxu3 %v5485_v27  ;;  %7366 = vst [vmem:[#allocation47_spill] sm:$0xff] %v5585_v33 }
 0x250   :  { %v3846_v34 = vpop.eup %3845 }
 0x251   :  { %v1405_v41 = vmul.f32 %v3846_v34, %v1399_v37  ;;  %1918 = vmatpush.msra.mxu0 %v5408_v35  ;;  %1984 = vmatpush.msra.mxu3 %v5497_v20  ;;  %v5501_v34 = vld [vmem:[#allocation6 + $0x60] sm:$0xff]  ;;  %v5504_v37 = vld [vmem:[#allocation6 + $0x68] sm:$0xff] }
 0x252   :  { %7340 = vst [vmem:[#allocation23_spill] sm:$0xff] %v5501_v34  ;;  %1945 = vmatpush.msra.mxu1 %v5504_v37 }
 0x253   :  { %3670 = vst [vmem:[%s6753_s5 + $0x28] sm:$0xff] %v1405_v41  ;;  %1711 = vmatmul.f32.vlgmr.msrb.gmra.mxu0 %v1405_v41  ;;  %1731 = vmatmul.f32.vlgmr.msrb.gmra.mxu1 %v1405_v41 }
 0x254   :  { %1751 = vmatmul.f32.vlgmr.msrb.gmra.mxu2 %v1405_v41  ;;  %1771 = vmatmul.f32.vlgmr.msrb.gmra.mxu3 %v1405_v41  ;;  %7341 = vst [vmem:[#allocation24_spill] sm:$0xff] %v5504_v37  ;;  %v5506_v41 = vld [vmem:[#allocation6 + $0x70] sm:$0xff] }
 0x255   :  { %1919 = vmatpush.msra.mxu0 %v5420_v11  ;;  %7342 = vst [vmem:[#allocation25_spill] sm:$0xff] %v5506_v41  ;;  %1965 = vmatpush.msra.mxu2 %v5506_v41  ;;  %v5530_v41 = vld [vmem:[#allocation6 + $0x30] sm:$0xff] }
 0x256   :  { %7350 = vst [vmem:[#allocation33_spill] sm:$0xff] %v5530_v41 }
 0x257   :  { %1920 = vmatpush.msra.mxu0 %v5432_v47 }
 0x259   :  { %1921 = vmatpush.msra.mxu0 %v5450_v57 }
 0x25b   :  { %1922 = vmatpush.msra.mxu0 %v5462_v13 }
 0x25d   :  { %1923 = vmatpush.msra.mxu0 %v5474_v21  ;;  %v5652_v21 = vld [vmem:[#allocation8 + $0x128] sm:$0xff] }
 0x25f   :  { %1924 = vmatpush.msra.mxu0 %v5489_v30 }
 0x261   :  { %1925 = vmatpush.msra.mxu0 %v5501_v34  ;;  %v5571_v34 = vld [vmem:[#allocation8 + $0x1d0] sm:$0xff] }
 0x262   :  { %7362 = vst [vmem:[#allocation44_spill] sm:$0xff] %v5571_v34 }
 0x2ac   :  { %v1494_v54 = vpop.f32.mrf.mxu0  ;;  %v1514_v42 = vpop.f32.mrf.mxu1 }
 0x2ad   :  { %v1557_v1 = vadd.f32 %v3671_v60, %v1494_v54  ;;  %v1558_v2 = vadd.f32 %v3672_v61, %v1514_v42  ;;  %v5508_v60 = vld [vmem:[#allocation6 + $0x78] sm:$0xff]  ;;  %v5512_v54 = vld [vmem:[#allocation6 + $0x40] sm:$0xff]  ;;  %v5514_v42 = vld [vmem:[#allocation6 + $0x48] sm:$0xff] }
 0x2ae   :  { %7343 = vst [vmem:[#allocation26_spill] sm:$0xff] %v5508_v60  ;;  %1985 = vmatpush.msra.mxu3 %v5508_v60  ;;  %1926 = vmatpush.msra.mxu0 %v5512_v54  ;;  %v5569_v60 = vld [vmem:[#allocation8 + $0x1c8] sm:$0xff] }
 0x2af   :  { %v3675_v17 = vmul.f32 -1.442695, %v1557_v1  ;;  %v3676_v18 = vmul.f32 -1.442695, %v1558_v2  ;;  %7344 = vst [vmem:[#allocation27_spill] sm:$0xff] %v5512_v54  ;;  %v5516_v1 = vld [vmem:[#allocation6 + $0x50] sm:$0xff]  ;;  %1946 = vmatpush.msra.mxu1 %v5514_v42 }
 0x2b0   :  { %7345 = vst [vmem:[#allocation28_spill] sm:$0xff] %v5514_v42  ;;  %1966 = vmatpush.msra.mxu2 %v5516_v1  ;;  %v5536_v54 = vld [vmem:[#allocation6 + $0x38] sm:$0xff] }
 0x2b1   :  { %3847 = vpow2.f32 %v3675_v17  ;;  %7346 = vst [vmem:[#allocation29_spill] sm:$0xff] %v5516_v1  ;;  %v5520_v17 = vld [vmem:[#allocation6 + $0x58] sm:$0xff]  ;;  %v5545_v1 = vld [vmem:[#allocation6 + $0x10] sm:$0xff] }
 0x2b2   :  { %3849 = vpow2.f32 %v3676_v18  ;;  %7347 = vst [vmem:[#allocation30_spill] sm:$0xff] %v5520_v17  ;;  %1986 = vmatpush.msra.mxu3 %v5520_v17  ;;  %1967 = vmatpush.msra.mxu2 %v5530_v41  ;;  %v5554_v17 = vld [vmem:[#allocation8 + $0x1e8] sm:$0xff]  ;;  %v3673_v41 = vld [vmem:[%s6748_s0 + $0x70] sm:$0xff]  ;;  %v5563_v42 = vld [vmem:[#allocation8 + $0x1f8] sm:$0xff] }
 0x2b3   :  { %v1554_v40 = vpop.f32.mrf.mxu3  ;;  %7351 = vst [vmem:[#allocation34_spill] sm:$0xff] %v5536_v54 }
 0x2b4   :  { %v1560_v26 = vadd.f32 %v3674_v23, %v1554_v40  ;;  %v5526_v40 = vld [vmem:[#allocation6 + $0x20] sm:$0xff]  ;;  %7354 = vst [vmem:[#allocation37_spill] sm:$0xff] %v5545_v1  ;;  %1987 = vmatpush.msra.mxu3 %v5536_v54  ;;  %1968 = vmatpush.msra.mxu2 %v5545_v1  ;;  %v1534_v54 = vpop.f32.mrf.mxu2  ;;  %v5575_v1 = vld [vmem:[#allocation8 + $0x1d8] sm:$0xff] }
 0x2b5   :  { %7348 = vst [vmem:[#allocation31_spill] sm:$0xff] %v5526_v40  ;;  %1927 = vmatpush.msra.mxu0 %v5526_v40  ;;  %v5552_v40 = vld [vmem:[#allocation8 + $0x1e0] sm:$0xff]  ;;  %v1559_v30 = vadd.f32 %v3673_v41, %v1534_v54  ;;  %v5602_v41 = vld [vmem:[#allocation8 + $0x188] sm:$0xff]  ;;  %v5604_v54 = vld [vmem:[#allocation8 + $0x190] sm:$0xff] }
 0x2b6   :  { %v3677_v61 = vmul.f32 -1.442695, %v1560_v26  ;;  %v5528_v26 = vld [vmem:[#allocation6 + $0x28] sm:$0xff]  ;;  %7356 = vst [vmem:[#allocation39_spill] sm:$0xff] %v5552_v40 }
 0x2b7   :  { %v3848_v2 = vpop.eup %3847  ;;  %7349 = vst [vmem:[#allocation32_spill] sm:$0xff] %v5528_v26  ;;  %1947 = vmatpush.msra.mxu1 %v5528_v26  ;;  %v5561_v26 = vld [vmem:[#allocation8 + $0x1f0] sm:$0xff] }
 0x2b8   :  { %v3850_v18 = vpop.eup %3849  ;;  %v5522_v23 = vadd.f32 1.0, %v3848_v2  ;;  %3851 = vpow2.f32 %v3677_v61  ;;  %v5541_v61 = vld [vmem:[#allocation6] sm:$0xff]  ;;  %v5543_v2 = vld [vmem:[#allocation6 + $0x8] sm:$0xff]  ;;  %7357 = vst [vmem:[#allocation40_spill] sm:$0xff] %v5554_v17  ;;  %2171 = vmatpush.msrb.mxu2 %v5561_v26 }
 0x2b9   :  { %v5532_v37 = vadd.f32 1.0, %v3850_v18  ;;  %7352 = vst [vmem:[#allocation35_spill] sm:$0xff] %v5541_v61  ;;  %1928 = vmatpush.msra.mxu0 %v5541_v61  ;;  %v5550_v18 = vld [vmem:[#allocation6 + $0x18] sm:$0xff]  ;;  %1948 = vmatpush.msra.mxu1 %v5543_v2  ;;  %v5567_v61 = vld [vmem:[#allocation8 + $0x1c0] sm:$0xff] }
 0x2ba   :  { %3853 = vrcp.f32 %v5522_v23  ;;  %7353 = vst [vmem:[#allocation36_spill] sm:$0xff] %v5543_v2  ;;  %1988 = vmatpush.msra.mxu3 %v5550_v18  ;;  %2172 = vmatpush.msrb.mxu2 %v5571_v34  ;;  %v1576_v24 = vand.u32 2147483648, %v5522_v23  ;;  %vm1570_vm10 = vweird.f32 %v5522_v23 }
 0x2bb   :  { %3855 = vrcp.f32 %v5532_v37  ;;  %7355 = vst [vmem:[#allocation38_spill] sm:$0xff] %v5550_v18  ;;  %2131 = vmatpush.msrb.mxu0 %v5552_v40  ;;  %2151 = vmatpush.msrb.mxu1 %v5554_v17  ;;  %v5581_v40 = vld [vmem:[#allocation8 + $0x1a0] sm:$0xff]  ;;  %v5583_v18 = vld [vmem:[#allocation8 + $0x1a8] sm:$0xff]  ;;  %vm1589_vm11 = vweird.f32 %v5532_v37 }
 0x2bc   :  { %7358 = vst [vmem:[#allocation41_spill] sm:$0xff] %v5561_v26  ;;  %2191 = vmatpush.msrb.mxu3 %v5563_v42  ;;  %v5591_v26 = vld [vmem:[#allocation8 + $0x1b8] sm:$0xff]  ;;  %2173 = vmatpush.msrb.mxu2 %v5585_v33  ;;  %v5621_v33 = vld [vmem:[#allocation8 + $0x170] sm:$0xff] }
 0x2bd   :  { %7359 = vst [vmem:[#allocation42_spill] sm:$0xff] %v5563_v42  ;;  %2132 = vmatpush.msrb.mxu0 %v5567_v61  ;;  %2152 = vmatpush.msrb.mxu1 %v5569_v60  ;;  %v5600_v42 = vld [vmem:[#allocation8 + $0x180] sm:$0xff] }
 0x2be   :  { %7360 = vst [vmem:[#allocation43_spill] sm:$0xff] %v5567_v61  ;;  %v3852_v20 = vpop.eup %3851  ;;  %2192 = vmatpush.msrb.mxu3 %v5575_v1  ;;  %2174 = vmatpush.msrb.mxu2 %v5604_v54 }
 0x2bf   :  { %7361 = vst [vmem:[#allocation48_spill] sm:$0xff] %v5569_v60  ;;  %v5577_v2 = vadd.f32 1.0, %v3852_v20  ;;  %2133 = vmatpush.msrb.mxu0 %v5581_v40  ;;  %2153 = vmatpush.msrb.mxu1 %v5583_v18  ;;  %v5610_v60 = vld [vmem:[#allocation8 + $0x198] sm:$0xff] }
 0x2c0   :  { %7363 = vst [vmem:[#allocation45_spill] sm:$0xff] %v5575_v1  ;;  %v5587_v36 = vpop.eup %3853  ;;  %2193 = vmatpush.msrb.mxu3 %v5591_v26  ;;  %v5616_v1 = vld [vmem:[#allocation8 + $0x168] sm:$0xff]  ;;  %2175 = vmatpush.msrb.mxu2 %v5621_v33 }
 0x2c1   :  { %7364 = vst [vmem:[#allocation46_spill] sm:$0xff] %v5581_v40  ;;  %v5593_v20 = vpop.eup %3855  ;;  %v1566_v61 = vmul.f32 %v5587_v36, %v5522_v23  ;;  %3857 = vrcp.f32 %v5577_v2  ;;  %2134 = vmatpush.msrb.mxu0 %v5600_v42  ;;  %v5614_v40 = vld [vmem:[#allocation8 + $0x160] sm:$0xff]  ;;  %2154 = vmatpush.msrb.mxu1 %v5602_v41  ;;  %vm1571_vm8 = vweird.f32 %v5587_v36  ;;  %vm1609_vm1 = vweird.f32 %v5577_v2 }
 0x2c2   :  { %7365 = vst [vmem:[#allocation52_spill] sm:$0xff] %v5583_v18  ;;  %v1585_v34 = vmul.f32 %v5593_v20, %v5532_v37  ;;  %3859 = vtanh.f32 %v1559_v30  ;;  %v5623_v18 = vld [vmem:[#allocation8 + $0x178] sm:$0xff]  ;;  %2194 = vmatpush.msrb.mxu3 %v5610_v60  ;;  %v5631_v30 = vld [vmem:[#allocation8 + $0x140] sm:$0xff]  ;;  %vm1590_vm9 = vweird.f32 %v5593_v20  ;;  %vm5659_vm12 = vmor %vm1570_vm10, %vm1571_vm8 }
 0x2c3   :  { %7367 = vst [vmem:[#allocation49_spill] sm:$0xff] %v5591_v26  ;;  %v1567_v17 = vsub.f32 1.0, %v1566_v61  ;;  %v1595_v61 = vand.u32 2147483648, %v5532_v37  ;;  %v1574_v26 = vand.u32 2147483647, %v5522_v23  ;;  %2135 = vmatpush.msrb.mxu0 %v5614_v40  ;;  %2155 = vmatpush.msrb.mxu1 %v5616_v1  ;;  %vm5672_vm13 = vmor %vm1589_vm11, %vm1590_vm9 }
 0x2c4   :  { %7368 = vst [vmem:[#allocation50_spill] sm:$0xff] %v5600_v42  ;;  %v1586_v27 = vsub.f32 1.0, %v1585_v34  ;;  %v5633_v34 = vld [vmem:[#allocation8 + $0x148] sm:$0xff]  ;;  %2195 = vmatpush.msrb.mxu3 %v5623_v18 }
 0x2c5   :  { %7369 = vst [vmem:[#allocation56_spill] sm:$0xff] %v5602_v41  ;;  %v1568_v42 = vmul.f32 %v5587_v36, %v1567_v17  ;;  %v1593_v17 = vand.u32 2147483647, %v5532_v37  ;;  %2136 = vmatpush.msrb.mxu0 %v5631_v30  ;;  %2156 = vmatpush.msrb.mxu1 %v5633_v34  ;;  %vm1575_vm14 = vcmp.eq.f32.partialorder %v1574_v26, 8.507059e+37 }
 0x2c6   :  { %7370 = vst [vmem:[#allocation51_spill] sm:$0xff] %v5604_v54  ;;  %v5635_v54 = vld [vmem:[#allocation8 + $0x150] sm:$0xff]  ;;  %v1587_v41 = vmul.f32 %v5593_v20, %v1586_v27  ;;  %v5650_v27 = vld [vmem:[#allocation8 + $0x120] sm:$0xff]  ;;  %2196 = vmatpush.msrb.mxu3 %v5642_v22 }
 0x2c7   :  { %7371 = vst [vmem:[#allocation53_spill] sm:$0xff] %v5610_v60  ;;  %v5644_v60 = vpop.eup %3857  ;;  %2176 = vmatpush.msrb.mxu2 %v5635_v54  ;;  %2137 = vmatpush.msrb.mxu0 %v5650_v27  ;;  %vm1594_vm15 = vcmp.eq.f32.partialorder %v1593_v17, 8.507059e+37  ;;  %v5704_v17 = vld [vmem:[#allocation8 + $0xe8] sm:$0xff] }
 0x2c8   :  { %7372 = vst [vmem:[#allocation54_spill] sm:$0xff] %v5614_v40  ;;  %v1569_v40 = vadd.f32 %v5587_v36, %v1568_v42  ;;  %v1577_v42 = vor.u32 1.1754944e-38, %v1576_v24  ;;  %v1588_v23 = vadd.f32 %v5593_v20, %v1587_v41  ;;  %v5681_v41 = vld [vmem:[#allocation8 + $0x100] sm:$0xff]  ;;  %2157 = vmatpush.msrb.mxu1 %v5652_v21  ;;  %vm1610_vm0 = vweird.f32 %v5644_v60 }
 0x2c9   :  { %7373 = vst [vmem:[#allocation60_spill] sm:$0xff] %v5616_v1  ;;  %v1596_v1 = vor.u32 1.1754944e-38, %v1595_v61  ;;  %2177 = vmatpush.msrb.mxu2 %v5654_v16  ;;  %2138 = vmatpush.msrb.mxu0 %v5681_v41  ;;  %vm5756_vm2 = vmor %vm1609_vm1, %vm1610_vm0 }
 0x2ca   :  { %7374 = vst [vmem:[#allocation55_spill] sm:$0xff] %v5621_v33  ;;  %v1573_v24 = vsel %vm5659_vm12, %v5587_v36, %v1569_v40  ;;  %v1592_v14 = vsel %vm5672_vm13, %v5593_v20, %v1588_v23  ;;  %v3679_v36 = vld [vmem:[%s6749_s1 + $0x80] sm:$0xff]  ;;  %v5693_v33 = vld [vmem:[#allocation8 + $0x110] sm:$0xff]  ;;  %v5695_v40 = vld [vmem:[#allocation8 + $0x118] sm:$0xff] }
 0x2cb   :  { %7375 = vst [vmem:[#allocation57_spill] sm:$0xff] %v5623_v18  ;;  %v5668_v18 = vld [vmem:[#allocation8 + $0x138] sm:$0xff]  ;;  %v1578_v15 = vsel %vm1575_vm14, %v1577_v42, %v1573_v24  ;;  %v1597_v26 = vsel %vm1594_vm15, %v1596_v1, %v1592_v14  ;;  %v3680_v20 = vld [vmem:[%s6749_s1 + $0x88] sm:$0xff]  ;;  %2178 = vmatpush.msrb.mxu2 %v5693_v33  ;;  %v5710_v14 = vld [vmem:[#allocation8 + $0xf0] sm:$0xff] }
 0x2cc   :  { %7376 = vst [vmem:[#allocation58_spill] sm:$0xff] %v5631_v30  ;;  %v1605_v30 = vmul.f32 %v5644_v60, %v5577_v2  ;;  %2197 = vmatpush.msrb.mxu3 %v5668_v18  ;;  %v1619_v23 = vmul.f32 %v1597_v26, %v5329_v50  ;;  %v5716_v24 = vld [vmem:[#allocation8 + $0xc0] sm:$0xff] }
 0x2cd   :  { %7377 = vst [vmem:[#allocation64_spill] sm:$0xff] %v5633_v34  ;;  %v3860_v34 = vpop.eup %3859  ;;  %2179 = vmatpush.msrb.mxu2 %v5710_v14 }
 0x2ce   :  { %7378 = vst [vmem:[#allocation59_spill] sm:$0xff] %v5635_v54  ;;  %v5683_v54 = vld [vmem:[#allocation8 + $0x108] sm:$0xff]  ;;  %v1606_v61 = vsub.f32 1.0, %v1605_v30  ;;  %v1620_v42 = vmul.f32 %v3860_v34, %v1578_v15  ;;  %v5702_v30 = vld [vmem:[#allocation8 + $0xe0] sm:$0xff]  ;;  %v5712_v15 = vld [vmem:[#allocation8 + $0xf8] sm:$0xff]  ;;  %2198 = vmatpush.msrb.mxu3 %v5695_v40 }
 0x2cf   :  { %7383 = vst [vmem:[#allocation61_spill] sm:$0xff] %v5681_v41  ;;  %2158 = vmatpush.msrb.mxu1 %v5683_v54  ;;  %2139 = vmatpush.msrb.mxu0 %v5702_v30  ;;  %v5718_v41 = vld [vmem:[#allocation8 + $0xc8] sm:$0xff] }
 0x2d0   :  { %7384 = vst [vmem:[#allocation62_spill] sm:$0xff] %v5683_v54  ;;  %v1607_v37 = vmul.f32 %v5644_v60, %v1606_v61  ;;  %v1712_v1 = vpop.f32.mrf.mxu0  ;;  %v1732_v34 = vpop.f32.mrf.mxu1  ;;  %v5720_v50 = vadd.f32 %v1620_v42, %v1619_v23  ;;  %v5725_v54 = vld [vmem:[#allocation8 + $0xd8] sm:$0xff]  ;;  %2199 = vmatpush.msrb.mxu3 %v5712_v15  ;;  %v5732_v42 = vld [vmem:[#allocation8 + $0xa0] sm:$0xff] }
 0x2d1   :  { %7385 = vst [vmem:[#allocation68_spill] sm:$0xff] %v5693_v33  ;;  %v1775_v61 = vadd.f32 %v3679_v36, %v1712_v1  ;;  %v1776_v26 = vadd.f32 %v3680_v20, %v1732_v34  ;;  %2159 = vmatpush.msrb.mxu1 %v5704_v17  ;;  %v5723_v33 = vld [vmem:[#allocation8 + $0xd0] sm:$0xff]  ;;  %v5734_v36 = vld [vmem:[#allocation8 + $0xa8] sm:$0xff]  ;;  %2140 = vmatpush.msrb.mxu0 %v5716_v24  ;;  %v5741_v34 = vld [vmem:[#allocation8 + $0xb8] sm:$0xff] }
 0x2d2   :  { %7386 = vst [vmem:[#allocation63_spill] sm:$0xff] %v5695_v40  ;;  %v1615_v40 = vand.u32 2147483648, %v5577_v2  ;;  %3861 = vtanh.f32 %v5720_v50  ;;  %v5739_v1 = vld [vmem:[#allocation8 + $0xb0] sm:$0xff]  ;;  %2180 = vmatpush.msrb.mxu2 %v5723_v33  ;;  %2200 = vmatpush.msrb.mxu3 %v5725_v54 }
 0x2d3   :  { %7387 = vst [vmem:[#allocation65_spill] sm:$0xff] %v5702_v30  ;;  %v1608_v30 = vadd.f32 %v5644_v60, %v1607_v37  ;;  %v3683_v20 = vmul.f32 -1.442695, %v1775_v61  ;;  %v3684_v23 = vmul.f32 -1.442695, %v1776_v26  ;;  %2160 = vmatpush.msrb.mxu1 %v5718_v41  ;;  %v3682_v37 = vld [vmem:[%s6749_s1 + $0x98] sm:$0xff]  ;;  %2141 = vmatpush.msrb.mxu0 %v5732_v42 }
 0x2d4   :  { %7388 = vst [vmem:[#allocation66_spill] sm:$0xff] %v5712_v15  ;;  %v1613_v15 = vand.u32 2147483647, %v5577_v2  ;;  %v5750_v61 = vld [vmem:[#allocation8 + $0x80] sm:$0xff]  ;;  %v5752_v26 = vld [vmem:[#allocation8 + $0x88] sm:$0xff]  ;;  %v5762_v2 = vld [vmem:[#allocation8 + $0x90] sm:$0xff]  ;;  %2181 = vmatpush.msrb.mxu2 %v5739_v1  ;;  %2201 = vmatpush.msrb.mxu3 %v5741_v34 }
 0x2d5   :  { %7389 = vst [vmem:[#allocation67_spill] sm:$0xff] %v5716_v24  ;;  %3863 = vpow2.f32 %v3683_v20  ;;  %2161 = vmatpush.msrb.mxu1 %v5734_v36  ;;  %v5773_v20 = vld [vmem:[#allocation8 + $0x68] sm:$0xff]  ;;  %2142 = vmatpush.msrb.mxu0 %v5750_v61 }
 0x2d6   :  { %7390 = vst [vmem:[#allocation69_spill] sm:$0xff] %v5718_v41  ;;  %3865 = vpow2.f32 %v3684_v23  ;;  %v5771_v41 = vld [vmem:[#allocation8 + $0x60] sm:$0xff]  ;;  %v5779_v23 = vld [vmem:[#allocation8 + $0x78] sm:$0xff]  ;;  %vm1614_vm3 = vcmp.eq.f32.partialorder %v1613_v15, 8.507059e+37  ;;  %2182 = vmatpush.msrb.mxu2 %v5762_v2 }
 0x2d7   :  { %7391 = vst [vmem:[#allocation71_spill] sm:$0xff] %v5720_v50  ;;  %v1772_v24 = vpop.f32.mrf.mxu3  ;;  %2162 = vmatpush.msrb.mxu1 %v5752_v26  ;;  %2143 = vmatpush.msrb.mxu0 %v5771_v41 }
 0x2d8   :  { %7392 = vst [vmem:[#allocation72_spill] sm:$0xff] %v5723_v33  ;;  %v5764_v33 = vld [vmem:[#allocation8 + $0x98] sm:$0xff]  ;;  %v1778_v50 = vadd.f32 %v3682_v37, %v1772_v24  ;;  %v5793_v24 = vld [vmem:[#allocation8 + $0x50] sm:$0xff] }
 0x2d9   :  { %7393 = vst [vmem:[#allocation73_spill] sm:$0xff] %v5725_v54  ;;  %v1612_v54 = vsel %vm5756_vm2, %v5644_v60, %v1608_v30  ;;  %2202 = vmatpush.msrb.mxu3 %v5764_v33  ;;  %v5783_v60 = vld [vmem:[#allocation8 + $0x40] sm:$0xff]  ;;  %v5785_v30 = vld [vmem:[#allocation8 + $0x48] sm:$0xff]  ;;  %2163 = vmatpush.msrb.mxu1 %v5773_v20  ;;  %v5795_v37 = vld [vmem:[#allocation8 + $0x58] sm:$0xff] }
 0x2da   :  { %7394 = vst [vmem:[#allocation74_spill] sm:$0xff] %v5732_v42  ;;  %v1616_v42 = vor.u32 1.1754944e-38, %v1615_v40  ;;  %v3862_v40 = vpop.eup %3861  ;;  %2144 = vmatpush.msrb.mxu0 %v5783_v60 }
 0x2db   :  { %7395 = vst [vmem:[#allocation75_spill] sm:$0xff] %v5734_v36  ;;  %v5777_v36 = vld [vmem:[#allocation8 + $0x70] sm:$0xff]  ;;  %2203 = vmatpush.msrb.mxu3 %v5779_v23  ;;  %v3864_v15 = vpop.eup %3863  ;;  %2164 = vmatpush.msrb.mxu1 %v5785_v30 }
 0x2dc   :  { %7396 = vst [vmem:[#allocation76_spill] sm:$0xff] %v5741_v34  ;;  %v1617_v34 = vsel %vm1614_vm3, %v1616_v42, %v1612_v54  ;;  %2183 = vmatpush.msrb.mxu2 %v5777_v36  ;;  %v3866_v54 = vpop.eup %3865  ;;  %v5797_v42 = vadd.f32 1.0, %v3864_v15  ;;  %v5817_v15 = vld [vmem:[#allocation8 + $0x8] sm:$0xff] }
 0x2dd   :  { %7397 = vst [vmem:[#allocation77_spill] sm:$0xff] %v5750_v61  ;;  %v1623_v61 = vmul.f32 %v3862_v40, %v1617_v34  ;;  %v5802_v34 = vld [vmem:[#allocation8 + $0x20] sm:$0xff]  ;;  %v5806_v40 = vadd.f32 1.0, %v3866_v54  ;;  %2204 = vmatpush.msrb.mxu3 %v5795_v37  ;;  %v5824_v54 = vld [vmem:[#allocation8 + $0x18] sm:$0xff] }
 0x2de   :  { %7398 = vst [vmem:[#allocation78_spill] sm:$0xff] %v5752_v26  ;;  %v3685_v26 = vmul.f32 -1.442695, %v1778_v50  ;;  %v5804_v50 = vld [vmem:[#allocation8 + $0x28] sm:$0xff]  ;;  %2184 = vmatpush.msrb.mxu2 %v5793_v24  ;;  %2145 = vmatpush.msrb.mxu0 %v5802_v34  ;;  %vm1788_vm6 = vweird.f32 %v5797_v42 }
 0x2df   :  { %7401 = vst [vmem:[#allocation79_spill] sm:$0xff] %v5783_v60  ;;  %1929 = vmatmul.f32.vlgmr.msra.gmra.mxu0 %v1623_v61  ;;  %1949 = vmatmul.f32.vlgmr.msra.gmra.mxu1 %v1623_v61  ;;  %v5810_v60 = vld [vmem:[#allocation8 + $0x38] sm:$0xff]  ;;  %vm1807_vm7 = vweird.f32 %v5806_v40 }
 0x2e0   :  { %7402 = vst [vmem:[#allocation80_spill] sm:$0xff] %v5785_v30  ;;  %3867 = vpow2.f32 %v3685_v26  ;;  %1969 = vmatmul.f32.vlgmr.msra.gmra.mxu2 %v1623_v61  ;;  %1989 = vmatmul.f32.vlgmr.msra.gmra.mxu3 %v1623_v61  ;;  %v5808_v30 = vld [vmem:[#allocation8 + $0x30] sm:$0xff]  ;;  %v5815_v26 = vld [vmem:[#allocation8] sm:$0xff] }
 0x2e1   :  { %7403 = vst [vmem:[#allocation81_spill] sm:$0xff] %v5793_v24  ;;  %3869 = vrcp.f32 %v5797_v42  ;;  %2165 = vmatpush.msrb.mxu1 %v5804_v50  ;;  %2185 = vmatpush.msrb.mxu2 %v5808_v30  ;;  %v1752_v24 = vpop.f32.mrf.mxu2 }
 0x2e2   :  { %7404 = vst [vmem:[#allocation82_spill] sm:$0xff] %v5795_v37  ;;  %3871 = vrcp.f32 %v5806_v40  ;;  %2205 = vmatpush.msrb.mxu3 %v5810_v60  ;;  %v3681_v37 = vld [vmem:[%s6749_s1 + $0x90] sm:$0xff]  ;;  %2146 = vmatpush.msrb.mxu0 %v5815_v26 }
 0x2e3   :  { %3678 = vst [vmem:[%s6752_s4 + $0x18] sm:$0xff] %v1623_v61  ;;  %v5822_v61 = vld [vmem:[#allocation8 + $0x10] sm:$0xff]  ;;  %2166 = vmatpush.msrb.mxu1 %v5817_v15 }
 0x2e4   :  { %7405 = vst [vmem:[#allocation83_spill] sm:$0xff] %v5802_v34  ;;  %2186 = vmatpush.msrb.mxu2 %v5822_v61  ;;  %2206 = vmatpush.msrb.mxu3 %v5824_v54 }
 0x2e5   :  { %7406 = vst [vmem:[#allocation84_spill] sm:$0xff] %v5804_v50  ;;  %2349 = vmatpush.msra.mxu0 %v5348_v63  ;;  %2369 = vmatpush.msra.mxu1 %v5350_v31 }
 0x2e6   :  { %7407 = vst [vmem:[#allocation85_spill] sm:$0xff] %v5808_v30  ;;  %v3868_v34 = vpop.eup %3867  ;;  %v1777_v30 = vadd.f32 %v3681_v37, %v1752_v24  ;;  %2389 = vmatpush.msra.mxu2 %v5352_v38  ;;  %2409 = vmatpush.msra.mxu3 %v5356_v45  ;;  %v1794_v38 = vand.u32 2147483648, %v5797_v42  ;;  %v1813_v45 = vand.u32 2147483648, %v5806_v40  ;;  %v7420_v24 = vld [vmem:[#allocation22_spill] sm:$0xff]  ;;  %v7421_v37 = vld [vmem:[#allocation15_spill] sm:$0xff] }
 0x2e7   :  { %7408 = vst [vmem:[#allocation86_spill] sm:$0xff] %v5810_v60  ;;  %v5835_v50 = vadd.f32 1.0, %v3868_v34  ;;  %v3870_v60 = vpop.eup %3869  ;;  %2350 = vmatpush.msra.mxu0 %v5360_v49  ;;  %2370 = vmatpush.msra.mxu1 %v5362_v52  ;;  %v1792_v52 = vand.u32 2147483647, %v5797_v42 }
 0x2e8   :  { %7409 = vst [vmem:[#allocation87_spill] sm:$0xff] %v5815_v26  ;;  %v3872_v26 = vpop.eup %3871  ;;  %2390 = vmatpush.msra.mxu2 %v5364_v43  ;;  %2410 = vmatpush.msra.mxu3 %v5368_v25  ;;  %vm1789_vm4 = vweird.f32 %v3870_v60  ;;  %v1811_v25 = vand.u32 2147483647, %v5806_v40 }
 0x2e9   :  { %7410 = vst [vmem:[#allocation70_spill] sm:$0xff] %v5817_v15  ;;  %v1784_v15 = vmul.f32 %v3870_v60, %v5797_v42  ;;  %3873 = vrcp.f32 %v5835_v50  ;;  %v1803_v34 = vmul.f32 %v3872_v26, %v5806_v40  ;;  %2351 = vmatpush.msra.mxu0 %v5372_v29  ;;  %2371 = vmatpush.msra.mxu1 %v5374_v32  ;;  %vm1808_vm5 = vweird.f32 %v3872_v26  ;;  %vm1790_vm8 = vmor %vm1788_vm6, %vm1789_vm4  ;;  %v7423_v40 = vld [vmem:[#allocation24_spill] sm:$0xff] }
 0x2ea   :  { %3875 = vtanh.f32 %v1777_v30  ;;  %2391 = vmatpush.msra.mxu2 %v5376_v28  ;;  %2411 = vmatpush.msra.mxu3 %v5380_v48  ;;  %v1795_v28 = vor.u32 1.1754944e-38, %v1794_v38  ;;  %vm1809_vm9 = vmor %vm1807_vm7, %vm1808_vm5  ;;  %vm1793_vm10 = vcmp.eq.f32.partialorder %v1792_v52, 8.507059e+37  ;;  %vm1812_vm11 = vcmp.eq.f32.partialorder %v1811_v25, 8.507059e+37  ;;  %v7429_v38 = vld [vmem:[#allocation30_spill] sm:$0xff]  ;;  %v7432_v52 = vld [vmem:[#allocation33_spill] sm:$0xff] }
 0x2eb   :  { %v1785_v63 = vsub.f32 1.0, %v1784_v15  ;;  %v1804_v31 = vsub.f32 1.0, %v1803_v34  ;;  %2352 = vmatpush.msra.mxu0 %v5384_v39  ;;  %2372 = vmatpush.msra.mxu1 %v5386_v53  ;;  %v1814_v53 = vor.u32 1.1754944e-38, %v1813_v45  ;;  %vm1827_vm13 = vweird.f32 %v5835_v50  ;;  %v7425_v15 = vld [vmem:[#allocation26_spill] sm:$0xff]  ;;  %v7426_v34 = vld [vmem:[#allocation27_spill] sm:$0xff] }
 0x2ec   :  { %2392 = vmatpush.msra.mxu2 %v5388_v59  ;;  %2412 = vmatpush.msra.mxu3 %v5392_v3  ;;  %v7430_v45 = vld [vmem:[#allocation31_spill] sm:$0xff] }
 0x2ed   :  { %v1786_v49 = vmul.f32 %v3870_v60, %v1785_v63  ;;  %v1805_v43 = vmul.f32 %v3872_v26, %v1804_v31  ;;  %2353 = vmatpush.msra.mxu0 %v5396_v5  ;;  %2373 = vmatpush.msra.mxu1 %v5398_v6  ;;  %v7427_v63 = vld [vmem:[#allocation28_spill] sm:$0xff]  ;;  %v7428_v31 = vld [vmem:[#allocation29_spill] sm:$0xff]  ;;  %v7434_v25 = vld [vmem:[#allocation35_spill] sm:$0xff] }
 0x2ee   :  { %2393 = vmatpush.msra.mxu2 %v5400_v7  ;;  %2413 = vmatpush.msra.mxu3 %v5404_v4 }
 0x2ef   :  { %v5860_v29 = vpop.eup %3873  ;;  %v1787_v32 = vadd.f32 %v3870_v60, %v1786_v49  ;;  %v1806_v48 = vadd.f32 %v3872_v26, %v1805_v43  ;;  %2354 = vmatpush.msra.mxu0 %v5408_v35  ;;  %2374 = vmatpush.msra.mxu1 %v5410_v8  ;;  %v7431_v49 = vld [vmem:[#allocation32_spill] sm:$0xff]  ;;  %v7433_v43 = vld [vmem:[#allocation34_spill] sm:$0xff] }
 0x2f0   :  { %v1823_v39 = vmul.f32 %v5860_v29, %v5835_v50  ;;  %v3876_v3 = vpop.eup %3875  ;;  %2394 = vmatpush.msra.mxu2 %v5412_v9  ;;  %2414 = vmatpush.msra.mxu3 %v5416_v10  ;;  %vm1828_vm12 = vweird.f32 %v5860_v29  ;;  %v1833_v9 = vand.u32 2147483648, %v5835_v50  ;;  %v1831_v10 = vand.u32 2147483647, %v5835_v50  ;;  %v7422_v50 = vld [vmem:[#allocation23_spill] sm:$0xff] }
 0x2f1   :  { %v1791_v59 = vsel %vm1790_vm8, %v3870_v60, %v1787_v32  ;;  %v1810_v6 = vsel %vm1809_vm9, %v3872_v26, %v1806_v48  ;;  %2355 = vmatpush.msra.mxu0 %v5420_v11  ;;  %2375 = vmatpush.msra.mxu1 %v5422_v12  ;;  %v7411_v11 = vld [vmem:[#allocation14_spill] sm:$0xff]  ;;  %vm1829_vm14 = vmor %vm1827_vm13, %vm1828_vm12  ;;  %v7412_v12 = vld [vmem:[#allocation16_spill] sm:$0xff] }
 0x2f2   :  { %v1796_v5 = vsel %vm1793_vm10, %v1795_v28, %v1791_v59  ;;  %v1824_v30 = vsub.f32 1.0, %v1823_v39  ;;  %v1815_v7 = vsel %vm1812_vm11, %v1814_v53, %v1810_v6  ;;  %2395 = vmatpush.msra.mxu2 %v5424_v56  ;;  %2415 = vmatpush.msra.mxu3 %v5428_v51  ;;  %v7413_v56 = vld [vmem:[#allocation12_spill] sm:$0xff]  ;;  %vm1832_vm15 = vcmp.eq.f32.partialorder %v1831_v10, 8.507059e+37  ;;  %v7424_v26 = vld [vmem:[#allocation25_spill] sm:$0xff]  ;;  %v7437_v28 = vld [vmem:[#allocation38_spill] sm:$0xff] }
 0x2f3   :  { %v1838_v4 = vmul.f32 %v3876_v3, %v1796_v5  ;;  %v1837_v60 = vmul.f32 %v1815_v7, %v5342_v19  ;;  %2356 = vmatpush.msra.mxu0 %v5432_v47  ;;  %2376 = vmatpush.msra.mxu1 %v5434_v55  ;;  %v7414_v47 = vld [vmem:[#allocation17_spill] sm:$0xff]  ;;  %v7415_v55 = vld [vmem:[#allocation18_spill] sm:$0xff]  ;;  %v7438_v48 = vld [vmem:[#allocation39_spill] sm:$0xff] }
 0x2f4   :  { %v1825_v35 = vmul.f32 %v5860_v29, %v1824_v30  ;;  %2396 = vmatpush.msra.mxu2 %v5436_v58  ;;  %2416 = vmatpush.msra.mxu3 %v5446_v44  ;;  %v1834_v58 = vor.u32 1.1754944e-38, %v1833_v9  ;;  %v7416_v44 = vld [vmem:[#allocation19_spill] sm:$0xff]  ;;  %v7436_v32 = vld [vmem:[#allocation37_spill] sm:$0xff]  ;;  %v7439_v39 = vld [vmem:[#allocation40_spill] sm:$0xff] }
 0x2f5   :  { %v5884_v8 = vadd.f32 %v1838_v4, %v1837_v60  ;;  %2357 = vmatpush.msra.mxu0 %v5450_v57  ;;  %2377 = vmatpush.msra.mxu1 %v5452_v62  ;;  %v7417_v57 = vld [vmem:[#allocation13_spill] sm:$0xff]  ;;  %v7418_v62 = vld [vmem:[#allocation20_spill] sm:$0xff]  ;;  %v7441_v59 = vld [vmem:[#allocation42_spill] sm:$0xff] }
 0x2f6   :  { %v1826_v19 = vadd.f32 %v5860_v29, %v1825_v35  ;;  %2397 = vmatpush.msra.mxu2 %v5454_v46  ;;  %2417 = vmatpush.msra.mxu3 %v5458_v0  ;;  %v7419_v46 = vld [vmem:[#allocation21_spill] sm:$0xff]  ;;  %v7442_v3 = vld [vmem:[#allocation43_spill] sm:$0xff]  ;;  %v7443_v5 = vld [vmem:[#allocation48_spill] sm:$0xff] }
 0x2f7   :  { %3877 = vtanh.f32 %v5884_v8  ;;  %2358 = vmatpush.msra.mxu0 %v5462_v13  ;;  %2378 = vmatpush.msra.mxu1 %v7411_v11  ;;  %v7440_v53 = vld [vmem:[#allocation41_spill] sm:$0xff]  ;;  %v7444_v6 = vld [vmem:[#allocation44_spill] sm:$0xff]  ;;  %v7446_v7 = vld [vmem:[#allocation46_spill] sm:$0xff] }
 0x2f8   :  { %2398 = vmatpush.msra.mxu2 %v7412_v12  ;;  %2418 = vmatpush.msra.mxu3 %v7413_v56  ;;  %v1830_v51 = vsel %vm1829_vm14, %v5860_v29, %v1826_v19  ;;  %v7435_v29 = vld [vmem:[#allocation36_spill] sm:$0xff]  ;;  %v7445_v30 = vld [vmem:[#allocation45_spill] sm:$0xff]  ;;  %v7448_v60 = vld [vmem:[#allocation47_spill] sm:$0xff] }
 0x2f9   :  { %2359 = vmatpush.msra.mxu0 %v7414_v47  ;;  %2379 = vmatpush.msra.mxu1 %v7415_v55  ;;  %v1835_v13 = vsel %vm1832_vm15, %v1834_v58, %v1830_v51  ;;  %v7447_v4 = vld [vmem:[#allocation52_spill] sm:$0xff]  ;;  %v7449_v35 = vld [vmem:[#allocation49_spill] sm:$0xff]  ;;  %v7450_v19 = vld [vmem:[#allocation50_spill] sm:$0xff] }
 0x2fa   :  { %2399 = vmatpush.msra.mxu2 %v7416_v44  ;;  %2419 = vmatpush.msra.mxu3 %v7417_v57  ;;  %v7451_v9 = vld [vmem:[#allocation56_spill] sm:$0xff]  ;;  %v7452_v10 = vld [vmem:[#allocation51_spill] sm:$0xff]  ;;  %v7453_v11 = vld [vmem:[#allocation53_spill] sm:$0xff] }
 0x2fb   :  { %2360 = vmatpush.msra.mxu0 %v7418_v62  ;;  %2380 = vmatpush.msra.mxu1 %v7419_v46  ;;  %v7454_v12 = vld [vmem:[#allocation54_spill] sm:$0xff]  ;;  %v7455_v56 = vld [vmem:[#allocation60_spill] sm:$0xff]  ;;  %v7456_v51 = vld [vmem:[#allocation55_spill] sm:$0xff] }
 0x2fc   :  { %2400 = vmatpush.msra.mxu2 %v7420_v24  ;;  %2420 = vmatpush.msra.mxu3 %v7421_v37  ;;  %v7457_v47 = vld [vmem:[#allocation57_spill] sm:$0xff]  ;;  %v7458_v55 = vld [vmem:[#allocation58_spill] sm:$0xff]  ;;  %v7459_v58 = vld [vmem:[#allocation64_spill] sm:$0xff] }
 0x2fd   :  { %v3878_v0 = vpop.eup %3877  ;;  %2361 = vmatpush.msra.mxu0 %v7422_v50  ;;  %2381 = vmatpush.msra.mxu1 %v7423_v40  ;;  %v7460_v44 = vld [vmem:[#allocation59_spill] sm:$0xff]  ;;  %v7461_v57 = vld [vmem:[#allocation61_spill] sm:$0xff]  ;;  %v7462_v62 = vld [vmem:[#allocation62_spill] sm:$0xff] }
 0x2fe   :  { %v1841_v42 = vmul.f32 %v3878_v0, %v1835_v13  ;;  %2401 = vmatpush.msra.mxu2 %v7424_v26  ;;  %2421 = vmatpush.msra.mxu3 %v7425_v15  ;;  %v7463_v46 = vld [vmem:[#allocation68_spill] sm:$0xff]  ;;  %v7464_v0 = vld [vmem:[#allocation63_spill] sm:$0xff]  ;;  %v7465_v13 = vld [vmem:[#allocation65_spill] sm:$0xff] }
 0x2ff   :  { %2362 = vmatpush.msra.mxu0 %v7426_v34  ;;  %2382 = vmatpush.msra.mxu1 %v7427_v63  ;;  %v7471_v24 = vld [vmem:[#allocation74_spill] sm:$0xff]  ;;  %v7472_v37 = vld [vmem:[#allocation75_spill] sm:$0xff]  ;;  %v7478_v40 = vld [vmem:[#allocation81_spill] sm:$0xff] }
 0x300   :  { %3686 = vst [vmem:[%s6753_s5 + $0x20] sm:$0xff] %v1841_v42  ;;  %2147 = vmatmul.f32.vlgmr.msrb.gmra.mxu0 %v1841_v42  ;;  %2167 = vmatmul.f32.vlgmr.msrb.gmra.mxu1 %v1841_v42  ;;  %v7476_v50 = vld [vmem:[#allocation79_spill] sm:$0xff]  ;;  %v7479_v26 = vld [vmem:[#allocation82_spill] sm:$0xff]  ;;  %v3688_v34 = vld [vmem:[%s6748_s0 + $0x88] sm:$0xff] }
 0x301   :  { %2187 = vmatmul.f32.vlgmr.msrb.gmra.mxu2 %v1841_v42  ;;  %2207 = vmatmul.f32.vlgmr.msrb.gmra.mxu3 %v1841_v42  ;;  %v7473_v42 = vld [vmem:[#allocation76_spill] sm:$0xff]  ;;  %v7480_v15 = vld [vmem:[#allocation83_spill] sm:$0xff] }
 0x302   :  { %2402 = vmatpush.msra.mxu2 %v7428_v31  ;;  %2422 = vmatpush.msra.mxu3 %v7429_v38 }
 0x303   :  { %2363 = vmatpush.msra.mxu0 %v7430_v45  ;;  %2383 = vmatpush.msra.mxu1 %v7431_v49 }
 0x304   :  { %2403 = vmatpush.msra.mxu2 %v7432_v52  ;;  %2423 = vmatpush.msra.mxu3 %v7433_v43 }
 0x305   :  { %2364 = vmatpush.msra.mxu0 %v7434_v25  ;;  %2384 = vmatpush.msra.mxu1 %v7435_v29 }
 0x306   :  { %2404 = vmatpush.msra.mxu2 %v7436_v32  ;;  %2424 = vmatpush.msra.mxu3 %v7437_v28 }
 0x307   :  { %2567 = vmatpush.msrb.mxu0 %v7438_v48  ;;  %2587 = vmatpush.msrb.mxu1 %v7439_v39  ;;  %v3689_v39 = vld [vmem:[%s6748_s0 + $0x90] sm:$0xff] }
 0x308   :  { %2607 = vmatpush.msrb.mxu2 %v7440_v53  ;;  %2627 = vmatpush.msrb.mxu3 %v7441_v59 }
 0x309   :  { %2568 = vmatpush.msrb.mxu0 %v7442_v3  ;;  %2588 = vmatpush.msrb.mxu1 %v7443_v5 }
 0x30a   :  { %2608 = vmatpush.msrb.mxu2 %v7444_v6  ;;  %2628 = vmatpush.msrb.mxu3 %v7445_v30 }
 0x30b   :  { %2569 = vmatpush.msrb.mxu0 %v7446_v7  ;;  %2589 = vmatpush.msrb.mxu1 %v7447_v4 }
 0x30c   :  { %2609 = vmatpush.msrb.mxu2 %v7448_v60  ;;  %2629 = vmatpush.msrb.mxu3 %v7449_v35 }
 0x30d   :  { %2570 = vmatpush.msrb.mxu0 %v7450_v19  ;;  %2590 = vmatpush.msrb.mxu1 %v7451_v9 }
 0x30e   :  { %2610 = vmatpush.msrb.mxu2 %v7452_v10  ;;  %2630 = vmatpush.msrb.mxu3 %v7453_v11 }
 0x30f   :  { %2571 = vmatpush.msrb.mxu0 %v7454_v12  ;;  %2591 = vmatpush.msrb.mxu1 %v7455_v56 }
 0x310   :  { %2611 = vmatpush.msrb.mxu2 %v7456_v51  ;;  %2631 = vmatpush.msrb.mxu3 %v7457_v47 }
 0x311   :  { %2572 = vmatpush.msrb.mxu0 %v7458_v55  ;;  %2592 = vmatpush.msrb.mxu1 %v7459_v58 }
 0x312   :  { %2612 = vmatpush.msrb.mxu2 %v7460_v44  ;;  %2632 = vmatpush.msrb.mxu3 %v5642_v22  ;;  %v7466_v22 = vld [vmem:[#allocation66_spill] sm:$0xff] }
 0x313   :  { %2573 = vmatpush.msrb.mxu0 %v5650_v27  ;;  %2593 = vmatpush.msrb.mxu1 %v5652_v21  ;;  %v7467_v21 = vld [vmem:[#allocation67_spill] sm:$0xff]  ;;  %v7470_v27 = vld [vmem:[#allocation73_spill] sm:$0xff] }
 0x314   :  { %2613 = vmatpush.msrb.mxu2 %v5654_v16  ;;  %2633 = vmatpush.msrb.mxu3 %v5668_v18  ;;  %v7468_v16 = vld [vmem:[#allocation69_spill] sm:$0xff]  ;;  %v7469_v18 = vld [vmem:[#allocation72_spill] sm:$0xff] }
 0x315   :  { %2574 = vmatpush.msrb.mxu0 %v7461_v57  ;;  %2594 = vmatpush.msrb.mxu1 %v7462_v62 }
 0x316   :  { %2614 = vmatpush.msrb.mxu2 %v7463_v46  ;;  %2634 = vmatpush.msrb.mxu3 %v7464_v0 }
 0x317   :  { %2575 = vmatpush.msrb.mxu0 %v7465_v13  ;;  %2595 = vmatpush.msrb.mxu1 %v5704_v17  ;;  %v7474_v17 = vld [vmem:[#allocation77_spill] sm:$0xff] }
 0x318   :  { %2615 = vmatpush.msrb.mxu2 %v5710_v14  ;;  %2635 = vmatpush.msrb.mxu3 %v7466_v22  ;;  %v7475_v14 = vld [vmem:[#allocation78_spill] sm:$0xff] }
 0x319   :  { %2576 = vmatpush.msrb.mxu0 %v7467_v21  ;;  %2596 = vmatpush.msrb.mxu1 %v7468_v16 }
 0x31a   :  { %2616 = vmatpush.msrb.mxu2 %v7469_v18  ;;  %2636 = vmatpush.msrb.mxu3 %v7470_v27  ;;  %v3695_v18 = vld [vmem:[%s6749_s1 + $0x60] sm:$0xff]  ;;  %v3696_v27 = vld [vmem:[%s6749_s1 + $0x68] sm:$0xff] }
 0x31b   :  { %2577 = vmatpush.msrb.mxu0 %v7471_v24  ;;  %2597 = vmatpush.msrb.mxu1 %v7472_v37  ;;  %v7486_v24 = vld [vmem:[#allocation71_spill] sm:$0xff] }
 0x31c   :  { %2617 = vmatpush.msrb.mxu2 %v5739_v1  ;;  %2637 = vmatpush.msrb.mxu3 %v7473_v42  ;;  %v7477_v1 = vld [vmem:[#allocation80_spill] sm:$0xff] }
 0x31d   :  { %2578 = vmatpush.msrb.mxu0 %v7474_v17  ;;  %2598 = vmatpush.msrb.mxu1 %v7475_v14 }
 0x31e   :  { %2618 = vmatpush.msrb.mxu2 %v5762_v2  ;;  %2638 = vmatpush.msrb.mxu3 %v5764_v33  ;;  %v7481_v2 = vld [vmem:[#allocation84_spill] sm:$0xff]  ;;  %v7482_v33 = vld [vmem:[#allocation85_spill] sm:$0xff] }
 0x31f   :  { %2579 = vmatpush.msrb.mxu0 %v5771_v41  ;;  %2599 = vmatpush.msrb.mxu1 %v5773_v20  ;;  %v7483_v41 = vld [vmem:[#allocation86_spill] sm:$0xff]  ;;  %v7484_v20 = vld [vmem:[#allocation87_spill] sm:$0xff] }
 0x320   :  { %2619 = vmatpush.msrb.mxu2 %v5777_v36  ;;  %2639 = vmatpush.msrb.mxu3 %v5779_v23  ;;  %v7485_v36 = vld [vmem:[#allocation70_spill] sm:$0xff]  ;;  %v3687_v23 = vld [vmem:[%s6748_s0 + $0x80] sm:$0xff] }
 0x321   :  { %2580 = vmatpush.msrb.mxu0 %v7476_v50  ;;  %2600 = vmatpush.msrb.mxu1 %v7477_v1 }
 0x322   :  { %2620 = vmatpush.msrb.mxu2 %v7478_v40  ;;  %2640 = vmatpush.msrb.mxu3 %v7479_v26 }
 0x323   :  { %2581 = vmatpush.msrb.mxu0 %v7480_v15  ;;  %2601 = vmatpush.msrb.mxu1 %v7481_v2 }
 0x324   :  { %2621 = vmatpush.msrb.mxu2 %v7482_v33  ;;  %2641 = vmatpush.msrb.mxu3 %v7483_v41 }
 0x325   :  { %2582 = vmatpush.msrb.mxu0 %v7484_v20  ;;  %2602 = vmatpush.msrb.mxu1 %v7485_v36  ;;  %v3698_v20 = vld [vmem:[%s6749_s1 + $0x78] sm:$0xff] }
 0x326   :  { %2622 = vmatpush.msrb.mxu2 %v5822_v61  ;;  %2642 = vmatpush.msrb.mxu3 %v5824_v54  ;;  %v3690_v61 = vld [vmem:[%s6748_s0 + $0x98] sm:$0xff] }
 0x35c   :  { %v1930_v63 = vpop.f32.mrf.mxu0  ;;  %v1950_v31 = vpop.f32.mrf.mxu1 }
 0x35d   :  { %v1993_v38 = vadd.f32 %v3687_v23, %v1930_v63  ;;  %v1994_v45 = vadd.f32 %v3688_v34, %v1950_v31 }
 0x35f   :  { %v3691_v49 = vmul.f32 -1.442695, %v1993_v38  ;;  %v3692_v52 = vmul.f32 -1.442695, %v1994_v45 }
 0x361   :  { %3879 = vpow2.f32 %v3691_v49 }
 0x362   :  { %3881 = vpow2.f32 %v3692_v52 }
 0x363   :  { %v1990_v54 = vpop.f32.mrf.mxu3  ;;  %v1970_v53 = vpop.f32.mrf.mxu2 }
 0x364   :  { %v1996_v43 = vadd.f32 %v3690_v61, %v1990_v54  ;;  %v1995_v6 = vadd.f32 %v3689_v39, %v1970_v53 }
 0x366   :  { %v3693_v25 = vmul.f32 -1.442695, %v1996_v43 }
 0x367   :  { %v3880_v29 = vpop.eup %3879 }
 0x368   :  { %v3882_v32 = vpop.eup %3881  ;;  %v2000_v28 = vadd.f32 1.0, %v3880_v29  ;;  %3883 = vpow2.f32 %v3693_v25  ;;  %v3697_v25 = vld [vmem:[%s6749_s1 + $0x70] sm:$0xff] }
 0x369   :  { %v2019_v48 = vadd.f32 1.0, %v3882_v32 }
 0x36a   :  { %3885 = vrcp.f32 %v2000_v28  ;;  %v2012_v19 = vand.u32 2147483648, %v2000_v28  ;;  %v2010_v11 = vand.u32 2147483647, %v2000_v28  ;;  %vm2006_vm2 = vweird.f32 %v2000_v28 }
 0x36b   :  { %3887 = vrcp.f32 %v2019_v48  ;;  %v2031_v9 = vand.u32 2147483648, %v2019_v48  ;;  %v2029_v56 = vand.u32 2147483647, %v2019_v48  ;;  %vm2025_vm3 = vweird.f32 %v2019_v48 }
 0x36c   :  { %v2013_v55 = vor.u32 1.1754944e-38, %v2012_v19  ;;  %vm2011_vm6 = vcmp.eq.f32.partialorder %v2010_v11, 8.507059e+37 }
 0x36d   :  { %v2032_v57 = vor.u32 1.1754944e-38, %v2031_v9  ;;  %vm2030_vm7 = vcmp.eq.f32.partialorder %v2029_v56, 8.507059e+37 }
 0x36e   :  { %v3884_v59 = vpop.eup %3883 }
 0x36f   :  { %v2039_v3 = vadd.f32 1.0, %v3884_v59 }
 0x370   :  { %v3886_v5 = vpop.eup %3885 }
 0x371   :  { %v3888_v30 = vpop.eup %3887  ;;  %v2002_v7 = vmul.f32 %v3886_v5, %v2000_v28  ;;  %3889 = vrcp.f32 %v2039_v3  ;;  %vm2007_vm0 = vweird.f32 %v3886_v5  ;;  %v2051_v15 = vand.u32 2147483648, %v2039_v3 }
 0x372   :  { %v2021_v4 = vmul.f32 %v3888_v30, %v2019_v48  ;;  %3891 = vtanh.f32 %v1995_v6  ;;  %vm2026_vm1 = vweird.f32 %v3888_v30  ;;  %vm2008_vm4 = vmor %vm2006_vm2, %vm2007_vm0  ;;  %vm2045_vm9 = vweird.f32 %v2039_v3 }
 0x373   :  { %v2003_v60 = vsub.f32 1.0, %v2002_v7  ;;  %vm2027_vm5 = vmor %vm2025_vm3, %vm2026_vm1  ;;  %v2049_v41 = vand.u32 2147483647, %v2039_v3  ;;  %v2052_v23 = vor.u32 1.1754944e-38, %v2051_v15  ;;  %v6046_v15 = vld [vmem:[#allocation6 + $0x1c8] sm:$0xff] }
 0x374   :  { %v2022_v35 = vsub.f32 1.0, %v2021_v4 }
 0x375   :  { %v2004_v10 = vmul.f32 %v3886_v5, %v2003_v60  ;;  %vm2050_vm11 = vcmp.eq.f32.partialorder %v2049_v41, 8.507059e+37  ;;  %v6056_v41 = vld [vmem:[#allocation6 + $0x1a0] sm:$0xff] }
 0x376   :  { %v2023_v12 = vmul.f32 %v3888_v30, %v2022_v35 }
 0x377   :  { %v3890_v51 = vpop.eup %3889  ;;  %v2005_v47 = vadd.f32 %v3886_v5, %v2004_v10 }
 0x378   :  { %v2024_v58 = vadd.f32 %v3888_v30, %v2023_v12  ;;  %v2041_v44 = vmul.f32 %v3890_v51, %v2039_v3  ;;  %v3892_v46 = vpop.eup %3891  ;;  %vm2046_vm8 = vweird.f32 %v3890_v51 }
 0x379   :  { %v2009_v62 = vsel %vm2008_vm4, %v3886_v5, %v2005_v47  ;;  %vm2047_vm10 = vmor %vm2045_vm9, %vm2046_vm8 }
 0x37a   :  { %v2014_v0 = vsel %vm2011_vm6, %v2013_v55, %v2009_v62  ;;  %v2028_v13 = vsel %vm2027_vm5, %v3888_v30, %v2024_v58  ;;  %v2042_v22 = vsub.f32 1.0, %v2041_v44 }
 0x37b   :  { %v2033_v21 = vsel %vm2030_vm7, %v2032_v57, %v2028_v13  ;;  %v2056_v16 = vmul.f32 %v3892_v46, %v2014_v0 }
 0x37c   :  { %v2055_v37 = vmul.f32 %v2033_v21, %v7486_v24  ;;  %v2043_v42 = vmul.f32 %v3890_v51, %v2042_v22 }
 0x37d   :  { %v2148_v17 = vpop.f32.mrf.mxu0  ;;  %v2168_v14 = vpop.f32.mrf.mxu1 }
 0x37e   :  { %v6013_v50 = vadd.f32 %v2056_v16, %v2055_v37  ;;  %v2211_v1 = vadd.f32 %v3695_v18, %v2148_v17  ;;  %v2212_v40 = vadd.f32 %v3696_v27, %v2168_v14  ;;  %v2044_v26 = vadd.f32 %v3890_v51, %v2043_v42  ;;  %v6034_v14 = vld [vmem:[#allocation6 + $0x1e8] sm:$0xff] }
 0x380   :  { %3893 = vtanh.f32 %v6013_v50  ;;  %v3699_v2 = vmul.f32 -1.442695, %v2211_v1  ;;  %v3700_v33 = vmul.f32 -1.442695, %v2212_v40  ;;  %v2048_v36 = vsel %vm2047_vm10, %v3890_v51, %v2044_v26  ;;  %v6036_v1 = vld [vmem:[#allocation6 + $0x1f0] sm:$0xff]  ;;  %v6040_v40 = vld [vmem:[#allocation6 + $0x1f8] sm:$0xff] }
 0x381   :  { %v2053_v38 = vsel %vm2050_vm11, %v2052_v23, %v2048_v36  ;;  %v6044_v26 = vld [vmem:[#allocation6 + $0x1c0] sm:$0xff]  ;;  %v6060_v36 = vld [vmem:[#allocation6 + $0x1b0] sm:$0xff]  ;;  %v6064_v23 = vld [vmem:[#allocation6 + $0x1b8] sm:$0xff] }
 0x382   :  { %3895 = vpow2.f32 %v3699_v2  ;;  %v6048_v2 = vld [vmem:[#allocation6 + $0x1d0] sm:$0xff] }
 0x383   :  { %3897 = vpow2.f32 %v3700_v33  ;;  %v6052_v33 = vld [vmem:[#allocation6 + $0x1d8] sm:$0xff] }
 0x384   :  { %v2208_v34 = vpop.f32.mrf.mxu3  ;;  %v2188_v29 = vpop.f32.mrf.mxu2 }
 0x385   :  { %v2214_v63 = vadd.f32 %v3698_v20, %v2208_v34  ;;  %v2213_v39 = vadd.f32 %v3697_v25, %v2188_v29  ;;  %v6058_v20 = vld [vmem:[#allocation6 + $0x1a8] sm:$0xff]  ;;  %v6068_v34 = vld [vmem:[#allocation6 + $0x180] sm:$0xff]  ;;  %v6096_v25 = vld [vmem:[#allocation6 + $0x150] sm:$0xff] }
 0x386   :  { %v3894_v31 = vpop.eup %3893  ;;  %v6100_v29 = vld [vmem:[#allocation6 + $0x158] sm:$0xff] }
 0x387   :  { %v3701_v45 = vmul.f32 -1.442695, %v2214_v63  ;;  %v2059_v49 = vmul.f32 %v3894_v31, %v2053_v38  ;;  %v6070_v63 = vld [vmem:[#allocation6 + $0x188] sm:$0xff]  ;;  %v6072_v31 = vld [vmem:[#allocation6 + $0x190] sm:$0xff]  ;;  %v6076_v38 = vld [vmem:[#allocation6 + $0x198] sm:$0xff] }
 0x388   :  { %v3896_v52 = vpop.eup %3895 }
 0x389   :  { %v3898_v61 = vpop.eup %3897  ;;  %v2218_v54 = vadd.f32 1.0, %v3896_v52  ;;  %3899 = vpow2.f32 %v3701_v45  ;;  %3694 = vst [vmem:[%s6752_s4 + $0x20] sm:$0xff] %v2059_v49  ;;  %2365 = vmatmul.f32.vlgmr.msra.gmra.mxu0 %v2059_v49  ;;  %2385 = vmatmul.f32.vlgmr.msra.gmra.mxu1 %v2059_v49  ;;  %v6080_v45 = vld [vmem:[#allocation6 + $0x160] sm:$0xff]  ;;  %v6084_v52 = vld [vmem:[#allocation6 + $0x170] sm:$0xff] }
 0x38a   :  { %v2237_v43 = vadd.f32 1.0, %v3898_v61  ;;  %2405 = vmatmul.f32.vlgmr.msra.gmra.mxu2 %v2059_v49  ;;  %2425 = vmatmul.f32.vlgmr.msra.gmra.mxu3 %v2059_v49  ;;  %v6082_v49 = vld [vmem:[#allocation6 + $0x168] sm:$0xff]  ;;  %v6088_v61 = vld [vmem:[#allocation6 + $0x178] sm:$0xff] }
 0x38b   :  { %3901 = vrcp.f32 %v2218_v54  ;;  %v2230_v30 = vand.u32 2147483648, %v2218_v54  ;;  %v2228_v60 = vand.u32 2147483647, %v2218_v54  ;;  %vm2224_vm14 = vweird.f32 %v2218_v54  ;;  %2805 = vmatpush.msra.mxu1 %v6034_v14  ;;  %2825 = vmatpush.msra.mxu2 %v6036_v1 }
 0x38c   :  { %3903 = vrcp.f32 %v2237_v43  ;;  %v2249_v7 = vand.u32 2147483648, %v2237_v43  ;;  %v2247_v19 = vand.u32 2147483647, %v2237_v43  ;;  %vm2243_vm15 = vweird.f32 %v2237_v43  ;;  %2845 = vmatpush.msra.mxu3 %v6040_v40 }
 0x38d   :  { %v2231_v11 = vor.u32 1.1754944e-38, %v2230_v30  ;;  %vm2229_vm2 = vcmp.eq.f32.partialorder %v2228_v60, 8.507059e+37  ;;  %2806 = vmatpush.msra.mxu1 %v6046_v15  ;;  %2826 = vmatpush.msra.mxu2 %v6048_v2  ;;  %v6130_v30 = vld [vmem:[#allocation6 + $0x118] sm:$0xff]  ;;  %v6138_v60 = vld [vmem:[#allocation6 + $0xf0] sm:$0xff] }
 0x38e   :  { %v2250_v51 = vor.u32 1.1754944e-38, %v2249_v7  ;;  %vm2248_vm3 = vcmp.eq.f32.partialorder %v2247_v19, 8.507059e+37  ;;  %2846 = vmatpush.msra.mxu3 %v6052_v33  ;;  %v6134_v7 = vld [vmem:[#allocation6 + $0xe0] sm:$0xff] }
 0x38f   :  { %v3900_v32 = vpop.eup %3899  ;;  %2807 = vmatpush.msra.mxu1 %v6058_v20  ;;  %2827 = vmatpush.msra.mxu2 %v6060_v36 }
 0x390   :  { %v2257_v28 = vadd.f32 1.0, %v3900_v32  ;;  %2847 = vmatpush.msra.mxu3 %v6064_v23  ;;  %v6104_v32 = vld [vmem:[#allocation6 + $0x120] sm:$0xff] }
 0x391   :  { %v3902_v48 = vpop.eup %3901  ;;  %2808 = vmatpush.msra.mxu1 %v6070_v63  ;;  %2828 = vmatpush.msra.mxu2 %v6072_v31 }
 0x392   :  { %v3904_v53 = vpop.eup %3903  ;;  %v2220_v59 = vmul.f32 %v3902_v48, %v2218_v54  ;;  %3905 = vrcp.f32 %v2257_v28  ;;  %vm2225_vm12 = vweird.f32 %v3902_v48  ;;  %v2269_v16 = vand.u32 2147483648, %v2257_v28  ;;  %2848 = vmatpush.msra.mxu3 %v6076_v38  ;;  %v6092_v54 = vld [vmem:[#allocation6 + $0x140] sm:$0xff] }
 0x393   :  { %v2239_v3 = vmul.f32 %v3904_v53, %v2237_v43  ;;  %3907 = vtanh.f32 %v2213_v39  ;;  %vm2244_vm13 = vweird.f32 %v3904_v53  ;;  %vm2226_vm0 = vmor %vm2224_vm14, %vm2225_vm12  ;;  %vm2263_vm5 = vweird.f32 %v2257_v28  ;;  %2809 = vmatpush.msra.mxu1 %v6082_v49  ;;  %2829 = vmatpush.msra.mxu2 %v6084_v52  ;;  %v6094_v43 = vld [vmem:[#allocation6 + $0x148] sm:$0xff]  ;;  %v6112_v39 = vld [vmem:[#allocation6 + $0x138] sm:$0xff] }
 0x394   :  { %v2221_v5 = vsub.f32 1.0, %v2220_v59  ;;  %vm2245_vm1 = vmor %vm2243_vm15, %vm2244_vm13  ;;  %v2267_v18 = vand.u32 2147483647, %v2257_v28  ;;  %v2270_v24 = vor.u32 1.1754944e-38, %v2269_v16  ;;  %2849 = vmatpush.msra.mxu3 %v6088_v61  ;;  %v6118_v59 = vld [vmem:[#allocation6 + $0x108] sm:$0xff]  ;;  %v6177_v16 = vld [vmem:[#allocation6 + $0x90] sm:$0xff] }
 0x395   :  { %v2240_v6 = vsub.f32 1.0, %v2239_v3  ;;  %2810 = vmatpush.msra.mxu1 %v6094_v43  ;;  %2830 = vmatpush.msra.mxu2 %v6096_v25  ;;  %v6120_v3 = vld [vmem:[#allocation6 + $0x110] sm:$0xff]  ;;  %7496 = vst [vmem:[#allocation22_spill] sm:$0xff] %v6177_v16 }
 0x396   :  { %v2222_v4 = vmul.f32 %v3902_v48, %v2221_v5  ;;  %vm2268_vm7 = vcmp.eq.f32.partialorder %v2267_v18, 8.507059e+37  ;;  %2850 = vmatpush.msra.mxu3 %v6100_v29  ;;  %v3703_v5 = vld [vmem:[%s6748_s0 + $0xa0] sm:$0xff]  ;;  %v6181_v18 = vld [vmem:[#allocation6 + $0x98] sm:$0xff] }
 0x397   :  { %v2241_v35 = vmul.f32 %v3904_v53, %v2240_v6  ;;  %v3704_v6 = vld [vmem:[%s6748_s0 + $0xa8] sm:$0xff]  ;;  %7497 = vst [vmem:[#allocation15_spill] sm:$0xff] %v6181_v18 }
 0x398   :  { %v3906_v9 = vpop.eup %3905  ;;  %v2223_v10 = vadd.f32 %v3902_v48, %v2222_v4  ;;  %2851 = vmatpush.msra.mxu3 %v6112_v39  ;;  %v6136_v4 = vld [vmem:[#allocation6 + $0xe8] sm:$0xff] }
 0x399   :  { %v2242_v12 = vadd.f32 %v3904_v53, %v2241_v35  ;;  %v2259_v56 = vmul.f32 %v3906_v9, %v2257_v28  ;;  %v3908_v55 = vpop.eup %3907  ;;  %vm2264_vm4 = vweird.f32 %v3906_v9  ;;  %v6106_v28 = vld [vmem:[#allocation6 + $0x128] sm:$0xff] }
 0x39a   :  { %v2227_v47 = vsel %vm2226_vm0, %v3902_v48, %v2223_v10  ;;  %vm2265_vm6 = vmor %vm2263_vm5, %vm2264_vm4  ;;  %v6108_v48 = vld [vmem:[#allocation6 + $0x130] sm:$0xff]  ;;  %2811 = vmatpush.msra.mxu1 %v6106_v28  ;;  %2852 = vmatpush.msra.mxu3 %v6130_v30 }
 0x39b   :  { %v2232_v58 = vsel %vm2229_vm2, %v2231_v11, %v2227_v47  ;;  %v2246_v44 = vsel %vm2245_vm1, %v3904_v53, %v2242_v12  ;;  %v2260_v57 = vsub.f32 1.0, %v2259_v56  ;;  %2831 = vmatpush.msra.mxu2 %v6108_v48  ;;  %v6116_v53 = vld [vmem:[#allocation6 + $0x100] sm:$0xff]  ;;  %v6148_v56 = vld [vmem:[#allocation6 + $0xc8] sm:$0xff]  ;;  %v6154_v47 = vld [vmem:[#allocation6 + $0xd8] sm:$0xff] }
 0x39c   :  { %v2251_v62 = vsel %vm2248_vm3, %v2250_v51, %v2246_v44  ;;  %v2274_v46 = vmul.f32 %v3908_v55, %v2232_v58  ;;  %2812 = vmatpush.msra.mxu1 %v6118_v59  ;;  %v6146_v12 = vld [vmem:[#allocation6 + $0xc0] sm:$0xff]  ;;  %7487 = vst [vmem:[#allocation14_spill] sm:$0xff] %v6148_v56  ;;  %v6150_v51 = vld [vmem:[#allocation6 + $0xd0] sm:$0xff] }
 0x39d   :  { %v2273_v0 = vmul.f32 %v2251_v62, %v5884_v8  ;;  %v2261_v13 = vmul.f32 %v3906_v9, %v2260_v57  ;;  %v6032_v8 = vld [vmem:[#allocation6 + $0x1e0] sm:$0xff]  ;;  %2832 = vmatpush.msra.mxu2 %v6120_v3  ;;  %7488 = vst [vmem:[#allocation16_spill] sm:$0xff] %v6150_v51  ;;  %v6160_v57 = vld [vmem:[#allocation6 + $0xa8] sm:$0xff]  ;;  %v3706_v62 = vld [vmem:[%s6748_s0 + $0xb8] sm:$0xff] }
 0x39e   :  { %2785 = vmatpush.msra.mxu0 %v6032_v8  ;;  %2813 = vmatpush.msra.mxu1 %v6136_v4  ;;  %7489 = vst [vmem:[#allocation12_spill] sm:$0xff] %v6154_v47  ;;  %v6158_v44 = vld [vmem:[#allocation6 + $0xa0] sm:$0xff] }
 0x39f   :  { %v6026_v22 = vadd.f32 %v2274_v46, %v2273_v0  ;;  %v2262_v21 = vadd.f32 %v3906_v9, %v2261_v13  ;;  %2833 = vmatpush.msra.mxu2 %v6138_v60  ;;  %7490 = vst [vmem:[#allocation17_spill] sm:$0xff] %v6158_v44  ;;  %v6167_v46 = vld [vmem:[#allocation6 + $0xb0] sm:$0xff]  ;;  %v6169_v0 = vld [vmem:[#allocation6 + $0xb8] sm:$0xff]  ;;  %v6173_v13 = vld [vmem:[#allocation6 + $0x80] sm:$0xff] }
 0x3a0   :  { %2786 = vmatpush.msra.mxu0 %v6044_v26  ;;  %2814 = vmatpush.msra.mxu1 %v6148_v56  ;;  %7491 = vst [vmem:[#allocation18_spill] sm:$0xff] %v6160_v57 }
 0x3a1   :  { %3909 = vtanh.f32 %v6026_v22  ;;  %v2266_v27 = vsel %vm2265_vm6, %v3906_v9, %v2262_v21  ;;  %v6142_v9 = vld [vmem:[#allocation6 + $0xf8] sm:$0xff]  ;;  %2834 = vmatpush.msra.mxu2 %v6150_v51  ;;  %7492 = vst [vmem:[#allocation19_spill] sm:$0xff] %v6167_v46  ;;  %v6175_v21 = vld [vmem:[#allocation6 + $0x88] sm:$0xff] }
 0x3a2   :  { %v2271_v42 = vsel %vm2268_vm7, %v2270_v24, %v2266_v27  ;;  %2787 = vmatpush.msra.mxu0 %v6056_v41  ;;  %2853 = vmatpush.msra.mxu3 %v6142_v9  ;;  %7493 = vst [vmem:[#allocation13_spill] sm:$0xff] %v6169_v0 }
 0x3a3   :  { %2815 = vmatpush.msra.mxu1 %v6160_v57  ;;  %2835 = vmatpush.msra.mxu2 %v6167_v46  ;;  %7494 = vst [vmem:[#allocation20_spill] sm:$0xff] %v6173_v13  ;;  %v6326_v57 = vld [vmem:[#allocation8 + $0x158] sm:$0xff] }
 0x3a4   :  { %2788 = vmatpush.msra.mxu0 %v6068_v34  ;;  %2854 = vmatpush.msra.mxu3 %v6154_v47  ;;  %7495 = vst [vmem:[#allocation21_spill] sm:$0xff] %v6175_v21  ;;  %v6338_v47 = vld [vmem:[#allocation8 + $0x130] sm:$0xff] }
 0x3a5   :  { %2816 = vmatpush.msra.mxu1 %v6175_v21  ;;  %2836 = vmatpush.msra.mxu2 %v6177_v16  ;;  %v6269_v16 = vld [vmem:[#allocation8 + $0x1b0] sm:$0xff] }
 0x3a6   :  { %2789 = vmatpush.msra.mxu0 %v6080_v45  ;;  %2855 = vmatpush.msra.mxu3 %v6169_v0  ;;  %7524 = vst [vmem:[#allocation47_spill] sm:$0xff] %v6269_v16 }
 0x3a7   :  { %v3910_v37 = vpop.eup %3909 }
 0x3a8   :  { %v2277_v17 = vmul.f32 %v3910_v37, %v2271_v42  ;;  %2790 = vmatpush.msra.mxu0 %v6092_v54  ;;  %2856 = vmatpush.msra.mxu3 %v6181_v18  ;;  %v6185_v37 = vld [vmem:[#allocation6 + $0x60] sm:$0xff]  ;;  %v6188_v42 = vld [vmem:[#allocation6 + $0x68] sm:$0xff] }
 0x3a9   :  { %7498 = vst [vmem:[#allocation23_spill] sm:$0xff] %v6185_v37  ;;  %2817 = vmatpush.msra.mxu1 %v6188_v42 }
 0x3aa   :  { %3702 = vst [vmem:[%s6753_s5 + $0x18] sm:$0xff] %v2277_v17  ;;  %2583 = vmatmul.f32.vlgmr.msrb.gmra.mxu0 %v2277_v17  ;;  %2603 = vmatmul.f32.vlgmr.msrb.gmra.mxu1 %v2277_v17 }
 0x3ab   :  { %2623 = vmatmul.f32.vlgmr.msrb.gmra.mxu2 %v2277_v17  ;;  %2643 = vmatmul.f32.vlgmr.msrb.gmra.mxu3 %v2277_v17  ;;  %7499 = vst [vmem:[#allocation24_spill] sm:$0xff] %v6188_v42  ;;  %v6190_v17 = vld [vmem:[#allocation6 + $0x70] sm:$0xff] }
 0x3ac   :  { %2791 = vmatpush.msra.mxu0 %v6104_v32  ;;  %7500 = vst [vmem:[#allocation25_spill] sm:$0xff] %v6190_v17  ;;  %2837 = vmatpush.msra.mxu2 %v6190_v17  ;;  %v6214_v17 = vld [vmem:[#allocation6 + $0x30] sm:$0xff] }
 0x3ad   :  { %7508 = vst [vmem:[#allocation33_spill] sm:$0xff] %v6214_v17 }
 0x3ae   :  { %2792 = vmatpush.msra.mxu0 %v6116_v53 }
 0x3b0   :  { %2793 = vmatpush.msra.mxu0 %v6134_v7 }
 0x3b2   :  { %2794 = vmatpush.msra.mxu0 %v6146_v12 }
 0x3b4   :  { %2795 = vmatpush.msra.mxu0 %v6158_v44  ;;  %v6336_v44 = vld [vmem:[#allocation8 + $0x128] sm:$0xff] }
 0x3b6   :  { %2796 = vmatpush.msra.mxu0 %v6173_v13 }
 0x3b8   :  { %2797 = vmatpush.msra.mxu0 %v6185_v37  ;;  %v6255_v37 = vld [vmem:[#allocation8 + $0x1d0] sm:$0xff] }
 0x3b9   :  { %7520 = vst [vmem:[#allocation44_spill] sm:$0xff] %v6255_v37 }
 0x406   :  { %v2366_v35 = vpop.f32.mrf.mxu0  ;;  %v2386_v19 = vpop.f32.mrf.mxu1 }
 0x407   :  { %v2429_v10 = vadd.f32 %v3703_v5, %v2366_v35  ;;  %v2430_v11 = vadd.f32 %v3704_v6, %v2386_v19  ;;  %v6192_v5 = vld [vmem:[#allocation6 + $0x78] sm:$0xff]  ;;  %v6196_v35 = vld [vmem:[#allocation6 + $0x40] sm:$0xff]  ;;  %v6198_v19 = vld [vmem:[#allocation6 + $0x48] sm:$0xff] }
 0x408   :  { %7501 = vst [vmem:[#allocation26_spill] sm:$0xff] %v6192_v5  ;;  %2857 = vmatpush.msra.mxu3 %v6192_v5  ;;  %2798 = vmatpush.msra.mxu0 %v6196_v35  ;;  %v6253_v5 = vld [vmem:[#allocation8 + $0x1c8] sm:$0xff] }
 0x409   :  { %v3707_v55 = vmul.f32 -1.442695, %v2429_v10  ;;  %v3708_v58 = vmul.f32 -1.442695, %v2430_v11  ;;  %7502 = vst [vmem:[#allocation27_spill] sm:$0xff] %v6196_v35  ;;  %v6200_v10 = vld [vmem:[#allocation6 + $0x50] sm:$0xff]  ;;  %2818 = vmatpush.msra.mxu1 %v6198_v19 }
 0x40a   :  { %7503 = vst [vmem:[#allocation28_spill] sm:$0xff] %v6198_v19  ;;  %2838 = vmatpush.msra.mxu2 %v6200_v10  ;;  %v6220_v35 = vld [vmem:[#allocation6 + $0x38] sm:$0xff] }
 0x40b   :  { %3911 = vpow2.f32 %v3707_v55  ;;  %7504 = vst [vmem:[#allocation29_spill] sm:$0xff] %v6200_v10  ;;  %v6204_v55 = vld [vmem:[#allocation6 + $0x58] sm:$0xff]  ;;  %v6229_v10 = vld [vmem:[#allocation6 + $0x10] sm:$0xff] }
 0x40c   :  { %3913 = vpow2.f32 %v3708_v58  ;;  %7505 = vst [vmem:[#allocation30_spill] sm:$0xff] %v6204_v55  ;;  %2858 = vmatpush.msra.mxu3 %v6204_v55  ;;  %2839 = vmatpush.msra.mxu2 %v6214_v17  ;;  %v6238_v55 = vld [vmem:[#allocation8 + $0x1e8] sm:$0xff]  ;;  %v3705_v17 = vld [vmem:[%s6748_s0 + $0xb0] sm:$0xff]  ;;  %v6247_v19 = vld [vmem:[#allocation8 + $0x1f8] sm:$0xff] }
 0x40d   :  { %v2426_v27 = vpop.f32.mrf.mxu3  ;;  %7509 = vst [vmem:[#allocation34_spill] sm:$0xff] %v6220_v35 }
 0x40e   :  { %v2432_v24 = vadd.f32 %v3706_v62, %v2426_v27  ;;  %v6210_v27 = vld [vmem:[#allocation6 + $0x20] sm:$0xff]  ;;  %7512 = vst [vmem:[#allocation37_spill] sm:$0xff] %v6229_v10  ;;  %2859 = vmatpush.msra.mxu3 %v6220_v35  ;;  %2840 = vmatpush.msra.mxu2 %v6229_v10  ;;  %v2406_v35 = vpop.f32.mrf.mxu2  ;;  %v6259_v10 = vld [vmem:[#allocation8 + $0x1d8] sm:$0xff] }
 0x40f   :  { %7506 = vst [vmem:[#allocation31_spill] sm:$0xff] %v6210_v27  ;;  %2799 = vmatpush.msra.mxu0 %v6210_v27  ;;  %v6236_v27 = vld [vmem:[#allocation8 + $0x1e0] sm:$0xff]  ;;  %v2431_v13 = vadd.f32 %v3705_v17, %v2406_v35  ;;  %v6286_v17 = vld [vmem:[#allocation8 + $0x188] sm:$0xff]  ;;  %v6288_v35 = vld [vmem:[#allocation8 + $0x190] sm:$0xff] }
 0x410   :  { %v3709_v6 = vmul.f32 -1.442695, %v2432_v24  ;;  %v6212_v24 = vld [vmem:[#allocation6 + $0x28] sm:$0xff]  ;;  %7514 = vst [vmem:[#allocation39_spill] sm:$0xff] %v6236_v27 }
 0x411   :  { %v3912_v11 = vpop.eup %3911  ;;  %7507 = vst [vmem:[#allocation32_spill] sm:$0xff] %v6212_v24  ;;  %2819 = vmatpush.msra.mxu1 %v6212_v24  ;;  %v6245_v24 = vld [vmem:[#allocation8 + $0x1f0] sm:$0xff] }
 0x412   :  { %v3914_v58 = vpop.eup %3913  ;;  %v6206_v62 = vadd.f32 1.0, %v3912_v11  ;;  %3915 = vpow2.f32 %v3709_v6  ;;  %v6225_v6 = vld [vmem:[#allocation6] sm:$0xff]  ;;  %v6227_v11 = vld [vmem:[#allocation6 + $0x8] sm:$0xff]  ;;  %7515 = vst [vmem:[#allocation40_spill] sm:$0xff] %v6238_v55  ;;  %3043 = vmatpush.msrb.mxu2 %v6245_v24 }
 0x413   :  { %v6216_v42 = vadd.f32 1.0, %v3914_v58  ;;  %7510 = vst [vmem:[#allocation35_spill] sm:$0xff] %v6225_v6  ;;  %2800 = vmatpush.msra.mxu0 %v6225_v6  ;;  %v6234_v58 = vld [vmem:[#allocation6 + $0x18] sm:$0xff]  ;;  %2820 = vmatpush.msra.mxu1 %v6227_v11  ;;  %v6251_v6 = vld [vmem:[#allocation8 + $0x1c0] sm:$0xff] }
 0x414   :  { %3917 = vrcp.f32 %v6206_v62  ;;  %7511 = vst [vmem:[#allocation36_spill] sm:$0xff] %v6227_v11  ;;  %2860 = vmatpush.msra.mxu3 %v6234_v58  ;;  %3044 = vmatpush.msrb.mxu2 %v6255_v37  ;;  %v2448_v46 = vand.u32 2147483648, %v6206_v62  ;;  %vm2442_vm10 = vweird.f32 %v6206_v62 }
 0x415   :  { %3919 = vrcp.f32 %v6216_v42  ;;  %7513 = vst [vmem:[#allocation38_spill] sm:$0xff] %v6234_v58  ;;  %3003 = vmatpush.msrb.mxu0 %v6236_v27  ;;  %3023 = vmatpush.msrb.mxu1 %v6238_v55  ;;  %v6265_v27 = vld [vmem:[#allocation8 + $0x1a0] sm:$0xff]  ;;  %v6267_v58 = vld [vmem:[#allocation8 + $0x1a8] sm:$0xff]  ;;  %vm2461_vm11 = vweird.f32 %v6216_v42 }
 0x416   :  { %7516 = vst [vmem:[#allocation41_spill] sm:$0xff] %v6245_v24  ;;  %3063 = vmatpush.msrb.mxu3 %v6247_v19  ;;  %v6275_v24 = vld [vmem:[#allocation8 + $0x1b8] sm:$0xff]  ;;  %3045 = vmatpush.msrb.mxu2 %v6269_v16  ;;  %v6305_v16 = vld [vmem:[#allocation8 + $0x170] sm:$0xff] }
 0x417   :  { %7517 = vst [vmem:[#allocation42_spill] sm:$0xff] %v6247_v19  ;;  %3004 = vmatpush.msrb.mxu0 %v6251_v6  ;;  %3024 = vmatpush.msrb.mxu1 %v6253_v5  ;;  %v6284_v19 = vld [vmem:[#allocation8 + $0x180] sm:$0xff] }
 0x418   :  { %7518 = vst [vmem:[#allocation43_spill] sm:$0xff] %v6251_v6  ;;  %v3916_v18 = vpop.eup %3915  ;;  %3064 = vmatpush.msrb.mxu3 %v6259_v10  ;;  %3046 = vmatpush.msrb.mxu2 %v6288_v35 }
 0x419   :  { %7519 = vst [vmem:[#allocation48_spill] sm:$0xff] %v6253_v5  ;;  %v6261_v11 = vadd.f32 1.0, %v3916_v18  ;;  %3005 = vmatpush.msrb.mxu0 %v6265_v27  ;;  %3025 = vmatpush.msrb.mxu1 %v6267_v58  ;;  %v6294_v5 = vld [vmem:[#allocation8 + $0x198] sm:$0xff] }
 0x41a   :  { %7521 = vst [vmem:[#allocation45_spill] sm:$0xff] %v6259_v10  ;;  %v6271_v21 = vpop.eup %3917  ;;  %3065 = vmatpush.msrb.mxu3 %v6275_v24  ;;  %v6300_v10 = vld [vmem:[#allocation8 + $0x168] sm:$0xff]  ;;  %3047 = vmatpush.msrb.mxu2 %v6305_v16 }
 0x41b   :  { %7522 = vst [vmem:[#allocation46_spill] sm:$0xff] %v6265_v27  ;;  %v6277_v18 = vpop.eup %3919  ;;  %v2438_v6 = vmul.f32 %v6271_v21, %v6206_v62  ;;  %3921 = vrcp.f32 %v6261_v11  ;;  %3006 = vmatpush.msrb.mxu0 %v6284_v19  ;;  %v6298_v27 = vld [vmem:[#allocation8 + $0x160] sm:$0xff]  ;;  %3026 = vmatpush.msrb.mxu1 %v6286_v17  ;;  %vm2443_vm8 = vweird.f32 %v6271_v21  ;;  %vm2481_vm1 = vweird.f32 %v6261_v11 }
 0x41c   :  { %7523 = vst [vmem:[#allocation52_spill] sm:$0xff] %v6267_v58  ;;  %v2457_v37 = vmul.f32 %v6277_v18, %v6216_v42  ;;  %3923 = vtanh.f32 %v2431_v13  ;;  %v6307_v58 = vld [vmem:[#allocation8 + $0x178] sm:$0xff]  ;;  %3066 = vmatpush.msrb.mxu3 %v6294_v5  ;;  %v6315_v13 = vld [vmem:[#allocation8 + $0x140] sm:$0xff]  ;;  %vm2462_vm9 = vweird.f32 %v6277_v18  ;;  %vm6343_vm12 = vmor %vm2442_vm10, %vm2443_vm8 }
 0x41d   :  { %7525 = vst [vmem:[#allocation49_spill] sm:$0xff] %v6275_v24  ;;  %v2439_v55 = vsub.f32 1.0, %v2438_v6  ;;  %v2467_v6 = vand.u32 2147483648, %v6216_v42  ;;  %v2446_v24 = vand.u32 2147483647, %v6206_v62  ;;  %3007 = vmatpush.msrb.mxu0 %v6298_v27  ;;  %3027 = vmatpush.msrb.mxu1 %v6300_v10  ;;  %vm6356_vm13 = vmor %vm2461_vm11, %vm2462_vm9 }
 0x41e   :  { %7526 = vst [vmem:[#allocation50_spill] sm:$0xff] %v6284_v19  ;;  %v2458_v0 = vsub.f32 1.0, %v2457_v37  ;;  %v6317_v37 = vld [vmem:[#allocation8 + $0x148] sm:$0xff]  ;;  %3067 = vmatpush.msrb.mxu3 %v6307_v58 }
 0x41f   :  { %7527 = vst [vmem:[#allocation56_spill] sm:$0xff] %v6286_v17  ;;  %v2440_v19 = vmul.f32 %v6271_v21, %v2439_v55  ;;  %v2465_v55 = vand.u32 2147483647, %v6216_v42  ;;  %3008 = vmatpush.msrb.mxu0 %v6315_v13  ;;  %3028 = vmatpush.msrb.mxu1 %v6317_v37  ;;  %vm2447_vm14 = vcmp.eq.f32.partialorder %v2446_v24, 8.507059e+37 }
 0x420   :  { %7528 = vst [vmem:[#allocation51_spill] sm:$0xff] %v6288_v35  ;;  %v6319_v35 = vld [vmem:[#allocation8 + $0x150] sm:$0xff]  ;;  %v2459_v17 = vmul.f32 %v6277_v18, %v2458_v0  ;;  %v6334_v0 = vld [vmem:[#allocation8 + $0x120] sm:$0xff]  ;;  %3068 = vmatpush.msrb.mxu3 %v6326_v57 }
 0x421   :  { %7529 = vst [vmem:[#allocation53_spill] sm:$0xff] %v6294_v5  ;;  %v6328_v5 = vpop.eup %3921  ;;  %3048 = vmatpush.msrb.mxu2 %v6319_v35  ;;  %3009 = vmatpush.msrb.mxu0 %v6334_v0  ;;  %vm2466_vm15 = vcmp.eq.f32.partialorder %v2465_v55, 8.507059e+37  ;;  %v6388_v55 = vld [vmem:[#allocation8 + $0xe8] sm:$0xff] }
 0x422   :  { %7530 = vst [vmem:[#allocation54_spill] sm:$0xff] %v6298_v27  ;;  %v2441_v27 = vadd.f32 %v6271_v21, %v2440_v19  ;;  %v2449_v19 = vor.u32 1.1754944e-38, %v2448_v46  ;;  %v2460_v62 = vadd.f32 %v6277_v18, %v2459_v17  ;;  %v6365_v17 = vld [vmem:[#allocation8 + $0x100] sm:$0xff]  ;;  %3029 = vmatpush.msrb.mxu1 %v6336_v44  ;;  %vm2482_vm0 = vweird.f32 %v6328_v5 }
 0x423   :  { %7531 = vst [vmem:[#allocation60_spill] sm:$0xff] %v6300_v10  ;;  %v2468_v10 = vor.u32 1.1754944e-38, %v2467_v6  ;;  %3049 = vmatpush.msrb.mxu2 %v6338_v47  ;;  %3010 = vmatpush.msrb.mxu0 %v6365_v17  ;;  %vm6440_vm2 = vmor %vm2481_vm1, %vm2482_vm0 }
 0x424   :  { %7532 = vst [vmem:[#allocation55_spill] sm:$0xff] %v6305_v16  ;;  %v2445_v46 = vsel %vm6343_vm12, %v6271_v21, %v2441_v27  ;;  %v2464_v56 = vsel %vm6356_vm13, %v6277_v18, %v2460_v62  ;;  %v3711_v21 = vld [vmem:[%s6749_s1 + $0x40] sm:$0xff]  ;;  %v6377_v16 = vld [vmem:[#allocation8 + $0x110] sm:$0xff]  ;;  %v6379_v27 = vld [vmem:[#allocation8 + $0x118] sm:$0xff] }
 0x425   :  { %7533 = vst [vmem:[#allocation57_spill] sm:$0xff] %v6307_v58  ;;  %v6352_v58 = vld [vmem:[#allocation8 + $0x138] sm:$0xff]  ;;  %v2450_v51 = vsel %vm2447_vm14, %v2449_v19, %v2445_v46  ;;  %v2469_v24 = vsel %vm2466_vm15, %v2468_v10, %v2464_v56  ;;  %v3712_v18 = vld [vmem:[%s6749_s1 + $0x48] sm:$0xff]  ;;  %3050 = vmatpush.msrb.mxu2 %v6377_v16  ;;  %v6394_v56 = vld [vmem:[#allocation8 + $0xf0] sm:$0xff] }
 0x426   :  { %7534 = vst [vmem:[#allocation58_spill] sm:$0xff] %v6315_v13  ;;  %v2477_v13 = vmul.f32 %v6328_v5, %v6261_v11  ;;  %3069 = vmatpush.msrb.mxu3 %v6352_v58  ;;  %v2491_v62 = vmul.f32 %v2469_v24, %v6013_v50  ;;  %v6400_v46 = vld [vmem:[#allocation8 + $0xc0] sm:$0xff] }
 0x427   :  { %7535 = vst [vmem:[#allocation64_spill] sm:$0xff] %v6317_v37  ;;  %v3924_v37 = vpop.eup %3923  ;;  %v2584_v10 = vpop.f32.mrf.mxu0  ;;  %3051 = vmatpush.msrb.mxu2 %v6394_v56 }
 0x428   :  { %7536 = vst [vmem:[#allocation59_spill] sm:$0xff] %v6319_v35  ;;  %v6367_v35 = vld [vmem:[#allocation8 + $0x108] sm:$0xff]  ;;  %v2478_v6 = vsub.f32 1.0, %v2477_v13  ;;  %v2492_v19 = vmul.f32 %v3924_v37, %v2450_v51  ;;  %v6386_v13 = vld [vmem:[#allocation8 + $0xe0] sm:$0xff]  ;;  %v6396_v51 = vld [vmem:[#allocation8 + $0xf8] sm:$0xff]  ;;  %v2604_v37 = vpop.f32.mrf.mxu1  ;;  %3070 = vmatpush.msrb.mxu3 %v6379_v27 }
 0x429   :  { %7541 = vst [vmem:[#allocation61_spill] sm:$0xff] %v6365_v17  ;;  %3030 = vmatpush.msrb.mxu1 %v6367_v35  ;;  %3011 = vmatpush.msrb.mxu0 %v6386_v13  ;;  %v6402_v17 = vld [vmem:[#allocation8 + $0xc8] sm:$0xff]  ;;  %v2648_v24 = vadd.f32 %v3712_v18, %v2604_v37  ;;  %v6425_v37 = vld [vmem:[#allocation8 + $0xb8] sm:$0xff] }
 0x42a   :  { %7542 = vst [vmem:[#allocation62_spill] sm:$0xff] %v6367_v35  ;;  %v2479_v42 = vmul.f32 %v6328_v5, %v2478_v6  ;;  %v6404_v50 = vadd.f32 %v2492_v19, %v2491_v62  ;;  %v2647_v6 = vadd.f32 %v3711_v21, %v2584_v10  ;;  %v6409_v35 = vld [vmem:[#allocation8 + $0xd8] sm:$0xff]  ;;  %3071 = vmatpush.msrb.mxu3 %v6396_v51  ;;  %v6416_v19 = vld [vmem:[#allocation8 + $0xa0] sm:$0xff]  ;;  %v6418_v21 = vld [vmem:[#allocation8 + $0xa8] sm:$0xff] }
 0x42b   :  { %7543 = vst [vmem:[#allocation68_spill] sm:$0xff] %v6377_v16  ;;  %3031 = vmatpush.msrb.mxu1 %v6388_v55  ;;  %v6407_v16 = vld [vmem:[#allocation8 + $0xd0] sm:$0xff]  ;;  %v3716_v62 = vmul.f32 -1.442695, %v2648_v24  ;;  %3012 = vmatpush.msrb.mxu0 %v6400_v46  ;;  %v6436_v24 = vld [vmem:[#allocation8 + $0x88] sm:$0xff] }
 0x42c   :  { %7544 = vst [vmem:[#allocation63_spill] sm:$0xff] %v6379_v27  ;;  %v2487_v27 = vand.u32 2147483648, %v6261_v11  ;;  %3925 = vtanh.f32 %v6404_v50  ;;  %v3715_v18 = vmul.f32 -1.442695, %v2647_v6  ;;  %v6423_v10 = vld [vmem:[#allocation8 + $0xb0] sm:$0xff]  ;;  %3052 = vmatpush.msrb.mxu2 %v6407_v16  ;;  %3072 = vmatpush.msrb.mxu3 %v6409_v35  ;;  %v6434_v6 = vld [vmem:[#allocation8 + $0x80] sm:$0xff] }
 0x42d   :  { %7545 = vst [vmem:[#allocation65_spill] sm:$0xff] %v6386_v13  ;;  %v2480_v13 = vadd.f32 %v6328_v5, %v2479_v42  ;;  %3032 = vmatpush.msrb.mxu1 %v6402_v17  ;;  %v3714_v42 = vld [vmem:[%s6749_s1 + $0x58] sm:$0xff]  ;;  %3013 = vmatpush.msrb.mxu0 %v6416_v19 }
 0x42e   :  { %7546 = vst [vmem:[#allocation66_spill] sm:$0xff] %v6396_v51  ;;  %v2485_v51 = vand.u32 2147483647, %v6261_v11  ;;  %3927 = vpow2.f32 %v3715_v18  ;;  %v6446_v11 = vld [vmem:[#allocation8 + $0x90] sm:$0xff]  ;;  %3053 = vmatpush.msrb.mxu2 %v6423_v10  ;;  %3073 = vmatpush.msrb.mxu3 %v6425_v37  ;;  %v6457_v18 = vld [vmem:[#allocation8 + $0x68] sm:$0xff] }
 0x42f   :  { %7547 = vst [vmem:[#allocation67_spill] sm:$0xff] %v6400_v46  ;;  %3033 = vmatpush.msrb.mxu1 %v6418_v21  ;;  %3929 = vpow2.f32 %v3716_v62  ;;  %v2644_v46 = vpop.f32.mrf.mxu3  ;;  %3014 = vmatpush.msrb.mxu0 %v6434_v6  ;;  %v6463_v62 = vld [vmem:[#allocation8 + $0x78] sm:$0xff] }
 0x430   :  { %7548 = vst [vmem:[#allocation69_spill] sm:$0xff] %v6402_v17  ;;  %v6455_v17 = vld [vmem:[#allocation8 + $0x60] sm:$0xff]  ;;  %vm2486_vm3 = vcmp.eq.f32.partialorder %v2485_v51, 8.507059e+37  ;;  %3054 = vmatpush.msrb.mxu2 %v6446_v11 }
 0x431   :  { %7549 = vst [vmem:[#allocation72_spill] sm:$0xff] %v6404_v50  ;;  %3034 = vmatpush.msrb.mxu1 %v6436_v24  ;;  %v2650_v50 = vadd.f32 %v3714_v42, %v2644_v46  ;;  %3015 = vmatpush.msrb.mxu0 %v6455_v17  ;;  %v6477_v46 = vld [vmem:[#allocation8 + $0x50] sm:$0xff]  ;;  %v6479_v42 = vld [vmem:[#allocation8 + $0x58] sm:$0xff] }
 0x432   :  { %7550 = vst [vmem:[#allocation73_spill] sm:$0xff] %v6407_v16  ;;  %v6448_v16 = vld [vmem:[#allocation8 + $0x98] sm:$0xff] }
 0x433   :  { %7551 = vst [vmem:[#allocation74_spill] sm:$0xff] %v6409_v35  ;;  %v2484_v35 = vsel %vm6440_vm2, %v6328_v5, %v2480_v13  ;;  %3074 = vmatpush.msrb.mxu3 %v6448_v16  ;;  %v6467_v5 = vld [vmem:[#allocation8 + $0x40] sm:$0xff]  ;;  %v6469_v13 = vld [vmem:[#allocation8 + $0x48] sm:$0xff]  ;;  %3035 = vmatpush.msrb.mxu1 %v6457_v18 }
 0x434   :  { %7552 = vst [vmem:[#allocation75_spill] sm:$0xff] %v6416_v19  ;;  %v2488_v19 = vor.u32 1.1754944e-38, %v2487_v27  ;;  %v3926_v27 = vpop.eup %3925  ;;  %3016 = vmatpush.msrb.mxu0 %v6467_v5 }
 0x435   :  { %7553 = vst [vmem:[#allocation76_spill] sm:$0xff] %v6418_v21  ;;  %v6461_v21 = vld [vmem:[#allocation8 + $0x70] sm:$0xff]  ;;  %3075 = vmatpush.msrb.mxu3 %v6463_v62  ;;  %v3928_v51 = vpop.eup %3927  ;;  %3036 = vmatpush.msrb.mxu1 %v6469_v13 }
 0x436   :  { %7554 = vst [vmem:[#allocation77_spill] sm:$0xff] %v6425_v37  ;;  %v2489_v37 = vsel %vm2486_vm3, %v2488_v19, %v2484_v35  ;;  %3055 = vmatpush.msrb.mxu2 %v6461_v21  ;;  %v3930_v35 = vpop.eup %3929  ;;  %v6481_v19 = vadd.f32 1.0, %v3928_v51  ;;  %v6501_v51 = vld [vmem:[#allocation8 + $0x8] sm:$0xff] }
 0x437   :  { %7555 = vst [vmem:[#allocation78_spill] sm:$0xff] %v6434_v6  ;;  %v2495_v6 = vmul.f32 %v3926_v27, %v2489_v37  ;;  %v6486_v37 = vld [vmem:[#allocation8 + $0x20] sm:$0xff]  ;;  %v6490_v27 = vadd.f32 1.0, %v3930_v35  ;;  %3076 = vmatpush.msrb.mxu3 %v6479_v42  ;;  %v6508_v35 = vld [vmem:[#allocation8 + $0x18] sm:$0xff] }
 0x438   :  { %7556 = vst [vmem:[#allocation79_spill] sm:$0xff] %v6436_v24  ;;  %v3717_v24 = vmul.f32 -1.442695, %v2650_v50  ;;  %v6488_v50 = vld [vmem:[#allocation8 + $0x28] sm:$0xff]  ;;  %3056 = vmatpush.msrb.mxu2 %v6477_v46  ;;  %3017 = vmatpush.msrb.mxu0 %v6486_v37  ;;  %vm2660_vm6 = vweird.f32 %v6481_v19 }
 0x439   :  { %7559 = vst [vmem:[#allocation80_spill] sm:$0xff] %v6467_v5  ;;  %2801 = vmatmul.f32.vlgmr.msra.gmra.mxu0 %v2495_v6  ;;  %2821 = vmatmul.f32.vlgmr.msra.gmra.mxu1 %v2495_v6  ;;  %v6494_v5 = vld [vmem:[#allocation8 + $0x38] sm:$0xff]  ;;  %vm2679_vm7 = vweird.f32 %v6490_v27 }
 0x43a   :  { %7560 = vst [vmem:[#allocation81_spill] sm:$0xff] %v6469_v13  ;;  %3931 = vpow2.f32 %v3717_v24  ;;  %2841 = vmatmul.f32.vlgmr.msra.gmra.mxu2 %v2495_v6  ;;  %2861 = vmatmul.f32.vlgmr.msra.gmra.mxu3 %v2495_v6  ;;  %v6492_v13 = vld [vmem:[#allocation8 + $0x30] sm:$0xff]  ;;  %v6499_v24 = vld [vmem:[#allocation8] sm:$0xff] }
 0x43b   :  { %7561 = vst [vmem:[#allocation82_spill] sm:$0xff] %v6477_v46  ;;  %3933 = vrcp.f32 %v6481_v19  ;;  %3037 = vmatpush.msrb.mxu1 %v6488_v50  ;;  %3057 = vmatpush.msrb.mxu2 %v6492_v13  ;;  %v2624_v46 = vpop.f32.mrf.mxu2 }
 0x43c   :  { %7562 = vst [vmem:[#allocation83_spill] sm:$0xff] %v6479_v42  ;;  %3935 = vrcp.f32 %v6490_v27  ;;  %3077 = vmatpush.msrb.mxu3 %v6494_v5  ;;  %v3713_v42 = vld [vmem:[%s6749_s1 + $0x50] sm:$0xff]  ;;  %3018 = vmatpush.msrb.mxu0 %v6499_v24 }
 0x43d   :  { %3710 = vst [vmem:[%s6752_s4 + $0x28] sm:$0xff] %v2495_v6  ;;  %v6506_v6 = vld [vmem:[#allocation8 + $0x10] sm:$0xff]  ;;  %3038 = vmatpush.msrb.mxu1 %v6501_v51 }
 0x43e   :  { %7563 = vst [vmem:[#allocation84_spill] sm:$0xff] %v6486_v37  ;;  %3058 = vmatpush.msrb.mxu2 %v6506_v6  ;;  %3078 = vmatpush.msrb.mxu3 %v6508_v35 }
 0x43f   :  { %7564 = vst [vmem:[#allocation85_spill] sm:$0xff] %v6488_v50  ;;  %3221 = vmatpush.msra.mxu0 %v6032_v8  ;;  %3241 = vmatpush.msra.mxu1 %v6034_v14 }
 0x440   :  { %7565 = vst [vmem:[#allocation86_spill] sm:$0xff] %v6492_v13  ;;  %v3932_v37 = vpop.eup %3931  ;;  %v2649_v13 = vadd.f32 %v3713_v42, %v2624_v46  ;;  %3261 = vmatpush.msra.mxu2 %v6036_v1  ;;  %3281 = vmatpush.msra.mxu3 %v6040_v40  ;;  %v2666_v1 = vand.u32 2147483648, %v6481_v19  ;;  %v2685_v40 = vand.u32 2147483648, %v6490_v27  ;;  %v7578_v46 = vld [vmem:[#allocation22_spill] sm:$0xff]  ;;  %v7579_v42 = vld [vmem:[#allocation15_spill] sm:$0xff] }
 0x441   :  { %7566 = vst [vmem:[#allocation87_spill] sm:$0xff] %v6494_v5  ;;  %v6519_v50 = vadd.f32 1.0, %v3932_v37  ;;  %v3934_v5 = vpop.eup %3933  ;;  %3222 = vmatpush.msra.mxu0 %v6044_v26  ;;  %3242 = vmatpush.msra.mxu1 %v6046_v15  ;;  %v2664_v15 = vand.u32 2147483647, %v6481_v19 }
 0x442   :  { %7567 = vst [vmem:[#allocation70_spill] sm:$0xff] %v6499_v24  ;;  %v3936_v24 = vpop.eup %3935  ;;  %3262 = vmatpush.msra.mxu2 %v6048_v2  ;;  %3282 = vmatpush.msra.mxu3 %v6052_v33  ;;  %vm2661_vm4 = vweird.f32 %v3934_v5  ;;  %v2683_v33 = vand.u32 2147483647, %v6490_v27 }
 0x443   :  { %7568 = vst [vmem:[#allocation71_spill] sm:$0xff] %v6501_v51  ;;  %v2656_v51 = vmul.f32 %v3934_v5, %v6481_v19  ;;  %3937 = vrcp.f32 %v6519_v50  ;;  %v2675_v37 = vmul.f32 %v3936_v24, %v6490_v27  ;;  %3223 = vmatpush.msra.mxu0 %v6056_v41  ;;  %3243 = vmatpush.msra.mxu1 %v6058_v20  ;;  %vm2680_vm5 = vweird.f32 %v3936_v24  ;;  %vm2662_vm8 = vmor %vm2660_vm6, %vm2661_vm4  ;;  %v7581_v27 = vld [vmem:[#allocation24_spill] sm:$0xff] }
 0x444   :  { %3939 = vtanh.f32 %v2649_v13  ;;  %3263 = vmatpush.msra.mxu2 %v6060_v36  ;;  %3283 = vmatpush.msra.mxu3 %v6064_v23  ;;  %v2667_v36 = vor.u32 1.1754944e-38, %v2666_v1  ;;  %vm2681_vm9 = vmor %vm2679_vm7, %vm2680_vm5  ;;  %vm2665_vm10 = vcmp.eq.f32.partialorder %v2664_v15, 8.507059e+37  ;;  %vm2684_vm11 = vcmp.eq.f32.partialorder %v2683_v33, 8.507059e+37  ;;  %v7587_v1 = vld [vmem:[#allocation30_spill] sm:$0xff]  ;;  %v7590_v15 = vld [vmem:[#allocation33_spill] sm:$0xff] }
 0x445   :  { %v2657_v8 = vsub.f32 1.0, %v2656_v51  ;;  %v2676_v14 = vsub.f32 1.0, %v2675_v37  ;;  %3224 = vmatpush.msra.mxu0 %v6068_v34  ;;  %3244 = vmatpush.msra.mxu1 %v6070_v63  ;;  %v2686_v63 = vor.u32 1.1754944e-38, %v2685_v40  ;;  %vm2699_vm13 = vweird.f32 %v6519_v50  ;;  %v7583_v51 = vld [vmem:[#allocation26_spill] sm:$0xff]  ;;  %v7584_v37 = vld [vmem:[#allocation27_spill] sm:$0xff] }
 0x446   :  { %3264 = vmatpush.msra.mxu2 %v6072_v31  ;;  %3284 = vmatpush.msra.mxu3 %v6076_v38  ;;  %v7588_v40 = vld [vmem:[#allocation31_spill] sm:$0xff] }
 0x447   :  { %v2658_v26 = vmul.f32 %v3934_v5, %v2657_v8  ;;  %v2677_v2 = vmul.f32 %v3936_v24, %v2676_v14  ;;  %3225 = vmatpush.msra.mxu0 %v6080_v45  ;;  %3245 = vmatpush.msra.mxu1 %v6082_v49  ;;  %v7585_v8 = vld [vmem:[#allocation28_spill] sm:$0xff]  ;;  %v7586_v14 = vld [vmem:[#allocation29_spill] sm:$0xff]  ;;  %v7592_v33 = vld [vmem:[#allocation35_spill] sm:$0xff] }
 0x448   :  { %3265 = vmatpush.msra.mxu2 %v6084_v52  ;;  %3285 = vmatpush.msra.mxu3 %v6088_v61 }
 0x449   :  { %v6544_v41 = vpop.eup %3937  ;;  %v2659_v20 = vadd.f32 %v3934_v5, %v2658_v26  ;;  %v2678_v23 = vadd.f32 %v3936_v24, %v2677_v2  ;;  %3226 = vmatpush.msra.mxu0 %v6092_v54  ;;  %3246 = vmatpush.msra.mxu1 %v6094_v43  ;;  %v7589_v26 = vld [vmem:[#allocation32_spill] sm:$0xff]  ;;  %v7591_v2 = vld [vmem:[#allocation34_spill] sm:$0xff] }
 0x44a   :  { %v2695_v34 = vmul.f32 %v6544_v41, %v6519_v50  ;;  %v3940_v38 = vpop.eup %3939  ;;  %3266 = vmatpush.msra.mxu2 %v6096_v25  ;;  %3286 = vmatpush.msra.mxu3 %v6100_v29  ;;  %vm2700_vm12 = vweird.f32 %v6544_v41  ;;  %v2705_v25 = vand.u32 2147483648, %v6519_v50  ;;  %v2703_v29 = vand.u32 2147483647, %v6519_v50  ;;  %v7580_v50 = vld [vmem:[#allocation23_spill] sm:$0xff] }
 0x44b   :  { %v2663_v31 = vsel %vm2662_vm8, %v3934_v5, %v2659_v20  ;;  %v2682_v49 = vsel %vm2681_vm9, %v3936_v24, %v2678_v23  ;;  %3227 = vmatpush.msra.mxu0 %v6104_v32  ;;  %3247 = vmatpush.msra.mxu1 %v6106_v28  ;;  %v7569_v32 = vld [vmem:[#allocation14_spill] sm:$0xff]  ;;  %vm2701_vm14 = vmor %vm2699_vm13, %vm2700_vm12  ;;  %v7570_v28 = vld [vmem:[#allocation16_spill] sm:$0xff] }
 0x44c   :  { %v2668_v45 = vsel %vm2665_vm10, %v2667_v36, %v2663_v31  ;;  %v2696_v13 = vsub.f32 1.0, %v2695_v34  ;;  %v2687_v52 = vsel %vm2684_vm11, %v2686_v63, %v2682_v49  ;;  %3267 = vmatpush.msra.mxu2 %v6108_v48  ;;  %3287 = vmatpush.msra.mxu3 %v6112_v39  ;;  %v7571_v48 = vld [vmem:[#allocation12_spill] sm:$0xff]  ;;  %vm2704_vm15 = vcmp.eq.f32.partialorder %v2703_v29, 8.507059e+37  ;;  %v7582_v24 = vld [vmem:[#allocation25_spill] sm:$0xff]  ;;  %v7595_v36 = vld [vmem:[#allocation38_spill] sm:$0xff] }
 0x44d   :  { %v2710_v61 = vmul.f32 %v3940_v38, %v2668_v45  ;;  %v2709_v5 = vmul.f32 %v2687_v52, %v6026_v22  ;;  %3228 = vmatpush.msra.mxu0 %v6116_v53  ;;  %3248 = vmatpush.msra.mxu1 %v6118_v59  ;;  %v7572_v53 = vld [vmem:[#allocation17_spill] sm:$0xff]  ;;  %v7573_v59 = vld [vmem:[#allocation18_spill] sm:$0xff]  ;;  %v7596_v23 = vld [vmem:[#allocation39_spill] sm:$0xff] }
 0x44e   :  { %v2697_v54 = vmul.f32 %v6544_v41, %v2696_v13  ;;  %3268 = vmatpush.msra.mxu2 %v6120_v3  ;;  %3288 = vmatpush.msra.mxu3 %v6130_v30  ;;  %v2706_v3 = vor.u32 1.1754944e-38, %v2705_v25  ;;  %v7574_v30 = vld [vmem:[#allocation19_spill] sm:$0xff]  ;;  %v7594_v20 = vld [vmem:[#allocation37_spill] sm:$0xff]  ;;  %v7597_v34 = vld [vmem:[#allocation40_spill] sm:$0xff] }
 0x44f   :  { %v6568_v43 = vadd.f32 %v2710_v61, %v2709_v5  ;;  %3229 = vmatpush.msra.mxu0 %v6134_v7  ;;  %3249 = vmatpush.msra.mxu1 %v6136_v4  ;;  %v7575_v7 = vld [vmem:[#allocation13_spill] sm:$0xff]  ;;  %v7576_v4 = vld [vmem:[#allocation20_spill] sm:$0xff]  ;;  %v7599_v31 = vld [vmem:[#allocation42_spill] sm:$0xff] }
 0x450   :  { %v2698_v22 = vadd.f32 %v6544_v41, %v2697_v54  ;;  %3269 = vmatpush.msra.mxu2 %v6138_v60  ;;  %3289 = vmatpush.msra.mxu3 %v6142_v9  ;;  %v7577_v60 = vld [vmem:[#allocation21_spill] sm:$0xff]  ;;  %v7600_v38 = vld [vmem:[#allocation43_spill] sm:$0xff]  ;;  %v7601_v45 = vld [vmem:[#allocation48_spill] sm:$0xff] }
 0x451   :  { %3941 = vtanh.f32 %v6568_v43  ;;  %3230 = vmatpush.msra.mxu0 %v6146_v12  ;;  %3250 = vmatpush.msra.mxu1 %v7569_v32  ;;  %v7598_v63 = vld [vmem:[#allocation41_spill] sm:$0xff]  ;;  %v7602_v49 = vld [vmem:[#allocation44_spill] sm:$0xff]  ;;  %v7604_v52 = vld [vmem:[#allocation46_spill] sm:$0xff] }
 0x452   :  { %3270 = vmatpush.msra.mxu2 %v7570_v28  ;;  %3290 = vmatpush.msra.mxu3 %v7571_v48  ;;  %v2702_v39 = vsel %vm2701_vm14, %v6544_v41, %v2698_v22  ;;  %v7593_v41 = vld [vmem:[#allocation36_spill] sm:$0xff]  ;;  %v7603_v13 = vld [vmem:[#allocation45_spill] sm:$0xff]  ;;  %v7606_v5 = vld [vmem:[#allocation47_spill] sm:$0xff] }
 0x453   :  { %3231 = vmatpush.msra.mxu0 %v7572_v53  ;;  %3251 = vmatpush.msra.mxu1 %v7573_v59  ;;  %v2707_v12 = vsel %vm2704_vm15, %v2706_v3, %v2702_v39  ;;  %v7605_v61 = vld [vmem:[#allocation52_spill] sm:$0xff]  ;;  %v7607_v54 = vld [vmem:[#allocation49_spill] sm:$0xff]  ;;  %v7608_v22 = vld [vmem:[#allocation50_spill] sm:$0xff] }
 0x454   :  { %3271 = vmatpush.msra.mxu2 %v7574_v30  ;;  %3291 = vmatpush.msra.mxu3 %v7575_v7  ;;  %v7609_v25 = vld [vmem:[#allocation56_spill] sm:$0xff]  ;;  %v7610_v29 = vld [vmem:[#allocation51_spill] sm:$0xff]  ;;  %v7611_v32 = vld [vmem:[#allocation53_spill] sm:$0xff] }
 0x455   :  { %3232 = vmatpush.msra.mxu0 %v7576_v4  ;;  %3252 = vmatpush.msra.mxu1 %v7577_v60  ;;  %v7612_v28 = vld [vmem:[#allocation54_spill] sm:$0xff]  ;;  %v7613_v48 = vld [vmem:[#allocation60_spill] sm:$0xff]  ;;  %v7614_v39 = vld [vmem:[#allocation55_spill] sm:$0xff] }
 0x456   :  { %3272 = vmatpush.msra.mxu2 %v7578_v46  ;;  %3292 = vmatpush.msra.mxu3 %v7579_v42  ;;  %v7615_v53 = vld [vmem:[#allocation57_spill] sm:$0xff]  ;;  %v7616_v59 = vld [vmem:[#allocation58_spill] sm:$0xff]  ;;  %v7617_v3 = vld [vmem:[#allocation64_spill] sm:$0xff] }
 0x457   :  { %v3942_v9 = vpop.eup %3941  ;;  %3233 = vmatpush.msra.mxu0 %v7580_v50  ;;  %3253 = vmatpush.msra.mxu1 %v7581_v27  ;;  %v7618_v30 = vld [vmem:[#allocation59_spill] sm:$0xff]  ;;  %v7619_v7 = vld [vmem:[#allocation61_spill] sm:$0xff]  ;;  %v7620_v4 = vld [vmem:[#allocation62_spill] sm:$0xff] }
 0x458   :  { %v2713_v19 = vmul.f32 %v3942_v9, %v2707_v12  ;;  %3273 = vmatpush.msra.mxu2 %v7582_v24  ;;  %3293 = vmatpush.msra.mxu3 %v7583_v51  ;;  %v7621_v60 = vld [vmem:[#allocation68_spill] sm:$0xff]  ;;  %v7622_v9 = vld [vmem:[#allocation63_spill] sm:$0xff]  ;;  %v7623_v12 = vld [vmem:[#allocation65_spill] sm:$0xff] }
 0x459   :  { %3234 = vmatpush.msra.mxu0 %v7584_v37  ;;  %3254 = vmatpush.msra.mxu1 %v7585_v8  ;;  %v7629_v46 = vld [vmem:[#allocation75_spill] sm:$0xff]  ;;  %v7630_v42 = vld [vmem:[#allocation76_spill] sm:$0xff]  ;;  %v7636_v27 = vld [vmem:[#allocation82_spill] sm:$0xff] }
 0x45a   :  { %3718 = vst [vmem:[%s6753_s5 + $0x10] sm:$0xff] %v2713_v19  ;;  %3019 = vmatmul.f32.vlgmr.msrb.gmra.mxu0 %v2713_v19  ;;  %3039 = vmatmul.f32.vlgmr.msrb.gmra.mxu1 %v2713_v19  ;;  %v7634_v50 = vld [vmem:[#allocation80_spill] sm:$0xff]  ;;  %v7637_v24 = vld [vmem:[#allocation83_spill] sm:$0xff]  ;;  %v3720_v37 = vld [vmem:[%s6748_s0 + $0xc8] sm:$0xff] }
 0x45b   :  { %3059 = vmatmul.f32.vlgmr.msrb.gmra.mxu2 %v2713_v19  ;;  %3079 = vmatmul.f32.vlgmr.msrb.gmra.mxu3 %v2713_v19  ;;  %v7631_v19 = vld [vmem:[#allocation77_spill] sm:$0xff]  ;;  %v7638_v51 = vld [vmem:[#allocation84_spill] sm:$0xff] }
 0x45c   :  { %3274 = vmatpush.msra.mxu2 %v7586_v14  ;;  %3294 = vmatpush.msra.mxu3 %v7587_v1 }
 0x45d   :  { %3235 = vmatpush.msra.mxu0 %v7588_v40  ;;  %3255 = vmatpush.msra.mxu1 %v7589_v26 }
 0x45e   :  { %3275 = vmatpush.msra.mxu2 %v7590_v15  ;;  %3295 = vmatpush.msra.mxu3 %v7591_v2 }
 0x45f   :  { %3236 = vmatpush.msra.mxu0 %v7592_v33  ;;  %3256 = vmatpush.msra.mxu1 %v7593_v41 }
 0x460   :  { %3276 = vmatpush.msra.mxu2 %v7594_v20  ;;  %3296 = vmatpush.msra.mxu3 %v7595_v36 }
 0x461   :  { %3438 = vmatpush.msrb.mxu0 %v7596_v23  ;;  %3458 = vmatpush.msrb.mxu1 %v7597_v34  ;;  %v3721_v34 = vld [vmem:[%s6748_s0 + $0xd0] sm:$0xff] }
 0x462   :  { %3478 = vmatpush.msrb.mxu2 %v7598_v63  ;;  %3498 = vmatpush.msrb.mxu3 %v7599_v31 }
 0x463   :  { %3439 = vmatpush.msrb.mxu0 %v7600_v38  ;;  %3459 = vmatpush.msrb.mxu1 %v7601_v45 }
 0x464   :  { %3479 = vmatpush.msrb.mxu2 %v7602_v49  ;;  %3499 = vmatpush.msrb.mxu3 %v7603_v13 }
 0x465   :  { %3440 = vmatpush.msrb.mxu0 %v7604_v52  ;;  %3460 = vmatpush.msrb.mxu1 %v7605_v61 }
 0x466   :  { %3480 = vmatpush.msrb.mxu2 %v7606_v5  ;;  %3500 = vmatpush.msrb.mxu3 %v7607_v54 }
 0x467   :  { %3441 = vmatpush.msrb.mxu0 %v7608_v22  ;;  %3461 = vmatpush.msrb.mxu1 %v7609_v25 }
 0x468   :  { %3481 = vmatpush.msrb.mxu2 %v7610_v29  ;;  %3501 = vmatpush.msrb.mxu3 %v7611_v32 }
 0x469   :  { %3442 = vmatpush.msrb.mxu0 %v7612_v28  ;;  %3462 = vmatpush.msrb.mxu1 %v7613_v48 }
 0x46a   :  { %3482 = vmatpush.msrb.mxu2 %v7614_v39  ;;  %3502 = vmatpush.msrb.mxu3 %v7615_v53 }
 0x46b   :  { %3443 = vmatpush.msrb.mxu0 %v7616_v59  ;;  %3463 = vmatpush.msrb.mxu1 %v7617_v3 }
 0x46c   :  { %3483 = vmatpush.msrb.mxu2 %v7618_v30  ;;  %3503 = vmatpush.msrb.mxu3 %v6326_v57  ;;  %v7624_v57 = vld [vmem:[#allocation66_spill] sm:$0xff] }
 0x46d   :  { %3444 = vmatpush.msrb.mxu0 %v6334_v0  ;;  %3464 = vmatpush.msrb.mxu1 %v6336_v44  ;;  %v7625_v44 = vld [vmem:[#allocation67_spill] sm:$0xff]  ;;  %v7628_v0 = vld [vmem:[#allocation74_spill] sm:$0xff] }
 0x46e   :  { %3484 = vmatpush.msrb.mxu2 %v6338_v47  ;;  %3504 = vmatpush.msrb.mxu3 %v6352_v58  ;;  %v7626_v47 = vld [vmem:[#allocation69_spill] sm:$0xff] }
 0x46f   :  { %3445 = vmatpush.msrb.mxu0 %v7619_v7  ;;  %3465 = vmatpush.msrb.mxu1 %v7620_v4  ;;  %v7627_v58 = vld [vmem:[#allocation73_spill] sm:$0xff] }
 0x470   :  { %3485 = vmatpush.msrb.mxu2 %v7621_v60  ;;  %3505 = vmatpush.msrb.mxu3 %v7622_v9 }
 0x471   :  { %3446 = vmatpush.msrb.mxu0 %v7623_v12  ;;  %3466 = vmatpush.msrb.mxu1 %v6388_v55  ;;  %v7632_v55 = vld [vmem:[#allocation78_spill] sm:$0xff] }
 0x472   :  { %3486 = vmatpush.msrb.mxu2 %v6394_v56  ;;  %3506 = vmatpush.msrb.mxu3 %v7624_v57  ;;  %v7633_v56 = vld [vmem:[#allocation79_spill] sm:$0xff] }
 0x473   :  { %3447 = vmatpush.msrb.mxu0 %v7625_v44  ;;  %3467 = vmatpush.msrb.mxu1 %v7626_v47 }
 0x474   :  { %3487 = vmatpush.msrb.mxu2 %v7627_v58  ;;  %3507 = vmatpush.msrb.mxu3 %v7628_v0  ;;  %v3727_v58 = vld [vmem:[%s6749_s1 + $0x20] sm:$0xff]  ;;  %v3728_v0 = vld [vmem:[%s6749_s1 + $0x28] sm:$0xff] }
 0x475   :  { %3448 = vmatpush.msrb.mxu0 %v7629_v46  ;;  %3468 = vmatpush.msrb.mxu1 %v7630_v42  ;;  %v7644_v46 = vld [vmem:[#allocation72_spill] sm:$0xff] }
 0x476   :  { %3488 = vmatpush.msrb.mxu2 %v6423_v10  ;;  %3508 = vmatpush.msrb.mxu3 %v7631_v19  ;;  %v7635_v10 = vld [vmem:[#allocation81_spill] sm:$0xff] }
 0x477   :  { %3449 = vmatpush.msrb.mxu0 %v7632_v55  ;;  %3469 = vmatpush.msrb.mxu1 %v7633_v56 }
 0x478   :  { %3489 = vmatpush.msrb.mxu2 %v6446_v11  ;;  %3509 = vmatpush.msrb.mxu3 %v6448_v16  ;;  %v7639_v11 = vld [vmem:[#allocation85_spill] sm:$0xff]  ;;  %v7640_v16 = vld [vmem:[#allocation86_spill] sm:$0xff] }
 0x479   :  { %3450 = vmatpush.msrb.mxu0 %v6455_v17  ;;  %3470 = vmatpush.msrb.mxu1 %v6457_v18  ;;  %v7641_v17 = vld [vmem:[#allocation87_spill] sm:$0xff]  ;;  %v7642_v18 = vld [vmem:[#allocation70_spill] sm:$0xff] }
 0x47a   :  { %3490 = vmatpush.msrb.mxu2 %v6461_v21  ;;  %3510 = vmatpush.msrb.mxu3 %v6463_v62  ;;  %v7643_v21 = vld [vmem:[#allocation71_spill] sm:$0xff]  ;;  %v3719_v62 = vld [vmem:[%s6748_s0 + $0xc0] sm:$0xff] }
 0x47b   :  { %3451 = vmatpush.msrb.mxu0 %v7634_v50  ;;  %3471 = vmatpush.msrb.mxu1 %v7635_v10 }
 0x47c   :  { %3491 = vmatpush.msrb.mxu2 %v7636_v27  ;;  %3511 = vmatpush.msrb.mxu3 %v7637_v24 }
 0x47d   :  { %3452 = vmatpush.msrb.mxu0 %v7638_v51  ;;  %3472 = vmatpush.msrb.mxu1 %v7639_v11 }
 0x47e   :  { %3492 = vmatpush.msrb.mxu2 %v7640_v16  ;;  %3512 = vmatpush.msrb.mxu3 %v7641_v17 }
 0x47f   :  { %3453 = vmatpush.msrb.mxu0 %v7642_v18  ;;  %3473 = vmatpush.msrb.mxu1 %v7643_v21  ;;  %v3730_v18 = vld [vmem:[%s6749_s1 + $0x38] sm:$0xff] }
 0x480   :  { %3493 = vmatpush.msrb.mxu2 %v6506_v6  ;;  %3513 = vmatpush.msrb.mxu3 %v6508_v35  ;;  %v3722_v6 = vld [vmem:[%s6748_s0 + $0xd8] sm:$0xff] }
 0x4b6   :  { %v2802_v8 = vpop.f32.mrf.mxu0  ;;  %v2822_v14 = vpop.f32.mrf.mxu1 }
 0x4b7   :  { %v2865_v1 = vadd.f32 %v3719_v62, %v2802_v8  ;;  %v2866_v40 = vadd.f32 %v3720_v37, %v2822_v14 }
 0x4b9   :  { %v3723_v26 = vmul.f32 -1.442695, %v2865_v1  ;;  %v3724_v15 = vmul.f32 -1.442695, %v2866_v40 }
 0x4bb   :  { %3943 = vpow2.f32 %v3723_v26 }
 0x4bc   :  { %3945 = vpow2.f32 %v3724_v15 }
 0x4bd   :  { %v2862_v35 = vpop.f32.mrf.mxu3  ;;  %v2842_v63 = vpop.f32.mrf.mxu2 }
 0x4be   :  { %v2868_v2 = vadd.f32 %v3722_v6, %v2862_v35  ;;  %v2867_v49 = vadd.f32 %v3721_v34, %v2842_v63 }
 0x4c0   :  { %v3725_v33 = vmul.f32 -1.442695, %v2868_v2 }
 0x4c1   :  { %v3944_v41 = vpop.eup %3943 }
 0x4c2   :  { %v3946_v20 = vpop.eup %3945  ;;  %v2872_v36 = vadd.f32 1.0, %v3944_v41  ;;  %3947 = vpow2.f32 %v3725_v33  ;;  %v3729_v33 = vld [vmem:[%s6749_s1 + $0x30] sm:$0xff] }
 0x4c3   :  { %v2891_v23 = vadd.f32 1.0, %v3946_v20 }
 0x4c4   :  { %3949 = vrcp.f32 %v2872_v36  ;;  %v2884_v22 = vand.u32 2147483648, %v2872_v36  ;;  %v2882_v32 = vand.u32 2147483647, %v2872_v36  ;;  %vm2878_vm2 = vweird.f32 %v2872_v36 }
 0x4c5   :  { %3951 = vrcp.f32 %v2891_v23  ;;  %v2903_v25 = vand.u32 2147483648, %v2891_v23  ;;  %v2901_v48 = vand.u32 2147483647, %v2891_v23  ;;  %vm2897_vm3 = vweird.f32 %v2891_v23 }
 0x4c6   :  { %v2885_v59 = vor.u32 1.1754944e-38, %v2884_v22  ;;  %vm2883_vm6 = vcmp.eq.f32.partialorder %v2882_v32, 8.507059e+37 }
 0x4c7   :  { %v2904_v7 = vor.u32 1.1754944e-38, %v2903_v25  ;;  %vm2902_vm7 = vcmp.eq.f32.partialorder %v2901_v48, 8.507059e+37 }
 0x4c8   :  { %v3948_v31 = vpop.eup %3947 }
 0x4c9   :  { %v2911_v38 = vadd.f32 1.0, %v3948_v31 }
 0x4ca   :  { %v3950_v45 = vpop.eup %3949 }
 0x4cb   :  { %v3952_v13 = vpop.eup %3951  ;;  %v2874_v52 = vmul.f32 %v3950_v45, %v2872_v36  ;;  %3953 = vrcp.f32 %v2911_v38  ;;  %vm2879_vm0 = vweird.f32 %v3950_v45  ;;  %v2923_v51 = vand.u32 2147483648, %v2911_v38 }
 0x4cc   :  { %v2893_v61 = vmul.f32 %v3952_v13, %v2891_v23  ;;  %3955 = vtanh.f32 %v2867_v49  ;;  %vm2898_vm1 = vweird.f32 %v3952_v13  ;;  %vm2880_vm4 = vmor %vm2878_vm2, %vm2879_vm0  ;;  %vm2917_vm9 = vweird.f32 %v2911_v38 }
 0x4cd   :  { %v2875_v5 = vsub.f32 1.0, %v2874_v52  ;;  %vm2899_vm5 = vmor %vm2897_vm3, %vm2898_vm1  ;;  %v2921_v17 = vand.u32 2147483647, %v2911_v38  ;;  %v2924_v62 = vor.u32 1.1754944e-38, %v2923_v51 }
 0x4ce   :  { %v2894_v54 = vsub.f32 1.0, %v2893_v61 }
 0x4cf   :  { %v2876_v29 = vmul.f32 %v3950_v45, %v2875_v5  ;;  %vm2922_vm11 = vcmp.eq.f32.partialorder %v2921_v17, 8.507059e+37  ;;  %v3738_v17 = vld [vmem:[%s6748_s0 + $0xf8] sm:$0xff] }
 0x4d0   :  { %v2895_v28 = vmul.f32 %v3952_v13, %v2894_v54 }
 0x4d1   :  { %v3954_v39 = vpop.eup %3953  ;;  %v2877_v53 = vadd.f32 %v3950_v45, %v2876_v29 }
 0x4d2   :  { %v2896_v3 = vadd.f32 %v3952_v13, %v2895_v28  ;;  %v2913_v30 = vmul.f32 %v3954_v39, %v2911_v38  ;;  %v3956_v60 = vpop.eup %3955  ;;  %vm2918_vm8 = vweird.f32 %v3954_v39 }
 0x4d3   :  { %v2881_v4 = vsel %vm2880_vm4, %v3950_v45, %v2877_v53  ;;  %vm2919_vm10 = vmor %vm2917_vm9, %vm2918_vm8 }
 0x4d4   :  { %v2886_v9 = vsel %vm2883_vm6, %v2885_v59, %v2881_v4  ;;  %v2900_v12 = vsel %vm2899_vm5, %v3952_v13, %v2896_v3  ;;  %v2914_v57 = vsub.f32 1.0, %v2913_v30 }
 0x4d5   :  { %v2905_v44 = vsel %vm2902_vm7, %v2904_v7, %v2900_v12  ;;  %v2928_v47 = vmul.f32 %v3956_v60, %v2886_v9 }
 0x4d6   :  { %v2927_v42 = vmul.f32 %v2905_v44, %v7644_v46  ;;  %v2915_v19 = vmul.f32 %v3954_v39, %v2914_v57 }
 0x4d7   :  { %v3020_v55 = vpop.f32.mrf.mxu0  ;;  %v3040_v56 = vpop.f32.mrf.mxu1 }
 0x4d8   :  { %v6697_v50 = vadd.f32 %v2928_v47, %v2927_v42  ;;  %v3083_v10 = vadd.f32 %v3727_v58, %v3020_v55  ;;  %v3084_v27 = vadd.f32 %v3728_v0, %v3040_v56  ;;  %v2916_v24 = vadd.f32 %v3954_v39, %v2915_v19  ;;  %v3736_v56 = vld [vmem:[%s6748_s0 + $0xe8] sm:$0xff] }
 0x4da   :  { %3957 = vtanh.f32 %v6697_v50  ;;  %v3731_v11 = vmul.f32 -1.442695, %v3083_v10  ;;  %v3732_v16 = vmul.f32 -1.442695, %v3084_v27  ;;  %v2920_v21 = vsel %vm2919_vm10, %v3954_v39, %v2916_v24 }
 0x4db   :  { %v2925_v1 = vsel %vm2922_vm11, %v2924_v62, %v2920_v21 }
 0x4dc   :  { %3959 = vpow2.f32 %v3731_v11 }
 0x4dd   :  { %3961 = vpow2.f32 %v3732_v16 }
 0x4de   :  { %v3080_v37 = vpop.f32.mrf.mxu3  ;;  %v3060_v41 = vpop.f32.mrf.mxu2 }
 0x4df   :  { %v3086_v8 = vadd.f32 %v3730_v18, %v3080_v37  ;;  %v3085_v34 = vadd.f32 %v3729_v33, %v3060_v41 }
 0x4e0   :  { %v3958_v14 = vpop.eup %3957 }
 0x4e1   :  { %v3733_v40 = vmul.f32 -1.442695, %v3086_v8  ;;  %v2931_v26 = vmul.f32 %v3958_v14, %v2925_v1 }
 0x4e2   :  { %v3960_v15 = vpop.eup %3959 }
 0x4e3   :  { %v3962_v6 = vpop.eup %3961  ;;  %v3090_v35 = vadd.f32 1.0, %v3960_v15  ;;  %3963 = vpow2.f32 %v3733_v40  ;;  %3726 = vst [vmem:[%s6752_s4 + $0x30] sm:$0xff] %v2931_v26  ;;  %3237 = vmatmul.f32.vlgmr.msra.gmra.mxu0 %v2931_v26  ;;  %3257 = vmatmul.f32.vlgmr.msra.gmra.mxu1 %v2931_v26  ;;  %v3737_v40 = vld [vmem:[%s6748_s0 + $0xf0] sm:$0xff] }
 0x4e4   :  { %v3109_v2 = vadd.f32 1.0, %v3962_v6  ;;  %3277 = vmatmul.f32.vlgmr.msra.gmra.mxu2 %v2931_v26  ;;  %3297 = vmatmul.f32.vlgmr.msra.gmra.mxu3 %v2931_v26 }
 0x4e5   :  { %3965 = vrcp.f32 %v3090_v35  ;;  %v3102_v13 = vand.u32 2147483648, %v3090_v35  ;;  %v3100_v5 = vand.u32 2147483647, %v3090_v35  ;;  %vm3096_vm14 = vweird.f32 %v3090_v35 }
 0x4e6   :  { %3967 = vrcp.f32 %v3109_v2  ;;  %v3121_v52 = vand.u32 2147483648, %v3109_v2  ;;  %v3119_v22 = vand.u32 2147483647, %v3109_v2  ;;  %vm3115_vm15 = vweird.f32 %v3109_v2 }
 0x4e7   :  { %v3103_v32 = vor.u32 1.1754944e-38, %v3102_v13  ;;  %vm3101_vm2 = vcmp.eq.f32.partialorder %v3100_v5, 8.507059e+37 }
 0x4e8   :  { %v3122_v39 = vor.u32 1.1754944e-38, %v3121_v52  ;;  %vm3120_vm3 = vcmp.eq.f32.partialorder %v3119_v22, 8.507059e+37 }
 0x4e9   :  { %v3964_v20 = vpop.eup %3963 }
 0x4ea   :  { %v3129_v36 = vadd.f32 1.0, %v3964_v20 }
 0x4eb   :  { %v3966_v23 = vpop.eup %3965 }
 0x4ec   :  { %v3968_v63 = vpop.eup %3967  ;;  %v3092_v31 = vmul.f32 %v3966_v23, %v3090_v35  ;;  %3969 = vrcp.f32 %v3129_v36  ;;  %vm3097_vm12 = vweird.f32 %v3966_v23  ;;  %v3141_v47 = vand.u32 2147483648, %v3129_v36 }
 0x4ed   :  { %v3111_v38 = vmul.f32 %v3968_v63, %v3109_v2  ;;  %3971 = vtanh.f32 %v3085_v34  ;;  %vm3116_vm13 = vweird.f32 %v3968_v63  ;;  %vm3098_vm0 = vmor %vm3096_vm14, %vm3097_vm12  ;;  %vm3135_vm5 = vweird.f32 %v3129_v36 }
 0x4ee   :  { %v3093_v45 = vsub.f32 1.0, %v3092_v31  ;;  %vm3117_vm1 = vmor %vm3115_vm15, %vm3116_vm13  ;;  %v3139_v58 = vand.u32 2147483647, %v3129_v36  ;;  %v3142_v46 = vor.u32 1.1754944e-38, %v3141_v47 }
 0x4ef   :  { %v3112_v49 = vsub.f32 1.0, %v3111_v38 }
 0x4f0   :  { %v3094_v61 = vmul.f32 %v3966_v23, %v3093_v45  ;;  %vm3140_vm7 = vcmp.eq.f32.partialorder %v3139_v58, 8.507059e+37 }
 0x4f1   :  { %v3113_v54 = vmul.f32 %v3968_v63, %v3112_v49 }
 0x4f2   :  { %v3970_v25 = vpop.eup %3969  ;;  %v3095_v29 = vadd.f32 %v3966_v23, %v3094_v61 }
 0x4f3   :  { %v3114_v28 = vadd.f32 %v3968_v63, %v3113_v54  ;;  %v3131_v48 = vmul.f32 %v3970_v25, %v3129_v36  ;;  %v3972_v59 = vpop.eup %3971  ;;  %vm3136_vm4 = vweird.f32 %v3970_v25 }
 0x4f4   :  { %v3099_v53 = vsel %vm3098_vm0, %v3966_v23, %v3095_v29  ;;  %vm3137_vm6 = vmor %vm3135_vm5, %vm3136_vm4 }
 0x4f5   :  { %v3104_v3 = vsel %vm3101_vm2, %v3103_v32, %v3099_v53  ;;  %v3118_v30 = vsel %vm3117_vm1, %v3968_v63, %v3114_v28  ;;  %v3132_v7 = vsub.f32 1.0, %v3131_v48 }
 0x4f6   :  { %v3123_v4 = vsel %vm3120_vm3, %v3122_v39, %v3118_v30  ;;  %v3146_v60 = vmul.f32 %v3972_v59, %v3104_v3  ;;  %v3370_v59 = vld [vmem:[%s6749_s1] sm:$0xff]  ;;  %v3371_v3 = vld [vmem:[%s6749_s1 + $0x8] sm:$0xff] }
 0x4f7   :  { %v3145_v9 = vmul.f32 %v3123_v4, %v6568_v43  ;;  %v3133_v12 = vmul.f32 %v3970_v25, %v3132_v7  ;;  %v3735_v43 = vld [vmem:[%s6748_s0 + $0xe0] sm:$0xff] }
 0x4f9   :  { %v6710_v57 = vadd.f32 %v3146_v60, %v3145_v9  ;;  %v3134_v44 = vadd.f32 %v3970_v25, %v3133_v12 }
 0x4fb   :  { %3973 = vtanh.f32 %v6710_v57  ;;  %v3138_v0 = vsel %vm3137_vm6, %v3970_v25, %v3134_v44 }
 0x4fc   :  { %v3143_v19 = vsel %vm3140_vm7, %v3142_v46, %v3138_v0 }
 0x501   :  { %v3974_v42 = vpop.eup %3973 }
 0x502   :  { %v3149_v55 = vmul.f32 %v3974_v42, %v3143_v19 }
 0x504   :  { %3734 = vst [vmem:[%s6753_s5 + $0x8] sm:$0xff] %v3149_v55  ;;  %3454 = vmatmul.f32.vlgmr.msrb.gmra.mxu0 %v3149_v55  ;;  %3474 = vmatmul.f32.vlgmr.msrb.gmra.mxu1 %v3149_v55 }
 0x505   :  { %3494 = vmatmul.f32.vlgmr.msrb.gmra.mxu2 %v3149_v55  ;;  %3514 = vmatmul.f32.vlgmr.msrb.gmra.mxu3 %v3149_v55 }
 0x560   :  { %v3238_v10 = vpop.f32.mrf.mxu0  ;;  %v3258_v27 = vpop.f32.mrf.mxu1 }
 0x561   :  { %v3301_v24 = vadd.f32 %v3735_v43, %v3238_v10  ;;  %v3302_v51 = vadd.f32 %v3736_v56, %v3258_v27 }
 0x563   :  { %v3739_v11 = vmul.f32 -1.442695, %v3301_v24  ;;  %v3740_v16 = vmul.f32 -1.442695, %v3302_v51 }
 0x565   :  { %3975 = vpow2.f32 %v3739_v11 }
 0x566   :  { %3977 = vpow2.f32 %v3740_v16 }
 0x567   :  { %v3298_v18 = vpop.f32.mrf.mxu3  ;;  %v3278_v26 = vpop.f32.mrf.mxu2 }
 0x568   :  { %v3304_v21 = vadd.f32 %v3738_v17, %v3298_v18  ;;  %v3303_v2 = vadd.f32 %v3737_v40, %v3278_v26 }
 0x56a   :  { %v3741_v62 = vmul.f32 -1.442695, %v3304_v21  ;;  %v3372_v21 = vld [vmem:[%s6749_s1 + $0x10] sm:$0xff] }
 0x56b   :  { %v3976_v37 = vpop.eup %3975 }
 0x56c   :  { %v3978_v8 = vpop.eup %3977  ;;  %v3308_v14 = vadd.f32 1.0, %v3976_v37  ;;  %3979 = vpow2.f32 %v3741_v62 }
 0x56d   :  { %v3327_v1 = vadd.f32 1.0, %v3978_v8 }
 0x56e   :  { %3981 = vrcp.f32 %v3308_v14  ;;  %v3320_v34 = vand.u32 2147483648, %v3308_v14  ;;  %v3318_v38 = vand.u32 2147483647, %v3308_v14  ;;  %vm3314_vm10 = vweird.f32 %v3308_v14 }
 0x56f   :  { %3983 = vrcp.f32 %v3327_v1  ;;  %v3339_v63 = vand.u32 2147483648, %v3327_v1  ;;  %v3337_v49 = vand.u32 2147483647, %v3327_v1  ;;  %vm3333_vm11 = vweird.f32 %v3327_v1 }
 0x570   :  { %v3321_v61 = vor.u32 1.1754944e-38, %v3320_v34  ;;  %vm3319_vm14 = vcmp.eq.f32.partialorder %v3318_v38, 8.507059e+37 }
 0x571   :  { %v3340_v22 = vor.u32 1.1754944e-38, %v3339_v63  ;;  %vm3338_vm15 = vcmp.eq.f32.partialorder %v3337_v49, 8.507059e+37 }
 0x572   :  { %v3980_v15 = vpop.eup %3979 }
 0x573   :  { %v3347_v6 = vadd.f32 1.0, %v3980_v15 }
 0x574   :  { %v3982_v35 = vpop.eup %3981 }
 0x575   :  { %v3984_v33 = vpop.eup %3983  ;;  %v3310_v41 = vmul.f32 %v3982_v35, %v3308_v14  ;;  %3985 = vrcp.f32 %v3347_v6  ;;  %vm3315_vm8 = vweird.f32 %v3982_v35  ;;  %v3359_v58 = vand.u32 2147483648, %v3347_v6 }
 0x576   :  { %v3329_v20 = vmul.f32 %v3984_v33, %v3327_v1  ;;  %3987 = vtanh.f32 %v3303_v2  ;;  %vm3334_vm9 = vweird.f32 %v3984_v33  ;;  %vm3316_vm12 = vmor %vm3314_vm10, %vm3315_vm8  ;;  %vm3353_vm1 = vweird.f32 %v3347_v6 }
 0x577   :  { %v3311_v36 = vsub.f32 1.0, %v3310_v41  ;;  %vm3335_vm13 = vmor %vm3333_vm11, %vm3334_vm9  ;;  %v3357_v42 = vand.u32 2147483647, %v3347_v6  ;;  %v3360_v55 = vor.u32 1.1754944e-38, %v3359_v58 }
 0x578   :  { %v3330_v23 = vsub.f32 1.0, %v3329_v20 }
 0x579   :  { %v3312_v31 = vmul.f32 %v3982_v35, %v3311_v36  ;;  %vm3358_vm3 = vcmp.eq.f32.partialorder %v3357_v42, 8.507059e+37 }
 0x57a   :  { %v3331_v45 = vmul.f32 %v3984_v33, %v3330_v23 }
 0x57b   :  { %v3986_v13 = vpop.eup %3985  ;;  %v3313_v52 = vadd.f32 %v3982_v35, %v3312_v31 }
 0x57c   :  { %v3332_v5 = vadd.f32 %v3984_v33, %v3331_v45  ;;  %v3349_v54 = vmul.f32 %v3986_v13, %v3347_v6  ;;  %v3988_v29 = vpop.eup %3987  ;;  %vm3354_vm0 = vweird.f32 %v3986_v13 }
 0x57d   :  { %v3317_v25 = vsel %vm3316_vm12, %v3982_v35, %v3313_v52  ;;  %vm3355_vm2 = vmor %vm3353_vm1, %vm3354_vm0 }
 0x57e   :  { %v3322_v32 = vsel %vm3319_vm14, %v3321_v61, %v3317_v25  ;;  %v3336_v28 = vsel %vm3335_vm13, %v3984_v33, %v3332_v5  ;;  %v3350_v48 = vsub.f32 1.0, %v3349_v54 }
 0x57f   :  { %v3341_v39 = vsel %vm3338_vm15, %v3340_v22, %v3336_v28  ;;  %v3364_v53 = vmul.f32 %v3988_v29, %v3322_v32 }
 0x580   :  { %v3363_v30 = vmul.f32 %v3341_v39, %v6697_v50  ;;  %v3351_v7 = vmul.f32 %v3986_v13, %v3350_v48  ;;  %v3373_v50 = vld [vmem:[%s6749_s1 + $0x18] sm:$0xff] }
 0x581   :  { %v3455_v4 = vpop.f32.mrf.mxu0  ;;  %v3475_v60 = vpop.f32.mrf.mxu1 }
 0x582   :  { %v3365_v9 = vadd.f32 %v3364_v53, %v3363_v30  ;;  %v3518_v12 = vadd.f32 %v3455_v4, %v3370_v59  ;;  %v3519_v44 = vadd.f32 %v3475_v60, %v3371_v3  ;;  %v3352_v47 = vadd.f32 %v3986_v13, %v3351_v7 }
 0x584   :  { %3989 = vtanh.f32 %v3365_v9  ;;  %v3743_v0 = vmul.f32 -1.442695, %v3518_v12  ;;  %v3744_v46 = vmul.f32 -1.442695, %v3519_v44  ;;  %v3356_v19 = vsel %vm3355_vm2, %v3986_v13, %v3352_v47 }
 0x585   :  { %v3361_v27 = vsel %vm3358_vm3, %v3360_v55, %v3356_v19 }
 0x586   :  { %3991 = vpow2.f32 %v3743_v0 }
 0x587   :  { %3993 = vpow2.f32 %v3744_v46 }
 0x588   :  { %v3515_v43 = vpop.f32.mrf.mxu3  ;;  %v3495_v62 = vpop.f32.mrf.mxu2 }
 0x589   :  { %v3521_v56 = vadd.f32 %v3515_v43, %v3373_v50  ;;  %v3520_v1 = vadd.f32 %v3495_v62, %v3372_v21 }
 0x58a   :  { %v3990_v10 = vpop.eup %3989 }
 0x58b   :  { %v3367_v24 = vmul.f32 %v3990_v10, %v3361_v27  ;;  %v3745_v51 = vmul.f32 -1.442695, %v3521_v56 }
 0x58c   :  { %v3992_v11 = vpop.eup %3991 }
 0x58d   :  { %v3994_v16 = vpop.eup %3993  ;;  %3742 = vst [vmem:[%s6752_s4 + $0x38] sm:$0xff] %v3367_v24  ;;  %v3525_v17 = vadd.f32 1.0, %v3992_v11  ;;  %3995 = vpow2.f32 %v3745_v51 }
 0x58e   :  { %v3544_v18 = vadd.f32 1.0, %v3994_v16 }
 0x58f   :  { %3997 = vrcp.f32 %v3525_v17  ;;  %v3537_v2 = vand.u32 2147483648, %v3525_v17  ;;  %v3535_v20 = vand.u32 2147483647, %v3525_v17  ;;  %vm3531_vm6 = vweird.f32 %v3525_v17 }
 0x590   :  { %3999 = vrcp.f32 %v3544_v18  ;;  %v3556_v33 = vand.u32 2147483648, %v3544_v18  ;;  %v3554_v23 = vand.u32 2147483647, %v3544_v18  ;;  %vm3550_vm7 = vweird.f32 %v3544_v18 }
 0x591   :  { %v3538_v31 = vor.u32 1.1754944e-38, %v3537_v2  ;;  %vm3536_vm10 = vcmp.eq.f32.partialorder %v3535_v20, 8.507059e+37 }
 0x592   :  { %v3557_v49 = vor.u32 1.1754944e-38, %v3556_v33  ;;  %vm3555_vm11 = vcmp.eq.f32.partialorder %v3554_v23, 8.507059e+37 }
 0x593   :  { %v3996_v37 = vpop.eup %3995 }
 0x594   :  { %v3564_v8 = vadd.f32 1.0, %v3996_v37 }
 0x595   :  { %v3998_v14 = vpop.eup %3997 }
 0x596   :  { %v4000_v40 = vpop.eup %3999  ;;  %v3527_v26 = vmul.f32 %v3998_v14, %v3525_v17  ;;  %4001 = vrcp.f32 %v3564_v8  ;;  %vm3532_vm4 = vweird.f32 %v3998_v14  ;;  %v3576_v39 = vand.u32 2147483648, %v3564_v8 }
 0x597   :  { %v3546_v15 = vmul.f32 %v4000_v40, %v3544_v18  ;;  %4003 = vtanh.f32 %v3520_v1  ;;  %vm3551_vm5 = vweird.f32 %v4000_v40  ;;  %vm3533_vm8 = vmor %vm3531_vm6, %vm3532_vm4  ;;  %vm3570_vm13 = vweird.f32 %v3564_v8 }
 0x598   :  { %v3528_v6 = vsub.f32 1.0, %v3527_v26  ;;  %vm3552_vm9 = vmor %vm3550_vm7, %vm3551_vm5  ;;  %v3574_v53 = vand.u32 2147483647, %v3564_v8  ;;  %v3577_v3 = vor.u32 1.1754944e-38, %v3576_v39 }
 0x599   :  { %v3547_v35 = vsub.f32 1.0, %v3546_v15 }
 0x59a   :  { %v3529_v41 = vmul.f32 %v3998_v14, %v3528_v6  ;;  %vm3575_vm15 = vcmp.eq.f32.partialorder %v3574_v53, 8.507059e+37 }
 0x59b   :  { %v3548_v36 = vmul.f32 %v4000_v40, %v3547_v35 }
 0x59c   :  { %v4002_v34 = vpop.eup %4001  ;;  %v3530_v63 = vadd.f32 %v3998_v14, %v3529_v41 }
 0x59d   :  { %v3549_v38 = vadd.f32 %v4000_v40, %v3548_v36  ;;  %v3566_v45 = vmul.f32 %v4002_v34, %v3564_v8  ;;  %v4004_v52 = vpop.eup %4003  ;;  %vm3571_vm12 = vweird.f32 %v4002_v34 }
 0x59e   :  { %v3534_v13 = vsel %vm3533_vm8, %v3998_v14, %v3530_v63  ;;  %vm3572_vm14 = vmor %vm3570_vm13, %vm3571_vm12 }
 0x59f   :  { %v3539_v61 = vsel %vm3536_vm10, %v3538_v31, %v3534_v13  ;;  %v3553_v5 = vsel %vm3552_vm9, %v4000_v40, %v3549_v38  ;;  %v3567_v54 = vsub.f32 1.0, %v3566_v45 }
 0x5a0   :  { %v3558_v22 = vsel %vm3555_vm11, %v3557_v49, %v3553_v5  ;;  %v3581_v25 = vmul.f32 %v4004_v52, %v3539_v61 }
 0x5a1   :  { %v3580_v29 = vmul.f32 %v3558_v22, %v6710_v57  ;;  %v3568_v32 = vmul.f32 %v4002_v34, %v3567_v54 }
 0x5a3   :  { %v3582_v28 = vadd.f32 %v3581_v25, %v3580_v29  ;;  %v3569_v48 = vadd.f32 %v4002_v34, %v3568_v32 }
 0x5a5   :  { %4005 = vtanh.f32 %v3582_v28  ;;  %v3573_v59 = vsel %vm3572_vm14, %v4002_v34, %v3569_v48 }
 0x5a6   :  { %v3578_v7 = vsel %vm3575_vm15, %v3577_v3, %v3573_v59 }
 0x5ab   :  { %v4006_v30 = vpop.eup %4005 }
 0x5ac   :  { %v3584_v4 = vmul.f32 %v4006_v30, %v3578_v7 }
 0x5ae   :  { %3585 = vst [vmem:[%s6753_s5] sm:$0xff] %v3584_v4 }
 0x5af   :  { %3612 = vsyncpa [#allocation7], 1 }
 0x5b0   :  { %3613 = vsyncpa [#allocation9], 1 }

</bundles_post_ra>
